<compile_context>
chip_gen: v7x
topology: tpu7x:2x2x1
jax: 0.10.0
libtpu: 0.0.40
codegen_flags: <defaults>
</compile_context>

<pallas_src>
import math

import jax
import jax.numpy as jnp
from jax import lax
from jax.experimental import pallas as pl
from jax.experimental.pallas import tpu as pltpu

# ---------------- synthetic hparams (small) ----------------
DIM_CODE = 8          # hparams.dim_code
DIM_SPK = 8           # hparams.dim_spk
D_IN = DIM_CODE + DIM_SPK
D_MODEL = 32          # hparams.enc_rnn_size
N_HEADS = 4           # hparams.heads
D_HEAD = D_MODEL // N_HEADS
D_FF = 64             # hparams.transformer_ff
N_LAYERS = 2          # hparams.enc_layers
MAX_LEN = 1600        # PositionalEncoding max_len in Prenet
LN_EPS = 1e-6
NEG_INF = -1e9
SQRT_D = math.sqrt(D_MODEL)
INV_SQRT_DH = 1.0 / math.sqrt(D_HEAD)

# ----- packed-weight row layout (last dim = D_MODEL buffer) -----
# rows [0, D_IN)                      : mlp_w * sqrt(d_model)
# per layer l (base = D_IN + l*PER_LAYER32):
#   +0 ln1_g, +1 ln1_b, +2 bo, +3 ln2_g, +4 ln2_b, +5 b2, +6..+6+D_FF w2
# tail: lnf_g, lnf_b
PER_LAYER32 = 6 + D_FF
R32 = D_IN + N_LAYERS * PER_LAYER32 + 2
# last dim = D_FF buffer: per layer [w1 (D_MODEL rows); b1 (1 row)]
PER_LAYER64 = D_MODEL + 1
R64 = N_LAYERS * PER_LAYER64


# ---------------- Pallas kernel ----------------
def _encoder_kernel(lens_ref,                     # scalar-prefetch: (B,) int32 in SMEM
                    x_ref,                        # (1, L, D_IN) f32
                    pe_ref,                       # (L, D_MODEL) f32: pe + mlp_b*sqrt(d)
                    pk32_ref,                     # (R32, D_MODEL) f32 packed weights
                    pk64_ref,                     # (R64, D_FF) f32 packed weights
                    wqkv_ref,                     # (N_LAYERS, D_MODEL, 3*D_MODEL) bf16
                    bqkv_ref,                     # (N_LAYERS, 1, 3*D_MODEL) f32
                    wo_ref,                       # (N_LAYERS, D_MODEL, D_MODEL) bf16
                    emb_out_ref, mem_out_ref,     # (1, L, D_MODEL) each
                    state_ref,                    # (L, D_MODEL) f32 residual stream
                    q_sc, k_sc, v_sc,             # (L, D_MODEL) bf16 each
                    m_sc, l_sc, acc_sc):          # flash-softmax state per head
    b = pl.program_id(0)
    L = x_ref.shape[1]                            # padded length (multiple of TQ)
    TQ = m_sc.shape[1]                            # query/key tile size
    n_qt = L // TQ

    # valid length of this batch element (lengths are assumed >= 1; clamp anyway)
    length = jnp.maximum(jnp.minimum(lens_ref[b], L), 1)
    n_kt = pl.cdiv(length, TQ)                    # only key tiles holding valid keys

    # ---- Prenet: x @ (W*sqrt_d) + (pe + b*sqrt_d)  (dropout = identity) ----
    emb = jnp.dot(x_ref[0], pk32_ref[0:D_IN, :],
                  preferred_element_type=jnp.float32) + pe_ref[...]
    emb_out_ref[0] = emb                          # enc_states
    state_ref[...] = emb

    def layer_norm(h, g_row, b_row):              # g_row/b_row are (1, D_MODEL)
        mu = jnp.mean(h, axis=-1, keepdims=True)
        var = jnp.mean((h - mu) ** 2, axis=-1, keepdims=True)
        return (h - mu) * lax.rsqrt(var + LN_EPS) * g_row + b_row

    for l in range(N_LAYERS):                     # static, tiny layer loop
        base = D_IN + l * PER_LAYER32
        bo_row = pk32_ref[base + 2:base + 3, :]

        # ---- pre-LN + fused QKV projection for the whole sequence ----
        h = layer_norm(state_ref[...],
                       pk32_ref[base + 0:base + 1, :], pk32_ref[base + 1:base + 2, :])
        qkv = jnp.dot(h.astype(jnp.bfloat16), wqkv_ref[l],
                      preferred_element_type=jnp.float32) + bqkv_ref[l]
        qkv_bf = qkv.astype(jnp.bfloat16)
        q_sc[...] = qkv_bf[:, 0:D_MODEL]
        k_sc[...] = qkv_bf[:, D_MODEL:2 * D_MODEL]
        v_sc[...] = qkv_bf[:, 2 * D_MODEL:3 * D_MODEL]

        # ---- self-attention: query-tiled, key tiles clamped to `length` ----
        for qt in range(n_qt):                    # static unroll over query tiles
            q0 = qt * TQ

            @pl.when(q0 < length)                 # skip all-padding query tiles
            def _attend():
                m_sc[...] = jnp.full(m_sc.shape, -jnp.inf, jnp.float32)
                l_sc[...] = jnp.zeros(l_sc.shape, jnp.float32)
                acc_sc[...] = jnp.zeros(acc_sc.shape, jnp.float32)

                q_all = q_sc[pl.ds(q0, TQ), :]    # (TQ, D_MODEL) bf16

                @pl.loop(0, n_kt)                 # online softmax over valid key tiles
                def _kv(kt):
                    k0 = pl.multiple_of(kt * TQ, 8)
                    k_all = k_sc[pl.ds(k0, TQ), :]
                    v_all = v_sc[pl.ds(k0, TQ), :]
                    key_idx = k0 + lax.broadcasted_iota(jnp.int32, (1, TQ), 1)
                    key_bias = jnp.where(key_idx >= length,
                                         jnp.float32(NEG_INF), jnp.float32(0.0))
                    for hh in range(N_HEADS):     # statically unrolled heads
                        sl = slice(hh * D_HEAD, (hh + 1) * D_HEAD)
                        # NT contraction (no explicit K transpose); 1/sqrt(d_head)
                        # is folded into Wq/bq in the wrapper.
                        s = lax.dot_general(q_all[:, sl], k_all[:, sl],
                                            (((1,), (1,)), ((), ())),
                                            preferred_element_type=jnp.float32)
                        s = s + key_bias
                        m_prev = m_sc[hh]
                        m_new = jnp.maximum(m_prev, jnp.max(s, axis=-1, keepdims=True))
                        alpha = jnp.exp(m_prev - m_new)
                        p = jnp.exp(s - m_new)    # f32 exp (portable to v5e)
                        l_sc[hh] = alpha * l_sc[hh] + jnp.sum(p, axis=-1, keepdims=True)
                        acc_sc[hh] = alpha * acc_sc[hh] + jnp.dot(
                            p.astype(jnp.bfloat16), v_all[:, sl],
                            preferred_element_type=jnp.float32)
                        m_sc[hh] = m_new

                # concat heads, single (TQ,32)@(32,32) output projection
                ctx = jnp.concatenate(
                    [(acc_sc[hh] * pl.reciprocal(l_sc[hh], approx=True)
                      ).astype(jnp.bfloat16) for hh in range(N_HEADS)], axis=-1)
                attn = jnp.dot(ctx, wo_ref[l], preferred_element_type=jnp.float32)
                state_ref[pl.ds(q0, TQ), :] = (state_ref[pl.ds(q0, TQ), :]
                                               + attn + bo_row)

        # ---- position-wise FFN (pre-LN, residual) ----
        out = state_ref[...]
        y = layer_norm(out, pk32_ref[base + 3:base + 4, :], pk32_ref[base + 4:base + 5, :])
        b64 = l * PER_LAYER64
        w1 = pk64_ref[b64:b64 + D_MODEL, :].astype(jnp.bfloat16)
        b1 = pk64_ref[b64 + D_MODEL:b64 + D_MODEL + 1, :]
        inter = jnp.dot(y.astype(jnp.bfloat16), w1,
                        preferred_element_type=jnp.float32) + b1
        inter = jnp.maximum(inter, 0.0)
        w2 = pk32_ref[base + 6:base + 6 + D_FF, :].astype(jnp.bfloat16)
        ff = jnp.dot(inter.astype(jnp.bfloat16), w2, preferred_element_type=jnp.float32)
        state_ref[...] = out + ff + pk32_ref[base + 5:base + 6, :]

    # ---- final LayerNorm of the TransformerEncoder ----
    fbase = D_IN + N_LAYERS * PER_LAYER32
    mem_out_ref[0] = layer_norm(state_ref[...], pk32_ref[fbase:fbase + 1, :],
                                pk32_ref[fbase + 1:fbase + 2, :])


# ---------------- parameter packing (trace-time glue) ----------------
def _pack_params(params, L, L_pad):
    f32 = jnp.float32
    rows32 = [params['mlp_w'].astype(f32) * SQRT_D]
    for l in range(N_LAYERS):
        rows32 += [params['ln1_g'][l][None, :], params['ln1_b'][l][None, :],
                   params['bo'][l][None, :],
                   params['ln2_g'][l][None, :], params['ln2_b'][l][None, :],
                   params['b2'][l][None, :],
                   params['w2'][l]]
    rows32 += [params['lnf_g'][None, :], params['lnf_b'][None, :]]
    pk32 = jnp.concatenate(rows32, axis=0).astype(f32)        # (R32, D_MODEL)

    rows64 = []
    for l in range(N_LAYERS):
        rows64 += [params['w1'][l], params['b1'][l][None, :]]
    pk64 = jnp.concatenate(rows64, axis=0).astype(f32)        # (R64, D_FF)

    # fused per-layer QKV projection; 1/sqrt(d_head) folded into Wq/bq
    wqkv = jnp.stack([jnp.concatenate(
        [params['wq'][l] * INV_SQRT_DH, params['wk'][l], params['wv'][l]], axis=1)
        for l in range(N_LAYERS)]).astype(jnp.bfloat16)       # (NL, 32, 96)
    bqkv = jnp.stack([jnp.concatenate(
        [params['bq'][l] * INV_SQRT_DH, params['bk'][l], params['bv'][l]])[None, :]
        for l in range(N_LAYERS)]).astype(f32)                # (NL, 1, 96)
    wo = params['wo'].astype(jnp.bfloat16)                    # (NL, 32, 32)

    pe_b = (params['pe'][:L] + params['mlp_b'] * SQRT_D).astype(f32)
    if L_pad != L:
        pe_b = jnp.pad(pe_b, ((0, L_pad - L), (0, 0)))
    return pe_b, pk32, pk64, wqkv, bqkv, wo


# ---------------- wrapper ----------------
def encoder_tx_spk(src, src_lengths, spk_emb, params, tile_q=None):
    """src: (L, B, dim_code) f32, src_lengths: (B,) int32, spk_emb: (B, dim_spk) f32."""
    L, B, _ = src.shape
    L8 = ((L + 7) // 8) * 8
    if tile_q is None:
        tile_q = 256 if L8 >= 256 else L8
    TQ = min(max(8, ((tile_q + 7) // 8) * 8), L8)
    L_pad = ((L + TQ - 1) // TQ) * TQ             # multiple of TQ (and of 8)

    # glue: broadcast speaker embedding, concat, go batch-major, pad seq axis
    spk = jnp.broadcast_to(spk_emb[None, :, :], (L, B, DIM_SPK))
    src_spk = jnp.concatenate([src, spk], axis=-1)             # (L, B, D_IN)
    x = jnp.transpose(src_spk, (1, 0, 2)).astype(jnp.float32)  # (B, L, D_IN)
    if L_pad != L:
        x = jnp.pad(x, ((0, 0), (0, L_pad - L), (0, 0)))

    pe_bias, pk32, pk64, wqkv, bqkv, wo = _pack_params(params, L, L_pad)

    def fullspec(a):
        nd = a.ndim
        return pl.BlockSpec(tuple(a.shape), lambda *_, _nd=nd: (0,) * _nd)

    in_specs = [
        pl.BlockSpec((1, L_pad, D_IN), lambda b, lens: (b, 0, 0)),     # x
        fullspec(pe_bias),
        fullspec(pk32),
        fullspec(pk64),
        fullspec(wqkv),
        fullspec(bqkv),
        fullspec(wo),
    ]
    out_specs = [pl.BlockSpec((1, L_pad, D_MODEL), lambda b, lens: (b, 0, 0)),
                 pl.BlockSpec((1, L_pad, D_MODEL), lambda b, lens: (b, 0, 0))]

    grid_spec = pltpu.PrefetchScalarGridSpec(
        num_scalar_prefetch=1,
        grid=(B,),
        in_specs=in_specs,
        out_specs=out_specs,
        scratch_shapes=[
            pltpu.VMEM((L_pad, D_MODEL), jnp.float32),    # residual stream
            pltpu.VMEM((L_pad, D_MODEL), jnp.bfloat16),   # Q
            pltpu.VMEM((L_pad, D_MODEL), jnp.bfloat16),   # K
            pltpu.VMEM((L_pad, D_MODEL), jnp.bfloat16),   # V
            pltpu.VMEM((N_HEADS, TQ, 1), jnp.float32),    # running max
            pltpu.VMEM((N_HEADS, TQ, 1), jnp.float32),    # running sum
            pltpu.VMEM((N_HEADS, TQ, D_HEAD), jnp.float32),  # running ctx acc
        ])

    emb_b, mem_b = pl.pallas_call(
        _encoder_kernel,
        out_shape=(jax.ShapeDtypeStruct((B, L_pad, D_MODEL), jnp.float32),
                   jax.ShapeDtypeStruct((B, L_pad, D_MODEL), jnp.float32)),
        grid_spec=grid_spec,
        compiler_params=pltpu.CompilerParams(
            dimension_semantics=("parallel",),
            vmem_limit_bytes=48 * 1024 * 1024),   # < v7x's 64 MiB per-TC VMEM
    )(src_lengths.astype(jnp.int32), x, pe_bias, pk32, pk64, wqkv, bqkv, wo)

    enc_states = jnp.transpose(emb_b[:, :L], (1, 0, 2))   # (L, B, D_MODEL)
    memory_bank = jnp.transpose(mem_b[:, :L], (1, 0, 2))  # (L, B, D_MODEL)
    return enc_states, memory_bank, src_lengths


# ---------------- deterministic parameter init ----------------
def positional_encoding(max_len, dim):
    position = jnp.arange(max_len, dtype=jnp.float32)[:, None]
    div_term = jnp.exp(jnp.arange(0, dim, 2, dtype=jnp.float32)
                       * -(math.log(10000.0) / dim))
    pe = jnp.zeros((max_len, dim), jnp.float32)
    pe = pe.at[:, 0::2].set(jnp.sin(position * div_term))
    pe = pe.at[:, 1::2].set(jnp.cos(position * div_term))
    return pe


def init_params(key):
    ks = jax.random.split(key, 20)
    nrm = lambda k, shp, s=0.1: (s * jax.random.normal(k, shp)).astype(jnp.float32)
    p = {
        'pe': positional_encoding(MAX_LEN, D_MODEL),
        'mlp_w': nrm(ks[0], (D_IN, D_MODEL)),
        'mlp_b': nrm(ks[1], (D_MODEL,), 0.02),
        'ln1_g': 1.0 + nrm(ks[2], (N_LAYERS, D_MODEL), 0.01),
        'ln1_b': nrm(ks[3], (N_LAYERS, D_MODEL), 0.01),
        'wq': nrm(ks[4], (N_LAYERS, D_MODEL, D_MODEL)),
        'bq': nrm(ks[5], (N_LAYERS, D_MODEL), 0.02),
        'wk': nrm(ks[6], (N_LAYERS, D_MODEL, D_MODEL)),
        'bk': nrm(ks[7], (N_LAYERS, D_MODEL), 0.02),
        'wv': nrm(ks[8], (N_LAYERS, D_MODEL, D_MODEL)),
        'bv': nrm(ks[9], (N_LAYERS, D_MODEL), 0.02),
        'wo': nrm(ks[10], (N_LAYERS, D_MODEL, D_MODEL)),
        'bo': nrm(ks[11], (N_LAYERS, D_MODEL), 0.02),
        'ln2_g': 1.0 + nrm(ks[12], (N_LAYERS, D_MODEL), 0.01),
        'ln2_b': nrm(ks[13], (N_LAYERS, D_MODEL), 0.01),
        'w1': nrm(ks[14], (N_LAYERS, D_MODEL, D_FF)),
        'b1': nrm(ks[15], (N_LAYERS, D_FF), 0.02),
        'w2': nrm(ks[16], (N_LAYERS, D_FF, D_MODEL)),
        'b2': nrm(ks[17], (N_LAYERS, D_MODEL), 0.02),
        'lnf_g': 1.0 + nrm(ks[18], (D_MODEL,), 0.01),
        'lnf_b': nrm(ks[19], (D_MODEL,), 0.01),
    }
    return p


# ---------------- pure-JAX reference (for a sanity check) ----------------
def reference(src, src_lengths, spk_emb, params):
    L, B, _ = src.shape
    hp = lax.Precision.HIGHEST
    spk = jnp.broadcast_to(spk_emb[None], (L, B, DIM_SPK))
    x = jnp.concatenate([src, spk], axis=-1)
    emb = jnp.einsum('lbi,io->lbo', x, params['mlp_w'], precision=hp) + params['mlp_b']
    emb = emb * SQRT_D + params['pe'][:L, None, :]
    out = jnp.transpose(emb, (1, 0, 2))
    pad = jnp.arange(L)[None, :] >= src_lengths[:, None]

    def ln(h, g, b):
        mu = jnp.mean(h, -1, keepdims=True)
        var = jnp.mean((h - mu) ** 2, -1, keepdims=True)
        return (h - mu) / jnp.sqrt(var + LN_EPS) * g + b

    for l in range(N_LAYERS):
        h = ln(out, params['ln1_g'][l], params['ln1_b'][l])
        q = (jnp.einsum('bld,de->ble', h, params['wq'][l], precision=hp) + params['bq'][l])
        k = (jnp.einsum('bld,de->ble', h, params['wk'][l], precision=hp) + params['bk'][l])
        v = (jnp.einsum('bld,de->ble', h, params['wv'][l], precision=hp) + params['bv'][l])
        q = q.reshape(B, L, N_HEADS, D_HEAD) * INV_SQRT_DH
        k = k.reshape(B, L, N_HEADS, D_HEAD)
        v = v.reshape(B, L, N_HEADS, D_HEAD)
        s = jnp.einsum('bqhd,bkhd->bhqk', q, k, precision=hp)
        s = jnp.where(pad[:, None, None, :], NEG_INF, s)
        p = jax.nn.softmax(s, axis=-1)
        ctx = jnp.einsum('bhqk,bkhd->bqhd', p, v, precision=hp).reshape(B, L, D_MODEL)
        attn = jnp.einsum('bld,de->ble', ctx, params['wo'][l], precision=hp) + params['bo'][l]
        out = attn + out
        y = ln(out, params['ln2_g'][l], params['ln2_b'][l])
        inter = jax.nn.relu(jnp.einsum('bld,df->blf', y, params['w1'][l], precision=hp)
                            + params['b1'][l])
        ff = jnp.einsum('blf,fd->bld', inter, params['w2'][l], precision=hp) + params['b2'][l]
        out = ff + out
    mem = ln(out, params['lnf_g'], params['lnf_b'])
    return emb, jnp.transpose(mem, (1, 0, 2)), src_lengths


if __name__ == "__main__":
    key = jax.random.PRNGKey(0)
    k_src, k_spk, k_par = jax.random.split(key, 3)

    L, B = 24, 2
    src = jax.random.normal(k_src, (L, B, DIM_CODE), jnp.float32)
    spk_emb = jax.random.normal(k_spk, (B, DIM_SPK), jnp.float32)
    src_lengths = jnp.array([24, 10], jnp.int32)
    params = init_params(k_par)

    # tile_q=8 so the query-tiling / key-length-clamping / tile-skip paths are
    # all exercised even at this small L (production default is 256).
    enc_states, memory_bank, out_lengths = encoder_tx_spk(
        src, src_lengths, spk_emb, params, tile_q=8)
    jax.block_until_ready((enc_states, memory_bank, out_lengths))

    ref_emb, ref_mem, _ = reference(src, src_lengths, spk_emb, params)
    assert enc_states.shape == (L, B, D_MODEL) and memory_bank.shape == (L, B, D_MODEL)
    # prenet path: identical math (MXU default-precision matmul) on every row
    assert jnp.allclose(enc_states, ref_emb, atol=2e-2, rtol=2e-2)
    # transformer output: compare valid rows only — query rows >= length are
    # skipped in the kernel (the PyTorch module also leaves them as
    # unspecified-for-downstream values); bf16 MXU operands -> loose tolerance
    valid = (jnp.arange(L)[:, None] < src_lengths[None, :])[:, :, None]
    assert jnp.allclose(jnp.where(valid, memory_bank, 0.0),
                        jnp.where(valid, ref_mem, 0.0), atol=2e-2, rtol=2e-2)

    print("KERNEL_OK")
</pallas_src>

<mosaic_0001>
module attributes {stable_mosaic.version = 11 : i64} {
  func.func @_encoder_kernel(%arg0: i32, %arg1: memref<2xi32, #tpu.memory_space<smem>>, %arg2: memref<1x24x16xf32, #tpu.memory_space<vmem>>, %arg3: memref<24x32xf32, #tpu.memory_space<vmem>>, %arg4: memref<158x32xf32, #tpu.memory_space<vmem>>, %arg5: memref<66x64xf32, #tpu.memory_space<vmem>>, %arg6: memref<2x32x96xbf16, #tpu.memory_space<vmem>>, %arg7: memref<2x1x96xf32, #tpu.memory_space<vmem>>, %arg8: memref<2x32x32xbf16, #tpu.memory_space<vmem>>, %arg9: memref<1x24x32xf32, #tpu.memory_space<vmem>>, %arg10: memref<1x24x32xf32, #tpu.memory_space<vmem>>, %arg11: memref<24x32xf32, #tpu.memory_space<vmem>>, %arg12: memref<24x32xbf16, #tpu.memory_space<vmem>>, %arg13: memref<24x32xbf16, #tpu.memory_space<vmem>>, %arg14: memref<24x32xbf16, #tpu.memory_space<vmem>>, %arg15: memref<4x8x1xf32, #tpu.memory_space<vmem>>, %arg16: memref<4x8x1xf32, #tpu.memory_space<vmem>>, %arg17: memref<4x8x8xf32, #tpu.memory_space<vmem>>) attributes {dimension_semantics = [#tpu.dimension_semantics<parallel>], iteration_bounds = array<i64: 2>, scalar_prefetch = 1 : i64, scratch_operands = 7 : i64, tpu.core_type = #tpu.core_type<tc>, window_params = [{transform_indices = @transform_0, window_bounds = array<i64: 1, 24, 16>}, {pipeline_mode = #tpu.pipeline_mode<synchronous>, transform_indices = @transform_1, window_bounds = array<i64: 24, 32>}, {pipeline_mode = #tpu.pipeline_mode<synchronous>, transform_indices = @transform_2, window_bounds = array<i64: 158, 32>}, {pipeline_mode = #tpu.pipeline_mode<synchronous>, transform_indices = @transform_3, window_bounds = array<i64: 66, 64>}, {pipeline_mode = #tpu.pipeline_mode<synchronous>, transform_indices = @transform_4, window_bounds = array<i64: 2, 32, 96>}, {pipeline_mode = #tpu.pipeline_mode<synchronous>, transform_indices = @transform_5, window_bounds = array<i64: 2, 1, 96>}, {pipeline_mode = #tpu.pipeline_mode<synchronous>, transform_indices = @transform_6, window_bounds = array<i64: 2, 32, 32>}, {transform_indices = @transform_7, window_bounds = array<i64: 1, 24, 32>}, {transform_indices = @transform_8, window_bounds = array<i64: 1, 24, 32>}]} {
    %0 = arith.index_cast %arg0 : i32 to index
    %1 = memref.load %arg1[%0] : memref<2xi32, #tpu.memory_space<smem>>
    %c24_i32 = arith.constant 24 : i32
    %2 = arith.minsi %1, %c24_i32 : i32
    %c1_i32 = arith.constant 1 : i32
    %3 = arith.maxsi %2, %c1_i32 : i32
    %c7_i32 = arith.constant 7 : i32
    %4 = arith.addi %3, %c7_i32 : i32
    %c8_i32 = arith.constant 8 : i32
    %5 = arith.divsi %4, %c8_i32 : i32
    %c0 = arith.constant 0 : index
    %c0_0 = arith.constant 0 : index
    %c0_1 = arith.constant 0 : index
    %6 = vector.load %arg2[%c0, %c0_0, %c0_1] : memref<1x24x16xf32, #tpu.memory_space<vmem>>, vector<1x24x16xf32>
    %7 = vector.shape_cast %6 : vector<1x24x16xf32> to vector<24x16xf32>
    %c0_2 = arith.constant 0 : index
    %c0_3 = arith.constant 0 : index
    %8 = vector.load %arg4[%c0_2, %c0_3] : memref<158x32xf32, #tpu.memory_space<vmem>>, vector<16x32xf32>
    %cst = arith.constant dense<0.000000e+00> : vector<24x32xf32>
    %9 = tpu.matmul %7, %8, %cst {dimension_numbers = #tpu.dot_dimension_numbers<[1], [0], [0], [1], [0, 0, 1, 1], [], []>} : vector<24x16xf32>, vector<16x32xf32>, vector<24x32xf32> -> vector<24x32xf32>
    %c0_4 = arith.constant 0 : index
    %c0_5 = arith.constant 0 : index
    %10 = vector.load %arg3[%c0_4, %c0_5] : memref<24x32xf32, #tpu.memory_space<vmem>>, vector<24x32xf32>
    %11 = arith.addf %9, %10 : vector<24x32xf32>
    %c0_6 = arith.constant 0 : index
    %c0_7 = arith.constant 0 : index
    %c0_8 = arith.constant 0 : index
    %12 = vector.load %arg9[%c0_6, %c0_7, %c0_8] : memref<1x24x32xf32, #tpu.memory_space<vmem>>, vector<1x24x32xf32>
    %13 = vector.shape_cast %12 : vector<1x24x32xf32> to vector<24x32xf32>
    %14 = vector.shape_cast %11 : vector<24x32xf32> to vector<1x24x32xf32>
    tpu.vector_store %arg9[%c0_6, %c0_7, %c0_8], %14 {strides = array<i32>} : memref<1x24x32xf32, #tpu.memory_space<vmem>>, vector<1x24x32xf32>,
    %c0_9 = arith.constant 0 : index
    %c0_10 = arith.constant 0 : index
    %15 = vector.load %arg11[%c0_9, %c0_10] : memref<24x32xf32, #tpu.memory_space<vmem>>, vector<24x32xf32>
    tpu.vector_store %arg11[%c0_9, %c0_10], %11 {strides = array<i32>} : memref<24x32xf32, #tpu.memory_space<vmem>>, vector<24x32xf32>,
    %c18 = arith.constant 18 : index
    %c0_11 = arith.constant 0 : index
    %16 = vector.load %arg4[%c18, %c0_11] : memref<158x32xf32, #tpu.memory_space<vmem>>, vector<1x32xf32>
    %c0_12 = arith.constant 0 : index
    %c0_13 = arith.constant 0 : index
    %17 = vector.load %arg11[%c0_12, %c0_13] : memref<24x32xf32, #tpu.memory_space<vmem>>, vector<24x32xf32>
    %c16 = arith.constant 16 : index
    %c0_14 = arith.constant 0 : index
    %18 = vector.load %arg4[%c16, %c0_14] : memref<158x32xf32, #tpu.memory_space<vmem>>, vector<1x32xf32>
    %c17 = arith.constant 17 : index
    %c0_15 = arith.constant 0 : index
    %19 = vector.load %arg4[%c17, %c0_15] : memref<158x32xf32, #tpu.memory_space<vmem>>, vector<1x32xf32>
    %cst_16 = arith.constant dense<0.000000e+00> : vector<24xf32>
    %20 = vector.multi_reduction <add>, %17, %cst_16 [1] : vector<24x32xf32> to vector<24xf32>
    %21 = vector.shape_cast %20 : vector<24xf32> to vector<24x1xf32>
    %cst_17 = arith.constant 3.200000e+01 : f32
    %22 = vector.broadcast %cst_17 : f32 to vector<24x1xf32>
    %23 = arith.divf %21, %22 : vector<24x1xf32>
    %24 = vector.broadcast %23 : vector<24x1xf32> to vector<24x32xf32>
    %25 = arith.subf %17, %24 : vector<24x32xf32>
    %26 = arith.mulf %25, %25 : vector<24x32xf32>
    %cst_18 = arith.constant dense<0.000000e+00> : vector<24xf32>
    %27 = vector.multi_reduction <add>, %26, %cst_18 [1] : vector<24x32xf32> to vector<24xf32>
    %28 = vector.shape_cast %27 : vector<24xf32> to vector<24x1xf32>
    %cst_19 = arith.constant 3.200000e+01 : f32
    %29 = vector.broadcast %cst_19 : f32 to vector<24x1xf32>
    %30 = arith.divf %28, %29 : vector<24x1xf32>
    %31 = vector.broadcast %23 : vector<24x1xf32> to vector<24x32xf32>
    %32 = arith.subf %17, %31 : vector<24x32xf32>
    %cst_20 = arith.constant 9.99999997E-7 : f32
    %33 = vector.broadcast %cst_20 : f32 to vector<24x1xf32>
    %34 = arith.addf %30, %33 : vector<24x1xf32>
    %35 = math.rsqrt %34 : vector<24x1xf32>
    %36 = vector.broadcast %35 : vector<24x1xf32> to vector<24x32xf32>
    %37 = arith.mulf %32, %36 : vector<24x32xf32>
    %38 = vector.broadcast %18 : vector<1x32xf32> to vector<24x32xf32>
    %39 = arith.mulf %37, %38 : vector<24x32xf32>
    %40 = vector.broadcast %19 : vector<1x32xf32> to vector<24x32xf32>
    %41 = arith.addf %39, %40 : vector<24x32xf32>
    %42 = arith.truncf %41 : vector<24x32xf32> to vector<24x32xbf16>
    %c0_21 = arith.constant 0 : index
    %c0_22 = arith.constant 0 : index
    %c0_23 = arith.constant 0 : index
    %43 = vector.load %arg6[%c0_21, %c0_22, %c0_23] : memref<2x32x96xbf16, #tpu.memory_space<vmem>>, vector<1x32x96xbf16>
    %44 = vector.shape_cast %43 : vector<1x32x96xbf16> to vector<32x96xbf16>
    %cst_24 = arith.constant dense<0.000000e+00> : vector<24x96xf32>
    %45 = tpu.matmul %42, %44, %cst_24 {dimension_numbers = #tpu.dot_dimension_numbers<[1], [0], [0], [1], [0, 0, 1, 1], [], []>} : vector<24x32xbf16>, vector<32x96xbf16>, vector<24x96xf32> -> vector<24x96xf32>
    %c0_25 = arith.constant 0 : index
    %c0_26 = arith.constant 0 : index
    %c0_27 = arith.constant 0 : index
    %46 = vector.load %arg7[%c0_25, %c0_26, %c0_27] : memref<2x1x96xf32, #tpu.memory_space<vmem>>, vector<1x1x96xf32>
    %47 = vector.shape_cast %46 : vector<1x1x96xf32> to vector<1x96xf32>
    %48 = vector.broadcast %47 : vector<1x96xf32> to vector<24x96xf32>
    %49 = arith.addf %45, %48 : vector<24x96xf32>
    %50 = arith.truncf %49 : vector<24x96xf32> to vector<24x96xbf16>
    %51 = vector.extract_strided_slice %50 {offsets = [0, 0], sizes = [24, 32], strides = [1, 1]} : vector<24x96xbf16> to vector<24x32xbf16>
    %c0_28 = arith.constant 0 : index
    %c0_29 = arith.constant 0 : index
    %52 = vector.load %arg12[%c0_28, %c0_29] : memref<24x32xbf16, #tpu.memory_space<vmem>>, vector<24x32xbf16>
    tpu.vector_store %arg12[%c0_28, %c0_29], %51 {strides = array<i32>} : memref<24x32xbf16, #tpu.memory_space<vmem>>, vector<24x32xbf16>,
    %53 = vector.extract_strided_slice %50 {offsets = [0, 32], sizes = [24, 32], strides = [1, 1]} : vector<24x96xbf16> to vector<24x32xbf16>
    %c0_30 = arith.constant 0 : index
    %c0_31 = arith.constant 0 : index
    %54 = vector.load %arg13[%c0_30, %c0_31] : memref<24x32xbf16, #tpu.memory_space<vmem>>, vector<24x32xbf16>
    tpu.vector_store %arg13[%c0_30, %c0_31], %53 {strides = array<i32>} : memref<24x32xbf16, #tpu.memory_space<vmem>>, vector<24x32xbf16>,
    %55 = vector.extract_strided_slice %50 {offsets = [0, 64], sizes = [24, 32], strides = [1, 1]} : vector<24x96xbf16> to vector<24x32xbf16>
    %c0_32 = arith.constant 0 : index
    %c0_33 = arith.constant 0 : index
    %56 = vector.load %arg14[%c0_32, %c0_33] : memref<24x32xbf16, #tpu.memory_space<vmem>>, vector<24x32xbf16>
    tpu.vector_store %arg14[%c0_32, %c0_33], %55 {strides = array<i32>} : memref<24x32xbf16, #tpu.memory_space<vmem>>, vector<24x32xbf16>,
    %c0_i32 = arith.constant 0 : i32
    %57 = arith.cmpi sgt, %3, %c0_i32 : i32
    %58 = arith.extui %57 : i1 to i32
    %c0_i32_34 = arith.constant 0 : i32
    %59 = arith.cmpi ne, %58, %c0_i32_34 : i32
    scf.if %59 {
      %cst_115 = arith.constant 0xFF800000 : f32
      %230 = vector.broadcast %cst_115 : f32 to vector<4x8x1xf32>
      %c0_116 = arith.constant 0 : index
      %c0_117 = arith.constant 0 : index
      %c0_118 = arith.constant 0 : index
      %231 = vector.load %arg15[%c0_116, %c0_117, %c0_118] : memref<4x8x1xf32, #tpu.memory_space<vmem>>, vector<4x8x1xf32>
      tpu.vector_store %arg15[%c0_116, %c0_117, %c0_118], %230 {strides = array<i32>} : memref<4x8x1xf32, #tpu.memory_space<vmem>>, vector<4x8x1xf32>,
      %cst_119 = arith.constant 0.000000e+00 : f32
      %232 = vector.broadcast %cst_119 : f32 to vector<4x8x1xf32>
      %c0_120 = arith.constant 0 : index
      %c0_121 = arith.constant 0 : index
      %c0_122 = arith.constant 0 : index
      %233 = vector.load %arg16[%c0_120, %c0_121, %c0_122] : memref<4x8x1xf32, #tpu.memory_space<vmem>>, vector<4x8x1xf32>
      tpu.vector_store %arg16[%c0_120, %c0_121, %c0_122], %232 {strides = array<i32>} : memref<4x8x1xf32, #tpu.memory_space<vmem>>, vector<4x8x1xf32>,
      %cst_123 = arith.constant 0.000000e+00 : f32
      %234 = vector.broadcast %cst_123 : f32 to vector<4x8x8xf32>
      %c0_124 = arith.constant 0 : index
      %c0_125 = arith.constant 0 : index
      %c0_126 = arith.constant 0 : index
      %235 = vector.load %arg17[%c0_124, %c0_125, %c0_126] : memref<4x8x8xf32, #tpu.memory_space<vmem>>, vector<4x8x8xf32>
      tpu.vector_store %arg17[%c0_124, %c0_125, %c0_126], %234 {strides = array<i32>} : memref<4x8x8xf32, #tpu.memory_space<vmem>>, vector<4x8x8xf32>,
      %c0_127 = arith.constant 0 : index
      %c0_128 = arith.constant 0 : index
      %236 = vector.load %arg12[%c0_127, %c0_128] : memref<24x32xbf16, #tpu.memory_space<vmem>>, vector<8x32xbf16>
      %c0_i32_129 = arith.constant 0 : i32
      %237 = arith.subi %5, %c0_i32_129 : i32
      %c1_i32_130 = arith.constant 1 : i32
      %c1_i32_131 = arith.constant 1 : i32
      %238 = arith.subi %c1_i32_130, %c1_i32_131 : i32
      %239 = arith.addi %237, %238 : i32
      %c1_i32_132 = arith.constant 1 : i32
      %240 = arith.divsi %239, %c1_i32_132 : i32
      %c1_i32_133 = arith.constant 1 : i32
      %c0_i32_134 = arith.constant 0 : i32
      %c0_i32_135 = arith.constant 0 : i32
      %241 = arith.subi %240, %c0_i32_135 : i32
      %242 = arith.addi %c0_i32_135, %241 : i32
      %c1_i32_136 = arith.constant 1 : i32
      scf.for %arg18 = %c0_i32_135 to %242 step %c1_i32_136  : i32 {
        %284 = arith.muli %arg18, %c1_i32_133 : i32
        %285 = arith.addi %c0_i32_134, %284 : i32
        %c8_i32_167 = arith.constant 8 : i32
        %286 = arith.muli %285, %c8_i32_167 : i32
        %287 = tpu.assume_multiple %286, 8 : i32
        %288 = arith.index_cast %287 : i32 to index
        %c0_168 = arith.constant 0 : index
        %289 = vector.load %arg13[%288, %c0_168] : memref<24x32xbf16, #tpu.memory_space<vmem>>, vector<8x32xbf16>
        %290 = arith.index_cast %287 : i32 to index
        %c0_169 = arith.constant 0 : index
        %291 = vector.load %arg14[%290, %c0_169] : memref<24x32xbf16, #tpu.memory_space<vmem>>, vector<8x32xbf16>
        %292 = tpu.iota {dimensions = array<i32: 1>} : vector<1x8xi32>
        %293 = vector.broadcast %287 : i32 to vector<1x8xi32>
        %294 = arith.addi %293, %292 : vector<1x8xi32>
        %295 = vector.broadcast %3 : i32 to vector<1x8xi32>
        %296 = arith.cmpi sge, %294, %295 : vector<1x8xi32>
        %cst_170 = arith.constant -1.000000e+09 : f32
        %cst_171 = arith.constant 0.000000e+00 : f32
        %297 = vector.broadcast %cst_170 : f32 to vector<1x8xf32>
        %298 = vector.broadcast %cst_171 : f32 to vector<1x8xf32>
        %299 = arith.select %296, %297, %298 : vector<1x8xi1>, vector<1x8xf32>
        %300 = vector.extract_strided_slice %236 {offsets = [0, 0], sizes = [8, 8], strides = [1, 1]} : vector<8x32xbf16> to vector<8x8xbf16>
        %301 = vector.extract_strided_slice %289 {offsets = [0, 0], sizes = [8, 8], strides = [1, 1]} : vector<8x32xbf16> to vector<8x8xbf16>
        %cst_172 = arith.constant dense<0.000000e+00> : vector<8x8xf32>
        %302 = tpu.matmul %300, %301, %cst_172 {dimension_numbers = #tpu.dot_dimension_numbers<[1], [1], [0], [0], [0, 0, 1, 0], [], []>} : vector<8x8xbf16>, vector<8x8xbf16>, vector<8x8xf32> -> vector<8x8xf32>
        %303 = vector.broadcast %299 : vector<1x8xf32> to vector<8x8xf32>
        %304 = arith.addf %302, %303 : vector<8x8xf32>
        %c0_173 = arith.constant 0 : index
        %c0_174 = arith.constant 0 : index
        %c0_175 = arith.constant 0 : index
        %305 = vector.load %arg15[%c0_173, %c0_174, %c0_175] : memref<4x8x1xf32, #tpu.memory_space<vmem>>, vector<1x8x1xf32>
        %306 = vector.shape_cast %305 : vector<1x8x1xf32> to vector<8x1xf32>
        %cst_176 = arith.constant dense<0xFF800000> : vector<8xf32>
        %307 = vector.multi_reduction <maximumf>, %304, %cst_176 [1] : vector<8x8xf32> to vector<8xf32>
        %308 = vector.shape_cast %307 : vector<8xf32> to vector<8x1xf32>
        %309 = arith.maximumf %306, %308 : vector<8x1xf32>
        %310 = arith.subf %306, %309 : vector<8x1xf32>
        %311 = math.exp %310 : vector<8x1xf32>
        %312 = vector.broadcast %309 : vector<8x1xf32> to vector<8x8xf32>
        %313 = arith.subf %304, %312 : vector<8x8xf32>
        %314 = math.exp %313 : vector<8x8xf32>
        %c0_177 = arith.constant 0 : index
        %c0_178 = arith.constant 0 : index
        %c0_179 = arith.constant 0 : index
        %315 = vector.load %arg16[%c0_177, %c0_178, %c0_179] : memref<4x8x1xf32, #tpu.memory_space<vmem>>, vector<1x8x1xf32>
        %316 = vector.shape_cast %315 : vector<1x8x1xf32> to vector<8x1xf32>
        %317 = arith.mulf %311, %316 : vector<8x1xf32>
        %cst_180 = arith.constant dense<0.000000e+00> : vector<8xf32>
        %318 = vector.multi_reduction <add>, %314, %cst_180 [1] : vector<8x8xf32> to vector<8xf32>
        %319 = vector.shape_cast %318 : vector<8xf32> to vector<8x1xf32>
        %320 = arith.addf %317, %319 : vector<8x1xf32>
        %c0_181 = arith.constant 0 : index
        %c0_182 = arith.constant 0 : index
        %c0_183 = arith.constant 0 : index
        %321 = vector.load %arg16[%c0_181, %c0_182, %c0_183] : memref<4x8x1xf32, #tpu.memory_space<vmem>>, vector<1x8x1xf32>
        %322 = vector.shape_cast %321 : vector<1x8x1xf32> to vector<8x1xf32>
        %323 = vector.shape_cast %320 : vector<8x1xf32> to vector<1x8x1xf32>
        tpu.vector_store %arg16[%c0_181, %c0_182, %c0_183], %323 {strides = array<i32>} : memref<4x8x1xf32, #tpu.memory_space<vmem>>, vector<1x8x1xf32>,
        %c0_184 = arith.constant 0 : index
        %c0_185 = arith.constant 0 : index
        %c0_186 = arith.constant 0 : index
        %324 = vector.load %arg17[%c0_184, %c0_185, %c0_186] : memref<4x8x8xf32, #tpu.memory_space<vmem>>, vector<1x8x8xf32>
        %325 = vector.shape_cast %324 : vector<1x8x8xf32> to vector<8x8xf32>
        %326 = vector.broadcast %311 : vector<8x1xf32> to vector<8x8xf32>
        %327 = arith.mulf %326, %325 : vector<8x8xf32>
        %328 = arith.truncf %314 : vector<8x8xf32> to vector<8x8xbf16>
        %329 = vector.extract_strided_slice %291 {offsets = [0, 0], sizes = [8, 8], strides = [1, 1]} : vector<8x32xbf16> to vector<8x8xbf16>
        %cst_187 = arith.constant dense<0.000000e+00> : vector<8x8xf32>
        %330 = tpu.matmul %328, %329, %cst_187 {dimension_numbers = #tpu.dot_dimension_numbers<[1], [0], [0], [1], [0, 0, 1, 1], [], []>} : vector<8x8xbf16>, vector<8x8xbf16>, vector<8x8xf32> -> vector<8x8xf32>
        %331 = arith.addf %327, %330 : vector<8x8xf32>
        %c0_188 = arith.constant 0 : index
        %c0_189 = arith.constant 0 : index
        %c0_190 = arith.constant 0 : index
        %332 = vector.load %arg17[%c0_188, %c0_189, %c0_190] : memref<4x8x8xf32, #tpu.memory_space<vmem>>, vector<1x8x8xf32>
        %333 = vector.shape_cast %332 : vector<1x8x8xf32> to vector<8x8xf32>
        %334 = vector.shape_cast %331 : vector<8x8xf32> to vector<1x8x8xf32>
        tpu.vector_store %arg17[%c0_188, %c0_189, %c0_190], %334 {strides = array<i32>} : memref<4x8x8xf32, #tpu.memory_space<vmem>>, vector<1x8x8xf32>,
        %c0_191 = arith.constant 0 : index
        %c0_192 = arith.constant 0 : index
        %c0_193 = arith.constant 0 : index
        %335 = vector.load %arg15[%c0_191, %c0_192, %c0_193] : memref<4x8x1xf32, #tpu.memory_space<vmem>>, vector<1x8x1xf32>
        %336 = vector.shape_cast %335 : vector<1x8x1xf32> to vector<8x1xf32>
        %337 = vector.shape_cast %309 : vector<8x1xf32> to vector<1x8x1xf32>
        tpu.vector_store %arg15[%c0_191, %c0_192, %c0_193], %337 {strides = array<i32>} : memref<4x8x1xf32, #tpu.memory_space<vmem>>, vector<1x8x1xf32>,
        %338 = vector.extract_strided_slice %236 {offsets = [0, 8], sizes = [8, 8], strides = [1, 1]} : vector<8x32xbf16> to vector<8x8xbf16>
        %339 = vector.extract_strided_slice %289 {offsets = [0, 8], sizes = [8, 8], strides = [1, 1]} : vector<8x32xbf16> to vector<8x8xbf16>
        %cst_194 = arith.constant dense<0.000000e+00> : vector<8x8xf32>
        %340 = tpu.matmul %338, %339, %cst_194 {dimension_numbers = #tpu.dot_dimension_numbers<[1], [1], [0], [0], [0, 0, 1, 0], [], []>} : vector<8x8xbf16>, vector<8x8xbf16>, vector<8x8xf32> -> vector<8x8xf32>
        %341 = vector.broadcast %299 : vector<1x8xf32> to vector<8x8xf32>
        %342 = arith.addf %340, %341 : vector<8x8xf32>
        %c1_195 = arith.constant 1 : index
        %c0_196 = arith.constant 0 : index
        %c0_197 = arith.constant 0 : index
        %343 = vector.load %arg15[%c1_195, %c0_196, %c0_197] : memref<4x8x1xf32, #tpu.memory_space<vmem>>, vector<1x8x1xf32>
        %344 = vector.shape_cast %343 : vector<1x8x1xf32> to vector<8x1xf32>
        %cst_198 = arith.constant dense<0xFF800000> : vector<8xf32>
        %345 = vector.multi_reduction <maximumf>, %342, %cst_198 [1] : vector<8x8xf32> to vector<8xf32>
        %346 = vector.shape_cast %345 : vector<8xf32> to vector<8x1xf32>
        %347 = arith.maximumf %344, %346 : vector<8x1xf32>
        %348 = arith.subf %344, %347 : vector<8x1xf32>
        %349 = math.exp %348 : vector<8x1xf32>
        %350 = vector.broadcast %347 : vector<8x1xf32> to vector<8x8xf32>
        %351 = arith.subf %342, %350 : vector<8x8xf32>
        %352 = math.exp %351 : vector<8x8xf32>
        %c1_199 = arith.constant 1 : index
        %c0_200 = arith.constant 0 : index
        %c0_201 = arith.constant 0 : index
        %353 = vector.load %arg16[%c1_199, %c0_200, %c0_201] : memref<4x8x1xf32, #tpu.memory_space<vmem>>, vector<1x8x1xf32>
        %354 = vector.shape_cast %353 : vector<1x8x1xf32> to vector<8x1xf32>
        %355 = arith.mulf %349, %354 : vector<8x1xf32>
        %cst_202 = arith.constant dense<0.000000e+00> : vector<8xf32>
        %356 = vector.multi_reduction <add>, %352, %cst_202 [1] : vector<8x8xf32> to vector<8xf32>
        %357 = vector.shape_cast %356 : vector<8xf32> to vector<8x1xf32>
        %358 = arith.addf %355, %357 : vector<8x1xf32>
        %c1_203 = arith.constant 1 : index
        %c0_204 = arith.constant 0 : index
        %c0_205 = arith.constant 0 : index
        %359 = vector.load %arg16[%c1_203, %c0_204, %c0_205] : memref<4x8x1xf32, #tpu.memory_space<vmem>>, vector<1x8x1xf32>
        %360 = vector.shape_cast %359 : vector<1x8x1xf32> to vector<8x1xf32>
        %361 = vector.shape_cast %358 : vector<8x1xf32> to vector<1x8x1xf32>
        tpu.vector_store %arg16[%c1_203, %c0_204, %c0_205], %361 {strides = array<i32>} : memref<4x8x1xf32, #tpu.memory_space<vmem>>, vector<1x8x1xf32>,
        %c1_206 = arith.constant 1 : index
        %c0_207 = arith.constant 0 : index
        %c0_208 = arith.constant 0 : index
        %362 = vector.load %arg17[%c1_206, %c0_207, %c0_208] : memref<4x8x8xf32, #tpu.memory_space<vmem>>, vector<1x8x8xf32>
        %363 = vector.shape_cast %362 : vector<1x8x8xf32> to vector<8x8xf32>
        %364 = vector.broadcast %349 : vector<8x1xf32> to vector<8x8xf32>
        %365 = arith.mulf %364, %363 : vector<8x8xf32>
        %366 = arith.truncf %352 : vector<8x8xf32> to vector<8x8xbf16>
        %367 = vector.extract_strided_slice %291 {offsets = [0, 8], sizes = [8, 8], strides = [1, 1]} : vector<8x32xbf16> to vector<8x8xbf16>
        %cst_209 = arith.constant dense<0.000000e+00> : vector<8x8xf32>
        %368 = tpu.matmul %366, %367, %cst_209 {dimension_numbers = #tpu.dot_dimension_numbers<[1], [0], [0], [1], [0, 0, 1, 1], [], []>} : vector<8x8xbf16>, vector<8x8xbf16>, vector<8x8xf32> -> vector<8x8xf32>
        %369 = arith.addf %365, %368 : vector<8x8xf32>
        %c1_210 = arith.constant 1 : index
        %c0_211 = arith.constant 0 : index
        %c0_212 = arith.constant 0 : index
        %370 = vector.load %arg17[%c1_210, %c0_211, %c0_212] : memref<4x8x8xf32, #tpu.memory_space<vmem>>, vector<1x8x8xf32>
        %371 = vector.shape_cast %370 : vector<1x8x8xf32> to vector<8x8xf32>
        %372 = vector.shape_cast %369 : vector<8x8xf32> to vector<1x8x8xf32>
        tpu.vector_store %arg17[%c1_210, %c0_211, %c0_212], %372 {strides = array<i32>} : memref<4x8x8xf32, #tpu.memory_space<vmem>>, vector<1x8x8xf32>,
        %c1_213 = arith.constant 1 : index
        %c0_214 = arith.constant 0 : index
        %c0_215 = arith.constant 0 : index
        %373 = vector.load %arg15[%c1_213, %c0_214, %c0_215] : memref<4x8x1xf32, #tpu.memory_space<vmem>>, vector<1x8x1xf32>
        %374 = vector.shape_cast %373 : vector<1x8x1xf32> to vector<8x1xf32>
        %375 = vector.shape_cast %347 : vector<8x1xf32> to vector<1x8x1xf32>
        tpu.vector_store %arg15[%c1_213, %c0_214, %c0_215], %375 {strides = array<i32>} : memref<4x8x1xf32, #tpu.memory_space<vmem>>, vector<1x8x1xf32>,
        %376 = vector.extract_strided_slice %236 {offsets = [0, 16], sizes = [8, 8], strides = [1, 1]} : vector<8x32xbf16> to vector<8x8xbf16>
        %377 = vector.extract_strided_slice %289 {offsets = [0, 16], sizes = [8, 8], strides = [1, 1]} : vector<8x32xbf16> to vector<8x8xbf16>
        %cst_216 = arith.constant dense<0.000000e+00> : vector<8x8xf32>
        %378 = tpu.matmul %376, %377, %cst_216 {dimension_numbers = #tpu.dot_dimension_numbers<[1], [1], [0], [0], [0, 0, 1, 0], [], []>} : vector<8x8xbf16>, vector<8x8xbf16>, vector<8x8xf32> -> vector<8x8xf32>
        %379 = vector.broadcast %299 : vector<1x8xf32> to vector<8x8xf32>
        %380 = arith.addf %378, %379 : vector<8x8xf32>
        %c2_217 = arith.constant 2 : index
        %c0_218 = arith.constant 0 : index
        %c0_219 = arith.constant 0 : index
        %381 = vector.load %arg15[%c2_217, %c0_218, %c0_219] : memref<4x8x1xf32, #tpu.memory_space<vmem>>, vector<1x8x1xf32>
        %382 = vector.shape_cast %381 : vector<1x8x1xf32> to vector<8x1xf32>
        %cst_220 = arith.constant dense<0xFF800000> : vector<8xf32>
        %383 = vector.multi_reduction <maximumf>, %380, %cst_220 [1] : vector<8x8xf32> to vector<8xf32>
        %384 = vector.shape_cast %383 : vector<8xf32> to vector<8x1xf32>
        %385 = arith.maximumf %382, %384 : vector<8x1xf32>
        %386 = arith.subf %382, %385 : vector<8x1xf32>
        %387 = math.exp %386 : vector<8x1xf32>
        %388 = vector.broadcast %385 : vector<8x1xf32> to vector<8x8xf32>
        %389 = arith.subf %380, %388 : vector<8x8xf32>
        %390 = math.exp %389 : vector<8x8xf32>
        %c2_221 = arith.constant 2 : index
        %c0_222 = arith.constant 0 : index
        %c0_223 = arith.constant 0 : index
        %391 = vector.load %arg16[%c2_221, %c0_222, %c0_223] : memref<4x8x1xf32, #tpu.memory_space<vmem>>, vector<1x8x1xf32>
        %392 = vector.shape_cast %391 : vector<1x8x1xf32> to vector<8x1xf32>
        %393 = arith.mulf %387, %392 : vector<8x1xf32>
        %cst_224 = arith.constant dense<0.000000e+00> : vector<8xf32>
        %394 = vector.multi_reduction <add>, %390, %cst_224 [1] : vector<8x8xf32> to vector<8xf32>
        %395 = vector.shape_cast %394 : vector<8xf32> to vector<8x1xf32>
        %396 = arith.addf %393, %395 : vector<8x1xf32>
        %c2_225 = arith.constant 2 : index
        %c0_226 = arith.constant 0 : index
        %c0_227 = arith.constant 0 : index
        %397 = vector.load %arg16[%c2_225, %c0_226, %c0_227] : memref<4x8x1xf32, #tpu.memory_space<vmem>>, vector<1x8x1xf32>
        %398 = vector.shape_cast %397 : vector<1x8x1xf32> to vector<8x1xf32>
        %399 = vector.shape_cast %396 : vector<8x1xf32> to vector<1x8x1xf32>
        tpu.vector_store %arg16[%c2_225, %c0_226, %c0_227], %399 {strides = array<i32>} : memref<4x8x1xf32, #tpu.memory_space<vmem>>, vector<1x8x1xf32>,
        %c2_228 = arith.constant 2 : index
        %c0_229 = arith.constant 0 : index
        %c0_230 = arith.constant 0 : index
        %400 = vector.load %arg17[%c2_228, %c0_229, %c0_230] : memref<4x8x8xf32, #tpu.memory_space<vmem>>, vector<1x8x8xf32>
        %401 = vector.shape_cast %400 : vector<1x8x8xf32> to vector<8x8xf32>
        %402 = vector.broadcast %387 : vector<8x1xf32> to vector<8x8xf32>
        %403 = arith.mulf %402, %401 : vector<8x8xf32>
        %404 = arith.truncf %390 : vector<8x8xf32> to vector<8x8xbf16>
        %405 = vector.extract_strided_slice %291 {offsets = [0, 16], sizes = [8, 8], strides = [1, 1]} : vector<8x32xbf16> to vector<8x8xbf16>
        %cst_231 = arith.constant dense<0.000000e+00> : vector<8x8xf32>
        %406 = tpu.matmul %404, %405, %cst_231 {dimension_numbers = #tpu.dot_dimension_numbers<[1], [0], [0], [1], [0, 0, 1, 1], [], []>} : vector<8x8xbf16>, vector<8x8xbf16>, vector<8x8xf32> -> vector<8x8xf32>
        %407 = arith.addf %403, %406 : vector<8x8xf32>
        %c2_232 = arith.constant 2 : index
        %c0_233 = arith.constant 0 : index
        %c0_234 = arith.constant 0 : index
        %408 = vector.load %arg17[%c2_232, %c0_233, %c0_234] : memref<4x8x8xf32, #tpu.memory_space<vmem>>, vector<1x8x8xf32>
        %409 = vector.shape_cast %408 : vector<1x8x8xf32> to vector<8x8xf32>
        %410 = vector.shape_cast %407 : vector<8x8xf32> to vector<1x8x8xf32>
        tpu.vector_store %arg17[%c2_232, %c0_233, %c0_234], %410 {strides = array<i32>} : memref<4x8x8xf32, #tpu.memory_space<vmem>>, vector<1x8x8xf32>,
        %c2_235 = arith.constant 2 : index
        %c0_236 = arith.constant 0 : index
        %c0_237 = arith.constant 0 : index
        %411 = vector.load %arg15[%c2_235, %c0_236, %c0_237] : memref<4x8x1xf32, #tpu.memory_space<vmem>>, vector<1x8x1xf32>
        %412 = vector.shape_cast %411 : vector<1x8x1xf32> to vector<8x1xf32>
        %413 = vector.shape_cast %385 : vector<8x1xf32> to vector<1x8x1xf32>
        tpu.vector_store %arg15[%c2_235, %c0_236, %c0_237], %413 {strides = array<i32>} : memref<4x8x1xf32, #tpu.memory_space<vmem>>, vector<1x8x1xf32>,
        %414 = vector.extract_strided_slice %236 {offsets = [0, 24], sizes = [8, 8], strides = [1, 1]} : vector<8x32xbf16> to vector<8x8xbf16>
        %415 = vector.extract_strided_slice %289 {offsets = [0, 24], sizes = [8, 8], strides = [1, 1]} : vector<8x32xbf16> to vector<8x8xbf16>
        %cst_238 = arith.constant dense<0.000000e+00> : vector<8x8xf32>
        %416 = tpu.matmul %414, %415, %cst_238 {dimension_numbers = #tpu.dot_dimension_numbers<[1], [1], [0], [0], [0, 0, 1, 0], [], []>} : vector<8x8xbf16>, vector<8x8xbf16>, vector<8x8xf32> -> vector<8x8xf32>
        %417 = vector.broadcast %299 : vector<1x8xf32> to vector<8x8xf32>
        %418 = arith.addf %416, %417 : vector<8x8xf32>
        %c3_239 = arith.constant 3 : index
        %c0_240 = arith.constant 0 : index
        %c0_241 = arith.constant 0 : index
        %419 = vector.load %arg15[%c3_239, %c0_240, %c0_241] : memref<4x8x1xf32, #tpu.memory_space<vmem>>, vector<1x8x1xf32>
        %420 = vector.shape_cast %419 : vector<1x8x1xf32> to vector<8x1xf32>
        %cst_242 = arith.constant dense<0xFF800000> : vector<8xf32>
        %421 = vector.multi_reduction <maximumf>, %418, %cst_242 [1] : vector<8x8xf32> to vector<8xf32>
        %422 = vector.shape_cast %421 : vector<8xf32> to vector<8x1xf32>
        %423 = arith.maximumf %420, %422 : vector<8x1xf32>
        %424 = arith.subf %420, %423 : vector<8x1xf32>
        %425 = math.exp %424 : vector<8x1xf32>
        %426 = vector.broadcast %423 : vector<8x1xf32> to vector<8x8xf32>
        %427 = arith.subf %418, %426 : vector<8x8xf32>
        %428 = math.exp %427 : vector<8x8xf32>
        %c3_243 = arith.constant 3 : index
        %c0_244 = arith.constant 0 : index
        %c0_245 = arith.constant 0 : index
        %429 = vector.load %arg16[%c3_243, %c0_244, %c0_245] : memref<4x8x1xf32, #tpu.memory_space<vmem>>, vector<1x8x1xf32>
        %430 = vector.shape_cast %429 : vector<1x8x1xf32> to vector<8x1xf32>
        %431 = arith.mulf %425, %430 : vector<8x1xf32>
        %cst_246 = arith.constant dense<0.000000e+00> : vector<8xf32>
        %432 = vector.multi_reduction <add>, %428, %cst_246 [1] : vector<8x8xf32> to vector<8xf32>
        %433 = vector.shape_cast %432 : vector<8xf32> to vector<8x1xf32>
        %434 = arith.addf %431, %433 : vector<8x1xf32>
        %c3_247 = arith.constant 3 : index
        %c0_248 = arith.constant 0 : index
        %c0_249 = arith.constant 0 : index
        %435 = vector.load %arg16[%c3_247, %c0_248, %c0_249] : memref<4x8x1xf32, #tpu.memory_space<vmem>>, vector<1x8x1xf32>
        %436 = vector.shape_cast %435 : vector<1x8x1xf32> to vector<8x1xf32>
        %437 = vector.shape_cast %434 : vector<8x1xf32> to vector<1x8x1xf32>
        tpu.vector_store %arg16[%c3_247, %c0_248, %c0_249], %437 {strides = array<i32>} : memref<4x8x1xf32, #tpu.memory_space<vmem>>, vector<1x8x1xf32>,
        %c3_250 = arith.constant 3 : index
        %c0_251 = arith.constant 0 : index
        %c0_252 = arith.constant 0 : index
        %438 = vector.load %arg17[%c3_250, %c0_251, %c0_252] : memref<4x8x8xf32, #tpu.memory_space<vmem>>, vector<1x8x8xf32>
        %439 = vector.shape_cast %438 : vector<1x8x8xf32> to vector<8x8xf32>
        %440 = vector.broadcast %425 : vector<8x1xf32> to vector<8x8xf32>
        %441 = arith.mulf %440, %439 : vector<8x8xf32>
        %442 = arith.truncf %428 : vector<8x8xf32> to vector<8x8xbf16>
        %443 = vector.extract_strided_slice %291 {offsets = [0, 24], sizes = [8, 8], strides = [1, 1]} : vector<8x32xbf16> to vector<8x8xbf16>
        %cst_253 = arith.constant dense<0.000000e+00> : vector<8x8xf32>
        %444 = tpu.matmul %442, %443, %cst_253 {dimension_numbers = #tpu.dot_dimension_numbers<[1], [0], [0], [1], [0, 0, 1, 1], [], []>} : vector<8x8xbf16>, vector<8x8xbf16>, vector<8x8xf32> -> vector<8x8xf32>
        %445 = arith.addf %441, %444 : vector<8x8xf32>
        %c3_254 = arith.constant 3 : index
        %c0_255 = arith.constant 0 : index
        %c0_256 = arith.constant 0 : index
        %446 = vector.load %arg17[%c3_254, %c0_255, %c0_256] : memref<4x8x8xf32, #tpu.memory_space<vmem>>, vector<1x8x8xf32>
        %447 = vector.shape_cast %446 : vector<1x8x8xf32> to vector<8x8xf32>
        %448 = vector.shape_cast %445 : vector<8x8xf32> to vector<1x8x8xf32>
        tpu.vector_store %arg17[%c3_254, %c0_255, %c0_256], %448 {strides = array<i32>} : memref<4x8x8xf32, #tpu.memory_space<vmem>>, vector<1x8x8xf32>,
        %c3_257 = arith.constant 3 : index
        %c0_258 = arith.constant 0 : index
        %c0_259 = arith.constant 0 : index
        %449 = vector.load %arg15[%c3_257, %c0_258, %c0_259] : memref<4x8x1xf32, #tpu.memory_space<vmem>>, vector<1x8x1xf32>
        %450 = vector.shape_cast %449 : vector<1x8x1xf32> to vector<8x1xf32>
        %451 = vector.shape_cast %423 : vector<8x1xf32> to vector<1x8x1xf32>
        tpu.vector_store %arg15[%c3_257, %c0_258, %c0_259], %451 {strides = array<i32>} : memref<4x8x1xf32, #tpu.memory_space<vmem>>, vector<1x8x1xf32>,
      }
      %c0_137 = arith.constant 0 : index
      %c0_138 = arith.constant 0 : index
      %c0_139 = arith.constant 0 : index
      %243 = vector.load %arg17[%c0_137, %c0_138, %c0_139] : memref<4x8x8xf32, #tpu.memory_space<vmem>>, vector<1x8x8xf32>
      %244 = vector.shape_cast %243 : vector<1x8x8xf32> to vector<8x8xf32>
      %c0_140 = arith.constant 0 : index
      %c0_141 = arith.constant 0 : index
      %c0_142 = arith.constant 0 : index
      %245 = vector.load %arg16[%c0_140, %c0_141, %c0_142] : memref<4x8x1xf32, #tpu.memory_space<vmem>>, vector<1x8x1xf32>
      %246 = vector.shape_cast %245 : vector<1x8x1xf32> to vector<8x1xf32>
      %247 = tpu.reciprocal %246 {approx = true} : vector<8x1xf32> -> vector<8x1xf32>
      %248 = vector.broadcast %247 : vector<8x1xf32> to vector<8x8xf32>
      %249 = arith.mulf %244, %248 : vector<8x8xf32>
      %250 = arith.truncf %249 : vector<8x8xf32> to vector<8x8xbf16>
      %c1_143 = arith.constant 1 : index
      %c0_144 = arith.constant 0 : index
      %c0_145 = arith.constant 0 : index
      %251 = vector.load %arg17[%c1_143, %c0_144, %c0_145] : memref<4x8x8xf32, #tpu.memory_space<vmem>>, vector<1x8x8xf32>
      %252 = vector.shape_cast %251 : vector<1x8x8xf32> to vector<8x8xf32>
      %c1_146 = arith.constant 1 : index
      %c0_147 = arith.constant 0 : index
      %c0_148 = arith.constant 0 : index
      %253 = vector.load %arg16[%c1_146, %c0_147, %c0_148] : memref<4x8x1xf32, #tpu.memory_space<vmem>>, vector<1x8x1xf32>
      %254 = vector.shape_cast %253 : vector<1x8x1xf32> to vector<8x1xf32>
      %255 = tpu.reciprocal %254 {approx = true} : vector<8x1xf32> -> vector<8x1xf32>
      %256 = vector.broadcast %255 : vector<8x1xf32> to vector<8x8xf32>
      %257 = arith.mulf %252, %256 : vector<8x8xf32>
      %258 = arith.truncf %257 : vector<8x8xf32> to vector<8x8xbf16>
      %c2 = arith.constant 2 : index
      %c0_149 = arith.constant 0 : index
      %c0_150 = arith.constant 0 : index
      %259 = vector.load %arg17[%c2, %c0_149, %c0_150] : memref<4x8x8xf32, #tpu.memory_space<vmem>>, vector<1x8x8xf32>
      %260 = vector.shape_cast %259 : vector<1x8x8xf32> to vector<8x8xf32>
      %c2_151 = arith.constant 2 : index
      %c0_152 = arith.constant 0 : index
      %c0_153 = arith.constant 0 : index
      %261 = vector.load %arg16[%c2_151, %c0_152, %c0_153] : memref<4x8x1xf32, #tpu.memory_space<vmem>>, vector<1x8x1xf32>
      %262 = vector.shape_cast %261 : vector<1x8x1xf32> to vector<8x1xf32>
      %263 = tpu.reciprocal %262 {approx = true} : vector<8x1xf32> -> vector<8x1xf32>
      %264 = vector.broadcast %263 : vector<8x1xf32> to vector<8x8xf32>
      %265 = arith.mulf %260, %264 : vector<8x8xf32>
      %266 = arith.truncf %265 : vector<8x8xf32> to vector<8x8xbf16>
      %c3 = arith.constant 3 : index
      %c0_154 = arith.constant 0 : index
      %c0_155 = arith.constant 0 : index
      %267 = vector.load %arg17[%c3, %c0_154, %c0_155] : memref<4x8x8xf32, #tpu.memory_space<vmem>>, vector<1x8x8xf32>
      %268 = vector.shape_cast %267 : vector<1x8x8xf32> to vector<8x8xf32>
      %c3_156 = arith.constant 3 : index
      %c0_157 = arith.constant 0 : index
      %c0_158 = arith.constant 0 : index
      %269 = vector.load %arg16[%c3_156, %c0_157, %c0_158] : memref<4x8x1xf32, #tpu.memory_space<vmem>>, vector<1x8x1xf32>
      %270 = vector.shape_cast %269 : vector<1x8x1xf32> to vector<8x1xf32>
      %271 = tpu.reciprocal %270 {approx = true} : vector<8x1xf32> -> vector<8x1xf32>
      %272 = vector.broadcast %271 : vector<8x1xf32> to vector<8x8xf32>
      %273 = arith.mulf %268, %272 : vector<8x8xf32>
      %274 = arith.truncf %273 : vector<8x8xf32> to vector<8x8xbf16>
      %275 = tpu.concatenate %250, %258, %266, %274 in 1 : vector<8x8xbf16>, vector<8x8xbf16>, vector<8x8xbf16>, vector<8x8xbf16> -> vector<8x32xbf16>
      %c0_159 = arith.constant 0 : index
      %c0_160 = arith.constant 0 : index
      %c0_161 = arith.constant 0 : index
      %276 = vector.load %arg8[%c0_159, %c0_160, %c0_161] : memref<2x32x32xbf16, #tpu.memory_space<vmem>>, vector<1x32x32xbf16>
      %277 = vector.shape_cast %276 : vector<1x32x32xbf16> to vector<32x32xbf16>
      %cst_162 = arith.constant dense<0.000000e+00> : vector<8x32xf32>
      %278 = tpu.matmul %275, %277, %cst_162 {dimension_numbers = #tpu.dot_dimension_numbers<[1], [0], [0], [1], [0, 0, 1, 1], [], []>} : vector<8x32xbf16>, vector<32x32xbf16>, vector<8x32xf32> -> vector<8x32xf32>
      %c0_163 = arith.constant 0 : index
      %c0_164 = arith.constant 0 : index
      %279 = vector.load %arg11[%c0_163, %c0_164] : memref<24x32xf32, #tpu.memory_space<vmem>>, vector<8x32xf32>
      %280 = arith.addf %279, %278 : vector<8x32xf32>
      %281 = vector.broadcast %16 : vector<1x32xf32> to vector<8x32xf32>
      %282 = arith.addf %280, %281 : vector<8x32xf32>
      %c0_165 = arith.constant 0 : index
      %c0_166 = arith.constant 0 : index
      %283 = vector.load %arg11[%c0_165, %c0_166] : memref<24x32xf32, #tpu.memory_space<vmem>>, vector<8x32xf32>
      tpu.vector_store %arg11[%c0_165, %c0_166], %282 {strides = array<i32>} : memref<24x32xf32, #tpu.memory_space<vmem>>, vector<8x32xf32>,
    } else {
    }
    %c8_i32_35 = arith.constant 8 : i32
    %60 = arith.cmpi sgt, %3, %c8_i32_35 : i32
    %61 = arith.extui %60 : i1 to i32
    %c0_i32_36 = arith.constant 0 : i32
    %62 = arith.cmpi ne, %61, %c0_i32_36 : i32
    scf.if %62 {
      %cst_115 = arith.constant 0xFF800000 : f32
      %230 = vector.broadcast %cst_115 : f32 to vector<4x8x1xf32>
      %c0_116 = arith.constant 0 : index
      %c0_117 = arith.constant 0 : index
      %c0_118 = arith.constant 0 : index
      %231 = vector.load %arg15[%c0_116, %c0_117, %c0_118] : memref<4x8x1xf32, #tpu.memory_space<vmem>>, vector<4x8x1xf32>
      tpu.vector_store %arg15[%c0_116, %c0_117, %c0_118], %230 {strides = array<i32>} : memref<4x8x1xf32, #tpu.memory_space<vmem>>, vector<4x8x1xf32>,
      %cst_119 = arith.constant 0.000000e+00 : f32
      %232 = vector.broadcast %cst_119 : f32 to vector<4x8x1xf32>
      %c0_120 = arith.constant 0 : index
      %c0_121 = arith.constant 0 : index
      %c0_122 = arith.constant 0 : index
      %233 = vector.load %arg16[%c0_120, %c0_121, %c0_122] : memref<4x8x1xf32, #tpu.memory_space<vmem>>, vector<4x8x1xf32>
      tpu.vector_store %arg16[%c0_120, %c0_121, %c0_122], %232 {strides = array<i32>} : memref<4x8x1xf32, #tpu.memory_space<vmem>>, vector<4x8x1xf32>,
      %cst_123 = arith.constant 0.000000e+00 : f32
      %234 = vector.broadcast %cst_123 : f32 to vector<4x8x8xf32>
      %c0_124 = arith.constant 0 : index
      %c0_125 = arith.constant 0 : index
      %c0_126 = arith.constant 0 : index
      %235 = vector.load %arg17[%c0_124, %c0_125, %c0_126] : memref<4x8x8xf32, #tpu.memory_space<vmem>>, vector<4x8x8xf32>
      tpu.vector_store %arg17[%c0_124, %c0_125, %c0_126], %234 {strides = array<i32>} : memref<4x8x8xf32, #tpu.memory_space<vmem>>, vector<4x8x8xf32>,
      %c8 = arith.constant 8 : index
      %c0_127 = arith.constant 0 : index
      %236 = vector.load %arg12[%c8, %c0_127] : memref<24x32xbf16, #tpu.memory_space<vmem>>, vector<8x32xbf16>
      %c0_i32_128 = arith.constant 0 : i32
      %237 = arith.subi %5, %c0_i32_128 : i32
      %c1_i32_129 = arith.constant 1 : i32
      %c1_i32_130 = arith.constant 1 : i32
      %238 = arith.subi %c1_i32_129, %c1_i32_130 : i32
      %239 = arith.addi %237, %238 : i32
      %c1_i32_131 = arith.constant 1 : i32
      %240 = arith.divsi %239, %c1_i32_131 : i32
      %c1_i32_132 = arith.constant 1 : i32
      %c0_i32_133 = arith.constant 0 : i32
      %c0_i32_134 = arith.constant 0 : i32
      %241 = arith.subi %240, %c0_i32_134 : i32
      %242 = arith.addi %c0_i32_134, %241 : i32
      %c1_i32_135 = arith.constant 1 : i32
      scf.for %arg18 = %c0_i32_134 to %242 step %c1_i32_135  : i32 {
        %284 = arith.muli %arg18, %c1_i32_132 : i32
        %285 = arith.addi %c0_i32_133, %284 : i32
        %c8_i32_166 = arith.constant 8 : i32
        %286 = arith.muli %285, %c8_i32_166 : i32
        %287 = tpu.assume_multiple %286, 8 : i32
        %288 = arith.index_cast %287 : i32 to index
        %c0_167 = arith.constant 0 : index
        %289 = vector.load %arg13[%288, %c0_167] : memref<24x32xbf16, #tpu.memory_space<vmem>>, vector<8x32xbf16>
        %290 = arith.index_cast %287 : i32 to index
        %c0_168 = arith.constant 0 : index
        %291 = vector.load %arg14[%290, %c0_168] : memref<24x32xbf16, #tpu.memory_space<vmem>>, vector<8x32xbf16>
        %292 = tpu.iota {dimensions = array<i32: 1>} : vector<1x8xi32>
        %293 = vector.broadcast %287 : i32 to vector<1x8xi32>
        %294 = arith.addi %293, %292 : vector<1x8xi32>
        %295 = vector.broadcast %3 : i32 to vector<1x8xi32>
        %296 = arith.cmpi sge, %294, %295 : vector<1x8xi32>
        %cst_169 = arith.constant -1.000000e+09 : f32
        %cst_170 = arith.constant 0.000000e+00 : f32
        %297 = vector.broadcast %cst_169 : f32 to vector<1x8xf32>
        %298 = vector.broadcast %cst_170 : f32 to vector<1x8xf32>
        %299 = arith.select %296, %297, %298 : vector<1x8xi1>, vector<1x8xf32>
        %300 = vector.extract_strided_slice %236 {offsets = [0, 0], sizes = [8, 8], strides = [1, 1]} : vector<8x32xbf16> to vector<8x8xbf16>
        %301 = vector.extract_strided_slice %289 {offsets = [0, 0], sizes = [8, 8], strides = [1, 1]} : vector<8x32xbf16> to vector<8x8xbf16>
        %cst_171 = arith.constant dense<0.000000e+00> : vector<8x8xf32>
        %302 = tpu.matmul %300, %301, %cst_171 {dimension_numbers = #tpu.dot_dimension_numbers<[1], [1], [0], [0], [0, 0, 1, 0], [], []>} : vector<8x8xbf16>, vector<8x8xbf16>, vector<8x8xf32> -> vector<8x8xf32>
        %303 = vector.broadcast %299 : vector<1x8xf32> to vector<8x8xf32>
        %304 = arith.addf %302, %303 : vector<8x8xf32>
        %c0_172 = arith.constant 0 : index
        %c0_173 = arith.constant 0 : index
        %c0_174 = arith.constant 0 : index
        %305 = vector.load %arg15[%c0_172, %c0_173, %c0_174] : memref<4x8x1xf32, #tpu.memory_space<vmem>>, vector<1x8x1xf32>
        %306 = vector.shape_cast %305 : vector<1x8x1xf32> to vector<8x1xf32>
        %cst_175 = arith.constant dense<0xFF800000> : vector<8xf32>
        %307 = vector.multi_reduction <maximumf>, %304, %cst_175 [1] : vector<8x8xf32> to vector<8xf32>
        %308 = vector.shape_cast %307 : vector<8xf32> to vector<8x1xf32>
        %309 = arith.maximumf %306, %308 : vector<8x1xf32>
        %310 = arith.subf %306, %309 : vector<8x1xf32>
        %311 = math.exp %310 : vector<8x1xf32>
        %312 = vector.broadcast %309 : vector<8x1xf32> to vector<8x8xf32>
        %313 = arith.subf %304, %312 : vector<8x8xf32>
        %314 = math.exp %313 : vector<8x8xf32>
        %c0_176 = arith.constant 0 : index
        %c0_177 = arith.constant 0 : index
        %c0_178 = arith.constant 0 : index
        %315 = vector.load %arg16[%c0_176, %c0_177, %c0_178] : memref<4x8x1xf32, #tpu.memory_space<vmem>>, vector<1x8x1xf32>
        %316 = vector.shape_cast %315 : vector<1x8x1xf32> to vector<8x1xf32>
        %317 = arith.mulf %311, %316 : vector<8x1xf32>
        %cst_179 = arith.constant dense<0.000000e+00> : vector<8xf32>
        %318 = vector.multi_reduction <add>, %314, %cst_179 [1] : vector<8x8xf32> to vector<8xf32>
        %319 = vector.shape_cast %318 : vector<8xf32> to vector<8x1xf32>
        %320 = arith.addf %317, %319 : vector<8x1xf32>
        %c0_180 = arith.constant 0 : index
        %c0_181 = arith.constant 0 : index
        %c0_182 = arith.constant 0 : index
        %321 = vector.load %arg16[%c0_180, %c0_181, %c0_182] : memref<4x8x1xf32, #tpu.memory_space<vmem>>, vector<1x8x1xf32>
        %322 = vector.shape_cast %321 : vector<1x8x1xf32> to vector<8x1xf32>
        %323 = vector.shape_cast %320 : vector<8x1xf32> to vector<1x8x1xf32>
        tpu.vector_store %arg16[%c0_180, %c0_181, %c0_182], %323 {strides = array<i32>} : memref<4x8x1xf32, #tpu.memory_space<vmem>>, vector<1x8x1xf32>,
        %c0_183 = arith.constant 0 : index
        %c0_184 = arith.constant 0 : index
        %c0_185 = arith.constant 0 : index
        %324 = vector.load %arg17[%c0_183, %c0_184, %c0_185] : memref<4x8x8xf32, #tpu.memory_space<vmem>>, vector<1x8x8xf32>
        %325 = vector.shape_cast %324 : vector<1x8x8xf32> to vector<8x8xf32>
        %326 = vector.broadcast %311 : vector<8x1xf32> to vector<8x8xf32>
        %327 = arith.mulf %326, %325 : vector<8x8xf32>
        %328 = arith.truncf %314 : vector<8x8xf32> to vector<8x8xbf16>
        %329 = vector.extract_strided_slice %291 {offsets = [0, 0], sizes = [8, 8], strides = [1, 1]} : vector<8x32xbf16> to vector<8x8xbf16>
        %cst_186 = arith.constant dense<0.000000e+00> : vector<8x8xf32>
        %330 = tpu.matmul %328, %329, %cst_186 {dimension_numbers = #tpu.dot_dimension_numbers<[1], [0], [0], [1], [0, 0, 1, 1], [], []>} : vector<8x8xbf16>, vector<8x8xbf16>, vector<8x8xf32> -> vector<8x8xf32>
        %331 = arith.addf %327, %330 : vector<8x8xf32>
        %c0_187 = arith.constant 0 : index
        %c0_188 = arith.constant 0 : index
        %c0_189 = arith.constant 0 : index
        %332 = vector.load %arg17[%c0_187, %c0_188, %c0_189] : memref<4x8x8xf32, #tpu.memory_space<vmem>>, vector<1x8x8xf32>
        %333 = vector.shape_cast %332 : vector<1x8x8xf32> to vector<8x8xf32>
        %334 = vector.shape_cast %331 : vector<8x8xf32> to vector<1x8x8xf32>
        tpu.vector_store %arg17[%c0_187, %c0_188, %c0_189], %334 {strides = array<i32>} : memref<4x8x8xf32, #tpu.memory_space<vmem>>, vector<1x8x8xf32>,
        %c0_190 = arith.constant 0 : index
        %c0_191 = arith.constant 0 : index
        %c0_192 = arith.constant 0 : index
        %335 = vector.load %arg15[%c0_190, %c0_191, %c0_192] : memref<4x8x1xf32, #tpu.memory_space<vmem>>, vector<1x8x1xf32>
        %336 = vector.shape_cast %335 : vector<1x8x1xf32> to vector<8x1xf32>
        %337 = vector.shape_cast %309 : vector<8x1xf32> to vector<1x8x1xf32>
        tpu.vector_store %arg15[%c0_190, %c0_191, %c0_192], %337 {strides = array<i32>} : memref<4x8x1xf32, #tpu.memory_space<vmem>>, vector<1x8x1xf32>,
        %338 = vector.extract_strided_slice %236 {offsets = [0, 8], sizes = [8, 8], strides = [1, 1]} : vector<8x32xbf16> to vector<8x8xbf16>
        %339 = vector.extract_strided_slice %289 {offsets = [0, 8], sizes = [8, 8], strides = [1, 1]} : vector<8x32xbf16> to vector<8x8xbf16>
        %cst_193 = arith.constant dense<0.000000e+00> : vector<8x8xf32>
        %340 = tpu.matmul %338, %339, %cst_193 {dimension_numbers = #tpu.dot_dimension_numbers<[1], [1], [0], [0], [0, 0, 1, 0], [], []>} : vector<8x8xbf16>, vector<8x8xbf16>, vector<8x8xf32> -> vector<8x8xf32>
        %341 = vector.broadcast %299 : vector<1x8xf32> to vector<8x8xf32>
        %342 = arith.addf %340, %341 : vector<8x8xf32>
        %c1_194 = arith.constant 1 : index
        %c0_195 = arith.constant 0 : index
        %c0_196 = arith.constant 0 : index
        %343 = vector.load %arg15[%c1_194, %c0_195, %c0_196] : memref<4x8x1xf32, #tpu.memory_space<vmem>>, vector<1x8x1xf32>
        %344 = vector.shape_cast %343 : vector<1x8x1xf32> to vector<8x1xf32>
        %cst_197 = arith.constant dense<0xFF800000> : vector<8xf32>
        %345 = vector.multi_reduction <maximumf>, %342, %cst_197 [1] : vector<8x8xf32> to vector<8xf32>
        %346 = vector.shape_cast %345 : vector<8xf32> to vector<8x1xf32>
        %347 = arith.maximumf %344, %346 : vector<8x1xf32>
        %348 = arith.subf %344, %347 : vector<8x1xf32>
        %349 = math.exp %348 : vector<8x1xf32>
        %350 = vector.broadcast %347 : vector<8x1xf32> to vector<8x8xf32>
        %351 = arith.subf %342, %350 : vector<8x8xf32>
        %352 = math.exp %351 : vector<8x8xf32>
        %c1_198 = arith.constant 1 : index
        %c0_199 = arith.constant 0 : index
        %c0_200 = arith.constant 0 : index
        %353 = vector.load %arg16[%c1_198, %c0_199, %c0_200] : memref<4x8x1xf32, #tpu.memory_space<vmem>>, vector<1x8x1xf32>
        %354 = vector.shape_cast %353 : vector<1x8x1xf32> to vector<8x1xf32>
        %355 = arith.mulf %349, %354 : vector<8x1xf32>
        %cst_201 = arith.constant dense<0.000000e+00> : vector<8xf32>
        %356 = vector.multi_reduction <add>, %352, %cst_201 [1] : vector<8x8xf32> to vector<8xf32>
        %357 = vector.shape_cast %356 : vector<8xf32> to vector<8x1xf32>
        %358 = arith.addf %355, %357 : vector<8x1xf32>
        %c1_202 = arith.constant 1 : index
        %c0_203 = arith.constant 0 : index
        %c0_204 = arith.constant 0 : index
        %359 = vector.load %arg16[%c1_202, %c0_203, %c0_204] : memref<4x8x1xf32, #tpu.memory_space<vmem>>, vector<1x8x1xf32>
        %360 = vector.shape_cast %359 : vector<1x8x1xf32> to vector<8x1xf32>
        %361 = vector.shape_cast %358 : vector<8x1xf32> to vector<1x8x1xf32>
        tpu.vector_store %arg16[%c1_202, %c0_203, %c0_204], %361 {strides = array<i32>} : memref<4x8x1xf32, #tpu.memory_space<vmem>>, vector<1x8x1xf32>,
        %c1_205 = arith.constant 1 : index
        %c0_206 = arith.constant 0 : index
        %c0_207 = arith.constant 0 : index
        %362 = vector.load %arg17[%c1_205, %c0_206, %c0_207] : memref<4x8x8xf32, #tpu.memory_space<vmem>>, vector<1x8x8xf32>
        %363 = vector.shape_cast %362 : vector<1x8x8xf32> to vector<8x8xf32>
        %364 = vector.broadcast %349 : vector<8x1xf32> to vector<8x8xf32>
        %365 = arith.mulf %364, %363 : vector<8x8xf32>
        %366 = arith.truncf %352 : vector<8x8xf32> to vector<8x8xbf16>
        %367 = vector.extract_strided_slice %291 {offsets = [0, 8], sizes = [8, 8], strides = [1, 1]} : vector<8x32xbf16> to vector<8x8xbf16>
        %cst_208 = arith.constant dense<0.000000e+00> : vector<8x8xf32>
        %368 = tpu.matmul %366, %367, %cst_208 {dimension_numbers = #tpu.dot_dimension_numbers<[1], [0], [0], [1], [0, 0, 1, 1], [], []>} : vector<8x8xbf16>, vector<8x8xbf16>, vector<8x8xf32> -> vector<8x8xf32>
        %369 = arith.addf %365, %368 : vector<8x8xf32>
        %c1_209 = arith.constant 1 : index
        %c0_210 = arith.constant 0 : index
        %c0_211 = arith.constant 0 : index
        %370 = vector.load %arg17[%c1_209, %c0_210, %c0_211] : memref<4x8x8xf32, #tpu.memory_space<vmem>>, vector<1x8x8xf32>
        %371 = vector.shape_cast %370 : vector<1x8x8xf32> to vector<8x8xf32>
        %372 = vector.shape_cast %369 : vector<8x8xf32> to vector<1x8x8xf32>
        tpu.vector_store %arg17[%c1_209, %c0_210, %c0_211], %372 {strides = array<i32>} : memref<4x8x8xf32, #tpu.memory_space<vmem>>, vector<1x8x8xf32>,
        %c1_212 = arith.constant 1 : index
        %c0_213 = arith.constant 0 : index
        %c0_214 = arith.constant 0 : index
        %373 = vector.load %arg15[%c1_212, %c0_213, %c0_214] : memref<4x8x1xf32, #tpu.memory_space<vmem>>, vector<1x8x1xf32>
        %374 = vector.shape_cast %373 : vector<1x8x1xf32> to vector<8x1xf32>
        %375 = vector.shape_cast %347 : vector<8x1xf32> to vector<1x8x1xf32>
        tpu.vector_store %arg15[%c1_212, %c0_213, %c0_214], %375 {strides = array<i32>} : memref<4x8x1xf32, #tpu.memory_space<vmem>>, vector<1x8x1xf32>,
        %376 = vector.extract_strided_slice %236 {offsets = [0, 16], sizes = [8, 8], strides = [1, 1]} : vector<8x32xbf16> to vector<8x8xbf16>
        %377 = vector.extract_strided_slice %289 {offsets = [0, 16], sizes = [8, 8], strides = [1, 1]} : vector<8x32xbf16> to vector<8x8xbf16>
        %cst_215 = arith.constant dense<0.000000e+00> : vector<8x8xf32>
        %378 = tpu.matmul %376, %377, %cst_215 {dimension_numbers = #tpu.dot_dimension_numbers<[1], [1], [0], [0], [0, 0, 1, 0], [], []>} : vector<8x8xbf16>, vector<8x8xbf16>, vector<8x8xf32> -> vector<8x8xf32>
        %379 = vector.broadcast %299 : vector<1x8xf32> to vector<8x8xf32>
        %380 = arith.addf %378, %379 : vector<8x8xf32>
        %c2_216 = arith.constant 2 : index
        %c0_217 = arith.constant 0 : index
        %c0_218 = arith.constant 0 : index
        %381 = vector.load %arg15[%c2_216, %c0_217, %c0_218] : memref<4x8x1xf32, #tpu.memory_space<vmem>>, vector<1x8x1xf32>
        %382 = vector.shape_cast %381 : vector<1x8x1xf32> to vector<8x1xf32>
        %cst_219 = arith.constant dense<0xFF800000> : vector<8xf32>
        %383 = vector.multi_reduction <maximumf>, %380, %cst_219 [1] : vector<8x8xf32> to vector<8xf32>
        %384 = vector.shape_cast %383 : vector<8xf32> to vector<8x1xf32>
        %385 = arith.maximumf %382, %384 : vector<8x1xf32>
        %386 = arith.subf %382, %385 : vector<8x1xf32>
        %387 = math.exp %386 : vector<8x1xf32>
        %388 = vector.broadcast %385 : vector<8x1xf32> to vector<8x8xf32>
        %389 = arith.subf %380, %388 : vector<8x8xf32>
        %390 = math.exp %389 : vector<8x8xf32>
        %c2_220 = arith.constant 2 : index
        %c0_221 = arith.constant 0 : index
        %c0_222 = arith.constant 0 : index
        %391 = vector.load %arg16[%c2_220, %c0_221, %c0_222] : memref<4x8x1xf32, #tpu.memory_space<vmem>>, vector<1x8x1xf32>
        %392 = vector.shape_cast %391 : vector<1x8x1xf32> to vector<8x1xf32>
        %393 = arith.mulf %387, %392 : vector<8x1xf32>
        %cst_223 = arith.constant dense<0.000000e+00> : vector<8xf32>
        %394 = vector.multi_reduction <add>, %390, %cst_223 [1] : vector<8x8xf32> to vector<8xf32>
        %395 = vector.shape_cast %394 : vector<8xf32> to vector<8x1xf32>
        %396 = arith.addf %393, %395 : vector<8x1xf32>
        %c2_224 = arith.constant 2 : index
        %c0_225 = arith.constant 0 : index
        %c0_226 = arith.constant 0 : index
        %397 = vector.load %arg16[%c2_224, %c0_225, %c0_226] : memref<4x8x1xf32, #tpu.memory_space<vmem>>, vector<1x8x1xf32>
        %398 = vector.shape_cast %397 : vector<1x8x1xf32> to vector<8x1xf32>
        %399 = vector.shape_cast %396 : vector<8x1xf32> to vector<1x8x1xf32>
        tpu.vector_store %arg16[%c2_224, %c0_225, %c0_226], %399 {strides = array<i32>} : memref<4x8x1xf32, #tpu.memory_space<vmem>>, vector<1x8x1xf32>,
        %c2_227 = arith.constant 2 : index
        %c0_228 = arith.constant 0 : index
        %c0_229 = arith.constant 0 : index
        %400 = vector.load %arg17[%c2_227, %c0_228, %c0_229] : memref<4x8x8xf32, #tpu.memory_space<vmem>>, vector<1x8x8xf32>
        %401 = vector.shape_cast %400 : vector<1x8x8xf32> to vector<8x8xf32>
        %402 = vector.broadcast %387 : vector<8x1xf32> to vector<8x8xf32>
        %403 = arith.mulf %402, %401 : vector<8x8xf32>
        %404 = arith.truncf %390 : vector<8x8xf32> to vector<8x8xbf16>
        %405 = vector.extract_strided_slice %291 {offsets = [0, 16], sizes = [8, 8], strides = [1, 1]} : vector<8x32xbf16> to vector<8x8xbf16>
        %cst_230 = arith.constant dense<0.000000e+00> : vector<8x8xf32>
        %406 = tpu.matmul %404, %405, %cst_230 {dimension_numbers = #tpu.dot_dimension_numbers<[1], [0], [0], [1], [0, 0, 1, 1], [], []>} : vector<8x8xbf16>, vector<8x8xbf16>, vector<8x8xf32> -> vector<8x8xf32>
        %407 = arith.addf %403, %406 : vector<8x8xf32>
        %c2_231 = arith.constant 2 : index
        %c0_232 = arith.constant 0 : index
        %c0_233 = arith.constant 0 : index
        %408 = vector.load %arg17[%c2_231, %c0_232, %c0_233] : memref<4x8x8xf32, #tpu.memory_space<vmem>>, vector<1x8x8xf32>
        %409 = vector.shape_cast %408 : vector<1x8x8xf32> to vector<8x8xf32>
        %410 = vector.shape_cast %407 : vector<8x8xf32> to vector<1x8x8xf32>
        tpu.vector_store %arg17[%c2_231, %c0_232, %c0_233], %410 {strides = array<i32>} : memref<4x8x8xf32, #tpu.memory_space<vmem>>, vector<1x8x8xf32>,
        %c2_234 = arith.constant 2 : index
        %c0_235 = arith.constant 0 : index
        %c0_236 = arith.constant 0 : index
        %411 = vector.load %arg15[%c2_234, %c0_235, %c0_236] : memref<4x8x1xf32, #tpu.memory_space<vmem>>, vector<1x8x1xf32>
        %412 = vector.shape_cast %411 : vector<1x8x1xf32> to vector<8x1xf32>
        %413 = vector.shape_cast %385 : vector<8x1xf32> to vector<1x8x1xf32>
        tpu.vector_store %arg15[%c2_234, %c0_235, %c0_236], %413 {strides = array<i32>} : memref<4x8x1xf32, #tpu.memory_space<vmem>>, vector<1x8x1xf32>,
        %414 = vector.extract_strided_slice %236 {offsets = [0, 24], sizes = [8, 8], strides = [1, 1]} : vector<8x32xbf16> to vector<8x8xbf16>
        %415 = vector.extract_strided_slice %289 {offsets = [0, 24], sizes = [8, 8], strides = [1, 1]} : vector<8x32xbf16> to vector<8x8xbf16>
        %cst_237 = arith.constant dense<0.000000e+00> : vector<8x8xf32>
        %416 = tpu.matmul %414, %415, %cst_237 {dimension_numbers = #tpu.dot_dimension_numbers<[1], [1], [0], [0], [0, 0, 1, 0], [], []>} : vector<8x8xbf16>, vector<8x8xbf16>, vector<8x8xf32> -> vector<8x8xf32>
        %417 = vector.broadcast %299 : vector<1x8xf32> to vector<8x8xf32>
        %418 = arith.addf %416, %417 : vector<8x8xf32>
        %c3_238 = arith.constant 3 : index
        %c0_239 = arith.constant 0 : index
        %c0_240 = arith.constant 0 : index
        %419 = vector.load %arg15[%c3_238, %c0_239, %c0_240] : memref<4x8x1xf32, #tpu.memory_space<vmem>>, vector<1x8x1xf32>
        %420 = vector.shape_cast %419 : vector<1x8x1xf32> to vector<8x1xf32>
        %cst_241 = arith.constant dense<0xFF800000> : vector<8xf32>
        %421 = vector.multi_reduction <maximumf>, %418, %cst_241 [1] : vector<8x8xf32> to vector<8xf32>
        %422 = vector.shape_cast %421 : vector<8xf32> to vector<8x1xf32>
        %423 = arith.maximumf %420, %422 : vector<8x1xf32>
        %424 = arith.subf %420, %423 : vector<8x1xf32>
        %425 = math.exp %424 : vector<8x1xf32>
        %426 = vector.broadcast %423 : vector<8x1xf32> to vector<8x8xf32>
        %427 = arith.subf %418, %426 : vector<8x8xf32>
        %428 = math.exp %427 : vector<8x8xf32>
        %c3_242 = arith.constant 3 : index
        %c0_243 = arith.constant 0 : index
        %c0_244 = arith.constant 0 : index
        %429 = vector.load %arg16[%c3_242, %c0_243, %c0_244] : memref<4x8x1xf32, #tpu.memory_space<vmem>>, vector<1x8x1xf32>
        %430 = vector.shape_cast %429 : vector<1x8x1xf32> to vector<8x1xf32>
        %431 = arith.mulf %425, %430 : vector<8x1xf32>
        %cst_245 = arith.constant dense<0.000000e+00> : vector<8xf32>
        %432 = vector.multi_reduction <add>, %428, %cst_245 [1] : vector<8x8xf32> to vector<8xf32>
        %433 = vector.shape_cast %432 : vector<8xf32> to vector<8x1xf32>
        %434 = arith.addf %431, %433 : vector<8x1xf32>
        %c3_246 = arith.constant 3 : index
        %c0_247 = arith.constant 0 : index
        %c0_248 = arith.constant 0 : index
        %435 = vector.load %arg16[%c3_246, %c0_247, %c0_248] : memref<4x8x1xf32, #tpu.memory_space<vmem>>, vector<1x8x1xf32>
        %436 = vector.shape_cast %435 : vector<1x8x1xf32> to vector<8x1xf32>
        %437 = vector.shape_cast %434 : vector<8x1xf32> to vector<1x8x1xf32>
        tpu.vector_store %arg16[%c3_246, %c0_247, %c0_248], %437 {strides = array<i32>} : memref<4x8x1xf32, #tpu.memory_space<vmem>>, vector<1x8x1xf32>,
        %c3_249 = arith.constant 3 : index
        %c0_250 = arith.constant 0 : index
        %c0_251 = arith.constant 0 : index
        %438 = vector.load %arg17[%c3_249, %c0_250, %c0_251] : memref<4x8x8xf32, #tpu.memory_space<vmem>>, vector<1x8x8xf32>
        %439 = vector.shape_cast %438 : vector<1x8x8xf32> to vector<8x8xf32>
        %440 = vector.broadcast %425 : vector<8x1xf32> to vector<8x8xf32>
        %441 = arith.mulf %440, %439 : vector<8x8xf32>
        %442 = arith.truncf %428 : vector<8x8xf32> to vector<8x8xbf16>
        %443 = vector.extract_strided_slice %291 {offsets = [0, 24], sizes = [8, 8], strides = [1, 1]} : vector<8x32xbf16> to vector<8x8xbf16>
        %cst_252 = arith.constant dense<0.000000e+00> : vector<8x8xf32>
        %444 = tpu.matmul %442, %443, %cst_252 {dimension_numbers = #tpu.dot_dimension_numbers<[1], [0], [0], [1], [0, 0, 1, 1], [], []>} : vector<8x8xbf16>, vector<8x8xbf16>, vector<8x8xf32> -> vector<8x8xf32>
        %445 = arith.addf %441, %444 : vector<8x8xf32>
        %c3_253 = arith.constant 3 : index
        %c0_254 = arith.constant 0 : index
        %c0_255 = arith.constant 0 : index
        %446 = vector.load %arg17[%c3_253, %c0_254, %c0_255] : memref<4x8x8xf32, #tpu.memory_space<vmem>>, vector<1x8x8xf32>
        %447 = vector.shape_cast %446 : vector<1x8x8xf32> to vector<8x8xf32>
        %448 = vector.shape_cast %445 : vector<8x8xf32> to vector<1x8x8xf32>
        tpu.vector_store %arg17[%c3_253, %c0_254, %c0_255], %448 {strides = array<i32>} : memref<4x8x8xf32, #tpu.memory_space<vmem>>, vector<1x8x8xf32>,
        %c3_256 = arith.constant 3 : index
        %c0_257 = arith.constant 0 : index
        %c0_258 = arith.constant 0 : index
        %449 = vector.load %arg15[%c3_256, %c0_257, %c0_258] : memref<4x8x1xf32, #tpu.memory_space<vmem>>, vector<1x8x1xf32>
        %450 = vector.shape_cast %449 : vector<1x8x1xf32> to vector<8x1xf32>
        %451 = vector.shape_cast %423 : vector<8x1xf32> to vector<1x8x1xf32>
        tpu.vector_store %arg15[%c3_256, %c0_257, %c0_258], %451 {strides = array<i32>} : memref<4x8x1xf32, #tpu.memory_space<vmem>>, vector<1x8x1xf32>,
      }
      %c0_136 = arith.constant 0 : index
      %c0_137 = arith.constant 0 : index
      %c0_138 = arith.constant 0 : index
      %243 = vector.load %arg17[%c0_136, %c0_137, %c0_138] : memref<4x8x8xf32, #tpu.memory_space<vmem>>, vector<1x8x8xf32>
      %244 = vector.shape_cast %243 : vector<1x8x8xf32> to vector<8x8xf32>
      %c0_139 = arith.constant 0 : index
      %c0_140 = arith.constant 0 : index
      %c0_141 = arith.constant 0 : index
      %245 = vector.load %arg16[%c0_139, %c0_140, %c0_141] : memref<4x8x1xf32, #tpu.memory_space<vmem>>, vector<1x8x1xf32>
      %246 = vector.shape_cast %245 : vector<1x8x1xf32> to vector<8x1xf32>
      %247 = tpu.reciprocal %246 {approx = true} : vector<8x1xf32> -> vector<8x1xf32>
      %248 = vector.broadcast %247 : vector<8x1xf32> to vector<8x8xf32>
      %249 = arith.mulf %244, %248 : vector<8x8xf32>
      %250 = arith.truncf %249 : vector<8x8xf32> to vector<8x8xbf16>
      %c1_142 = arith.constant 1 : index
      %c0_143 = arith.constant 0 : index
      %c0_144 = arith.constant 0 : index
      %251 = vector.load %arg17[%c1_142, %c0_143, %c0_144] : memref<4x8x8xf32, #tpu.memory_space<vmem>>, vector<1x8x8xf32>
      %252 = vector.shape_cast %251 : vector<1x8x8xf32> to vector<8x8xf32>
      %c1_145 = arith.constant 1 : index
      %c0_146 = arith.constant 0 : index
      %c0_147 = arith.constant 0 : index
      %253 = vector.load %arg16[%c1_145, %c0_146, %c0_147] : memref<4x8x1xf32, #tpu.memory_space<vmem>>, vector<1x8x1xf32>
      %254 = vector.shape_cast %253 : vector<1x8x1xf32> to vector<8x1xf32>
      %255 = tpu.reciprocal %254 {approx = true} : vector<8x1xf32> -> vector<8x1xf32>
      %256 = vector.broadcast %255 : vector<8x1xf32> to vector<8x8xf32>
      %257 = arith.mulf %252, %256 : vector<8x8xf32>
      %258 = arith.truncf %257 : vector<8x8xf32> to vector<8x8xbf16>
      %c2 = arith.constant 2 : index
      %c0_148 = arith.constant 0 : index
      %c0_149 = arith.constant 0 : index
      %259 = vector.load %arg17[%c2, %c0_148, %c0_149] : memref<4x8x8xf32, #tpu.memory_space<vmem>>, vector<1x8x8xf32>
      %260 = vector.shape_cast %259 : vector<1x8x8xf32> to vector<8x8xf32>
      %c2_150 = arith.constant 2 : index
      %c0_151 = arith.constant 0 : index
      %c0_152 = arith.constant 0 : index
      %261 = vector.load %arg16[%c2_150, %c0_151, %c0_152] : memref<4x8x1xf32, #tpu.memory_space<vmem>>, vector<1x8x1xf32>
      %262 = vector.shape_cast %261 : vector<1x8x1xf32> to vector<8x1xf32>
      %263 = tpu.reciprocal %262 {approx = true} : vector<8x1xf32> -> vector<8x1xf32>
      %264 = vector.broadcast %263 : vector<8x1xf32> to vector<8x8xf32>
      %265 = arith.mulf %260, %264 : vector<8x8xf32>
      %266 = arith.truncf %265 : vector<8x8xf32> to vector<8x8xbf16>
      %c3 = arith.constant 3 : index
      %c0_153 = arith.constant 0 : index
      %c0_154 = arith.constant 0 : index
      %267 = vector.load %arg17[%c3, %c0_153, %c0_154] : memref<4x8x8xf32, #tpu.memory_space<vmem>>, vector<1x8x8xf32>
      %268 = vector.shape_cast %267 : vector<1x8x8xf32> to vector<8x8xf32>
      %c3_155 = arith.constant 3 : index
      %c0_156 = arith.constant 0 : index
      %c0_157 = arith.constant 0 : index
      %269 = vector.load %arg16[%c3_155, %c0_156, %c0_157] : memref<4x8x1xf32, #tpu.memory_space<vmem>>, vector<1x8x1xf32>
      %270 = vector.shape_cast %269 : vector<1x8x1xf32> to vector<8x1xf32>
      %271 = tpu.reciprocal %270 {approx = true} : vector<8x1xf32> -> vector<8x1xf32>
      %272 = vector.broadcast %271 : vector<8x1xf32> to vector<8x8xf32>
      %273 = arith.mulf %268, %272 : vector<8x8xf32>
      %274 = arith.truncf %273 : vector<8x8xf32> to vector<8x8xbf16>
      %275 = tpu.concatenate %250, %258, %266, %274 in 1 : vector<8x8xbf16>, vector<8x8xbf16>, vector<8x8xbf16>, vector<8x8xbf16> -> vector<8x32xbf16>
      %c0_158 = arith.constant 0 : index
      %c0_159 = arith.constant 0 : index
      %c0_160 = arith.constant 0 : index
      %276 = vector.load %arg8[%c0_158, %c0_159, %c0_160] : memref<2x32x32xbf16, #tpu.memory_space<vmem>>, vector<1x32x32xbf16>
      %277 = vector.shape_cast %276 : vector<1x32x32xbf16> to vector<32x32xbf16>
      %cst_161 = arith.constant dense<0.000000e+00> : vector<8x32xf32>
      %278 = tpu.matmul %275, %277, %cst_161 {dimension_numbers = #tpu.dot_dimension_numbers<[1], [0], [0], [1], [0, 0, 1, 1], [], []>} : vector<8x32xbf16>, vector<32x32xbf16>, vector<8x32xf32> -> vector<8x32xf32>
      %c8_162 = arith.constant 8 : index
      %c0_163 = arith.constant 0 : index
      %279 = vector.load %arg11[%c8_162, %c0_163] : memref<24x32xf32, #tpu.memory_space<vmem>>, vector<8x32xf32>
      %280 = arith.addf %279, %278 : vector<8x32xf32>
      %281 = vector.broadcast %16 : vector<1x32xf32> to vector<8x32xf32>
      %282 = arith.addf %280, %281 : vector<8x32xf32>
      %c8_164 = arith.constant 8 : index
      %c0_165 = arith.constant 0 : index
      %283 = vector.load %arg11[%c8_164, %c0_165] : memref<24x32xf32, #tpu.memory_space<vmem>>, vector<8x32xf32>
      tpu.vector_store %arg11[%c8_164, %c0_165], %282 {strides = array<i32>} : memref<24x32xf32, #tpu.memory_space<vmem>>, vector<8x32xf32>,
    } else {
    }
    %c16_i32 = arith.constant 16 : i32
    %63 = arith.cmpi sgt, %3, %c16_i32 : i32
    %64 = arith.extui %63 : i1 to i32
    %c0_i32_37 = arith.constant 0 : i32
    %65 = arith.cmpi ne, %64, %c0_i32_37 : i32
    scf.if %65 {
      %cst_115 = arith.constant 0xFF800000 : f32
      %230 = vector.broadcast %cst_115 : f32 to vector<4x8x1xf32>
      %c0_116 = arith.constant 0 : index
      %c0_117 = arith.constant 0 : index
      %c0_118 = arith.constant 0 : index
      %231 = vector.load %arg15[%c0_116, %c0_117, %c0_118] : memref<4x8x1xf32, #tpu.memory_space<vmem>>, vector<4x8x1xf32>
      tpu.vector_store %arg15[%c0_116, %c0_117, %c0_118], %230 {strides = array<i32>} : memref<4x8x1xf32, #tpu.memory_space<vmem>>, vector<4x8x1xf32>,
      %cst_119 = arith.constant 0.000000e+00 : f32
      %232 = vector.broadcast %cst_119 : f32 to vector<4x8x1xf32>
      %c0_120 = arith.constant 0 : index
      %c0_121 = arith.constant 0 : index
      %c0_122 = arith.constant 0 : index
      %233 = vector.load %arg16[%c0_120, %c0_121, %c0_122] : memref<4x8x1xf32, #tpu.memory_space<vmem>>, vector<4x8x1xf32>
      tpu.vector_store %arg16[%c0_120, %c0_121, %c0_122], %232 {strides = array<i32>} : memref<4x8x1xf32, #tpu.memory_space<vmem>>, vector<4x8x1xf32>,
      %cst_123 = arith.constant 0.000000e+00 : f32
      %234 = vector.broadcast %cst_123 : f32 to vector<4x8x8xf32>
      %c0_124 = arith.constant 0 : index
      %c0_125 = arith.constant 0 : index
      %c0_126 = arith.constant 0 : index
      %235 = vector.load %arg17[%c0_124, %c0_125, %c0_126] : memref<4x8x8xf32, #tpu.memory_space<vmem>>, vector<4x8x8xf32>
      tpu.vector_store %arg17[%c0_124, %c0_125, %c0_126], %234 {strides = array<i32>} : memref<4x8x8xf32, #tpu.memory_space<vmem>>, vector<4x8x8xf32>,
      %c16_127 = arith.constant 16 : index
      %c0_128 = arith.constant 0 : index
      %236 = vector.load %arg12[%c16_127, %c0_128] : memref<24x32xbf16, #tpu.memory_space<vmem>>, vector<8x32xbf16>
      %c0_i32_129 = arith.constant 0 : i32
      %237 = arith.subi %5, %c0_i32_129 : i32
      %c1_i32_130 = arith.constant 1 : i32
      %c1_i32_131 = arith.constant 1 : i32
      %238 = arith.subi %c1_i32_130, %c1_i32_131 : i32
      %239 = arith.addi %237, %238 : i32
      %c1_i32_132 = arith.constant 1 : i32
      %240 = arith.divsi %239, %c1_i32_132 : i32
      %c1_i32_133 = arith.constant 1 : i32
      %c0_i32_134 = arith.constant 0 : i32
      %c0_i32_135 = arith.constant 0 : i32
      %241 = arith.subi %240, %c0_i32_135 : i32
      %242 = arith.addi %c0_i32_135, %241 : i32
      %c1_i32_136 = arith.constant 1 : i32
      scf.for %arg18 = %c0_i32_135 to %242 step %c1_i32_136  : i32 {
        %284 = arith.muli %arg18, %c1_i32_133 : i32
        %285 = arith.addi %c0_i32_134, %284 : i32
        %c8_i32_167 = arith.constant 8 : i32
        %286 = arith.muli %285, %c8_i32_167 : i32
        %287 = tpu.assume_multiple %286, 8 : i32
        %288 = arith.index_cast %287 : i32 to index
        %c0_168 = arith.constant 0 : index
        %289 = vector.load %arg13[%288, %c0_168] : memref<24x32xbf16, #tpu.memory_space<vmem>>, vector<8x32xbf16>
        %290 = arith.index_cast %287 : i32 to index
        %c0_169 = arith.constant 0 : index
        %291 = vector.load %arg14[%290, %c0_169] : memref<24x32xbf16, #tpu.memory_space<vmem>>, vector<8x32xbf16>
        %292 = tpu.iota {dimensions = array<i32: 1>} : vector<1x8xi32>
        %293 = vector.broadcast %287 : i32 to vector<1x8xi32>
        %294 = arith.addi %293, %292 : vector<1x8xi32>
        %295 = vector.broadcast %3 : i32 to vector<1x8xi32>
        %296 = arith.cmpi sge, %294, %295 : vector<1x8xi32>
        %cst_170 = arith.constant -1.000000e+09 : f32
        %cst_171 = arith.constant 0.000000e+00 : f32
        %297 = vector.broadcast %cst_170 : f32 to vector<1x8xf32>
        %298 = vector.broadcast %cst_171 : f32 to vector<1x8xf32>
        %299 = arith.select %296, %297, %298 : vector<1x8xi1>, vector<1x8xf32>
        %300 = vector.extract_strided_slice %236 {offsets = [0, 0], sizes = [8, 8], strides = [1, 1]} : vector<8x32xbf16> to vector<8x8xbf16>
        %301 = vector.extract_strided_slice %289 {offsets = [0, 0], sizes = [8, 8], strides = [1, 1]} : vector<8x32xbf16> to vector<8x8xbf16>
        %cst_172 = arith.constant dense<0.000000e+00> : vector<8x8xf32>
        %302 = tpu.matmul %300, %301, %cst_172 {dimension_numbers = #tpu.dot_dimension_numbers<[1], [1], [0], [0], [0, 0, 1, 0], [], []>} : vector<8x8xbf16>, vector<8x8xbf16>, vector<8x8xf32> -> vector<8x8xf32>
        %303 = vector.broadcast %299 : vector<1x8xf32> to vector<8x8xf32>
        %304 = arith.addf %302, %303 : vector<8x8xf32>
        %c0_173 = arith.constant 0 : index
        %c0_174 = arith.constant 0 : index
        %c0_175 = arith.constant 0 : index
        %305 = vector.load %arg15[%c0_173, %c0_174, %c0_175] : memref<4x8x1xf32, #tpu.memory_space<vmem>>, vector<1x8x1xf32>
        %306 = vector.shape_cast %305 : vector<1x8x1xf32> to vector<8x1xf32>
        %cst_176 = arith.constant dense<0xFF800000> : vector<8xf32>
        %307 = vector.multi_reduction <maximumf>, %304, %cst_176 [1] : vector<8x8xf32> to vector<8xf32>
        %308 = vector.shape_cast %307 : vector<8xf32> to vector<8x1xf32>
        %309 = arith.maximumf %306, %308 : vector<8x1xf32>
        %310 = arith.subf %306, %309 : vector<8x1xf32>
        %311 = math.exp %310 : vector<8x1xf32>
        %312 = vector.broadcast %309 : vector<8x1xf32> to vector<8x8xf32>
        %313 = arith.subf %304, %312 : vector<8x8xf32>
        %314 = math.exp %313 : vector<8x8xf32>
        %c0_177 = arith.constant 0 : index
        %c0_178 = arith.constant 0 : index
        %c0_179 = arith.constant 0 : index
        %315 = vector.load %arg16[%c0_177, %c0_178, %c0_179] : memref<4x8x1xf32, #tpu.memory_space<vmem>>, vector<1x8x1xf32>
        %316 = vector.shape_cast %315 : vector<1x8x1xf32> to vector<8x1xf32>
        %317 = arith.mulf %311, %316 : vector<8x1xf32>
        %cst_180 = arith.constant dense<0.000000e+00> : vector<8xf32>
        %318 = vector.multi_reduction <add>, %314, %cst_180 [1] : vector<8x8xf32> to vector<8xf32>
        %319 = vector.shape_cast %318 : vector<8xf32> to vector<8x1xf32>
        %320 = arith.addf %317, %319 : vector<8x1xf32>
        %c0_181 = arith.constant 0 : index
        %c0_182 = arith.constant 0 : index
        %c0_183 = arith.constant 0 : index
        %321 = vector.load %arg16[%c0_181, %c0_182, %c0_183] : memref<4x8x1xf32, #tpu.memory_space<vmem>>, vector<1x8x1xf32>
        %322 = vector.shape_cast %321 : vector<1x8x1xf32> to vector<8x1xf32>
        %323 = vector.shape_cast %320 : vector<8x1xf32> to vector<1x8x1xf32>
        tpu.vector_store %arg16[%c0_181, %c0_182, %c0_183], %323 {strides = array<i32>} : memref<4x8x1xf32, #tpu.memory_space<vmem>>, vector<1x8x1xf32>,
        %c0_184 = arith.constant 0 : index
        %c0_185 = arith.constant 0 : index
        %c0_186 = arith.constant 0 : index
        %324 = vector.load %arg17[%c0_184, %c0_185, %c0_186] : memref<4x8x8xf32, #tpu.memory_space<vmem>>, vector<1x8x8xf32>
        %325 = vector.shape_cast %324 : vector<1x8x8xf32> to vector<8x8xf32>
        %326 = vector.broadcast %311 : vector<8x1xf32> to vector<8x8xf32>
        %327 = arith.mulf %326, %325 : vector<8x8xf32>
        %328 = arith.truncf %314 : vector<8x8xf32> to vector<8x8xbf16>
        %329 = vector.extract_strided_slice %291 {offsets = [0, 0], sizes = [8, 8], strides = [1, 1]} : vector<8x32xbf16> to vector<8x8xbf16>
        %cst_187 = arith.constant dense<0.000000e+00> : vector<8x8xf32>
        %330 = tpu.matmul %328, %329, %cst_187 {dimension_numbers = #tpu.dot_dimension_numbers<[1], [0], [0], [1], [0, 0, 1, 1], [], []>} : vector<8x8xbf16>, vector<8x8xbf16>, vector<8x8xf32> -> vector<8x8xf32>
        %331 = arith.addf %327, %330 : vector<8x8xf32>
        %c0_188 = arith.constant 0 : index
        %c0_189 = arith.constant 0 : index
        %c0_190 = arith.constant 0 : index
        %332 = vector.load %arg17[%c0_188, %c0_189, %c0_190] : memref<4x8x8xf32, #tpu.memory_space<vmem>>, vector<1x8x8xf32>
        %333 = vector.shape_cast %332 : vector<1x8x8xf32> to vector<8x8xf32>
        %334 = vector.shape_cast %331 : vector<8x8xf32> to vector<1x8x8xf32>
        tpu.vector_store %arg17[%c0_188, %c0_189, %c0_190], %334 {strides = array<i32>} : memref<4x8x8xf32, #tpu.memory_space<vmem>>, vector<1x8x8xf32>,
        %c0_191 = arith.constant 0 : index
        %c0_192 = arith.constant 0 : index
        %c0_193 = arith.constant 0 : index
        %335 = vector.load %arg15[%c0_191, %c0_192, %c0_193] : memref<4x8x1xf32, #tpu.memory_space<vmem>>, vector<1x8x1xf32>
        %336 = vector.shape_cast %335 : vector<1x8x1xf32> to vector<8x1xf32>
        %337 = vector.shape_cast %309 : vector<8x1xf32> to vector<1x8x1xf32>
        tpu.vector_store %arg15[%c0_191, %c0_192, %c0_193], %337 {strides = array<i32>} : memref<4x8x1xf32, #tpu.memory_space<vmem>>, vector<1x8x1xf32>,
        %338 = vector.extract_strided_slice %236 {offsets = [0, 8], sizes = [8, 8], strides = [1, 1]} : vector<8x32xbf16> to vector<8x8xbf16>
        %339 = vector.extract_strided_slice %289 {offsets = [0, 8], sizes = [8, 8], strides = [1, 1]} : vector<8x32xbf16> to vector<8x8xbf16>
        %cst_194 = arith.constant dense<0.000000e+00> : vector<8x8xf32>
        %340 = tpu.matmul %338, %339, %cst_194 {dimension_numbers = #tpu.dot_dimension_numbers<[1], [1], [0], [0], [0, 0, 1, 0], [], []>} : vector<8x8xbf16>, vector<8x8xbf16>, vector<8x8xf32> -> vector<8x8xf32>
        %341 = vector.broadcast %299 : vector<1x8xf32> to vector<8x8xf32>
        %342 = arith.addf %340, %341 : vector<8x8xf32>
        %c1_195 = arith.constant 1 : index
        %c0_196 = arith.constant 0 : index
        %c0_197 = arith.constant 0 : index
        %343 = vector.load %arg15[%c1_195, %c0_196, %c0_197] : memref<4x8x1xf32, #tpu.memory_space<vmem>>, vector<1x8x1xf32>
        %344 = vector.shape_cast %343 : vector<1x8x1xf32> to vector<8x1xf32>
        %cst_198 = arith.constant dense<0xFF800000> : vector<8xf32>
        %345 = vector.multi_reduction <maximumf>, %342, %cst_198 [1] : vector<8x8xf32> to vector<8xf32>
        %346 = vector.shape_cast %345 : vector<8xf32> to vector<8x1xf32>
        %347 = arith.maximumf %344, %346 : vector<8x1xf32>
        %348 = arith.subf %344, %347 : vector<8x1xf32>
        %349 = math.exp %348 : vector<8x1xf32>
        %350 = vector.broadcast %347 : vector<8x1xf32> to vector<8x8xf32>
        %351 = arith.subf %342, %350 : vector<8x8xf32>
        %352 = math.exp %351 : vector<8x8xf32>
        %c1_199 = arith.constant 1 : index
        %c0_200 = arith.constant 0 : index
        %c0_201 = arith.constant 0 : index
        %353 = vector.load %arg16[%c1_199, %c0_200, %c0_201] : memref<4x8x1xf32, #tpu.memory_space<vmem>>, vector<1x8x1xf32>
        %354 = vector.shape_cast %353 : vector<1x8x1xf32> to vector<8x1xf32>
        %355 = arith.mulf %349, %354 : vector<8x1xf32>
        %cst_202 = arith.constant dense<0.000000e+00> : vector<8xf32>
        %356 = vector.multi_reduction <add>, %352, %cst_202 [1] : vector<8x8xf32> to vector<8xf32>
        %357 = vector.shape_cast %356 : vector<8xf32> to vector<8x1xf32>
        %358 = arith.addf %355, %357 : vector<8x1xf32>
        %c1_203 = arith.constant 1 : index
        %c0_204 = arith.constant 0 : index
        %c0_205 = arith.constant 0 : index
        %359 = vector.load %arg16[%c1_203, %c0_204, %c0_205] : memref<4x8x1xf32, #tpu.memory_space<vmem>>, vector<1x8x1xf32>
        %360 = vector.shape_cast %359 : vector<1x8x1xf32> to vector<8x1xf32>
        %361 = vector.shape_cast %358 : vector<8x1xf32> to vector<1x8x1xf32>
        tpu.vector_store %arg16[%c1_203, %c0_204, %c0_205], %361 {strides = array<i32>} : memref<4x8x1xf32, #tpu.memory_space<vmem>>, vector<1x8x1xf32>,
        %c1_206 = arith.constant 1 : index
        %c0_207 = arith.constant 0 : index
        %c0_208 = arith.constant 0 : index
        %362 = vector.load %arg17[%c1_206, %c0_207, %c0_208] : memref<4x8x8xf32, #tpu.memory_space<vmem>>, vector<1x8x8xf32>
        %363 = vector.shape_cast %362 : vector<1x8x8xf32> to vector<8x8xf32>
        %364 = vector.broadcast %349 : vector<8x1xf32> to vector<8x8xf32>
        %365 = arith.mulf %364, %363 : vector<8x8xf32>
        %366 = arith.truncf %352 : vector<8x8xf32> to vector<8x8xbf16>
        %367 = vector.extract_strided_slice %291 {offsets = [0, 8], sizes = [8, 8], strides = [1, 1]} : vector<8x32xbf16> to vector<8x8xbf16>
        %cst_209 = arith.constant dense<0.000000e+00> : vector<8x8xf32>
        %368 = tpu.matmul %366, %367, %cst_209 {dimension_numbers = #tpu.dot_dimension_numbers<[1], [0], [0], [1], [0, 0, 1, 1], [], []>} : vector<8x8xbf16>, vector<8x8xbf16>, vector<8x8xf32> -> vector<8x8xf32>
        %369 = arith.addf %365, %368 : vector<8x8xf32>
        %c1_210 = arith.constant 1 : index
        %c0_211 = arith.constant 0 : index
        %c0_212 = arith.constant 0 : index
        %370 = vector.load %arg17[%c1_210, %c0_211, %c0_212] : memref<4x8x8xf32, #tpu.memory_space<vmem>>, vector<1x8x8xf32>
        %371 = vector.shape_cast %370 : vector<1x8x8xf32> to vector<8x8xf32>
        %372 = vector.shape_cast %369 : vector<8x8xf32> to vector<1x8x8xf32>
        tpu.vector_store %arg17[%c1_210, %c0_211, %c0_212], %372 {strides = array<i32>} : memref<4x8x8xf32, #tpu.memory_space<vmem>>, vector<1x8x8xf32>,
        %c1_213 = arith.constant 1 : index
        %c0_214 = arith.constant 0 : index
        %c0_215 = arith.constant 0 : index
        %373 = vector.load %arg15[%c1_213, %c0_214, %c0_215] : memref<4x8x1xf32, #tpu.memory_space<vmem>>, vector<1x8x1xf32>
        %374 = vector.shape_cast %373 : vector<1x8x1xf32> to vector<8x1xf32>
        %375 = vector.shape_cast %347 : vector<8x1xf32> to vector<1x8x1xf32>
        tpu.vector_store %arg15[%c1_213, %c0_214, %c0_215], %375 {strides = array<i32>} : memref<4x8x1xf32, #tpu.memory_space<vmem>>, vector<1x8x1xf32>,
        %376 = vector.extract_strided_slice %236 {offsets = [0, 16], sizes = [8, 8], strides = [1, 1]} : vector<8x32xbf16> to vector<8x8xbf16>
        %377 = vector.extract_strided_slice %289 {offsets = [0, 16], sizes = [8, 8], strides = [1, 1]} : vector<8x32xbf16> to vector<8x8xbf16>
        %cst_216 = arith.constant dense<0.000000e+00> : vector<8x8xf32>
        %378 = tpu.matmul %376, %377, %cst_216 {dimension_numbers = #tpu.dot_dimension_numbers<[1], [1], [0], [0], [0, 0, 1, 0], [], []>} : vector<8x8xbf16>, vector<8x8xbf16>, vector<8x8xf32> -> vector<8x8xf32>
        %379 = vector.broadcast %299 : vector<1x8xf32> to vector<8x8xf32>
        %380 = arith.addf %378, %379 : vector<8x8xf32>
        %c2_217 = arith.constant 2 : index
        %c0_218 = arith.constant 0 : index
        %c0_219 = arith.constant 0 : index
        %381 = vector.load %arg15[%c2_217, %c0_218, %c0_219] : memref<4x8x1xf32, #tpu.memory_space<vmem>>, vector<1x8x1xf32>
        %382 = vector.shape_cast %381 : vector<1x8x1xf32> to vector<8x1xf32>
        %cst_220 = arith.constant dense<0xFF800000> : vector<8xf32>
        %383 = vector.multi_reduction <maximumf>, %380, %cst_220 [1] : vector<8x8xf32> to vector<8xf32>
        %384 = vector.shape_cast %383 : vector<8xf32> to vector<8x1xf32>
        %385 = arith.maximumf %382, %384 : vector<8x1xf32>
        %386 = arith.subf %382, %385 : vector<8x1xf32>
        %387 = math.exp %386 : vector<8x1xf32>
        %388 = vector.broadcast %385 : vector<8x1xf32> to vector<8x8xf32>
        %389 = arith.subf %380, %388 : vector<8x8xf32>
        %390 = math.exp %389 : vector<8x8xf32>
        %c2_221 = arith.constant 2 : index
        %c0_222 = arith.constant 0 : index
        %c0_223 = arith.constant 0 : index
        %391 = vector.load %arg16[%c2_221, %c0_222, %c0_223] : memref<4x8x1xf32, #tpu.memory_space<vmem>>, vector<1x8x1xf32>
        %392 = vector.shape_cast %391 : vector<1x8x1xf32> to vector<8x1xf32>
        %393 = arith.mulf %387, %392 : vector<8x1xf32>
        %cst_224 = arith.constant dense<0.000000e+00> : vector<8xf32>
        %394 = vector.multi_reduction <add>, %390, %cst_224 [1] : vector<8x8xf32> to vector<8xf32>
        %395 = vector.shape_cast %394 : vector<8xf32> to vector<8x1xf32>
        %396 = arith.addf %393, %395 : vector<8x1xf32>
        %c2_225 = arith.constant 2 : index
        %c0_226 = arith.constant 0 : index
        %c0_227 = arith.constant 0 : index
        %397 = vector.load %arg16[%c2_225, %c0_226, %c0_227] : memref<4x8x1xf32, #tpu.memory_space<vmem>>, vector<1x8x1xf32>
        %398 = vector.shape_cast %397 : vector<1x8x1xf32> to vector<8x1xf32>
        %399 = vector.shape_cast %396 : vector<8x1xf32> to vector<1x8x1xf32>
        tpu.vector_store %arg16[%c2_225, %c0_226, %c0_227], %399 {strides = array<i32>} : memref<4x8x1xf32, #tpu.memory_space<vmem>>, vector<1x8x1xf32>,
        %c2_228 = arith.constant 2 : index
        %c0_229 = arith.constant 0 : index
        %c0_230 = arith.constant 0 : index
        %400 = vector.load %arg17[%c2_228, %c0_229, %c0_230] : memref<4x8x8xf32, #tpu.memory_space<vmem>>, vector<1x8x8xf32>
        %401 = vector.shape_cast %400 : vector<1x8x8xf32> to vector<8x8xf32>
        %402 = vector.broadcast %387 : vector<8x1xf32> to vector<8x8xf32>
        %403 = arith.mulf %402, %401 : vector<8x8xf32>
        %404 = arith.truncf %390 : vector<8x8xf32> to vector<8x8xbf16>
        %405 = vector.extract_strided_slice %291 {offsets = [0, 16], sizes = [8, 8], strides = [1, 1]} : vector<8x32xbf16> to vector<8x8xbf16>
        %cst_231 = arith.constant dense<0.000000e+00> : vector<8x8xf32>
        %406 = tpu.matmul %404, %405, %cst_231 {dimension_numbers = #tpu.dot_dimension_numbers<[1], [0], [0], [1], [0, 0, 1, 1], [], []>} : vector<8x8xbf16>, vector<8x8xbf16>, vector<8x8xf32> -> vector<8x8xf32>
        %407 = arith.addf %403, %406 : vector<8x8xf32>
        %c2_232 = arith.constant 2 : index
        %c0_233 = arith.constant 0 : index
        %c0_234 = arith.constant 0 : index
        %408 = vector.load %arg17[%c2_232, %c0_233, %c0_234] : memref<4x8x8xf32, #tpu.memory_space<vmem>>, vector<1x8x8xf32>
        %409 = vector.shape_cast %408 : vector<1x8x8xf32> to vector<8x8xf32>
        %410 = vector.shape_cast %407 : vector<8x8xf32> to vector<1x8x8xf32>
        tpu.vector_store %arg17[%c2_232, %c0_233, %c0_234], %410 {strides = array<i32>} : memref<4x8x8xf32, #tpu.memory_space<vmem>>, vector<1x8x8xf32>,
        %c2_235 = arith.constant 2 : index
        %c0_236 = arith.constant 0 : index
        %c0_237 = arith.constant 0 : index
        %411 = vector.load %arg15[%c2_235, %c0_236, %c0_237] : memref<4x8x1xf32, #tpu.memory_space<vmem>>, vector<1x8x1xf32>
        %412 = vector.shape_cast %411 : vector<1x8x1xf32> to vector<8x1xf32>
        %413 = vector.shape_cast %385 : vector<8x1xf32> to vector<1x8x1xf32>
        tpu.vector_store %arg15[%c2_235, %c0_236, %c0_237], %413 {strides = array<i32>} : memref<4x8x1xf32, #tpu.memory_space<vmem>>, vector<1x8x1xf32>,
        %414 = vector.extract_strided_slice %236 {offsets = [0, 24], sizes = [8, 8], strides = [1, 1]} : vector<8x32xbf16> to vector<8x8xbf16>
        %415 = vector.extract_strided_slice %289 {offsets = [0, 24], sizes = [8, 8], strides = [1, 1]} : vector<8x32xbf16> to vector<8x8xbf16>
        %cst_238 = arith.constant dense<0.000000e+00> : vector<8x8xf32>
        %416 = tpu.matmul %414, %415, %cst_238 {dimension_numbers = #tpu.dot_dimension_numbers<[1], [1], [0], [0], [0, 0, 1, 0], [], []>} : vector<8x8xbf16>, vector<8x8xbf16>, vector<8x8xf32> -> vector<8x8xf32>
        %417 = vector.broadcast %299 : vector<1x8xf32> to vector<8x8xf32>
        %418 = arith.addf %416, %417 : vector<8x8xf32>
        %c3_239 = arith.constant 3 : index
        %c0_240 = arith.constant 0 : index
        %c0_241 = arith.constant 0 : index
        %419 = vector.load %arg15[%c3_239, %c0_240, %c0_241] : memref<4x8x1xf32, #tpu.memory_space<vmem>>, vector<1x8x1xf32>
        %420 = vector.shape_cast %419 : vector<1x8x1xf32> to vector<8x1xf32>
        %cst_242 = arith.constant dense<0xFF800000> : vector<8xf32>
        %421 = vector.multi_reduction <maximumf>, %418, %cst_242 [1] : vector<8x8xf32> to vector<8xf32>
        %422 = vector.shape_cast %421 : vector<8xf32> to vector<8x1xf32>
        %423 = arith.maximumf %420, %422 : vector<8x1xf32>
        %424 = arith.subf %420, %423 : vector<8x1xf32>
        %425 = math.exp %424 : vector<8x1xf32>
        %426 = vector.broadcast %423 : vector<8x1xf32> to vector<8x8xf32>
        %427 = arith.subf %418, %426 : vector<8x8xf32>
        %428 = math.exp %427 : vector<8x8xf32>
        %c3_243 = arith.constant 3 : index
        %c0_244 = arith.constant 0 : index
        %c0_245 = arith.constant 0 : index
        %429 = vector.load %arg16[%c3_243, %c0_244, %c0_245] : memref<4x8x1xf32, #tpu.memory_space<vmem>>, vector<1x8x1xf32>
        %430 = vector.shape_cast %429 : vector<1x8x1xf32> to vector<8x1xf32>
        %431 = arith.mulf %425, %430 : vector<8x1xf32>
        %cst_246 = arith.constant dense<0.000000e+00> : vector<8xf32>
        %432 = vector.multi_reduction <add>, %428, %cst_246 [1] : vector<8x8xf32> to vector<8xf32>
        %433 = vector.shape_cast %432 : vector<8xf32> to vector<8x1xf32>
        %434 = arith.addf %431, %433 : vector<8x1xf32>
        %c3_247 = arith.constant 3 : index
        %c0_248 = arith.constant 0 : index
        %c0_249 = arith.constant 0 : index
        %435 = vector.load %arg16[%c3_247, %c0_248, %c0_249] : memref<4x8x1xf32, #tpu.memory_space<vmem>>, vector<1x8x1xf32>
        %436 = vector.shape_cast %435 : vector<1x8x1xf32> to vector<8x1xf32>
        %437 = vector.shape_cast %434 : vector<8x1xf32> to vector<1x8x1xf32>
        tpu.vector_store %arg16[%c3_247, %c0_248, %c0_249], %437 {strides = array<i32>} : memref<4x8x1xf32, #tpu.memory_space<vmem>>, vector<1x8x1xf32>,
        %c3_250 = arith.constant 3 : index
        %c0_251 = arith.constant 0 : index
        %c0_252 = arith.constant 0 : index
        %438 = vector.load %arg17[%c3_250, %c0_251, %c0_252] : memref<4x8x8xf32, #tpu.memory_space<vmem>>, vector<1x8x8xf32>
        %439 = vector.shape_cast %438 : vector<1x8x8xf32> to vector<8x8xf32>
        %440 = vector.broadcast %425 : vector<8x1xf32> to vector<8x8xf32>
        %441 = arith.mulf %440, %439 : vector<8x8xf32>
        %442 = arith.truncf %428 : vector<8x8xf32> to vector<8x8xbf16>
        %443 = vector.extract_strided_slice %291 {offsets = [0, 24], sizes = [8, 8], strides = [1, 1]} : vector<8x32xbf16> to vector<8x8xbf16>
        %cst_253 = arith.constant dense<0.000000e+00> : vector<8x8xf32>
        %444 = tpu.matmul %442, %443, %cst_253 {dimension_numbers = #tpu.dot_dimension_numbers<[1], [0], [0], [1], [0, 0, 1, 1], [], []>} : vector<8x8xbf16>, vector<8x8xbf16>, vector<8x8xf32> -> vector<8x8xf32>
        %445 = arith.addf %441, %444 : vector<8x8xf32>
        %c3_254 = arith.constant 3 : index
        %c0_255 = arith.constant 0 : index
        %c0_256 = arith.constant 0 : index
        %446 = vector.load %arg17[%c3_254, %c0_255, %c0_256] : memref<4x8x8xf32, #tpu.memory_space<vmem>>, vector<1x8x8xf32>
        %447 = vector.shape_cast %446 : vector<1x8x8xf32> to vector<8x8xf32>
        %448 = vector.shape_cast %445 : vector<8x8xf32> to vector<1x8x8xf32>
        tpu.vector_store %arg17[%c3_254, %c0_255, %c0_256], %448 {strides = array<i32>} : memref<4x8x8xf32, #tpu.memory_space<vmem>>, vector<1x8x8xf32>,
        %c3_257 = arith.constant 3 : index
        %c0_258 = arith.constant 0 : index
        %c0_259 = arith.constant 0 : index
        %449 = vector.load %arg15[%c3_257, %c0_258, %c0_259] : memref<4x8x1xf32, #tpu.memory_space<vmem>>, vector<1x8x1xf32>
        %450 = vector.shape_cast %449 : vector<1x8x1xf32> to vector<8x1xf32>
        %451 = vector.shape_cast %423 : vector<8x1xf32> to vector<1x8x1xf32>
        tpu.vector_store %arg15[%c3_257, %c0_258, %c0_259], %451 {strides = array<i32>} : memref<4x8x1xf32, #tpu.memory_space<vmem>>, vector<1x8x1xf32>,
      }
      %c0_137 = arith.constant 0 : index
      %c0_138 = arith.constant 0 : index
      %c0_139 = arith.constant 0 : index
      %243 = vector.load %arg17[%c0_137, %c0_138, %c0_139] : memref<4x8x8xf32, #tpu.memory_space<vmem>>, vector<1x8x8xf32>
      %244 = vector.shape_cast %243 : vector<1x8x8xf32> to vector<8x8xf32>
      %c0_140 = arith.constant 0 : index
      %c0_141 = arith.constant 0 : index
      %c0_142 = arith.constant 0 : index
      %245 = vector.load %arg16[%c0_140, %c0_141, %c0_142] : memref<4x8x1xf32, #tpu.memory_space<vmem>>, vector<1x8x1xf32>
      %246 = vector.shape_cast %245 : vector<1x8x1xf32> to vector<8x1xf32>
      %247 = tpu.reciprocal %246 {approx = true} : vector<8x1xf32> -> vector<8x1xf32>
      %248 = vector.broadcast %247 : vector<8x1xf32> to vector<8x8xf32>
      %249 = arith.mulf %244, %248 : vector<8x8xf32>
      %250 = arith.truncf %249 : vector<8x8xf32> to vector<8x8xbf16>
      %c1_143 = arith.constant 1 : index
      %c0_144 = arith.constant 0 : index
      %c0_145 = arith.constant 0 : index
      %251 = vector.load %arg17[%c1_143, %c0_144, %c0_145] : memref<4x8x8xf32, #tpu.memory_space<vmem>>, vector<1x8x8xf32>
      %252 = vector.shape_cast %251 : vector<1x8x8xf32> to vector<8x8xf32>
      %c1_146 = arith.constant 1 : index
      %c0_147 = arith.constant 0 : index
      %c0_148 = arith.constant 0 : index
      %253 = vector.load %arg16[%c1_146, %c0_147, %c0_148] : memref<4x8x1xf32, #tpu.memory_space<vmem>>, vector<1x8x1xf32>
      %254 = vector.shape_cast %253 : vector<1x8x1xf32> to vector<8x1xf32>
      %255 = tpu.reciprocal %254 {approx = true} : vector<8x1xf32> -> vector<8x1xf32>
      %256 = vector.broadcast %255 : vector<8x1xf32> to vector<8x8xf32>
      %257 = arith.mulf %252, %256 : vector<8x8xf32>
      %258 = arith.truncf %257 : vector<8x8xf32> to vector<8x8xbf16>
      %c2 = arith.constant 2 : index
      %c0_149 = arith.constant 0 : index
      %c0_150 = arith.constant 0 : index
      %259 = vector.load %arg17[%c2, %c0_149, %c0_150] : memref<4x8x8xf32, #tpu.memory_space<vmem>>, vector<1x8x8xf32>
      %260 = vector.shape_cast %259 : vector<1x8x8xf32> to vector<8x8xf32>
      %c2_151 = arith.constant 2 : index
      %c0_152 = arith.constant 0 : index
      %c0_153 = arith.constant 0 : index
      %261 = vector.load %arg16[%c2_151, %c0_152, %c0_153] : memref<4x8x1xf32, #tpu.memory_space<vmem>>, vector<1x8x1xf32>
      %262 = vector.shape_cast %261 : vector<1x8x1xf32> to vector<8x1xf32>
      %263 = tpu.reciprocal %262 {approx = true} : vector<8x1xf32> -> vector<8x1xf32>
      %264 = vector.broadcast %263 : vector<8x1xf32> to vector<8x8xf32>
      %265 = arith.mulf %260, %264 : vector<8x8xf32>
      %266 = arith.truncf %265 : vector<8x8xf32> to vector<8x8xbf16>
      %c3 = arith.constant 3 : index
      %c0_154 = arith.constant 0 : index
      %c0_155 = arith.constant 0 : index
      %267 = vector.load %arg17[%c3, %c0_154, %c0_155] : memref<4x8x8xf32, #tpu.memory_space<vmem>>, vector<1x8x8xf32>
      %268 = vector.shape_cast %267 : vector<1x8x8xf32> to vector<8x8xf32>
      %c3_156 = arith.constant 3 : index
      %c0_157 = arith.constant 0 : index
      %c0_158 = arith.constant 0 : index
      %269 = vector.load %arg16[%c3_156, %c0_157, %c0_158] : memref<4x8x1xf32, #tpu.memory_space<vmem>>, vector<1x8x1xf32>
      %270 = vector.shape_cast %269 : vector<1x8x1xf32> to vector<8x1xf32>
      %271 = tpu.reciprocal %270 {approx = true} : vector<8x1xf32> -> vector<8x1xf32>
      %272 = vector.broadcast %271 : vector<8x1xf32> to vector<8x8xf32>
      %273 = arith.mulf %268, %272 : vector<8x8xf32>
      %274 = arith.truncf %273 : vector<8x8xf32> to vector<8x8xbf16>
      %275 = tpu.concatenate %250, %258, %266, %274 in 1 : vector<8x8xbf16>, vector<8x8xbf16>, vector<8x8xbf16>, vector<8x8xbf16> -> vector<8x32xbf16>
      %c0_159 = arith.constant 0 : index
      %c0_160 = arith.constant 0 : index
      %c0_161 = arith.constant 0 : index
      %276 = vector.load %arg8[%c0_159, %c0_160, %c0_161] : memref<2x32x32xbf16, #tpu.memory_space<vmem>>, vector<1x32x32xbf16>
      %277 = vector.shape_cast %276 : vector<1x32x32xbf16> to vector<32x32xbf16>
      %cst_162 = arith.constant dense<0.000000e+00> : vector<8x32xf32>
      %278 = tpu.matmul %275, %277, %cst_162 {dimension_numbers = #tpu.dot_dimension_numbers<[1], [0], [0], [1], [0, 0, 1, 1], [], []>} : vector<8x32xbf16>, vector<32x32xbf16>, vector<8x32xf32> -> vector<8x32xf32>
      %c16_163 = arith.constant 16 : index
      %c0_164 = arith.constant 0 : index
      %279 = vector.load %arg11[%c16_163, %c0_164] : memref<24x32xf32, #tpu.memory_space<vmem>>, vector<8x32xf32>
      %280 = arith.addf %279, %278 : vector<8x32xf32>
      %281 = vector.broadcast %16 : vector<1x32xf32> to vector<8x32xf32>
      %282 = arith.addf %280, %281 : vector<8x32xf32>
      %c16_165 = arith.constant 16 : index
      %c0_166 = arith.constant 0 : index
      %283 = vector.load %arg11[%c16_165, %c0_166] : memref<24x32xf32, #tpu.memory_space<vmem>>, vector<8x32xf32>
      tpu.vector_store %arg11[%c16_165, %c0_166], %282 {strides = array<i32>} : memref<24x32xf32, #tpu.memory_space<vmem>>, vector<8x32xf32>,
    } else {
    }
    %c0_38 = arith.constant 0 : index
    %c0_39 = arith.constant 0 : index
    %66 = vector.load %arg11[%c0_38, %c0_39] : memref<24x32xf32, #tpu.memory_space<vmem>>, vector<24x32xf32>
    %c19 = arith.constant 19 : index
    %c0_40 = arith.constant 0 : index
    %67 = vector.load %arg4[%c19, %c0_40] : memref<158x32xf32, #tpu.memory_space<vmem>>, vector<1x32xf32>
    %c20 = arith.constant 20 : index
    %c0_41 = arith.constant 0 : index
    %68 = vector.load %arg4[%c20, %c0_41] : memref<158x32xf32, #tpu.memory_space<vmem>>, vector<1x32xf32>
    %cst_42 = arith.constant dense<0.000000e+00> : vector<24xf32>
    %69 = vector.multi_reduction <add>, %66, %cst_42 [1] : vector<24x32xf32> to vector<24xf32>
    %70 = vector.shape_cast %69 : vector<24xf32> to vector<24x1xf32>
    %cst_43 = arith.constant 3.200000e+01 : f32
    %71 = vector.broadcast %cst_43 : f32 to vector<24x1xf32>
    %72 = arith.divf %70, %71 : vector<24x1xf32>
    %73 = vector.broadcast %72 : vector<24x1xf32> to vector<24x32xf32>
    %74 = arith.subf %66, %73 : vector<24x32xf32>
    %75 = arith.mulf %74, %74 : vector<24x32xf32>
    %cst_44 = arith.constant dense<0.000000e+00> : vector<24xf32>
    %76 = vector.multi_reduction <add>, %75, %cst_44 [1] : vector<24x32xf32> to vector<24xf32>
    %77 = vector.shape_cast %76 : vector<24xf32> to vector<24x1xf32>
    %cst_45 = arith.constant 3.200000e+01 : f32
    %78 = vector.broadcast %cst_45 : f32 to vector<24x1xf32>
    %79 = arith.divf %77, %78 : vector<24x1xf32>
    %80 = vector.broadcast %72 : vector<24x1xf32> to vector<24x32xf32>
    %81 = arith.subf %66, %80 : vector<24x32xf32>
    %cst_46 = arith.constant 9.99999997E-7 : f32
    %82 = vector.broadcast %cst_46 : f32 to vector<24x1xf32>
    %83 = arith.addf %79, %82 : vector<24x1xf32>
    %84 = math.rsqrt %83 : vector<24x1xf32>
    %85 = vector.broadcast %84 : vector<24x1xf32> to vector<24x32xf32>
    %86 = arith.mulf %81, %85 : vector<24x32xf32>
    %87 = vector.broadcast %67 : vector<1x32xf32> to vector<24x32xf32>
    %88 = arith.mulf %86, %87 : vector<24x32xf32>
    %89 = vector.broadcast %68 : vector<1x32xf32> to vector<24x32xf32>
    %90 = arith.addf %88, %89 : vector<24x32xf32>
    %c0_47 = arith.constant 0 : index
    %c0_48 = arith.constant 0 : index
    %91 = vector.load %arg5[%c0_47, %c0_48] : memref<66x64xf32, #tpu.memory_space<vmem>>, vector<32x64xf32>
    %92 = arith.truncf %91 : vector<32x64xf32> to vector<32x64xbf16>
    %c32 = arith.constant 32 : index
    %c0_49 = arith.constant 0 : index
    %93 = vector.load %arg5[%c32, %c0_49] : memref<66x64xf32, #tpu.memory_space<vmem>>, vector<1x64xf32>
    %94 = arith.truncf %90 : vector<24x32xf32> to vector<24x32xbf16>
    %cst_50 = arith.constant dense<0.000000e+00> : vector<24x64xf32>
    %95 = tpu.matmul %94, %92, %cst_50 {dimension_numbers = #tpu.dot_dimension_numbers<[1], [0], [0], [1], [0, 0, 1, 1], [], []>} : vector<24x32xbf16>, vector<32x64xbf16>, vector<24x64xf32> -> vector<24x64xf32>
    %96 = vector.broadcast %93 : vector<1x64xf32> to vector<24x64xf32>
    %97 = arith.addf %95, %96 : vector<24x64xf32>
    %cst_51 = arith.constant 0.000000e+00 : f32
    %98 = vector.broadcast %cst_51 : f32 to vector<24x64xf32>
    %99 = arith.maximumf %97, %98 : vector<24x64xf32>
    %c22 = arith.constant 22 : index
    %c0_52 = arith.constant 0 : index
    %100 = vector.load %arg4[%c22, %c0_52] : memref<158x32xf32, #tpu.memory_space<vmem>>, vector<64x32xf32>
    %101 = arith.truncf %100 : vector<64x32xf32> to vector<64x32xbf16>
    %102 = arith.truncf %99 : vector<24x64xf32> to vector<24x64xbf16>
    %cst_53 = arith.constant dense<0.000000e+00> : vector<24x32xf32>
    %103 = tpu.matmul %102, %101, %cst_53 {dimension_numbers = #tpu.dot_dimension_numbers<[1], [0], [0], [1], [0, 0, 1, 1], [], []>} : vector<24x64xbf16>, vector<64x32xbf16>, vector<24x32xf32> -> vector<24x32xf32>
    %104 = arith.addf %66, %103 : vector<24x32xf32>
    %c21 = arith.constant 21 : index
    %c0_54 = arith.constant 0 : index
    %105 = vector.load %arg4[%c21, %c0_54] : memref<158x32xf32, #tpu.memory_space<vmem>>, vector<1x32xf32>
    %106 = vector.broadcast %105 : vector<1x32xf32> to vector<24x32xf32>
    %107 = arith.addf %104, %106 : vector<24x32xf32>
    %c0_55 = arith.constant 0 : index
    %c0_56 = arith.constant 0 : index
    %108 = vector.load %arg11[%c0_55, %c0_56] : memref<24x32xf32, #tpu.memory_space<vmem>>, vector<24x32xf32>
    tpu.vector_store %arg11[%c0_55, %c0_56], %107 {strides = array<i32>} : memref<24x32xf32, #tpu.memory_space<vmem>>, vector<24x32xf32>,
    %c88 = arith.constant 88 : index
    %c0_57 = arith.constant 0 : index
    %109 = vector.load %arg4[%c88, %c0_57] : memref<158x32xf32, #tpu.memory_space<vmem>>, vector<1x32xf32>
    %c0_58 = arith.constant 0 : index
    %c0_59 = arith.constant 0 : index
    %110 = vector.load %arg11[%c0_58, %c0_59] : memref<24x32xf32, #tpu.memory_space<vmem>>, vector<24x32xf32>
    %c86 = arith.constant 86 : index
    %c0_60 = arith.constant 0 : index
    %111 = vector.load %arg4[%c86, %c0_60] : memref<158x32xf32, #tpu.memory_space<vmem>>, vector<1x32xf32>
    %c87 = arith.constant 87 : index
    %c0_61 = arith.constant 0 : index
    %112 = vector.load %arg4[%c87, %c0_61] : memref<158x32xf32, #tpu.memory_space<vmem>>, vector<1x32xf32>
    %cst_62 = arith.constant dense<0.000000e+00> : vector<24xf32>
    %113 = vector.multi_reduction <add>, %110, %cst_62 [1] : vector<24x32xf32> to vector<24xf32>
    %114 = vector.shape_cast %113 : vector<24xf32> to vector<24x1xf32>
    %cst_63 = arith.constant 3.200000e+01 : f32
    %115 = vector.broadcast %cst_63 : f32 to vector<24x1xf32>
    %116 = arith.divf %114, %115 : vector<24x1xf32>
    %117 = vector.broadcast %116 : vector<24x1xf32> to vector<24x32xf32>
    %118 = arith.subf %110, %117 : vector<24x32xf32>
    %119 = arith.mulf %118, %118 : vector<24x32xf32>
    %cst_64 = arith.constant dense<0.000000e+00> : vector<24xf32>
    %120 = vector.multi_reduction <add>, %119, %cst_64 [1] : vector<24x32xf32> to vector<24xf32>
    %121 = vector.shape_cast %120 : vector<24xf32> to vector<24x1xf32>
    %cst_65 = arith.constant 3.200000e+01 : f32
    %122 = vector.broadcast %cst_65 : f32 to vector<24x1xf32>
    %123 = arith.divf %121, %122 : vector<24x1xf32>
    %124 = vector.broadcast %116 : vector<24x1xf32> to vector<24x32xf32>
    %125 = arith.subf %110, %124 : vector<24x32xf32>
    %cst_66 = arith.constant 9.99999997E-7 : f32
    %126 = vector.broadcast %cst_66 : f32 to vector<24x1xf32>
    %127 = arith.addf %123, %126 : vector<24x1xf32>
    %128 = math.rsqrt %127 : vector<24x1xf32>
    %129 = vector.broadcast %128 : vector<24x1xf32> to vector<24x32xf32>
    %130 = arith.mulf %125, %129 : vector<24x32xf32>
    %131 = vector.broadcast %111 : vector<1x32xf32> to vector<24x32xf32>
    %132 = arith.mulf %130, %131 : vector<24x32xf32>
    %133 = vector.broadcast %112 : vector<1x32xf32> to vector<24x32xf32>
    %134 = arith.addf %132, %133 : vector<24x32xf32>
    %135 = arith.truncf %134 : vector<24x32xf32> to vector<24x32xbf16>
    %c1 = arith.constant 1 : index
    %c0_67 = arith.constant 0 : index
    %c0_68 = arith.constant 0 : index
    %136 = vector.load %arg6[%c1, %c0_67, %c0_68] : memref<2x32x96xbf16, #tpu.memory_space<vmem>>, vector<1x32x96xbf16>
    %137 = vector.shape_cast %136 : vector<1x32x96xbf16> to vector<32x96xbf16>
    %cst_69 = arith.constant dense<0.000000e+00> : vector<24x96xf32>
    %138 = tpu.matmul %135, %137, %cst_69 {dimension_numbers = #tpu.dot_dimension_numbers<[1], [0], [0], [1], [0, 0, 1, 1], [], []>} : vector<24x32xbf16>, vector<32x96xbf16>, vector<24x96xf32> -> vector<24x96xf32>
    %c1_70 = arith.constant 1 : index
    %c0_71 = arith.constant 0 : index
    %c0_72 = arith.constant 0 : index
    %139 = vector.load %arg7[%c1_70, %c0_71, %c0_72] : memref<2x1x96xf32, #tpu.memory_space<vmem>>, vector<1x1x96xf32>
    %140 = vector.shape_cast %139 : vector<1x1x96xf32> to vector<1x96xf32>
    %141 = vector.broadcast %140 : vector<1x96xf32> to vector<24x96xf32>
    %142 = arith.addf %138, %141 : vector<24x96xf32>
    %143 = arith.truncf %142 : vector<24x96xf32> to vector<24x96xbf16>
    %144 = vector.extract_strided_slice %143 {offsets = [0, 0], sizes = [24, 32], strides = [1, 1]} : vector<24x96xbf16> to vector<24x32xbf16>
    %c0_73 = arith.constant 0 : index
    %c0_74 = arith.constant 0 : index
    %145 = vector.load %arg12[%c0_73, %c0_74] : memref<24x32xbf16, #tpu.memory_space<vmem>>, vector<24x32xbf16>
    tpu.vector_store %arg12[%c0_73, %c0_74], %144 {strides = array<i32>} : memref<24x32xbf16, #tpu.memory_space<vmem>>, vector<24x32xbf16>,
    %146 = vector.extract_strided_slice %143 {offsets = [0, 32], sizes = [24, 32], strides = [1, 1]} : vector<24x96xbf16> to vector<24x32xbf16>
    %c0_75 = arith.constant 0 : index
    %c0_76 = arith.constant 0 : index
    %147 = vector.load %arg13[%c0_75, %c0_76] : memref<24x32xbf16, #tpu.memory_space<vmem>>, vector<24x32xbf16>
    tpu.vector_store %arg13[%c0_75, %c0_76], %146 {strides = array<i32>} : memref<24x32xbf16, #tpu.memory_space<vmem>>, vector<24x32xbf16>,
    %148 = vector.extract_strided_slice %143 {offsets = [0, 64], sizes = [24, 32], strides = [1, 1]} : vector<24x96xbf16> to vector<24x32xbf16>
    %c0_77 = arith.constant 0 : index
    %c0_78 = arith.constant 0 : index
    %149 = vector.load %arg14[%c0_77, %c0_78] : memref<24x32xbf16, #tpu.memory_space<vmem>>, vector<24x32xbf16>
    tpu.vector_store %arg14[%c0_77, %c0_78], %148 {strides = array<i32>} : memref<24x32xbf16, #tpu.memory_space<vmem>>, vector<24x32xbf16>,
    %c0_i32_79 = arith.constant 0 : i32
    %150 = arith.cmpi sgt, %3, %c0_i32_79 : i32
    %151 = arith.extui %150 : i1 to i32
    %c0_i32_80 = arith.constant 0 : i32
    %152 = arith.cmpi ne, %151, %c0_i32_80 : i32
    scf.if %152 {
      %cst_115 = arith.constant 0xFF800000 : f32
      %230 = vector.broadcast %cst_115 : f32 to vector<4x8x1xf32>
      %c0_116 = arith.constant 0 : index
      %c0_117 = arith.constant 0 : index
      %c0_118 = arith.constant 0 : index
      %231 = vector.load %arg15[%c0_116, %c0_117, %c0_118] : memref<4x8x1xf32, #tpu.memory_space<vmem>>, vector<4x8x1xf32>
      tpu.vector_store %arg15[%c0_116, %c0_117, %c0_118], %230 {strides = array<i32>} : memref<4x8x1xf32, #tpu.memory_space<vmem>>, vector<4x8x1xf32>,
      %cst_119 = arith.constant 0.000000e+00 : f32
      %232 = vector.broadcast %cst_119 : f32 to vector<4x8x1xf32>
      %c0_120 = arith.constant 0 : index
      %c0_121 = arith.constant 0 : index
      %c0_122 = arith.constant 0 : index
      %233 = vector.load %arg16[%c0_120, %c0_121, %c0_122] : memref<4x8x1xf32, #tpu.memory_space<vmem>>, vector<4x8x1xf32>
      tpu.vector_store %arg16[%c0_120, %c0_121, %c0_122], %232 {strides = array<i32>} : memref<4x8x1xf32, #tpu.memory_space<vmem>>, vector<4x8x1xf32>,
      %cst_123 = arith.constant 0.000000e+00 : f32
      %234 = vector.broadcast %cst_123 : f32 to vector<4x8x8xf32>
      %c0_124 = arith.constant 0 : index
      %c0_125 = arith.constant 0 : index
      %c0_126 = arith.constant 0 : index
      %235 = vector.load %arg17[%c0_124, %c0_125, %c0_126] : memref<4x8x8xf32, #tpu.memory_space<vmem>>, vector<4x8x8xf32>
      tpu.vector_store %arg17[%c0_124, %c0_125, %c0_126], %234 {strides = array<i32>} : memref<4x8x8xf32, #tpu.memory_space<vmem>>, vector<4x8x8xf32>,
      %c0_127 = arith.constant 0 : index
      %c0_128 = arith.constant 0 : index
      %236 = vector.load %arg12[%c0_127, %c0_128] : memref<24x32xbf16, #tpu.memory_space<vmem>>, vector<8x32xbf16>
      %c0_i32_129 = arith.constant 0 : i32
      %237 = arith.subi %5, %c0_i32_129 : i32
      %c1_i32_130 = arith.constant 1 : i32
      %c1_i32_131 = arith.constant 1 : i32
      %238 = arith.subi %c1_i32_130, %c1_i32_131 : i32
      %239 = arith.addi %237, %238 : i32
      %c1_i32_132 = arith.constant 1 : i32
      %240 = arith.divsi %239, %c1_i32_132 : i32
      %c1_i32_133 = arith.constant 1 : i32
      %c0_i32_134 = arith.constant 0 : i32
      %c0_i32_135 = arith.constant 0 : i32
      %241 = arith.subi %240, %c0_i32_135 : i32
      %242 = arith.addi %c0_i32_135, %241 : i32
      %c1_i32_136 = arith.constant 1 : i32
      scf.for %arg18 = %c0_i32_135 to %242 step %c1_i32_136  : i32 {
        %284 = arith.muli %arg18, %c1_i32_133 : i32
        %285 = arith.addi %c0_i32_134, %284 : i32
        %c8_i32_167 = arith.constant 8 : i32
        %286 = arith.muli %285, %c8_i32_167 : i32
        %287 = tpu.assume_multiple %286, 8 : i32
        %288 = arith.index_cast %287 : i32 to index
        %c0_168 = arith.constant 0 : index
        %289 = vector.load %arg13[%288, %c0_168] : memref<24x32xbf16, #tpu.memory_space<vmem>>, vector<8x32xbf16>
        %290 = arith.index_cast %287 : i32 to index
        %c0_169 = arith.constant 0 : index
        %291 = vector.load %arg14[%290, %c0_169] : memref<24x32xbf16, #tpu.memory_space<vmem>>, vector<8x32xbf16>
        %292 = tpu.iota {dimensions = array<i32: 1>} : vector<1x8xi32>
        %293 = vector.broadcast %287 : i32 to vector<1x8xi32>
        %294 = arith.addi %293, %292 : vector<1x8xi32>
        %295 = vector.broadcast %3 : i32 to vector<1x8xi32>
        %296 = arith.cmpi sge, %294, %295 : vector<1x8xi32>
        %cst_170 = arith.constant -1.000000e+09 : f32
        %cst_171 = arith.constant 0.000000e+00 : f32
        %297 = vector.broadcast %cst_170 : f32 to vector<1x8xf32>
        %298 = vector.broadcast %cst_171 : f32 to vector<1x8xf32>
        %299 = arith.select %296, %297, %298 : vector<1x8xi1>, vector<1x8xf32>
        %300 = vector.extract_strided_slice %236 {offsets = [0, 0], sizes = [8, 8], strides = [1, 1]} : vector<8x32xbf16> to vector<8x8xbf16>
        %301 = vector.extract_strided_slice %289 {offsets = [0, 0], sizes = [8, 8], strides = [1, 1]} : vector<8x32xbf16> to vector<8x8xbf16>
        %cst_172 = arith.constant dense<0.000000e+00> : vector<8x8xf32>
        %302 = tpu.matmul %300, %301, %cst_172 {dimension_numbers = #tpu.dot_dimension_numbers<[1], [1], [0], [0], [0, 0, 1, 0], [], []>} : vector<8x8xbf16>, vector<8x8xbf16>, vector<8x8xf32> -> vector<8x8xf32>
        %303 = vector.broadcast %299 : vector<1x8xf32> to vector<8x8xf32>
        %304 = arith.addf %302, %303 : vector<8x8xf32>
        %c0_173 = arith.constant 0 : index
        %c0_174 = arith.constant 0 : index
        %c0_175 = arith.constant 0 : index
        %305 = vector.load %arg15[%c0_173, %c0_174, %c0_175] : memref<4x8x1xf32, #tpu.memory_space<vmem>>, vector<1x8x1xf32>
        %306 = vector.shape_cast %305 : vector<1x8x1xf32> to vector<8x1xf32>
        %cst_176 = arith.constant dense<0xFF800000> : vector<8xf32>
        %307 = vector.multi_reduction <maximumf>, %304, %cst_176 [1] : vector<8x8xf32> to vector<8xf32>
        %308 = vector.shape_cast %307 : vector<8xf32> to vector<8x1xf32>
        %309 = arith.maximumf %306, %308 : vector<8x1xf32>
        %310 = arith.subf %306, %309 : vector<8x1xf32>
        %311 = math.exp %310 : vector<8x1xf32>
        %312 = vector.broadcast %309 : vector<8x1xf32> to vector<8x8xf32>
        %313 = arith.subf %304, %312 : vector<8x8xf32>
        %314 = math.exp %313 : vector<8x8xf32>
        %c0_177 = arith.constant 0 : index
        %c0_178 = arith.constant 0 : index
        %c0_179 = arith.constant 0 : index
        %315 = vector.load %arg16[%c0_177, %c0_178, %c0_179] : memref<4x8x1xf32, #tpu.memory_space<vmem>>, vector<1x8x1xf32>
        %316 = vector.shape_cast %315 : vector<1x8x1xf32> to vector<8x1xf32>
        %317 = arith.mulf %311, %316 : vector<8x1xf32>
        %cst_180 = arith.constant dense<0.000000e+00> : vector<8xf32>
        %318 = vector.multi_reduction <add>, %314, %cst_180 [1] : vector<8x8xf32> to vector<8xf32>
        %319 = vector.shape_cast %318 : vector<8xf32> to vector<8x1xf32>
        %320 = arith.addf %317, %319 : vector<8x1xf32>
        %c0_181 = arith.constant 0 : index
        %c0_182 = arith.constant 0 : index
        %c0_183 = arith.constant 0 : index
        %321 = vector.load %arg16[%c0_181, %c0_182, %c0_183] : memref<4x8x1xf32, #tpu.memory_space<vmem>>, vector<1x8x1xf32>
        %322 = vector.shape_cast %321 : vector<1x8x1xf32> to vector<8x1xf32>
        %323 = vector.shape_cast %320 : vector<8x1xf32> to vector<1x8x1xf32>
        tpu.vector_store %arg16[%c0_181, %c0_182, %c0_183], %323 {strides = array<i32>} : memref<4x8x1xf32, #tpu.memory_space<vmem>>, vector<1x8x1xf32>,
        %c0_184 = arith.constant 0 : index
        %c0_185 = arith.constant 0 : index
        %c0_186 = arith.constant 0 : index
        %324 = vector.load %arg17[%c0_184, %c0_185, %c0_186] : memref<4x8x8xf32, #tpu.memory_space<vmem>>, vector<1x8x8xf32>
        %325 = vector.shape_cast %324 : vector<1x8x8xf32> to vector<8x8xf32>
        %326 = vector.broadcast %311 : vector<8x1xf32> to vector<8x8xf32>
        %327 = arith.mulf %326, %325 : vector<8x8xf32>
        %328 = arith.truncf %314 : vector<8x8xf32> to vector<8x8xbf16>
        %329 = vector.extract_strided_slice %291 {offsets = [0, 0], sizes = [8, 8], strides = [1, 1]} : vector<8x32xbf16> to vector<8x8xbf16>
        %cst_187 = arith.constant dense<0.000000e+00> : vector<8x8xf32>
        %330 = tpu.matmul %328, %329, %cst_187 {dimension_numbers = #tpu.dot_dimension_numbers<[1], [0], [0], [1], [0, 0, 1, 1], [], []>} : vector<8x8xbf16>, vector<8x8xbf16>, vector<8x8xf32> -> vector<8x8xf32>
        %331 = arith.addf %327, %330 : vector<8x8xf32>
        %c0_188 = arith.constant 0 : index
        %c0_189 = arith.constant 0 : index
        %c0_190 = arith.constant 0 : index
        %332 = vector.load %arg17[%c0_188, %c0_189, %c0_190] : memref<4x8x8xf32, #tpu.memory_space<vmem>>, vector<1x8x8xf32>
        %333 = vector.shape_cast %332 : vector<1x8x8xf32> to vector<8x8xf32>
        %334 = vector.shape_cast %331 : vector<8x8xf32> to vector<1x8x8xf32>
        tpu.vector_store %arg17[%c0_188, %c0_189, %c0_190], %334 {strides = array<i32>} : memref<4x8x8xf32, #tpu.memory_space<vmem>>, vector<1x8x8xf32>,
        %c0_191 = arith.constant 0 : index
        %c0_192 = arith.constant 0 : index
        %c0_193 = arith.constant 0 : index
        %335 = vector.load %arg15[%c0_191, %c0_192, %c0_193] : memref<4x8x1xf32, #tpu.memory_space<vmem>>, vector<1x8x1xf32>
        %336 = vector.shape_cast %335 : vector<1x8x1xf32> to vector<8x1xf32>
        %337 = vector.shape_cast %309 : vector<8x1xf32> to vector<1x8x1xf32>
        tpu.vector_store %arg15[%c0_191, %c0_192, %c0_193], %337 {strides = array<i32>} : memref<4x8x1xf32, #tpu.memory_space<vmem>>, vector<1x8x1xf32>,
        %338 = vector.extract_strided_slice %236 {offsets = [0, 8], sizes = [8, 8], strides = [1, 1]} : vector<8x32xbf16> to vector<8x8xbf16>
        %339 = vector.extract_strided_slice %289 {offsets = [0, 8], sizes = [8, 8], strides = [1, 1]} : vector<8x32xbf16> to vector<8x8xbf16>
        %cst_194 = arith.constant dense<0.000000e+00> : vector<8x8xf32>
        %340 = tpu.matmul %338, %339, %cst_194 {dimension_numbers = #tpu.dot_dimension_numbers<[1], [1], [0], [0], [0, 0, 1, 0], [], []>} : vector<8x8xbf16>, vector<8x8xbf16>, vector<8x8xf32> -> vector<8x8xf32>
        %341 = vector.broadcast %299 : vector<1x8xf32> to vector<8x8xf32>
        %342 = arith.addf %340, %341 : vector<8x8xf32>
        %c1_195 = arith.constant 1 : index
        %c0_196 = arith.constant 0 : index
        %c0_197 = arith.constant 0 : index
        %343 = vector.load %arg15[%c1_195, %c0_196, %c0_197] : memref<4x8x1xf32, #tpu.memory_space<vmem>>, vector<1x8x1xf32>
        %344 = vector.shape_cast %343 : vector<1x8x1xf32> to vector<8x1xf32>
        %cst_198 = arith.constant dense<0xFF800000> : vector<8xf32>
        %345 = vector.multi_reduction <maximumf>, %342, %cst_198 [1] : vector<8x8xf32> to vector<8xf32>
        %346 = vector.shape_cast %345 : vector<8xf32> to vector<8x1xf32>
        %347 = arith.maximumf %344, %346 : vector<8x1xf32>
        %348 = arith.subf %344, %347 : vector<8x1xf32>
        %349 = math.exp %348 : vector<8x1xf32>
        %350 = vector.broadcast %347 : vector<8x1xf32> to vector<8x8xf32>
        %351 = arith.subf %342, %350 : vector<8x8xf32>
        %352 = math.exp %351 : vector<8x8xf32>
        %c1_199 = arith.constant 1 : index
        %c0_200 = arith.constant 0 : index
        %c0_201 = arith.constant 0 : index
        %353 = vector.load %arg16[%c1_199, %c0_200, %c0_201] : memref<4x8x1xf32, #tpu.memory_space<vmem>>, vector<1x8x1xf32>
        %354 = vector.shape_cast %353 : vector<1x8x1xf32> to vector<8x1xf32>
        %355 = arith.mulf %349, %354 : vector<8x1xf32>
        %cst_202 = arith.constant dense<0.000000e+00> : vector<8xf32>
        %356 = vector.multi_reduction <add>, %352, %cst_202 [1] : vector<8x8xf32> to vector<8xf32>
        %357 = vector.shape_cast %356 : vector<8xf32> to vector<8x1xf32>
        %358 = arith.addf %355, %357 : vector<8x1xf32>
        %c1_203 = arith.constant 1 : index
        %c0_204 = arith.constant 0 : index
        %c0_205 = arith.constant 0 : index
        %359 = vector.load %arg16[%c1_203, %c0_204, %c0_205] : memref<4x8x1xf32, #tpu.memory_space<vmem>>, vector<1x8x1xf32>
        %360 = vector.shape_cast %359 : vector<1x8x1xf32> to vector<8x1xf32>
        %361 = vector.shape_cast %358 : vector<8x1xf32> to vector<1x8x1xf32>
        tpu.vector_store %arg16[%c1_203, %c0_204, %c0_205], %361 {strides = array<i32>} : memref<4x8x1xf32, #tpu.memory_space<vmem>>, vector<1x8x1xf32>,
        %c1_206 = arith.constant 1 : index
        %c0_207 = arith.constant 0 : index
        %c0_208 = arith.constant 0 : index
        %362 = vector.load %arg17[%c1_206, %c0_207, %c0_208] : memref<4x8x8xf32, #tpu.memory_space<vmem>>, vector<1x8x8xf32>
        %363 = vector.shape_cast %362 : vector<1x8x8xf32> to vector<8x8xf32>
        %364 = vector.broadcast %349 : vector<8x1xf32> to vector<8x8xf32>
        %365 = arith.mulf %364, %363 : vector<8x8xf32>
        %366 = arith.truncf %352 : vector<8x8xf32> to vector<8x8xbf16>
        %367 = vector.extract_strided_slice %291 {offsets = [0, 8], sizes = [8, 8], strides = [1, 1]} : vector<8x32xbf16> to vector<8x8xbf16>
        %cst_209 = arith.constant dense<0.000000e+00> : vector<8x8xf32>
        %368 = tpu.matmul %366, %367, %cst_209 {dimension_numbers = #tpu.dot_dimension_numbers<[1], [0], [0], [1], [0, 0, 1, 1], [], []>} : vector<8x8xbf16>, vector<8x8xbf16>, vector<8x8xf32> -> vector<8x8xf32>
        %369 = arith.addf %365, %368 : vector<8x8xf32>
        %c1_210 = arith.constant 1 : index
        %c0_211 = arith.constant 0 : index
        %c0_212 = arith.constant 0 : index
        %370 = vector.load %arg17[%c1_210, %c0_211, %c0_212] : memref<4x8x8xf32, #tpu.memory_space<vmem>>, vector<1x8x8xf32>
        %371 = vector.shape_cast %370 : vector<1x8x8xf32> to vector<8x8xf32>
        %372 = vector.shape_cast %369 : vector<8x8xf32> to vector<1x8x8xf32>
        tpu.vector_store %arg17[%c1_210, %c0_211, %c0_212], %372 {strides = array<i32>} : memref<4x8x8xf32, #tpu.memory_space<vmem>>, vector<1x8x8xf32>,
        %c1_213 = arith.constant 1 : index
        %c0_214 = arith.constant 0 : index
        %c0_215 = arith.constant 0 : index
        %373 = vector.load %arg15[%c1_213, %c0_214, %c0_215] : memref<4x8x1xf32, #tpu.memory_space<vmem>>, vector<1x8x1xf32>
        %374 = vector.shape_cast %373 : vector<1x8x1xf32> to vector<8x1xf32>
        %375 = vector.shape_cast %347 : vector<8x1xf32> to vector<1x8x1xf32>
        tpu.vector_store %arg15[%c1_213, %c0_214, %c0_215], %375 {strides = array<i32>} : memref<4x8x1xf32, #tpu.memory_space<vmem>>, vector<1x8x1xf32>,
        %376 = vector.extract_strided_slice %236 {offsets = [0, 16], sizes = [8, 8], strides = [1, 1]} : vector<8x32xbf16> to vector<8x8xbf16>
        %377 = vector.extract_strided_slice %289 {offsets = [0, 16], sizes = [8, 8], strides = [1, 1]} : vector<8x32xbf16> to vector<8x8xbf16>
        %cst_216 = arith.constant dense<0.000000e+00> : vector<8x8xf32>
        %378 = tpu.matmul %376, %377, %cst_216 {dimension_numbers = #tpu.dot_dimension_numbers<[1], [1], [0], [0], [0, 0, 1, 0], [], []>} : vector<8x8xbf16>, vector<8x8xbf16>, vector<8x8xf32> -> vector<8x8xf32>
        %379 = vector.broadcast %299 : vector<1x8xf32> to vector<8x8xf32>
        %380 = arith.addf %378, %379 : vector<8x8xf32>
        %c2_217 = arith.constant 2 : index
        %c0_218 = arith.constant 0 : index
        %c0_219 = arith.constant 0 : index
        %381 = vector.load %arg15[%c2_217, %c0_218, %c0_219] : memref<4x8x1xf32, #tpu.memory_space<vmem>>, vector<1x8x1xf32>
        %382 = vector.shape_cast %381 : vector<1x8x1xf32> to vector<8x1xf32>
        %cst_220 = arith.constant dense<0xFF800000> : vector<8xf32>
        %383 = vector.multi_reduction <maximumf>, %380, %cst_220 [1] : vector<8x8xf32> to vector<8xf32>
        %384 = vector.shape_cast %383 : vector<8xf32> to vector<8x1xf32>
        %385 = arith.maximumf %382, %384 : vector<8x1xf32>
        %386 = arith.subf %382, %385 : vector<8x1xf32>
        %387 = math.exp %386 : vector<8x1xf32>
        %388 = vector.broadcast %385 : vector<8x1xf32> to vector<8x8xf32>
        %389 = arith.subf %380, %388 : vector<8x8xf32>
        %390 = math.exp %389 : vector<8x8xf32>
        %c2_221 = arith.constant 2 : index
        %c0_222 = arith.constant 0 : index
        %c0_223 = arith.constant 0 : index
        %391 = vector.load %arg16[%c2_221, %c0_222, %c0_223] : memref<4x8x1xf32, #tpu.memory_space<vmem>>, vector<1x8x1xf32>
        %392 = vector.shape_cast %391 : vector<1x8x1xf32> to vector<8x1xf32>
        %393 = arith.mulf %387, %392 : vector<8x1xf32>
        %cst_224 = arith.constant dense<0.000000e+00> : vector<8xf32>
        %394 = vector.multi_reduction <add>, %390, %cst_224 [1] : vector<8x8xf32> to vector<8xf32>
        %395 = vector.shape_cast %394 : vector<8xf32> to vector<8x1xf32>
        %396 = arith.addf %393, %395 : vector<8x1xf32>
        %c2_225 = arith.constant 2 : index
        %c0_226 = arith.constant 0 : index
        %c0_227 = arith.constant 0 : index
        %397 = vector.load %arg16[%c2_225, %c0_226, %c0_227] : memref<4x8x1xf32, #tpu.memory_space<vmem>>, vector<1x8x1xf32>
        %398 = vector.shape_cast %397 : vector<1x8x1xf32> to vector<8x1xf32>
        %399 = vector.shape_cast %396 : vector<8x1xf32> to vector<1x8x1xf32>
        tpu.vector_store %arg16[%c2_225, %c0_226, %c0_227], %399 {strides = array<i32>} : memref<4x8x1xf32, #tpu.memory_space<vmem>>, vector<1x8x1xf32>,
        %c2_228 = arith.constant 2 : index
        %c0_229 = arith.constant 0 : index
        %c0_230 = arith.constant 0 : index
        %400 = vector.load %arg17[%c2_228, %c0_229, %c0_230] : memref<4x8x8xf32, #tpu.memory_space<vmem>>, vector<1x8x8xf32>
        %401 = vector.shape_cast %400 : vector<1x8x8xf32> to vector<8x8xf32>
        %402 = vector.broadcast %387 : vector<8x1xf32> to vector<8x8xf32>
        %403 = arith.mulf %402, %401 : vector<8x8xf32>
        %404 = arith.truncf %390 : vector<8x8xf32> to vector<8x8xbf16>
        %405 = vector.extract_strided_slice %291 {offsets = [0, 16], sizes = [8, 8], strides = [1, 1]} : vector<8x32xbf16> to vector<8x8xbf16>
        %cst_231 = arith.constant dense<0.000000e+00> : vector<8x8xf32>
        %406 = tpu.matmul %404, %405, %cst_231 {dimension_numbers = #tpu.dot_dimension_numbers<[1], [0], [0], [1], [0, 0, 1, 1], [], []>} : vector<8x8xbf16>, vector<8x8xbf16>, vector<8x8xf32> -> vector<8x8xf32>
        %407 = arith.addf %403, %406 : vector<8x8xf32>
        %c2_232 = arith.constant 2 : index
        %c0_233 = arith.constant 0 : index
        %c0_234 = arith.constant 0 : index
        %408 = vector.load %arg17[%c2_232, %c0_233, %c0_234] : memref<4x8x8xf32, #tpu.memory_space<vmem>>, vector<1x8x8xf32>
        %409 = vector.shape_cast %408 : vector<1x8x8xf32> to vector<8x8xf32>
        %410 = vector.shape_cast %407 : vector<8x8xf32> to vector<1x8x8xf32>
        tpu.vector_store %arg17[%c2_232, %c0_233, %c0_234], %410 {strides = array<i32>} : memref<4x8x8xf32, #tpu.memory_space<vmem>>, vector<1x8x8xf32>,
        %c2_235 = arith.constant 2 : index
        %c0_236 = arith.constant 0 : index
        %c0_237 = arith.constant 0 : index
        %411 = vector.load %arg15[%c2_235, %c0_236, %c0_237] : memref<4x8x1xf32, #tpu.memory_space<vmem>>, vector<1x8x1xf32>
        %412 = vector.shape_cast %411 : vector<1x8x1xf32> to vector<8x1xf32>
        %413 = vector.shape_cast %385 : vector<8x1xf32> to vector<1x8x1xf32>
        tpu.vector_store %arg15[%c2_235, %c0_236, %c0_237], %413 {strides = array<i32>} : memref<4x8x1xf32, #tpu.memory_space<vmem>>, vector<1x8x1xf32>,
        %414 = vector.extract_strided_slice %236 {offsets = [0, 24], sizes = [8, 8], strides = [1, 1]} : vector<8x32xbf16> to vector<8x8xbf16>
        %415 = vector.extract_strided_slice %289 {offsets = [0, 24], sizes = [8, 8], strides = [1, 1]} : vector<8x32xbf16> to vector<8x8xbf16>
        %cst_238 = arith.constant dense<0.000000e+00> : vector<8x8xf32>
        %416 = tpu.matmul %414, %415, %cst_238 {dimension_numbers = #tpu.dot_dimension_numbers<[1], [1], [0], [0], [0, 0, 1, 0], [], []>} : vector<8x8xbf16>, vector<8x8xbf16>, vector<8x8xf32> -> vector<8x8xf32>
        %417 = vector.broadcast %299 : vector<1x8xf32> to vector<8x8xf32>
        %418 = arith.addf %416, %417 : vector<8x8xf32>
        %c3_239 = arith.constant 3 : index
        %c0_240 = arith.constant 0 : index
        %c0_241 = arith.constant 0 : index
        %419 = vector.load %arg15[%c3_239, %c0_240, %c0_241] : memref<4x8x1xf32, #tpu.memory_space<vmem>>, vector<1x8x1xf32>
        %420 = vector.shape_cast %419 : vector<1x8x1xf32> to vector<8x1xf32>
        %cst_242 = arith.constant dense<0xFF800000> : vector<8xf32>
        %421 = vector.multi_reduction <maximumf>, %418, %cst_242 [1] : vector<8x8xf32> to vector<8xf32>
        %422 = vector.shape_cast %421 : vector<8xf32> to vector<8x1xf32>
        %423 = arith.maximumf %420, %422 : vector<8x1xf32>
        %424 = arith.subf %420, %423 : vector<8x1xf32>
        %425 = math.exp %424 : vector<8x1xf32>
        %426 = vector.broadcast %423 : vector<8x1xf32> to vector<8x8xf32>
        %427 = arith.subf %418, %426 : vector<8x8xf32>
        %428 = math.exp %427 : vector<8x8xf32>
        %c3_243 = arith.constant 3 : index
        %c0_244 = arith.constant 0 : index
        %c0_245 = arith.constant 0 : index
        %429 = vector.load %arg16[%c3_243, %c0_244, %c0_245] : memref<4x8x1xf32, #tpu.memory_space<vmem>>, vector<1x8x1xf32>
        %430 = vector.shape_cast %429 : vector<1x8x1xf32> to vector<8x1xf32>
        %431 = arith.mulf %425, %430 : vector<8x1xf32>
        %cst_246 = arith.constant dense<0.000000e+00> : vector<8xf32>
        %432 = vector.multi_reduction <add>, %428, %cst_246 [1] : vector<8x8xf32> to vector<8xf32>
        %433 = vector.shape_cast %432 : vector<8xf32> to vector<8x1xf32>
        %434 = arith.addf %431, %433 : vector<8x1xf32>
        %c3_247 = arith.constant 3 : index
        %c0_248 = arith.constant 0 : index
        %c0_249 = arith.constant 0 : index
        %435 = vector.load %arg16[%c3_247, %c0_248, %c0_249] : memref<4x8x1xf32, #tpu.memory_space<vmem>>, vector<1x8x1xf32>
        %436 = vector.shape_cast %435 : vector<1x8x1xf32> to vector<8x1xf32>
        %437 = vector.shape_cast %434 : vector<8x1xf32> to vector<1x8x1xf32>
        tpu.vector_store %arg16[%c3_247, %c0_248, %c0_249], %437 {strides = array<i32>} : memref<4x8x1xf32, #tpu.memory_space<vmem>>, vector<1x8x1xf32>,
        %c3_250 = arith.constant 3 : index
        %c0_251 = arith.constant 0 : index
        %c0_252 = arith.constant 0 : index
        %438 = vector.load %arg17[%c3_250, %c0_251, %c0_252] : memref<4x8x8xf32, #tpu.memory_space<vmem>>, vector<1x8x8xf32>
        %439 = vector.shape_cast %438 : vector<1x8x8xf32> to vector<8x8xf32>
        %440 = vector.broadcast %425 : vector<8x1xf32> to vector<8x8xf32>
        %441 = arith.mulf %440, %439 : vector<8x8xf32>
        %442 = arith.truncf %428 : vector<8x8xf32> to vector<8x8xbf16>
        %443 = vector.extract_strided_slice %291 {offsets = [0, 24], sizes = [8, 8], strides = [1, 1]} : vector<8x32xbf16> to vector<8x8xbf16>
        %cst_253 = arith.constant dense<0.000000e+00> : vector<8x8xf32>
        %444 = tpu.matmul %442, %443, %cst_253 {dimension_numbers = #tpu.dot_dimension_numbers<[1], [0], [0], [1], [0, 0, 1, 1], [], []>} : vector<8x8xbf16>, vector<8x8xbf16>, vector<8x8xf32> -> vector<8x8xf32>
        %445 = arith.addf %441, %444 : vector<8x8xf32>
        %c3_254 = arith.constant 3 : index
        %c0_255 = arith.constant 0 : index
        %c0_256 = arith.constant 0 : index
        %446 = vector.load %arg17[%c3_254, %c0_255, %c0_256] : memref<4x8x8xf32, #tpu.memory_space<vmem>>, vector<1x8x8xf32>
        %447 = vector.shape_cast %446 : vector<1x8x8xf32> to vector<8x8xf32>
        %448 = vector.shape_cast %445 : vector<8x8xf32> to vector<1x8x8xf32>
        tpu.vector_store %arg17[%c3_254, %c0_255, %c0_256], %448 {strides = array<i32>} : memref<4x8x8xf32, #tpu.memory_space<vmem>>, vector<1x8x8xf32>,
        %c3_257 = arith.constant 3 : index
        %c0_258 = arith.constant 0 : index
        %c0_259 = arith.constant 0 : index
        %449 = vector.load %arg15[%c3_257, %c0_258, %c0_259] : memref<4x8x1xf32, #tpu.memory_space<vmem>>, vector<1x8x1xf32>
        %450 = vector.shape_cast %449 : vector<1x8x1xf32> to vector<8x1xf32>
        %451 = vector.shape_cast %423 : vector<8x1xf32> to vector<1x8x1xf32>
        tpu.vector_store %arg15[%c3_257, %c0_258, %c0_259], %451 {strides = array<i32>} : memref<4x8x1xf32, #tpu.memory_space<vmem>>, vector<1x8x1xf32>,
      }
      %c0_137 = arith.constant 0 : index
      %c0_138 = arith.constant 0 : index
      %c0_139 = arith.constant 0 : index
      %243 = vector.load %arg17[%c0_137, %c0_138, %c0_139] : memref<4x8x8xf32, #tpu.memory_space<vmem>>, vector<1x8x8xf32>
      %244 = vector.shape_cast %243 : vector<1x8x8xf32> to vector<8x8xf32>
      %c0_140 = arith.constant 0 : index
      %c0_141 = arith.constant 0 : index
      %c0_142 = arith.constant 0 : index
      %245 = vector.load %arg16[%c0_140, %c0_141, %c0_142] : memref<4x8x1xf32, #tpu.memory_space<vmem>>, vector<1x8x1xf32>
      %246 = vector.shape_cast %245 : vector<1x8x1xf32> to vector<8x1xf32>
      %247 = tpu.reciprocal %246 {approx = true} : vector<8x1xf32> -> vector<8x1xf32>
      %248 = vector.broadcast %247 : vector<8x1xf32> to vector<8x8xf32>
      %249 = arith.mulf %244, %248 : vector<8x8xf32>
      %250 = arith.truncf %249 : vector<8x8xf32> to vector<8x8xbf16>
      %c1_143 = arith.constant 1 : index
      %c0_144 = arith.constant 0 : index
      %c0_145 = arith.constant 0 : index
      %251 = vector.load %arg17[%c1_143, %c0_144, %c0_145] : memref<4x8x8xf32, #tpu.memory_space<vmem>>, vector<1x8x8xf32>
      %252 = vector.shape_cast %251 : vector<1x8x8xf32> to vector<8x8xf32>
      %c1_146 = arith.constant 1 : index
      %c0_147 = arith.constant 0 : index
      %c0_148 = arith.constant 0 : index
      %253 = vector.load %arg16[%c1_146, %c0_147, %c0_148] : memref<4x8x1xf32, #tpu.memory_space<vmem>>, vector<1x8x1xf32>
      %254 = vector.shape_cast %253 : vector<1x8x1xf32> to vector<8x1xf32>
      %255 = tpu.reciprocal %254 {approx = true} : vector<8x1xf32> -> vector<8x1xf32>
      %256 = vector.broadcast %255 : vector<8x1xf32> to vector<8x8xf32>
      %257 = arith.mulf %252, %256 : vector<8x8xf32>
      %258 = arith.truncf %257 : vector<8x8xf32> to vector<8x8xbf16>
      %c2 = arith.constant 2 : index
      %c0_149 = arith.constant 0 : index
      %c0_150 = arith.constant 0 : index
      %259 = vector.load %arg17[%c2, %c0_149, %c0_150] : memref<4x8x8xf32, #tpu.memory_space<vmem>>, vector<1x8x8xf32>
      %260 = vector.shape_cast %259 : vector<1x8x8xf32> to vector<8x8xf32>
      %c2_151 = arith.constant 2 : index
      %c0_152 = arith.constant 0 : index
      %c0_153 = arith.constant 0 : index
      %261 = vector.load %arg16[%c2_151, %c0_152, %c0_153] : memref<4x8x1xf32, #tpu.memory_space<vmem>>, vector<1x8x1xf32>
      %262 = vector.shape_cast %261 : vector<1x8x1xf32> to vector<8x1xf32>
      %263 = tpu.reciprocal %262 {approx = true} : vector<8x1xf32> -> vector<8x1xf32>
      %264 = vector.broadcast %263 : vector<8x1xf32> to vector<8x8xf32>
      %265 = arith.mulf %260, %264 : vector<8x8xf32>
      %266 = arith.truncf %265 : vector<8x8xf32> to vector<8x8xbf16>
      %c3 = arith.constant 3 : index
      %c0_154 = arith.constant 0 : index
      %c0_155 = arith.constant 0 : index
      %267 = vector.load %arg17[%c3, %c0_154, %c0_155] : memref<4x8x8xf32, #tpu.memory_space<vmem>>, vector<1x8x8xf32>
      %268 = vector.shape_cast %267 : vector<1x8x8xf32> to vector<8x8xf32>
      %c3_156 = arith.constant 3 : index
      %c0_157 = arith.constant 0 : index
      %c0_158 = arith.constant 0 : index
      %269 = vector.load %arg16[%c3_156, %c0_157, %c0_158] : memref<4x8x1xf32, #tpu.memory_space<vmem>>, vector<1x8x1xf32>
      %270 = vector.shape_cast %269 : vector<1x8x1xf32> to vector<8x1xf32>
      %271 = tpu.reciprocal %270 {approx = true} : vector<8x1xf32> -> vector<8x1xf32>
      %272 = vector.broadcast %271 : vector<8x1xf32> to vector<8x8xf32>
      %273 = arith.mulf %268, %272 : vector<8x8xf32>
      %274 = arith.truncf %273 : vector<8x8xf32> to vector<8x8xbf16>
      %275 = tpu.concatenate %250, %258, %266, %274 in 1 : vector<8x8xbf16>, vector<8x8xbf16>, vector<8x8xbf16>, vector<8x8xbf16> -> vector<8x32xbf16>
      %c1_159 = arith.constant 1 : index
      %c0_160 = arith.constant 0 : index
      %c0_161 = arith.constant 0 : index
      %276 = vector.load %arg8[%c1_159, %c0_160, %c0_161] : memref<2x32x32xbf16, #tpu.memory_space<vmem>>, vector<1x32x32xbf16>
      %277 = vector.shape_cast %276 : vector<1x32x32xbf16> to vector<32x32xbf16>
      %cst_162 = arith.constant dense<0.000000e+00> : vector<8x32xf32>
      %278 = tpu.matmul %275, %277, %cst_162 {dimension_numbers = #tpu.dot_dimension_numbers<[1], [0], [0], [1], [0, 0, 1, 1], [], []>} : vector<8x32xbf16>, vector<32x32xbf16>, vector<8x32xf32> -> vector<8x32xf32>
      %c0_163 = arith.constant 0 : index
      %c0_164 = arith.constant 0 : index
      %279 = vector.load %arg11[%c0_163, %c0_164] : memref<24x32xf32, #tpu.memory_space<vmem>>, vector<8x32xf32>
      %280 = arith.addf %279, %278 : vector<8x32xf32>
      %281 = vector.broadcast %109 : vector<1x32xf32> to vector<8x32xf32>
      %282 = arith.addf %280, %281 : vector<8x32xf32>
      %c0_165 = arith.constant 0 : index
      %c0_166 = arith.constant 0 : index
      %283 = vector.load %arg11[%c0_165, %c0_166] : memref<24x32xf32, #tpu.memory_space<vmem>>, vector<8x32xf32>
      tpu.vector_store %arg11[%c0_165, %c0_166], %282 {strides = array<i32>} : memref<24x32xf32, #tpu.memory_space<vmem>>, vector<8x32xf32>,
    } else {
    }
    %c8_i32_81 = arith.constant 8 : i32
    %153 = arith.cmpi sgt, %3, %c8_i32_81 : i32
    %154 = arith.extui %153 : i1 to i32
    %c0_i32_82 = arith.constant 0 : i32
    %155 = arith.cmpi ne, %154, %c0_i32_82 : i32
    scf.if %155 {
      %cst_115 = arith.constant 0xFF800000 : f32
      %230 = vector.broadcast %cst_115 : f32 to vector<4x8x1xf32>
      %c0_116 = arith.constant 0 : index
      %c0_117 = arith.constant 0 : index
      %c0_118 = arith.constant 0 : index
      %231 = vector.load %arg15[%c0_116, %c0_117, %c0_118] : memref<4x8x1xf32, #tpu.memory_space<vmem>>, vector<4x8x1xf32>
      tpu.vector_store %arg15[%c0_116, %c0_117, %c0_118], %230 {strides = array<i32>} : memref<4x8x1xf32, #tpu.memory_space<vmem>>, vector<4x8x1xf32>,
      %cst_119 = arith.constant 0.000000e+00 : f32
      %232 = vector.broadcast %cst_119 : f32 to vector<4x8x1xf32>
      %c0_120 = arith.constant 0 : index
      %c0_121 = arith.constant 0 : index
      %c0_122 = arith.constant 0 : index
      %233 = vector.load %arg16[%c0_120, %c0_121, %c0_122] : memref<4x8x1xf32, #tpu.memory_space<vmem>>, vector<4x8x1xf32>
      tpu.vector_store %arg16[%c0_120, %c0_121, %c0_122], %232 {strides = array<i32>} : memref<4x8x1xf32, #tpu.memory_space<vmem>>, vector<4x8x1xf32>,
      %cst_123 = arith.constant 0.000000e+00 : f32
      %234 = vector.broadcast %cst_123 : f32 to vector<4x8x8xf32>
      %c0_124 = arith.constant 0 : index
      %c0_125 = arith.constant 0 : index
      %c0_126 = arith.constant 0 : index
      %235 = vector.load %arg17[%c0_124, %c0_125, %c0_126] : memref<4x8x8xf32, #tpu.memory_space<vmem>>, vector<4x8x8xf32>
      tpu.vector_store %arg17[%c0_124, %c0_125, %c0_126], %234 {strides = array<i32>} : memref<4x8x8xf32, #tpu.memory_space<vmem>>, vector<4x8x8xf32>,
      %c8 = arith.constant 8 : index
      %c0_127 = arith.constant 0 : index
      %236 = vector.load %arg12[%c8, %c0_127] : memref<24x32xbf16, #tpu.memory_space<vmem>>, vector<8x32xbf16>
      %c0_i32_128 = arith.constant 0 : i32
      %237 = arith.subi %5, %c0_i32_128 : i32
      %c1_i32_129 = arith.constant 1 : i32
      %c1_i32_130 = arith.constant 1 : i32
      %238 = arith.subi %c1_i32_129, %c1_i32_130 : i32
      %239 = arith.addi %237, %238 : i32
      %c1_i32_131 = arith.constant 1 : i32
      %240 = arith.divsi %239, %c1_i32_131 : i32
      %c1_i32_132 = arith.constant 1 : i32
      %c0_i32_133 = arith.constant 0 : i32
      %c0_i32_134 = arith.constant 0 : i32
      %241 = arith.subi %240, %c0_i32_134 : i32
      %242 = arith.addi %c0_i32_134, %241 : i32
      %c1_i32_135 = arith.constant 1 : i32
      scf.for %arg18 = %c0_i32_134 to %242 step %c1_i32_135  : i32 {
        %284 = arith.muli %arg18, %c1_i32_132 : i32
        %285 = arith.addi %c0_i32_133, %284 : i32
        %c8_i32_166 = arith.constant 8 : i32
        %286 = arith.muli %285, %c8_i32_166 : i32
        %287 = tpu.assume_multiple %286, 8 : i32
        %288 = arith.index_cast %287 : i32 to index
        %c0_167 = arith.constant 0 : index
        %289 = vector.load %arg13[%288, %c0_167] : memref<24x32xbf16, #tpu.memory_space<vmem>>, vector<8x32xbf16>
        %290 = arith.index_cast %287 : i32 to index
        %c0_168 = arith.constant 0 : index
        %291 = vector.load %arg14[%290, %c0_168] : memref<24x32xbf16, #tpu.memory_space<vmem>>, vector<8x32xbf16>
        %292 = tpu.iota {dimensions = array<i32: 1>} : vector<1x8xi32>
        %293 = vector.broadcast %287 : i32 to vector<1x8xi32>
        %294 = arith.addi %293, %292 : vector<1x8xi32>
        %295 = vector.broadcast %3 : i32 to vector<1x8xi32>
        %296 = arith.cmpi sge, %294, %295 : vector<1x8xi32>
        %cst_169 = arith.constant -1.000000e+09 : f32
        %cst_170 = arith.constant 0.000000e+00 : f32
        %297 = vector.broadcast %cst_169 : f32 to vector<1x8xf32>
        %298 = vector.broadcast %cst_170 : f32 to vector<1x8xf32>
        %299 = arith.select %296, %297, %298 : vector<1x8xi1>, vector<1x8xf32>
        %300 = vector.extract_strided_slice %236 {offsets = [0, 0], sizes = [8, 8], strides = [1, 1]} : vector<8x32xbf16> to vector<8x8xbf16>
        %301 = vector.extract_strided_slice %289 {offsets = [0, 0], sizes = [8, 8], strides = [1, 1]} : vector<8x32xbf16> to vector<8x8xbf16>
        %cst_171 = arith.constant dense<0.000000e+00> : vector<8x8xf32>
        %302 = tpu.matmul %300, %301, %cst_171 {dimension_numbers = #tpu.dot_dimension_numbers<[1], [1], [0], [0], [0, 0, 1, 0], [], []>} : vector<8x8xbf16>, vector<8x8xbf16>, vector<8x8xf32> -> vector<8x8xf32>
        %303 = vector.broadcast %299 : vector<1x8xf32> to vector<8x8xf32>
        %304 = arith.addf %302, %303 : vector<8x8xf32>
        %c0_172 = arith.constant 0 : index
        %c0_173 = arith.constant 0 : index
        %c0_174 = arith.constant 0 : index
        %305 = vector.load %arg15[%c0_172, %c0_173, %c0_174] : memref<4x8x1xf32, #tpu.memory_space<vmem>>, vector<1x8x1xf32>
        %306 = vector.shape_cast %305 : vector<1x8x1xf32> to vector<8x1xf32>
        %cst_175 = arith.constant dense<0xFF800000> : vector<8xf32>
        %307 = vector.multi_reduction <maximumf>, %304, %cst_175 [1] : vector<8x8xf32> to vector<8xf32>
        %308 = vector.shape_cast %307 : vector<8xf32> to vector<8x1xf32>
        %309 = arith.maximumf %306, %308 : vector<8x1xf32>
        %310 = arith.subf %306, %309 : vector<8x1xf32>
        %311 = math.exp %310 : vector<8x1xf32>
        %312 = vector.broadcast %309 : vector<8x1xf32> to vector<8x8xf32>
        %313 = arith.subf %304, %312 : vector<8x8xf32>
        %314 = math.exp %313 : vector<8x8xf32>
        %c0_176 = arith.constant 0 : index
        %c0_177 = arith.constant 0 : index
        %c0_178 = arith.constant 0 : index
        %315 = vector.load %arg16[%c0_176, %c0_177, %c0_178] : memref<4x8x1xf32, #tpu.memory_space<vmem>>, vector<1x8x1xf32>
        %316 = vector.shape_cast %315 : vector<1x8x1xf32> to vector<8x1xf32>
        %317 = arith.mulf %311, %316 : vector<8x1xf32>
        %cst_179 = arith.constant dense<0.000000e+00> : vector<8xf32>
        %318 = vector.multi_reduction <add>, %314, %cst_179 [1] : vector<8x8xf32> to vector<8xf32>
        %319 = vector.shape_cast %318 : vector<8xf32> to vector<8x1xf32>
        %320 = arith.addf %317, %319 : vector<8x1xf32>
        %c0_180 = arith.constant 0 : index
        %c0_181 = arith.constant 0 : index
        %c0_182 = arith.constant 0 : index
        %321 = vector.load %arg16[%c0_180, %c0_181, %c0_182] : memref<4x8x1xf32, #tpu.memory_space<vmem>>, vector<1x8x1xf32>
        %322 = vector.shape_cast %321 : vector<1x8x1xf32> to vector<8x1xf32>
        %323 = vector.shape_cast %320 : vector<8x1xf32> to vector<1x8x1xf32>
        tpu.vector_store %arg16[%c0_180, %c0_181, %c0_182], %323 {strides = array<i32>} : memref<4x8x1xf32, #tpu.memory_space<vmem>>, vector<1x8x1xf32>,
        %c0_183 = arith.constant 0 : index
        %c0_184 = arith.constant 0 : index
        %c0_185 = arith.constant 0 : index
        %324 = vector.load %arg17[%c0_183, %c0_184, %c0_185] : memref<4x8x8xf32, #tpu.memory_space<vmem>>, vector<1x8x8xf32>
        %325 = vector.shape_cast %324 : vector<1x8x8xf32> to vector<8x8xf32>
        %326 = vector.broadcast %311 : vector<8x1xf32> to vector<8x8xf32>
        %327 = arith.mulf %326, %325 : vector<8x8xf32>
        %328 = arith.truncf %314 : vector<8x8xf32> to vector<8x8xbf16>
        %329 = vector.extract_strided_slice %291 {offsets = [0, 0], sizes = [8, 8], strides = [1, 1]} : vector<8x32xbf16> to vector<8x8xbf16>
        %cst_186 = arith.constant dense<0.000000e+00> : vector<8x8xf32>
        %330 = tpu.matmul %328, %329, %cst_186 {dimension_numbers = #tpu.dot_dimension_numbers<[1], [0], [0], [1], [0, 0, 1, 1], [], []>} : vector<8x8xbf16>, vector<8x8xbf16>, vector<8x8xf32> -> vector<8x8xf32>
        %331 = arith.addf %327, %330 : vector<8x8xf32>
        %c0_187 = arith.constant 0 : index
        %c0_188 = arith.constant 0 : index
        %c0_189 = arith.constant 0 : index
        %332 = vector.load %arg17[%c0_187, %c0_188, %c0_189] : memref<4x8x8xf32, #tpu.memory_space<vmem>>, vector<1x8x8xf32>
        %333 = vector.shape_cast %332 : vector<1x8x8xf32> to vector<8x8xf32>
        %334 = vector.shape_cast %331 : vector<8x8xf32> to vector<1x8x8xf32>
        tpu.vector_store %arg17[%c0_187, %c0_188, %c0_189], %334 {strides = array<i32>} : memref<4x8x8xf32, #tpu.memory_space<vmem>>, vector<1x8x8xf32>,
        %c0_190 = arith.constant 0 : index
        %c0_191 = arith.constant 0 : index
        %c0_192 = arith.constant 0 : index
        %335 = vector.load %arg15[%c0_190, %c0_191, %c0_192] : memref<4x8x1xf32, #tpu.memory_space<vmem>>, vector<1x8x1xf32>
        %336 = vector.shape_cast %335 : vector<1x8x1xf32> to vector<8x1xf32>
        %337 = vector.shape_cast %309 : vector<8x1xf32> to vector<1x8x1xf32>
        tpu.vector_store %arg15[%c0_190, %c0_191, %c0_192], %337 {strides = array<i32>} : memref<4x8x1xf32, #tpu.memory_space<vmem>>, vector<1x8x1xf32>,
        %338 = vector.extract_strided_slice %236 {offsets = [0, 8], sizes = [8, 8], strides = [1, 1]} : vector<8x32xbf16> to vector<8x8xbf16>
        %339 = vector.extract_strided_slice %289 {offsets = [0, 8], sizes = [8, 8], strides = [1, 1]} : vector<8x32xbf16> to vector<8x8xbf16>
        %cst_193 = arith.constant dense<0.000000e+00> : vector<8x8xf32>
        %340 = tpu.matmul %338, %339, %cst_193 {dimension_numbers = #tpu.dot_dimension_numbers<[1], [1], [0], [0], [0, 0, 1, 0], [], []>} : vector<8x8xbf16>, vector<8x8xbf16>, vector<8x8xf32> -> vector<8x8xf32>
        %341 = vector.broadcast %299 : vector<1x8xf32> to vector<8x8xf32>
        %342 = arith.addf %340, %341 : vector<8x8xf32>
        %c1_194 = arith.constant 1 : index
        %c0_195 = arith.constant 0 : index
        %c0_196 = arith.constant 0 : index
        %343 = vector.load %arg15[%c1_194, %c0_195, %c0_196] : memref<4x8x1xf32, #tpu.memory_space<vmem>>, vector<1x8x1xf32>
        %344 = vector.shape_cast %343 : vector<1x8x1xf32> to vector<8x1xf32>
        %cst_197 = arith.constant dense<0xFF800000> : vector<8xf32>
        %345 = vector.multi_reduction <maximumf>, %342, %cst_197 [1] : vector<8x8xf32> to vector<8xf32>
        %346 = vector.shape_cast %345 : vector<8xf32> to vector<8x1xf32>
        %347 = arith.maximumf %344, %346 : vector<8x1xf32>
        %348 = arith.subf %344, %347 : vector<8x1xf32>
        %349 = math.exp %348 : vector<8x1xf32>
        %350 = vector.broadcast %347 : vector<8x1xf32> to vector<8x8xf32>
        %351 = arith.subf %342, %350 : vector<8x8xf32>
        %352 = math.exp %351 : vector<8x8xf32>
        %c1_198 = arith.constant 1 : index
        %c0_199 = arith.constant 0 : index
        %c0_200 = arith.constant 0 : index
        %353 = vector.load %arg16[%c1_198, %c0_199, %c0_200] : memref<4x8x1xf32, #tpu.memory_space<vmem>>, vector<1x8x1xf32>
        %354 = vector.shape_cast %353 : vector<1x8x1xf32> to vector<8x1xf32>
        %355 = arith.mulf %349, %354 : vector<8x1xf32>
        %cst_201 = arith.constant dense<0.000000e+00> : vector<8xf32>
        %356 = vector.multi_reduction <add>, %352, %cst_201 [1] : vector<8x8xf32> to vector<8xf32>
        %357 = vector.shape_cast %356 : vector<8xf32> to vector<8x1xf32>
        %358 = arith.addf %355, %357 : vector<8x1xf32>
        %c1_202 = arith.constant 1 : index
        %c0_203 = arith.constant 0 : index
        %c0_204 = arith.constant 0 : index
        %359 = vector.load %arg16[%c1_202, %c0_203, %c0_204] : memref<4x8x1xf32, #tpu.memory_space<vmem>>, vector<1x8x1xf32>
        %360 = vector.shape_cast %359 : vector<1x8x1xf32> to vector<8x1xf32>
        %361 = vector.shape_cast %358 : vector<8x1xf32> to vector<1x8x1xf32>
        tpu.vector_store %arg16[%c1_202, %c0_203, %c0_204], %361 {strides = array<i32>} : memref<4x8x1xf32, #tpu.memory_space<vmem>>, vector<1x8x1xf32>,
        %c1_205 = arith.constant 1 : index
        %c0_206 = arith.constant 0 : index
        %c0_207 = arith.constant 0 : index
        %362 = vector.load %arg17[%c1_205, %c0_206, %c0_207] : memref<4x8x8xf32, #tpu.memory_space<vmem>>, vector<1x8x8xf32>
        %363 = vector.shape_cast %362 : vector<1x8x8xf32> to vector<8x8xf32>
        %364 = vector.broadcast %349 : vector<8x1xf32> to vector<8x8xf32>
        %365 = arith.mulf %364, %363 : vector<8x8xf32>
        %366 = arith.truncf %352 : vector<8x8xf32> to vector<8x8xbf16>
        %367 = vector.extract_strided_slice %291 {offsets = [0, 8], sizes = [8, 8], strides = [1, 1]} : vector<8x32xbf16> to vector<8x8xbf16>
        %cst_208 = arith.constant dense<0.000000e+00> : vector<8x8xf32>
        %368 = tpu.matmul %366, %367, %cst_208 {dimension_numbers = #tpu.dot_dimension_numbers<[1], [0], [0], [1], [0, 0, 1, 1], [], []>} : vector<8x8xbf16>, vector<8x8xbf16>, vector<8x8xf32> -> vector<8x8xf32>
        %369 = arith.addf %365, %368 : vector<8x8xf32>
        %c1_209 = arith.constant 1 : index
        %c0_210 = arith.constant 0 : index
        %c0_211 = arith.constant 0 : index
        %370 = vector.load %arg17[%c1_209, %c0_210, %c0_211] : memref<4x8x8xf32, #tpu.memory_space<vmem>>, vector<1x8x8xf32>
        %371 = vector.shape_cast %370 : vector<1x8x8xf32> to vector<8x8xf32>
        %372 = vector.shape_cast %369 : vector<8x8xf32> to vector<1x8x8xf32>
        tpu.vector_store %arg17[%c1_209, %c0_210, %c0_211], %372 {strides = array<i32>} : memref<4x8x8xf32, #tpu.memory_space<vmem>>, vector<1x8x8xf32>,
        %c1_212 = arith.constant 1 : index
        %c0_213 = arith.constant 0 : index
        %c0_214 = arith.constant 0 : index
        %373 = vector.load %arg15[%c1_212, %c0_213, %c0_214] : memref<4x8x1xf32, #tpu.memory_space<vmem>>, vector<1x8x1xf32>
        %374 = vector.shape_cast %373 : vector<1x8x1xf32> to vector<8x1xf32>
        %375 = vector.shape_cast %347 : vector<8x1xf32> to vector<1x8x1xf32>
        tpu.vector_store %arg15[%c1_212, %c0_213, %c0_214], %375 {strides = array<i32>} : memref<4x8x1xf32, #tpu.memory_space<vmem>>, vector<1x8x1xf32>,
        %376 = vector.extract_strided_slice %236 {offsets = [0, 16], sizes = [8, 8], strides = [1, 1]} : vector<8x32xbf16> to vector<8x8xbf16>
        %377 = vector.extract_strided_slice %289 {offsets = [0, 16], sizes = [8, 8], strides = [1, 1]} : vector<8x32xbf16> to vector<8x8xbf16>
        %cst_215 = arith.constant dense<0.000000e+00> : vector<8x8xf32>
        %378 = tpu.matmul %376, %377, %cst_215 {dimension_numbers = #tpu.dot_dimension_numbers<[1], [1], [0], [0], [0, 0, 1, 0], [], []>} : vector<8x8xbf16>, vector<8x8xbf16>, vector<8x8xf32> -> vector<8x8xf32>
        %379 = vector.broadcast %299 : vector<1x8xf32> to vector<8x8xf32>
        %380 = arith.addf %378, %379 : vector<8x8xf32>
        %c2_216 = arith.constant 2 : index
        %c0_217 = arith.constant 0 : index
        %c0_218 = arith.constant 0 : index
        %381 = vector.load %arg15[%c2_216, %c0_217, %c0_218] : memref<4x8x1xf32, #tpu.memory_space<vmem>>, vector<1x8x1xf32>
        %382 = vector.shape_cast %381 : vector<1x8x1xf32> to vector<8x1xf32>
        %cst_219 = arith.constant dense<0xFF800000> : vector<8xf32>
        %383 = vector.multi_reduction <maximumf>, %380, %cst_219 [1] : vector<8x8xf32> to vector<8xf32>
        %384 = vector.shape_cast %383 : vector<8xf32> to vector<8x1xf32>
        %385 = arith.maximumf %382, %384 : vector<8x1xf32>
        %386 = arith.subf %382, %385 : vector<8x1xf32>
        %387 = math.exp %386 : vector<8x1xf32>
        %388 = vector.broadcast %385 : vector<8x1xf32> to vector<8x8xf32>
        %389 = arith.subf %380, %388 : vector<8x8xf32>
        %390 = math.exp %389 : vector<8x8xf32>
        %c2_220 = arith.constant 2 : index
        %c0_221 = arith.constant 0 : index
        %c0_222 = arith.constant 0 : index
        %391 = vector.load %arg16[%c2_220, %c0_221, %c0_222] : memref<4x8x1xf32, #tpu.memory_space<vmem>>, vector<1x8x1xf32>
        %392 = vector.shape_cast %391 : vector<1x8x1xf32> to vector<8x1xf32>
        %393 = arith.mulf %387, %392 : vector<8x1xf32>
        %cst_223 = arith.constant dense<0.000000e+00> : vector<8xf32>
        %394 = vector.multi_reduction <add>, %390, %cst_223 [1] : vector<8x8xf32> to vector<8xf32>
        %395 = vector.shape_cast %394 : vector<8xf32> to vector<8x1xf32>
        %396 = arith.addf %393, %395 : vector<8x1xf32>
        %c2_224 = arith.constant 2 : index
        %c0_225 = arith.constant 0 : index
        %c0_226 = arith.constant 0 : index
        %397 = vector.load %arg16[%c2_224, %c0_225, %c0_226] : memref<4x8x1xf32, #tpu.memory_space<vmem>>, vector<1x8x1xf32>
        %398 = vector.shape_cast %397 : vector<1x8x1xf32> to vector<8x1xf32>
        %399 = vector.shape_cast %396 : vector<8x1xf32> to vector<1x8x1xf32>
        tpu.vector_store %arg16[%c2_224, %c0_225, %c0_226], %399 {strides = array<i32>} : memref<4x8x1xf32, #tpu.memory_space<vmem>>, vector<1x8x1xf32>,
        %c2_227 = arith.constant 2 : index
        %c0_228 = arith.constant 0 : index
        %c0_229 = arith.constant 0 : index
        %400 = vector.load %arg17[%c2_227, %c0_228, %c0_229] : memref<4x8x8xf32, #tpu.memory_space<vmem>>, vector<1x8x8xf32>
        %401 = vector.shape_cast %400 : vector<1x8x8xf32> to vector<8x8xf32>
        %402 = vector.broadcast %387 : vector<8x1xf32> to vector<8x8xf32>
        %403 = arith.mulf %402, %401 : vector<8x8xf32>
        %404 = arith.truncf %390 : vector<8x8xf32> to vector<8x8xbf16>
        %405 = vector.extract_strided_slice %291 {offsets = [0, 16], sizes = [8, 8], strides = [1, 1]} : vector<8x32xbf16> to vector<8x8xbf16>
        %cst_230 = arith.constant dense<0.000000e+00> : vector<8x8xf32>
        %406 = tpu.matmul %404, %405, %cst_230 {dimension_numbers = #tpu.dot_dimension_numbers<[1], [0], [0], [1], [0, 0, 1, 1], [], []>} : vector<8x8xbf16>, vector<8x8xbf16>, vector<8x8xf32> -> vector<8x8xf32>
        %407 = arith.addf %403, %406 : vector<8x8xf32>
        %c2_231 = arith.constant 2 : index
        %c0_232 = arith.constant 0 : index
        %c0_233 = arith.constant 0 : index
        %408 = vector.load %arg17[%c2_231, %c0_232, %c0_233] : memref<4x8x8xf32, #tpu.memory_space<vmem>>, vector<1x8x8xf32>
        %409 = vector.shape_cast %408 : vector<1x8x8xf32> to vector<8x8xf32>
        %410 = vector.shape_cast %407 : vector<8x8xf32> to vector<1x8x8xf32>
        tpu.vector_store %arg17[%c2_231, %c0_232, %c0_233], %410 {strides = array<i32>} : memref<4x8x8xf32, #tpu.memory_space<vmem>>, vector<1x8x8xf32>,
        %c2_234 = arith.constant 2 : index
        %c0_235 = arith.constant 0 : index
        %c0_236 = arith.constant 0 : index
        %411 = vector.load %arg15[%c2_234, %c0_235, %c0_236] : memref<4x8x1xf32, #tpu.memory_space<vmem>>, vector<1x8x1xf32>
        %412 = vector.shape_cast %411 : vector<1x8x1xf32> to vector<8x1xf32>
        %413 = vector.shape_cast %385 : vector<8x1xf32> to vector<1x8x1xf32>
        tpu.vector_store %arg15[%c2_234, %c0_235, %c0_236], %413 {strides = array<i32>} : memref<4x8x1xf32, #tpu.memory_space<vmem>>, vector<1x8x1xf32>,
        %414 = vector.extract_strided_slice %236 {offsets = [0, 24], sizes = [8, 8], strides = [1, 1]} : vector<8x32xbf16> to vector<8x8xbf16>
        %415 = vector.extract_strided_slice %289 {offsets = [0, 24], sizes = [8, 8], strides = [1, 1]} : vector<8x32xbf16> to vector<8x8xbf16>
        %cst_237 = arith.constant dense<0.000000e+00> : vector<8x8xf32>
        %416 = tpu.matmul %414, %415, %cst_237 {dimension_numbers = #tpu.dot_dimension_numbers<[1], [1], [0], [0], [0, 0, 1, 0], [], []>} : vector<8x8xbf16>, vector<8x8xbf16>, vector<8x8xf32> -> vector<8x8xf32>
        %417 = vector.broadcast %299 : vector<1x8xf32> to vector<8x8xf32>
        %418 = arith.addf %416, %417 : vector<8x8xf32>
        %c3_238 = arith.constant 3 : index
        %c0_239 = arith.constant 0 : index
        %c0_240 = arith.constant 0 : index
        %419 = vector.load %arg15[%c3_238, %c0_239, %c0_240] : memref<4x8x1xf32, #tpu.memory_space<vmem>>, vector<1x8x1xf32>
        %420 = vector.shape_cast %419 : vector<1x8x1xf32> to vector<8x1xf32>
        %cst_241 = arith.constant dense<0xFF800000> : vector<8xf32>
        %421 = vector.multi_reduction <maximumf>, %418, %cst_241 [1] : vector<8x8xf32> to vector<8xf32>
        %422 = vector.shape_cast %421 : vector<8xf32> to vector<8x1xf32>
        %423 = arith.maximumf %420, %422 : vector<8x1xf32>
        %424 = arith.subf %420, %423 : vector<8x1xf32>
        %425 = math.exp %424 : vector<8x1xf32>
        %426 = vector.broadcast %423 : vector<8x1xf32> to vector<8x8xf32>
        %427 = arith.subf %418, %426 : vector<8x8xf32>
        %428 = math.exp %427 : vector<8x8xf32>
        %c3_242 = arith.constant 3 : index
        %c0_243 = arith.constant 0 : index
        %c0_244 = arith.constant 0 : index
        %429 = vector.load %arg16[%c3_242, %c0_243, %c0_244] : memref<4x8x1xf32, #tpu.memory_space<vmem>>, vector<1x8x1xf32>
        %430 = vector.shape_cast %429 : vector<1x8x1xf32> to vector<8x1xf32>
        %431 = arith.mulf %425, %430 : vector<8x1xf32>
        %cst_245 = arith.constant dense<0.000000e+00> : vector<8xf32>
        %432 = vector.multi_reduction <add>, %428, %cst_245 [1] : vector<8x8xf32> to vector<8xf32>
        %433 = vector.shape_cast %432 : vector<8xf32> to vector<8x1xf32>
        %434 = arith.addf %431, %433 : vector<8x1xf32>
        %c3_246 = arith.constant 3 : index
        %c0_247 = arith.constant 0 : index
        %c0_248 = arith.constant 0 : index
        %435 = vector.load %arg16[%c3_246, %c0_247, %c0_248] : memref<4x8x1xf32, #tpu.memory_space<vmem>>, vector<1x8x1xf32>
        %436 = vector.shape_cast %435 : vector<1x8x1xf32> to vector<8x1xf32>
        %437 = vector.shape_cast %434 : vector<8x1xf32> to vector<1x8x1xf32>
        tpu.vector_store %arg16[%c3_246, %c0_247, %c0_248], %437 {strides = array<i32>} : memref<4x8x1xf32, #tpu.memory_space<vmem>>, vector<1x8x1xf32>,
        %c3_249 = arith.constant 3 : index
        %c0_250 = arith.constant 0 : index
        %c0_251 = arith.constant 0 : index
        %438 = vector.load %arg17[%c3_249, %c0_250, %c0_251] : memref<4x8x8xf32, #tpu.memory_space<vmem>>, vector<1x8x8xf32>
        %439 = vector.shape_cast %438 : vector<1x8x8xf32> to vector<8x8xf32>
        %440 = vector.broadcast %425 : vector<8x1xf32> to vector<8x8xf32>
        %441 = arith.mulf %440, %439 : vector<8x8xf32>
        %442 = arith.truncf %428 : vector<8x8xf32> to vector<8x8xbf16>
        %443 = vector.extract_strided_slice %291 {offsets = [0, 24], sizes = [8, 8], strides = [1, 1]} : vector<8x32xbf16> to vector<8x8xbf16>
        %cst_252 = arith.constant dense<0.000000e+00> : vector<8x8xf32>
        %444 = tpu.matmul %442, %443, %cst_252 {dimension_numbers = #tpu.dot_dimension_numbers<[1], [0], [0], [1], [0, 0, 1, 1], [], []>} : vector<8x8xbf16>, vector<8x8xbf16>, vector<8x8xf32> -> vector<8x8xf32>
        %445 = arith.addf %441, %444 : vector<8x8xf32>
        %c3_253 = arith.constant 3 : index
        %c0_254 = arith.constant 0 : index
        %c0_255 = arith.constant 0 : index
        %446 = vector.load %arg17[%c3_253, %c0_254, %c0_255] : memref<4x8x8xf32, #tpu.memory_space<vmem>>, vector<1x8x8xf32>
        %447 = vector.shape_cast %446 : vector<1x8x8xf32> to vector<8x8xf32>
        %448 = vector.shape_cast %445 : vector<8x8xf32> to vector<1x8x8xf32>
        tpu.vector_store %arg17[%c3_253, %c0_254, %c0_255], %448 {strides = array<i32>} : memref<4x8x8xf32, #tpu.memory_space<vmem>>, vector<1x8x8xf32>,
        %c3_256 = arith.constant 3 : index
        %c0_257 = arith.constant 0 : index
        %c0_258 = arith.constant 0 : index
        %449 = vector.load %arg15[%c3_256, %c0_257, %c0_258] : memref<4x8x1xf32, #tpu.memory_space<vmem>>, vector<1x8x1xf32>
        %450 = vector.shape_cast %449 : vector<1x8x1xf32> to vector<8x1xf32>
        %451 = vector.shape_cast %423 : vector<8x1xf32> to vector<1x8x1xf32>
        tpu.vector_store %arg15[%c3_256, %c0_257, %c0_258], %451 {strides = array<i32>} : memref<4x8x1xf32, #tpu.memory_space<vmem>>, vector<1x8x1xf32>,
      }
      %c0_136 = arith.constant 0 : index
      %c0_137 = arith.constant 0 : index
      %c0_138 = arith.constant 0 : index
      %243 = vector.load %arg17[%c0_136, %c0_137, %c0_138] : memref<4x8x8xf32, #tpu.memory_space<vmem>>, vector<1x8x8xf32>
      %244 = vector.shape_cast %243 : vector<1x8x8xf32> to vector<8x8xf32>
      %c0_139 = arith.constant 0 : index
      %c0_140 = arith.constant 0 : index
      %c0_141 = arith.constant 0 : index
      %245 = vector.load %arg16[%c0_139, %c0_140, %c0_141] : memref<4x8x1xf32, #tpu.memory_space<vmem>>, vector<1x8x1xf32>
      %246 = vector.shape_cast %245 : vector<1x8x1xf32> to vector<8x1xf32>
      %247 = tpu.reciprocal %246 {approx = true} : vector<8x1xf32> -> vector<8x1xf32>
      %248 = vector.broadcast %247 : vector<8x1xf32> to vector<8x8xf32>
      %249 = arith.mulf %244, %248 : vector<8x8xf32>
      %250 = arith.truncf %249 : vector<8x8xf32> to vector<8x8xbf16>
      %c1_142 = arith.constant 1 : index
      %c0_143 = arith.constant 0 : index
      %c0_144 = arith.constant 0 : index
      %251 = vector.load %arg17[%c1_142, %c0_143, %c0_144] : memref<4x8x8xf32, #tpu.memory_space<vmem>>, vector<1x8x8xf32>
      %252 = vector.shape_cast %251 : vector<1x8x8xf32> to vector<8x8xf32>
      %c1_145 = arith.constant 1 : index
      %c0_146 = arith.constant 0 : index
      %c0_147 = arith.constant 0 : index
      %253 = vector.load %arg16[%c1_145, %c0_146, %c0_147] : memref<4x8x1xf32, #tpu.memory_space<vmem>>, vector<1x8x1xf32>
      %254 = vector.shape_cast %253 : vector<1x8x1xf32> to vector<8x1xf32>
      %255 = tpu.reciprocal %254 {approx = true} : vector<8x1xf32> -> vector<8x1xf32>
      %256 = vector.broadcast %255 : vector<8x1xf32> to vector<8x8xf32>
      %257 = arith.mulf %252, %256 : vector<8x8xf32>
      %258 = arith.truncf %257 : vector<8x8xf32> to vector<8x8xbf16>
      %c2 = arith.constant 2 : index
      %c0_148 = arith.constant 0 : index
      %c0_149 = arith.constant 0 : index
      %259 = vector.load %arg17[%c2, %c0_148, %c0_149] : memref<4x8x8xf32, #tpu.memory_space<vmem>>, vector<1x8x8xf32>
      %260 = vector.shape_cast %259 : vector<1x8x8xf32> to vector<8x8xf32>
      %c2_150 = arith.constant 2 : index
      %c0_151 = arith.constant 0 : index
      %c0_152 = arith.constant 0 : index
      %261 = vector.load %arg16[%c2_150, %c0_151, %c0_152] : memref<4x8x1xf32, #tpu.memory_space<vmem>>, vector<1x8x1xf32>
      %262 = vector.shape_cast %261 : vector<1x8x1xf32> to vector<8x1xf32>
      %263 = tpu.reciprocal %262 {approx = true} : vector<8x1xf32> -> vector<8x1xf32>
      %264 = vector.broadcast %263 : vector<8x1xf32> to vector<8x8xf32>
      %265 = arith.mulf %260, %264 : vector<8x8xf32>
      %266 = arith.truncf %265 : vector<8x8xf32> to vector<8x8xbf16>
      %c3 = arith.constant 3 : index
      %c0_153 = arith.constant 0 : index
      %c0_154 = arith.constant 0 : index
      %267 = vector.load %arg17[%c3, %c0_153, %c0_154] : memref<4x8x8xf32, #tpu.memory_space<vmem>>, vector<1x8x8xf32>
      %268 = vector.shape_cast %267 : vector<1x8x8xf32> to vector<8x8xf32>
      %c3_155 = arith.constant 3 : index
      %c0_156 = arith.constant 0 : index
      %c0_157 = arith.constant 0 : index
      %269 = vector.load %arg16[%c3_155, %c0_156, %c0_157] : memref<4x8x1xf32, #tpu.memory_space<vmem>>, vector<1x8x1xf32>
      %270 = vector.shape_cast %269 : vector<1x8x1xf32> to vector<8x1xf32>
      %271 = tpu.reciprocal %270 {approx = true} : vector<8x1xf32> -> vector<8x1xf32>
      %272 = vector.broadcast %271 : vector<8x1xf32> to vector<8x8xf32>
      %273 = arith.mulf %268, %272 : vector<8x8xf32>
      %274 = arith.truncf %273 : vector<8x8xf32> to vector<8x8xbf16>
      %275 = tpu.concatenate %250, %258, %266, %274 in 1 : vector<8x8xbf16>, vector<8x8xbf16>, vector<8x8xbf16>, vector<8x8xbf16> -> vector<8x32xbf16>
      %c1_158 = arith.constant 1 : index
      %c0_159 = arith.constant 0 : index
      %c0_160 = arith.constant 0 : index
      %276 = vector.load %arg8[%c1_158, %c0_159, %c0_160] : memref<2x32x32xbf16, #tpu.memory_space<vmem>>, vector<1x32x32xbf16>
      %277 = vector.shape_cast %276 : vector<1x32x32xbf16> to vector<32x32xbf16>
      %cst_161 = arith.constant dense<0.000000e+00> : vector<8x32xf32>
      %278 = tpu.matmul %275, %277, %cst_161 {dimension_numbers = #tpu.dot_dimension_numbers<[1], [0], [0], [1], [0, 0, 1, 1], [], []>} : vector<8x32xbf16>, vector<32x32xbf16>, vector<8x32xf32> -> vector<8x32xf32>
      %c8_162 = arith.constant 8 : index
      %c0_163 = arith.constant 0 : index
      %279 = vector.load %arg11[%c8_162, %c0_163] : memref<24x32xf32, #tpu.memory_space<vmem>>, vector<8x32xf32>
      %280 = arith.addf %279, %278 : vector<8x32xf32>
      %281 = vector.broadcast %109 : vector<1x32xf32> to vector<8x32xf32>
      %282 = arith.addf %280, %281 : vector<8x32xf32>
      %c8_164 = arith.constant 8 : index
      %c0_165 = arith.constant 0 : index
      %283 = vector.load %arg11[%c8_164, %c0_165] : memref<24x32xf32, #tpu.memory_space<vmem>>, vector<8x32xf32>
      tpu.vector_store %arg11[%c8_164, %c0_165], %282 {strides = array<i32>} : memref<24x32xf32, #tpu.memory_space<vmem>>, vector<8x32xf32>,
    } else {
    }
    %c16_i32_83 = arith.constant 16 : i32
    %156 = arith.cmpi sgt, %3, %c16_i32_83 : i32
    %157 = arith.extui %156 : i1 to i32
    %c0_i32_84 = arith.constant 0 : i32
    %158 = arith.cmpi ne, %157, %c0_i32_84 : i32
    scf.if %158 {
      %cst_115 = arith.constant 0xFF800000 : f32
      %230 = vector.broadcast %cst_115 : f32 to vector<4x8x1xf32>
      %c0_116 = arith.constant 0 : index
      %c0_117 = arith.constant 0 : index
      %c0_118 = arith.constant 0 : index
      %231 = vector.load %arg15[%c0_116, %c0_117, %c0_118] : memref<4x8x1xf32, #tpu.memory_space<vmem>>, vector<4x8x1xf32>
      tpu.vector_store %arg15[%c0_116, %c0_117, %c0_118], %230 {strides = array<i32>} : memref<4x8x1xf32, #tpu.memory_space<vmem>>, vector<4x8x1xf32>,
      %cst_119 = arith.constant 0.000000e+00 : f32
      %232 = vector.broadcast %cst_119 : f32 to vector<4x8x1xf32>
      %c0_120 = arith.constant 0 : index
      %c0_121 = arith.constant 0 : index
      %c0_122 = arith.constant 0 : index
      %233 = vector.load %arg16[%c0_120, %c0_121, %c0_122] : memref<4x8x1xf32, #tpu.memory_space<vmem>>, vector<4x8x1xf32>
      tpu.vector_store %arg16[%c0_120, %c0_121, %c0_122], %232 {strides = array<i32>} : memref<4x8x1xf32, #tpu.memory_space<vmem>>, vector<4x8x1xf32>,
      %cst_123 = arith.constant 0.000000e+00 : f32
      %234 = vector.broadcast %cst_123 : f32 to vector<4x8x8xf32>
      %c0_124 = arith.constant 0 : index
      %c0_125 = arith.constant 0 : index
      %c0_126 = arith.constant 0 : index
      %235 = vector.load %arg17[%c0_124, %c0_125, %c0_126] : memref<4x8x8xf32, #tpu.memory_space<vmem>>, vector<4x8x8xf32>
      tpu.vector_store %arg17[%c0_124, %c0_125, %c0_126], %234 {strides = array<i32>} : memref<4x8x8xf32, #tpu.memory_space<vmem>>, vector<4x8x8xf32>,
      %c16_127 = arith.constant 16 : index
      %c0_128 = arith.constant 0 : index
      %236 = vector.load %arg12[%c16_127, %c0_128] : memref<24x32xbf16, #tpu.memory_space<vmem>>, vector<8x32xbf16>
      %c0_i32_129 = arith.constant 0 : i32
      %237 = arith.subi %5, %c0_i32_129 : i32
      %c1_i32_130 = arith.constant 1 : i32
      %c1_i32_131 = arith.constant 1 : i32
      %238 = arith.subi %c1_i32_130, %c1_i32_131 : i32
      %239 = arith.addi %237, %238 : i32
      %c1_i32_132 = arith.constant 1 : i32
      %240 = arith.divsi %239, %c1_i32_132 : i32
      %c1_i32_133 = arith.constant 1 : i32
      %c0_i32_134 = arith.constant 0 : i32
      %c0_i32_135 = arith.constant 0 : i32
      %241 = arith.subi %240, %c0_i32_135 : i32
      %242 = arith.addi %c0_i32_135, %241 : i32
      %c1_i32_136 = arith.constant 1 : i32
      scf.for %arg18 = %c0_i32_135 to %242 step %c1_i32_136  : i32 {
        %284 = arith.muli %arg18, %c1_i32_133 : i32
        %285 = arith.addi %c0_i32_134, %284 : i32
        %c8_i32_167 = arith.constant 8 : i32
        %286 = arith.muli %285, %c8_i32_167 : i32
        %287 = tpu.assume_multiple %286, 8 : i32
        %288 = arith.index_cast %287 : i32 to index
        %c0_168 = arith.constant 0 : index
        %289 = vector.load %arg13[%288, %c0_168] : memref<24x32xbf16, #tpu.memory_space<vmem>>, vector<8x32xbf16>
        %290 = arith.index_cast %287 : i32 to index
        %c0_169 = arith.constant 0 : index
        %291 = vector.load %arg14[%290, %c0_169] : memref<24x32xbf16, #tpu.memory_space<vmem>>, vector<8x32xbf16>
        %292 = tpu.iota {dimensions = array<i32: 1>} : vector<1x8xi32>
        %293 = vector.broadcast %287 : i32 to vector<1x8xi32>
        %294 = arith.addi %293, %292 : vector<1x8xi32>
        %295 = vector.broadcast %3 : i32 to vector<1x8xi32>
        %296 = arith.cmpi sge, %294, %295 : vector<1x8xi32>
        %cst_170 = arith.constant -1.000000e+09 : f32
        %cst_171 = arith.constant 0.000000e+00 : f32
        %297 = vector.broadcast %cst_170 : f32 to vector<1x8xf32>
        %298 = vector.broadcast %cst_171 : f32 to vector<1x8xf32>
        %299 = arith.select %296, %297, %298 : vector<1x8xi1>, vector<1x8xf32>
        %300 = vector.extract_strided_slice %236 {offsets = [0, 0], sizes = [8, 8], strides = [1, 1]} : vector<8x32xbf16> to vector<8x8xbf16>
        %301 = vector.extract_strided_slice %289 {offsets = [0, 0], sizes = [8, 8], strides = [1, 1]} : vector<8x32xbf16> to vector<8x8xbf16>
        %cst_172 = arith.constant dense<0.000000e+00> : vector<8x8xf32>
        %302 = tpu.matmul %300, %301, %cst_172 {dimension_numbers = #tpu.dot_dimension_numbers<[1], [1], [0], [0], [0, 0, 1, 0], [], []>} : vector<8x8xbf16>, vector<8x8xbf16>, vector<8x8xf32> -> vector<8x8xf32>
        %303 = vector.broadcast %299 : vector<1x8xf32> to vector<8x8xf32>
        %304 = arith.addf %302, %303 : vector<8x8xf32>
        %c0_173 = arith.constant 0 : index
        %c0_174 = arith.constant 0 : index
        %c0_175 = arith.constant 0 : index
        %305 = vector.load %arg15[%c0_173, %c0_174, %c0_175] : memref<4x8x1xf32, #tpu.memory_space<vmem>>, vector<1x8x1xf32>
        %306 = vector.shape_cast %305 : vector<1x8x1xf32> to vector<8x1xf32>
        %cst_176 = arith.constant dense<0xFF800000> : vector<8xf32>
        %307 = vector.multi_reduction <maximumf>, %304, %cst_176 [1] : vector<8x8xf32> to vector<8xf32>
        %308 = vector.shape_cast %307 : vector<8xf32> to vector<8x1xf32>
        %309 = arith.maximumf %306, %308 : vector<8x1xf32>
        %310 = arith.subf %306, %309 : vector<8x1xf32>
        %311 = math.exp %310 : vector<8x1xf32>
        %312 = vector.broadcast %309 : vector<8x1xf32> to vector<8x8xf32>
        %313 = arith.subf %304, %312 : vector<8x8xf32>
        %314 = math.exp %313 : vector<8x8xf32>
        %c0_177 = arith.constant 0 : index
        %c0_178 = arith.constant 0 : index
        %c0_179 = arith.constant 0 : index
        %315 = vector.load %arg16[%c0_177, %c0_178, %c0_179] : memref<4x8x1xf32, #tpu.memory_space<vmem>>, vector<1x8x1xf32>
        %316 = vector.shape_cast %315 : vector<1x8x1xf32> to vector<8x1xf32>
        %317 = arith.mulf %311, %316 : vector<8x1xf32>
        %cst_180 = arith.constant dense<0.000000e+00> : vector<8xf32>
        %318 = vector.multi_reduction <add>, %314, %cst_180 [1] : vector<8x8xf32> to vector<8xf32>
        %319 = vector.shape_cast %318 : vector<8xf32> to vector<8x1xf32>
        %320 = arith.addf %317, %319 : vector<8x1xf32>
        %c0_181 = arith.constant 0 : index
        %c0_182 = arith.constant 0 : index
        %c0_183 = arith.constant 0 : index
        %321 = vector.load %arg16[%c0_181, %c0_182, %c0_183] : memref<4x8x1xf32, #tpu.memory_space<vmem>>, vector<1x8x1xf32>
        %322 = vector.shape_cast %321 : vector<1x8x1xf32> to vector<8x1xf32>
        %323 = vector.shape_cast %320 : vector<8x1xf32> to vector<1x8x1xf32>
        tpu.vector_store %arg16[%c0_181, %c0_182, %c0_183], %323 {strides = array<i32>} : memref<4x8x1xf32, #tpu.memory_space<vmem>>, vector<1x8x1xf32>,
        %c0_184 = arith.constant 0 : index
        %c0_185 = arith.constant 0 : index
        %c0_186 = arith.constant 0 : index
        %324 = vector.load %arg17[%c0_184, %c0_185, %c0_186] : memref<4x8x8xf32, #tpu.memory_space<vmem>>, vector<1x8x8xf32>
        %325 = vector.shape_cast %324 : vector<1x8x8xf32> to vector<8x8xf32>
        %326 = vector.broadcast %311 : vector<8x1xf32> to vector<8x8xf32>
        %327 = arith.mulf %326, %325 : vector<8x8xf32>
        %328 = arith.truncf %314 : vector<8x8xf32> to vector<8x8xbf16>
        %329 = vector.extract_strided_slice %291 {offsets = [0, 0], sizes = [8, 8], strides = [1, 1]} : vector<8x32xbf16> to vector<8x8xbf16>
        %cst_187 = arith.constant dense<0.000000e+00> : vector<8x8xf32>
        %330 = tpu.matmul %328, %329, %cst_187 {dimension_numbers = #tpu.dot_dimension_numbers<[1], [0], [0], [1], [0, 0, 1, 1], [], []>} : vector<8x8xbf16>, vector<8x8xbf16>, vector<8x8xf32> -> vector<8x8xf32>
        %331 = arith.addf %327, %330 : vector<8x8xf32>
        %c0_188 = arith.constant 0 : index
        %c0_189 = arith.constant 0 : index
        %c0_190 = arith.constant 0 : index
        %332 = vector.load %arg17[%c0_188, %c0_189, %c0_190] : memref<4x8x8xf32, #tpu.memory_space<vmem>>, vector<1x8x8xf32>
        %333 = vector.shape_cast %332 : vector<1x8x8xf32> to vector<8x8xf32>
        %334 = vector.shape_cast %331 : vector<8x8xf32> to vector<1x8x8xf32>
        tpu.vector_store %arg17[%c0_188, %c0_189, %c0_190], %334 {strides = array<i32>} : memref<4x8x8xf32, #tpu.memory_space<vmem>>, vector<1x8x8xf32>,
        %c0_191 = arith.constant 0 : index
        %c0_192 = arith.constant 0 : index
        %c0_193 = arith.constant 0 : index
        %335 = vector.load %arg15[%c0_191, %c0_192, %c0_193] : memref<4x8x1xf32, #tpu.memory_space<vmem>>, vector<1x8x1xf32>
        %336 = vector.shape_cast %335 : vector<1x8x1xf32> to vector<8x1xf32>
        %337 = vector.shape_cast %309 : vector<8x1xf32> to vector<1x8x1xf32>
        tpu.vector_store %arg15[%c0_191, %c0_192, %c0_193], %337 {strides = array<i32>} : memref<4x8x1xf32, #tpu.memory_space<vmem>>, vector<1x8x1xf32>,
        %338 = vector.extract_strided_slice %236 {offsets = [0, 8], sizes = [8, 8], strides = [1, 1]} : vector<8x32xbf16> to vector<8x8xbf16>
        %339 = vector.extract_strided_slice %289 {offsets = [0, 8], sizes = [8, 8], strides = [1, 1]} : vector<8x32xbf16> to vector<8x8xbf16>
        %cst_194 = arith.constant dense<0.000000e+00> : vector<8x8xf32>
        %340 = tpu.matmul %338, %339, %cst_194 {dimension_numbers = #tpu.dot_dimension_numbers<[1], [1], [0], [0], [0, 0, 1, 0], [], []>} : vector<8x8xbf16>, vector<8x8xbf16>, vector<8x8xf32> -> vector<8x8xf32>
        %341 = vector.broadcast %299 : vector<1x8xf32> to vector<8x8xf32>
        %342 = arith.addf %340, %341 : vector<8x8xf32>
        %c1_195 = arith.constant 1 : index
        %c0_196 = arith.constant 0 : index
        %c0_197 = arith.constant 0 : index
        %343 = vector.load %arg15[%c1_195, %c0_196, %c0_197] : memref<4x8x1xf32, #tpu.memory_space<vmem>>, vector<1x8x1xf32>
        %344 = vector.shape_cast %343 : vector<1x8x1xf32> to vector<8x1xf32>
        %cst_198 = arith.constant dense<0xFF800000> : vector<8xf32>
        %345 = vector.multi_reduction <maximumf>, %342, %cst_198 [1] : vector<8x8xf32> to vector<8xf32>
        %346 = vector.shape_cast %345 : vector<8xf32> to vector<8x1xf32>
        %347 = arith.maximumf %344, %346 : vector<8x1xf32>
        %348 = arith.subf %344, %347 : vector<8x1xf32>
        %349 = math.exp %348 : vector<8x1xf32>
        %350 = vector.broadcast %347 : vector<8x1xf32> to vector<8x8xf32>
        %351 = arith.subf %342, %350 : vector<8x8xf32>
        %352 = math.exp %351 : vector<8x8xf32>
        %c1_199 = arith.constant 1 : index
        %c0_200 = arith.constant 0 : index
        %c0_201 = arith.constant 0 : index
        %353 = vector.load %arg16[%c1_199, %c0_200, %c0_201] : memref<4x8x1xf32, #tpu.memory_space<vmem>>, vector<1x8x1xf32>
        %354 = vector.shape_cast %353 : vector<1x8x1xf32> to vector<8x1xf32>
        %355 = arith.mulf %349, %354 : vector<8x1xf32>
        %cst_202 = arith.constant dense<0.000000e+00> : vector<8xf32>
        %356 = vector.multi_reduction <add>, %352, %cst_202 [1] : vector<8x8xf32> to vector<8xf32>
        %357 = vector.shape_cast %356 : vector<8xf32> to vector<8x1xf32>
        %358 = arith.addf %355, %357 : vector<8x1xf32>
        %c1_203 = arith.constant 1 : index
        %c0_204 = arith.constant 0 : index
        %c0_205 = arith.constant 0 : index
        %359 = vector.load %arg16[%c1_203, %c0_204, %c0_205] : memref<4x8x1xf32, #tpu.memory_space<vmem>>, vector<1x8x1xf32>
        %360 = vector.shape_cast %359 : vector<1x8x1xf32> to vector<8x1xf32>
        %361 = vector.shape_cast %358 : vector<8x1xf32> to vector<1x8x1xf32>
        tpu.vector_store %arg16[%c1_203, %c0_204, %c0_205], %361 {strides = array<i32>} : memref<4x8x1xf32, #tpu.memory_space<vmem>>, vector<1x8x1xf32>,
        %c1_206 = arith.constant 1 : index
        %c0_207 = arith.constant 0 : index
        %c0_208 = arith.constant 0 : index
        %362 = vector.load %arg17[%c1_206, %c0_207, %c0_208] : memref<4x8x8xf32, #tpu.memory_space<vmem>>, vector<1x8x8xf32>
        %363 = vector.shape_cast %362 : vector<1x8x8xf32> to vector<8x8xf32>
        %364 = vector.broadcast %349 : vector<8x1xf32> to vector<8x8xf32>
        %365 = arith.mulf %364, %363 : vector<8x8xf32>
        %366 = arith.truncf %352 : vector<8x8xf32> to vector<8x8xbf16>
        %367 = vector.extract_strided_slice %291 {offsets = [0, 8], sizes = [8, 8], strides = [1, 1]} : vector<8x32xbf16> to vector<8x8xbf16>
        %cst_209 = arith.constant dense<0.000000e+00> : vector<8x8xf32>
        %368 = tpu.matmul %366, %367, %cst_209 {dimension_numbers = #tpu.dot_dimension_numbers<[1], [0], [0], [1], [0, 0, 1, 1], [], []>} : vector<8x8xbf16>, vector<8x8xbf16>, vector<8x8xf32> -> vector<8x8xf32>
        %369 = arith.addf %365, %368 : vector<8x8xf32>
        %c1_210 = arith.constant 1 : index
        %c0_211 = arith.constant 0 : index
        %c0_212 = arith.constant 0 : index
        %370 = vector.load %arg17[%c1_210, %c0_211, %c0_212] : memref<4x8x8xf32, #tpu.memory_space<vmem>>, vector<1x8x8xf32>
        %371 = vector.shape_cast %370 : vector<1x8x8xf32> to vector<8x8xf32>
        %372 = vector.shape_cast %369 : vector<8x8xf32> to vector<1x8x8xf32>
        tpu.vector_store %arg17[%c1_210, %c0_211, %c0_212], %372 {strides = array<i32>} : memref<4x8x8xf32, #tpu.memory_space<vmem>>, vector<1x8x8xf32>,
        %c1_213 = arith.constant 1 : index
        %c0_214 = arith.constant 0 : index
        %c0_215 = arith.constant 0 : index
        %373 = vector.load %arg15[%c1_213, %c0_214, %c0_215] : memref<4x8x1xf32, #tpu.memory_space<vmem>>, vector<1x8x1xf32>
        %374 = vector.shape_cast %373 : vector<1x8x1xf32> to vector<8x1xf32>
        %375 = vector.shape_cast %347 : vector<8x1xf32> to vector<1x8x1xf32>
        tpu.vector_store %arg15[%c1_213, %c0_214, %c0_215], %375 {strides = array<i32>} : memref<4x8x1xf32, #tpu.memory_space<vmem>>, vector<1x8x1xf32>,
        %376 = vector.extract_strided_slice %236 {offsets = [0, 16], sizes = [8, 8], strides = [1, 1]} : vector<8x32xbf16> to vector<8x8xbf16>
        %377 = vector.extract_strided_slice %289 {offsets = [0, 16], sizes = [8, 8], strides = [1, 1]} : vector<8x32xbf16> to vector<8x8xbf16>
        %cst_216 = arith.constant dense<0.000000e+00> : vector<8x8xf32>
        %378 = tpu.matmul %376, %377, %cst_216 {dimension_numbers = #tpu.dot_dimension_numbers<[1], [1], [0], [0], [0, 0, 1, 0], [], []>} : vector<8x8xbf16>, vector<8x8xbf16>, vector<8x8xf32> -> vector<8x8xf32>
        %379 = vector.broadcast %299 : vector<1x8xf32> to vector<8x8xf32>
        %380 = arith.addf %378, %379 : vector<8x8xf32>
        %c2_217 = arith.constant 2 : index
        %c0_218 = arith.constant 0 : index
        %c0_219 = arith.constant 0 : index
        %381 = vector.load %arg15[%c2_217, %c0_218, %c0_219] : memref<4x8x1xf32, #tpu.memory_space<vmem>>, vector<1x8x1xf32>
        %382 = vector.shape_cast %381 : vector<1x8x1xf32> to vector<8x1xf32>
        %cst_220 = arith.constant dense<0xFF800000> : vector<8xf32>
        %383 = vector.multi_reduction <maximumf>, %380, %cst_220 [1] : vector<8x8xf32> to vector<8xf32>
        %384 = vector.shape_cast %383 : vector<8xf32> to vector<8x1xf32>
        %385 = arith.maximumf %382, %384 : vector<8x1xf32>
        %386 = arith.subf %382, %385 : vector<8x1xf32>
        %387 = math.exp %386 : vector<8x1xf32>
        %388 = vector.broadcast %385 : vector<8x1xf32> to vector<8x8xf32>
        %389 = arith.subf %380, %388 : vector<8x8xf32>
        %390 = math.exp %389 : vector<8x8xf32>
        %c2_221 = arith.constant 2 : index
        %c0_222 = arith.constant 0 : index
        %c0_223 = arith.constant 0 : index
        %391 = vector.load %arg16[%c2_221, %c0_222, %c0_223] : memref<4x8x1xf32, #tpu.memory_space<vmem>>, vector<1x8x1xf32>
        %392 = vector.shape_cast %391 : vector<1x8x1xf32> to vector<8x1xf32>
        %393 = arith.mulf %387, %392 : vector<8x1xf32>
        %cst_224 = arith.constant dense<0.000000e+00> : vector<8xf32>
        %394 = vector.multi_reduction <add>, %390, %cst_224 [1] : vector<8x8xf32> to vector<8xf32>
        %395 = vector.shape_cast %394 : vector<8xf32> to vector<8x1xf32>
        %396 = arith.addf %393, %395 : vector<8x1xf32>
        %c2_225 = arith.constant 2 : index
        %c0_226 = arith.constant 0 : index
        %c0_227 = arith.constant 0 : index
        %397 = vector.load %arg16[%c2_225, %c0_226, %c0_227] : memref<4x8x1xf32, #tpu.memory_space<vmem>>, vector<1x8x1xf32>
        %398 = vector.shape_cast %397 : vector<1x8x1xf32> to vector<8x1xf32>
        %399 = vector.shape_cast %396 : vector<8x1xf32> to vector<1x8x1xf32>
        tpu.vector_store %arg16[%c2_225, %c0_226, %c0_227], %399 {strides = array<i32>} : memref<4x8x1xf32, #tpu.memory_space<vmem>>, vector<1x8x1xf32>,
        %c2_228 = arith.constant 2 : index
        %c0_229 = arith.constant 0 : index
        %c0_230 = arith.constant 0 : index
        %400 = vector.load %arg17[%c2_228, %c0_229, %c0_230] : memref<4x8x8xf32, #tpu.memory_space<vmem>>, vector<1x8x8xf32>
        %401 = vector.shape_cast %400 : vector<1x8x8xf32> to vector<8x8xf32>
        %402 = vector.broadcast %387 : vector<8x1xf32> to vector<8x8xf32>
        %403 = arith.mulf %402, %401 : vector<8x8xf32>
        %404 = arith.truncf %390 : vector<8x8xf32> to vector<8x8xbf16>
        %405 = vector.extract_strided_slice %291 {offsets = [0, 16], sizes = [8, 8], strides = [1, 1]} : vector<8x32xbf16> to vector<8x8xbf16>
        %cst_231 = arith.constant dense<0.000000e+00> : vector<8x8xf32>
        %406 = tpu.matmul %404, %405, %cst_231 {dimension_numbers = #tpu.dot_dimension_numbers<[1], [0], [0], [1], [0, 0, 1, 1], [], []>} : vector<8x8xbf16>, vector<8x8xbf16>, vector<8x8xf32> -> vector<8x8xf32>
        %407 = arith.addf %403, %406 : vector<8x8xf32>
        %c2_232 = arith.constant 2 : index
        %c0_233 = arith.constant 0 : index
        %c0_234 = arith.constant 0 : index
        %408 = vector.load %arg17[%c2_232, %c0_233, %c0_234] : memref<4x8x8xf32, #tpu.memory_space<vmem>>, vector<1x8x8xf32>
        %409 = vector.shape_cast %408 : vector<1x8x8xf32> to vector<8x8xf32>
        %410 = vector.shape_cast %407 : vector<8x8xf32> to vector<1x8x8xf32>
        tpu.vector_store %arg17[%c2_232, %c0_233, %c0_234], %410 {strides = array<i32>} : memref<4x8x8xf32, #tpu.memory_space<vmem>>, vector<1x8x8xf32>,
        %c2_235 = arith.constant 2 : index
        %c0_236 = arith.constant 0 : index
        %c0_237 = arith.constant 0 : index
        %411 = vector.load %arg15[%c2_235, %c0_236, %c0_237] : memref<4x8x1xf32, #tpu.memory_space<vmem>>, vector<1x8x1xf32>
        %412 = vector.shape_cast %411 : vector<1x8x1xf32> to vector<8x1xf32>
        %413 = vector.shape_cast %385 : vector<8x1xf32> to vector<1x8x1xf32>
        tpu.vector_store %arg15[%c2_235, %c0_236, %c0_237], %413 {strides = array<i32>} : memref<4x8x1xf32, #tpu.memory_space<vmem>>, vector<1x8x1xf32>,
        %414 = vector.extract_strided_slice %236 {offsets = [0, 24], sizes = [8, 8], strides = [1, 1]} : vector<8x32xbf16> to vector<8x8xbf16>
        %415 = vector.extract_strided_slice %289 {offsets = [0, 24], sizes = [8, 8], strides = [1, 1]} : vector<8x32xbf16> to vector<8x8xbf16>
        %cst_238 = arith.constant dense<0.000000e+00> : vector<8x8xf32>
        %416 = tpu.matmul %414, %415, %cst_238 {dimension_numbers = #tpu.dot_dimension_numbers<[1], [1], [0], [0], [0, 0, 1, 0], [], []>} : vector<8x8xbf16>, vector<8x8xbf16>, vector<8x8xf32> -> vector<8x8xf32>
        %417 = vector.broadcast %299 : vector<1x8xf32> to vector<8x8xf32>
        %418 = arith.addf %416, %417 : vector<8x8xf32>
        %c3_239 = arith.constant 3 : index
        %c0_240 = arith.constant 0 : index
        %c0_241 = arith.constant 0 : index
        %419 = vector.load %arg15[%c3_239, %c0_240, %c0_241] : memref<4x8x1xf32, #tpu.memory_space<vmem>>, vector<1x8x1xf32>
        %420 = vector.shape_cast %419 : vector<1x8x1xf32> to vector<8x1xf32>
        %cst_242 = arith.constant dense<0xFF800000> : vector<8xf32>
        %421 = vector.multi_reduction <maximumf>, %418, %cst_242 [1] : vector<8x8xf32> to vector<8xf32>
        %422 = vector.shape_cast %421 : vector<8xf32> to vector<8x1xf32>
        %423 = arith.maximumf %420, %422 : vector<8x1xf32>
        %424 = arith.subf %420, %423 : vector<8x1xf32>
        %425 = math.exp %424 : vector<8x1xf32>
        %426 = vector.broadcast %423 : vector<8x1xf32> to vector<8x8xf32>
        %427 = arith.subf %418, %426 : vector<8x8xf32>
        %428 = math.exp %427 : vector<8x8xf32>
        %c3_243 = arith.constant 3 : index
        %c0_244 = arith.constant 0 : index
        %c0_245 = arith.constant 0 : index
        %429 = vector.load %arg16[%c3_243, %c0_244, %c0_245] : memref<4x8x1xf32, #tpu.memory_space<vmem>>, vector<1x8x1xf32>
        %430 = vector.shape_cast %429 : vector<1x8x1xf32> to vector<8x1xf32>
        %431 = arith.mulf %425, %430 : vector<8x1xf32>
        %cst_246 = arith.constant dense<0.000000e+00> : vector<8xf32>
        %432 = vector.multi_reduction <add>, %428, %cst_246 [1] : vector<8x8xf32> to vector<8xf32>
        %433 = vector.shape_cast %432 : vector<8xf32> to vector<8x1xf32>
        %434 = arith.addf %431, %433 : vector<8x1xf32>
        %c3_247 = arith.constant 3 : index
        %c0_248 = arith.constant 0 : index
        %c0_249 = arith.constant 0 : index
        %435 = vector.load %arg16[%c3_247, %c0_248, %c0_249] : memref<4x8x1xf32, #tpu.memory_space<vmem>>, vector<1x8x1xf32>
        %436 = vector.shape_cast %435 : vector<1x8x1xf32> to vector<8x1xf32>
        %437 = vector.shape_cast %434 : vector<8x1xf32> to vector<1x8x1xf32>
        tpu.vector_store %arg16[%c3_247, %c0_248, %c0_249], %437 {strides = array<i32>} : memref<4x8x1xf32, #tpu.memory_space<vmem>>, vector<1x8x1xf32>,
        %c3_250 = arith.constant 3 : index
        %c0_251 = arith.constant 0 : index
        %c0_252 = arith.constant 0 : index
        %438 = vector.load %arg17[%c3_250, %c0_251, %c0_252] : memref<4x8x8xf32, #tpu.memory_space<vmem>>, vector<1x8x8xf32>
        %439 = vector.shape_cast %438 : vector<1x8x8xf32> to vector<8x8xf32>
        %440 = vector.broadcast %425 : vector<8x1xf32> to vector<8x8xf32>
        %441 = arith.mulf %440, %439 : vector<8x8xf32>
        %442 = arith.truncf %428 : vector<8x8xf32> to vector<8x8xbf16>
        %443 = vector.extract_strided_slice %291 {offsets = [0, 24], sizes = [8, 8], strides = [1, 1]} : vector<8x32xbf16> to vector<8x8xbf16>
        %cst_253 = arith.constant dense<0.000000e+00> : vector<8x8xf32>
        %444 = tpu.matmul %442, %443, %cst_253 {dimension_numbers = #tpu.dot_dimension_numbers<[1], [0], [0], [1], [0, 0, 1, 1], [], []>} : vector<8x8xbf16>, vector<8x8xbf16>, vector<8x8xf32> -> vector<8x8xf32>
        %445 = arith.addf %441, %444 : vector<8x8xf32>
        %c3_254 = arith.constant 3 : index
        %c0_255 = arith.constant 0 : index
        %c0_256 = arith.constant 0 : index
        %446 = vector.load %arg17[%c3_254, %c0_255, %c0_256] : memref<4x8x8xf32, #tpu.memory_space<vmem>>, vector<1x8x8xf32>
        %447 = vector.shape_cast %446 : vector<1x8x8xf32> to vector<8x8xf32>
        %448 = vector.shape_cast %445 : vector<8x8xf32> to vector<1x8x8xf32>
        tpu.vector_store %arg17[%c3_254, %c0_255, %c0_256], %448 {strides = array<i32>} : memref<4x8x8xf32, #tpu.memory_space<vmem>>, vector<1x8x8xf32>,
        %c3_257 = arith.constant 3 : index
        %c0_258 = arith.constant 0 : index
        %c0_259 = arith.constant 0 : index
        %449 = vector.load %arg15[%c3_257, %c0_258, %c0_259] : memref<4x8x1xf32, #tpu.memory_space<vmem>>, vector<1x8x1xf32>
        %450 = vector.shape_cast %449 : vector<1x8x1xf32> to vector<8x1xf32>
        %451 = vector.shape_cast %423 : vector<8x1xf32> to vector<1x8x1xf32>
        tpu.vector_store %arg15[%c3_257, %c0_258, %c0_259], %451 {strides = array<i32>} : memref<4x8x1xf32, #tpu.memory_space<vmem>>, vector<1x8x1xf32>,
      }
      %c0_137 = arith.constant 0 : index
      %c0_138 = arith.constant 0 : index
      %c0_139 = arith.constant 0 : index
      %243 = vector.load %arg17[%c0_137, %c0_138, %c0_139] : memref<4x8x8xf32, #tpu.memory_space<vmem>>, vector<1x8x8xf32>
      %244 = vector.shape_cast %243 : vector<1x8x8xf32> to vector<8x8xf32>
      %c0_140 = arith.constant 0 : index
      %c0_141 = arith.constant 0 : index
      %c0_142 = arith.constant 0 : index
      %245 = vector.load %arg16[%c0_140, %c0_141, %c0_142] : memref<4x8x1xf32, #tpu.memory_space<vmem>>, vector<1x8x1xf32>
      %246 = vector.shape_cast %245 : vector<1x8x1xf32> to vector<8x1xf32>
      %247 = tpu.reciprocal %246 {approx = true} : vector<8x1xf32> -> vector<8x1xf32>
      %248 = vector.broadcast %247 : vector<8x1xf32> to vector<8x8xf32>
      %249 = arith.mulf %244, %248 : vector<8x8xf32>
      %250 = arith.truncf %249 : vector<8x8xf32> to vector<8x8xbf16>
      %c1_143 = arith.constant 1 : index
      %c0_144 = arith.constant 0 : index
      %c0_145 = arith.constant 0 : index
      %251 = vector.load %arg17[%c1_143, %c0_144, %c0_145] : memref<4x8x8xf32, #tpu.memory_space<vmem>>, vector<1x8x8xf32>
      %252 = vector.shape_cast %251 : vector<1x8x8xf32> to vector<8x8xf32>
      %c1_146 = arith.constant 1 : index
      %c0_147 = arith.constant 0 : index
      %c0_148 = arith.constant 0 : index
      %253 = vector.load %arg16[%c1_146, %c0_147, %c0_148] : memref<4x8x1xf32, #tpu.memory_space<vmem>>, vector<1x8x1xf32>
      %254 = vector.shape_cast %253 : vector<1x8x1xf32> to vector<8x1xf32>
      %255 = tpu.reciprocal %254 {approx = true} : vector<8x1xf32> -> vector<8x1xf32>
      %256 = vector.broadcast %255 : vector<8x1xf32> to vector<8x8xf32>
      %257 = arith.mulf %252, %256 : vector<8x8xf32>
      %258 = arith.truncf %257 : vector<8x8xf32> to vector<8x8xbf16>
      %c2 = arith.constant 2 : index
      %c0_149 = arith.constant 0 : index
      %c0_150 = arith.constant 0 : index
      %259 = vector.load %arg17[%c2, %c0_149, %c0_150] : memref<4x8x8xf32, #tpu.memory_space<vmem>>, vector<1x8x8xf32>
      %260 = vector.shape_cast %259 : vector<1x8x8xf32> to vector<8x8xf32>
      %c2_151 = arith.constant 2 : index
      %c0_152 = arith.constant 0 : index
      %c0_153 = arith.constant 0 : index
      %261 = vector.load %arg16[%c2_151, %c0_152, %c0_153] : memref<4x8x1xf32, #tpu.memory_space<vmem>>, vector<1x8x1xf32>
      %262 = vector.shape_cast %261 : vector<1x8x1xf32> to vector<8x1xf32>
      %263 = tpu.reciprocal %262 {approx = true} : vector<8x1xf32> -> vector<8x1xf32>
      %264 = vector.broadcast %263 : vector<8x1xf32> to vector<8x8xf32>
      %265 = arith.mulf %260, %264 : vector<8x8xf32>
      %266 = arith.truncf %265 : vector<8x8xf32> to vector<8x8xbf16>
      %c3 = arith.constant 3 : index
      %c0_154 = arith.constant 0 : index
      %c0_155 = arith.constant 0 : index
      %267 = vector.load %arg17[%c3, %c0_154, %c0_155] : memref<4x8x8xf32, #tpu.memory_space<vmem>>, vector<1x8x8xf32>
      %268 = vector.shape_cast %267 : vector<1x8x8xf32> to vector<8x8xf32>
      %c3_156 = arith.constant 3 : index
      %c0_157 = arith.constant 0 : index
      %c0_158 = arith.constant 0 : index
      %269 = vector.load %arg16[%c3_156, %c0_157, %c0_158] : memref<4x8x1xf32, #tpu.memory_space<vmem>>, vector<1x8x1xf32>
      %270 = vector.shape_cast %269 : vector<1x8x1xf32> to vector<8x1xf32>
      %271 = tpu.reciprocal %270 {approx = true} : vector<8x1xf32> -> vector<8x1xf32>
      %272 = vector.broadcast %271 : vector<8x1xf32> to vector<8x8xf32>
      %273 = arith.mulf %268, %272 : vector<8x8xf32>
      %274 = arith.truncf %273 : vector<8x8xf32> to vector<8x8xbf16>
      %275 = tpu.concatenate %250, %258, %266, %274 in 1 : vector<8x8xbf16>, vector<8x8xbf16>, vector<8x8xbf16>, vector<8x8xbf16> -> vector<8x32xbf16>
      %c1_159 = arith.constant 1 : index
      %c0_160 = arith.constant 0 : index
      %c0_161 = arith.constant 0 : index
      %276 = vector.load %arg8[%c1_159, %c0_160, %c0_161] : memref<2x32x32xbf16, #tpu.memory_space<vmem>>, vector<1x32x32xbf16>
      %277 = vector.shape_cast %276 : vector<1x32x32xbf16> to vector<32x32xbf16>
      %cst_162 = arith.constant dense<0.000000e+00> : vector<8x32xf32>
      %278 = tpu.matmul %275, %277, %cst_162 {dimension_numbers = #tpu.dot_dimension_numbers<[1], [0], [0], [1], [0, 0, 1, 1], [], []>} : vector<8x32xbf16>, vector<32x32xbf16>, vector<8x32xf32> -> vector<8x32xf32>
      %c16_163 = arith.constant 16 : index
      %c0_164 = arith.constant 0 : index
      %279 = vector.load %arg11[%c16_163, %c0_164] : memref<24x32xf32, #tpu.memory_space<vmem>>, vector<8x32xf32>
      %280 = arith.addf %279, %278 : vector<8x32xf32>
      %281 = vector.broadcast %109 : vector<1x32xf32> to vector<8x32xf32>
      %282 = arith.addf %280, %281 : vector<8x32xf32>
      %c16_165 = arith.constant 16 : index
      %c0_166 = arith.constant 0 : index
      %283 = vector.load %arg11[%c16_165, %c0_166] : memref<24x32xf32, #tpu.memory_space<vmem>>, vector<8x32xf32>
      tpu.vector_store %arg11[%c16_165, %c0_166], %282 {strides = array<i32>} : memref<24x32xf32, #tpu.memory_space<vmem>>, vector<8x32xf32>,
    } else {
    }
    %c0_85 = arith.constant 0 : index
    %c0_86 = arith.constant 0 : index
    %159 = vector.load %arg11[%c0_85, %c0_86] : memref<24x32xf32, #tpu.memory_space<vmem>>, vector<24x32xf32>
    %c89 = arith.constant 89 : index
    %c0_87 = arith.constant 0 : index
    %160 = vector.load %arg4[%c89, %c0_87] : memref<158x32xf32, #tpu.memory_space<vmem>>, vector<1x32xf32>
    %c90 = arith.constant 90 : index
    %c0_88 = arith.constant 0 : index
    %161 = vector.load %arg4[%c90, %c0_88] : memref<158x32xf32, #tpu.memory_space<vmem>>, vector<1x32xf32>
    %cst_89 = arith.constant dense<0.000000e+00> : vector<24xf32>
    %162 = vector.multi_reduction <add>, %159, %cst_89 [1] : vector<24x32xf32> to vector<24xf32>
    %163 = vector.shape_cast %162 : vector<24xf32> to vector<24x1xf32>
    %cst_90 = arith.constant 3.200000e+01 : f32
    %164 = vector.broadcast %cst_90 : f32 to vector<24x1xf32>
    %165 = arith.divf %163, %164 : vector<24x1xf32>
    %166 = vector.broadcast %165 : vector<24x1xf32> to vector<24x32xf32>
    %167 = arith.subf %159, %166 : vector<24x32xf32>
    %168 = arith.mulf %167, %167 : vector<24x32xf32>
    %cst_91 = arith.constant dense<0.000000e+00> : vector<24xf32>
    %169 = vector.multi_reduction <add>, %168, %cst_91 [1] : vector<24x32xf32> to vector<24xf32>
    %170 = vector.shape_cast %169 : vector<24xf32> to vector<24x1xf32>
    %cst_92 = arith.constant 3.200000e+01 : f32
    %171 = vector.broadcast %cst_92 : f32 to vector<24x1xf32>
    %172 = arith.divf %170, %171 : vector<24x1xf32>
    %173 = vector.broadcast %165 : vector<24x1xf32> to vector<24x32xf32>
    %174 = arith.subf %159, %173 : vector<24x32xf32>
    %cst_93 = arith.constant 9.99999997E-7 : f32
    %175 = vector.broadcast %cst_93 : f32 to vector<24x1xf32>
    %176 = arith.addf %172, %175 : vector<24x1xf32>
    %177 = math.rsqrt %176 : vector<24x1xf32>
    %178 = vector.broadcast %177 : vector<24x1xf32> to vector<24x32xf32>
    %179 = arith.mulf %174, %178 : vector<24x32xf32>
    %180 = vector.broadcast %160 : vector<1x32xf32> to vector<24x32xf32>
    %181 = arith.mulf %179, %180 : vector<24x32xf32>
    %182 = vector.broadcast %161 : vector<1x32xf32> to vector<24x32xf32>
    %183 = arith.addf %181, %182 : vector<24x32xf32>
    %c33 = arith.constant 33 : index
    %c0_94 = arith.constant 0 : index
    %184 = vector.load %arg5[%c33, %c0_94] : memref<66x64xf32, #tpu.memory_space<vmem>>, vector<32x64xf32>
    %185 = arith.truncf %184 : vector<32x64xf32> to vector<32x64xbf16>
    %c65 = arith.constant 65 : index
    %c0_95 = arith.constant 0 : index
    %186 = vector.load %arg5[%c65, %c0_95] : memref<66x64xf32, #tpu.memory_space<vmem>>, vector<1x64xf32>
    %187 = arith.truncf %183 : vector<24x32xf32> to vector<24x32xbf16>
    %cst_96 = arith.constant dense<0.000000e+00> : vector<24x64xf32>
    %188 = tpu.matmul %187, %185, %cst_96 {dimension_numbers = #tpu.dot_dimension_numbers<[1], [0], [0], [1], [0, 0, 1, 1], [], []>} : vector<24x32xbf16>, vector<32x64xbf16>, vector<24x64xf32> -> vector<24x64xf32>
    %189 = vector.broadcast %186 : vector<1x64xf32> to vector<24x64xf32>
    %190 = arith.addf %188, %189 : vector<24x64xf32>
    %cst_97 = arith.constant 0.000000e+00 : f32
    %191 = vector.broadcast %cst_97 : f32 to vector<24x64xf32>
    %192 = arith.maximumf %190, %191 : vector<24x64xf32>
    %c92 = arith.constant 92 : index
    %c0_98 = arith.constant 0 : index
    %193 = vector.load %arg4[%c92, %c0_98] : memref<158x32xf32, #tpu.memory_space<vmem>>, vector<64x32xf32>
    %194 = arith.truncf %193 : vector<64x32xf32> to vector<64x32xbf16>
    %195 = arith.truncf %192 : vector<24x64xf32> to vector<24x64xbf16>
    %cst_99 = arith.constant dense<0.000000e+00> : vector<24x32xf32>
    %196 = tpu.matmul %195, %194, %cst_99 {dimension_numbers = #tpu.dot_dimension_numbers<[1], [0], [0], [1], [0, 0, 1, 1], [], []>} : vector<24x64xbf16>, vector<64x32xbf16>, vector<24x32xf32> -> vector<24x32xf32>
    %197 = arith.addf %159, %196 : vector<24x32xf32>
    %c91 = arith.constant 91 : index
    %c0_100 = arith.constant 0 : index
    %198 = vector.load %arg4[%c91, %c0_100] : memref<158x32xf32, #tpu.memory_space<vmem>>, vector<1x32xf32>
    %199 = vector.broadcast %198 : vector<1x32xf32> to vector<24x32xf32>
    %200 = arith.addf %197, %199 : vector<24x32xf32>
    %c0_101 = arith.constant 0 : index
    %c0_102 = arith.constant 0 : index
    %201 = vector.load %arg11[%c0_101, %c0_102] : memref<24x32xf32, #tpu.memory_space<vmem>>, vector<24x32xf32>
    tpu.vector_store %arg11[%c0_101, %c0_102], %200 {strides = array<i32>} : memref<24x32xf32, #tpu.memory_space<vmem>>, vector<24x32xf32>,
    %c0_103 = arith.constant 0 : index
    %c0_104 = arith.constant 0 : index
    %202 = vector.load %arg11[%c0_103, %c0_104] : memref<24x32xf32, #tpu.memory_space<vmem>>, vector<24x32xf32>
    %c156 = arith.constant 156 : index
    %c0_105 = arith.constant 0 : index
    %203 = vector.load %arg4[%c156, %c0_105] : memref<158x32xf32, #tpu.memory_space<vmem>>, vector<1x32xf32>
    %c157 = arith.constant 157 : index
    %c0_106 = arith.constant 0 : index
    %204 = vector.load %arg4[%c157, %c0_106] : memref<158x32xf32, #tpu.memory_space<vmem>>, vector<1x32xf32>
    %cst_107 = arith.constant dense<0.000000e+00> : vector<24xf32>
    %205 = vector.multi_reduction <add>, %202, %cst_107 [1] : vector<24x32xf32> to vector<24xf32>
    %206 = vector.shape_cast %205 : vector<24xf32> to vector<24x1xf32>
    %cst_108 = arith.constant 3.200000e+01 : f32
    %207 = vector.broadcast %cst_108 : f32 to vector<24x1xf32>
    %208 = arith.divf %206, %207 : vector<24x1xf32>
    %209 = vector.broadcast %208 : vector<24x1xf32> to vector<24x32xf32>
    %210 = arith.subf %202, %209 : vector<24x32xf32>
    %211 = arith.mulf %210, %210 : vector<24x32xf32>
    %cst_109 = arith.constant dense<0.000000e+00> : vector<24xf32>
    %212 = vector.multi_reduction <add>, %211, %cst_109 [1] : vector<24x32xf32> to vector<24xf32>
    %213 = vector.shape_cast %212 : vector<24xf32> to vector<24x1xf32>
    %cst_110 = arith.constant 3.200000e+01 : f32
    %214 = vector.broadcast %cst_110 : f32 to vector<24x1xf32>
    %215 = arith.divf %213, %214 : vector<24x1xf32>
    %216 = vector.broadcast %208 : vector<24x1xf32> to vector<24x32xf32>
    %217 = arith.subf %202, %216 : vector<24x32xf32>
    %cst_111 = arith.constant 9.99999997E-7 : f32
    %218 = vector.broadcast %cst_111 : f32 to vector<24x1xf32>
    %219 = arith.addf %215, %218 : vector<24x1xf32>
    %220 = math.rsqrt %219 : vector<24x1xf32>
    %221 = vector.broadcast %220 : vector<24x1xf32> to vector<24x32xf32>
    %222 = arith.mulf %217, %221 : vector<24x32xf32>
    %223 = vector.broadcast %203 : vector<1x32xf32> to vector<24x32xf32>
    %224 = arith.mulf %222, %223 : vector<24x32xf32>
    %225 = vector.broadcast %204 : vector<1x32xf32> to vector<24x32xf32>
    %226 = arith.addf %224, %225 : vector<24x32xf32>
    %c0_112 = arith.constant 0 : index
    %c0_113 = arith.constant 0 : index
    %c0_114 = arith.constant 0 : index
    %227 = vector.load %arg10[%c0_112, %c0_113, %c0_114] : memref<1x24x32xf32, #tpu.memory_space<vmem>>, vector<1x24x32xf32>
    %228 = vector.shape_cast %227 : vector<1x24x32xf32> to vector<24x32xf32>
    %229 = vector.shape_cast %226 : vector<24x32xf32> to vector<1x24x32xf32>
    tpu.vector_store %arg10[%c0_112, %c0_113, %c0_114], %229 {strides = array<i32>} : memref<1x24x32xf32, #tpu.memory_space<vmem>>, vector<1x24x32xf32>,
    return
  }
  func.func @transform_0(%arg0: i32, %arg1: memref<2xi32, #tpu.memory_space<smem>>) -> (i32, i32, i32) {
    %c0_i32 = arith.constant 0 : i32
    %c0_i32_0 = arith.constant 0 : i32
    %c0_i32_1 = arith.constant 0 : i32
    return %arg0, %c0_i32, %c0_i32_0 : i32, i32, i32
  }
  func.func @transform_1(%arg0: i32, %arg1: memref<2xi32, #tpu.memory_space<smem>>) -> (i32, i32) {
    %c0_i32 = arith.constant 0 : i32
    %c0_i32_0 = arith.constant 0 : i32
    %c0_i32_1 = arith.constant 0 : i32
    return %c0_i32, %c0_i32_0 : i32, i32
  }
  func.func @transform_2(%arg0: i32, %arg1: memref<2xi32, #tpu.memory_space<smem>>) -> (i32, i32) {
    %c0_i32 = arith.constant 0 : i32
    %c0_i32_0 = arith.constant 0 : i32
    %c0_i32_1 = arith.constant 0 : i32
    return %c0_i32, %c0_i32_0 : i32, i32
  }
  func.func @transform_3(%arg0: i32, %arg1: memref<2xi32, #tpu.memory_space<smem>>) -> (i32, i32) {
    %c0_i32 = arith.constant 0 : i32
    %c0_i32_0 = arith.constant 0 : i32
    %c0_i32_1 = arith.constant 0 : i32
    return %c0_i32, %c0_i32_0 : i32, i32
  }
  func.func @transform_4(%arg0: i32, %arg1: memref<2xi32, #tpu.memory_space<smem>>) -> (i32, i32, i32) {
    %c0_i32 = arith.constant 0 : i32
    %c0_i32_0 = arith.constant 0 : i32
    %c0_i32_1 = arith.constant 0 : i32
    %c0_i32_2 = arith.constant 0 : i32
    return %c0_i32, %c0_i32_0, %c0_i32_1 : i32, i32, i32
  }
  func.func @transform_5(%arg0: i32, %arg1: memref<2xi32, #tpu.memory_space<smem>>) -> (i32, i32, i32) {
    %c0_i32 = arith.constant 0 : i32
    %c0_i32_0 = arith.constant 0 : i32
    %c0_i32_1 = arith.constant 0 : i32
    %c0_i32_2 = arith.constant 0 : i32
    return %c0_i32, %c0_i32_0, %c0_i32_1 : i32, i32, i32
  }
  func.func @transform_6(%arg0: i32, %arg1: memref<2xi32, #tpu.memory_space<smem>>) -> (i32, i32, i32) {
    %c0_i32 = arith.constant 0 : i32
    %c0_i32_0 = arith.constant 0 : i32
    %c0_i32_1 = arith.constant 0 : i32
    %c0_i32_2 = arith.constant 0 : i32
    return %c0_i32, %c0_i32_0, %c0_i32_1 : i32, i32, i32
  }
  func.func @transform_7(%arg0: i32, %arg1: memref<2xi32, #tpu.memory_space<smem>>) -> (i32, i32, i32) {
    %c0_i32 = arith.constant 0 : i32
    %c0_i32_0 = arith.constant 0 : i32
    %c0_i32_1 = arith.constant 0 : i32
    return %arg0, %c0_i32, %c0_i32_0 : i32, i32, i32
  }
  func.func @transform_8(%arg0: i32, %arg1: memref<2xi32, #tpu.memory_space<smem>>) -> (i32, i32, i32) {
    %c0_i32 = arith.constant 0 : i32
    %c0_i32_0 = arith.constant 0 : i32
    %c0_i32_1 = arith.constant 0 : i32
    return %arg0, %c0_i32, %c0_i32_0 : i32, i32, i32
  }
}

</mosaic_0001>

<bundles_post_ra>
// kernel: tpu_custom_call.1
= control target key start
LH: loop header
LB: loop body
LE: loop exit
PB: predicated region body
PF: predicated region fallthrough
CT: control target
= control target key end

     0   :  { %s8646_s0 = inlined_call_operand.vmem [shape: s32[2], index: 0, kind: input, shape index: {}]   ;;  %s8647_s1 = inlined_call_operand.vmem [shape: f32[2,24,16], index: 1, kind: input, shape index: {}]   ;;  %s8648_s2 = inlined_call_operand.vmem [shape: f32[24,32], index: 2, kind: input, shape index: {}]   ;;  %s8649_s3 = inlined_call_operand.vmem [shape: f32[158,32], index: 3, kind: input, shape index: {}]   ;;  %s8650_s4 = inlined_call_operand.vmem [shape: f32[66,64], index: 4, kind: input, shape index: {}]   ;;  %s8651_s5 = inlined_call_operand.vmem [shape: bf16[2,32,96], index: 5, kind: input, shape index: {}]   ;;  %s8652_s6 = inlined_call_operand.vmem [shape: f32[2,1,96], index: 6, kind: input, shape index: {}]   ;;  %s8653_s7 = inlined_call_operand.vmem [shape: bf16[2,32,32], index: 7, kind: input, shape index: {}]   ;;  %s8654_s8 = inlined_call_operand.hbm [shape: f32[2,24,32], index: 8, kind: output, shape index: {0}]   ;;  %s8655_s9 = inlined_call_operand.hbm [shape: f32[2,24,32], index: 9, kind: output, shape index: {1}]  }
   0x1   :  { %s15_s11 = sshll.u32 %s8646_s0, 4  ;;  %s16_s11 = int_to_ptr.vmem [resolvable:$true] %s15_s11 }
   0x2   :  { %s6889_s12 = scalar_lea.vmem %s16_s11, 16  ;;  %p6894_p1 = scmp.lt.s32.totalorder %s16_s11, %s16_s11 }
   0x3   :  { %p6890_p0 = scmp.ne.s32.totalorder %s16_s11, %s6889_s12  ;;  %p6895_p2 = scmp.lt.s32.totalorder %s6889_s12, %s6889_s12 }
   0x5   :  { %p6896_p3 = por %p6895_p2, %p6894_p1 }
   0x7   :  { %p6897_p4 = pnand %p6896_p3, %p6890_p0 }
   0x9   :  { %6900 = shalt.err (!%p6897_p4)  }
   0xa   :  { %s7047_s13 = smov [#allocation10]  }
   0xb   :  { %18 = dma.vmem_to_smem %s16_s11, 16, %s7047_s13, [#allocation9] }
   0xc   :  { %6997 = dma.done.wait [#allocation9], 16 }
   0xd   :  { %6998 = vsyncadd [#allocation9], 4294967280 }
   0xe   :  { %20 = sfence }
   0xf   :  { %21 = vsyncpa [#allocation12], 0 }
  0x10   :  { %23 = vsyncpa [#allocation12 + $0x1], 0 }
  0x11   :  { %24 = vsyncpa [#allocation14], 0 }
  0x12   :  { %26 = vsyncpa [#allocation14 + $0x1], 0  ;;  %s7188_s14 = smov 0   ;;  %s7190_s0 = smov 0  }
  0x13   :  { %s7192_s15 = smov 0   ;;  %s7194_s16 = smov 0  }
  0x14 LB: > { %s7209_s17 = sadd.s32 4294967295, %s7021_s16   ;;  %s5731_s18 = sadd.s32 4294967294, %s7021_s16   ;;  %s7021_s16 = sphi %s7194_s16, %s8669_s16   ;;  %s7017_s15 = sphi %s7192_s15, %s8668_s15   ;;  %s7013_s0 = sphi %s7190_s0, %s8667_s0   ;;  %s7009_s14 = sphi %s7188_s14, %s8666_s14  }
  0x15   : > { %s7213_s19 = sadd.s32 1, %s7021_s16   ;;  %s191_s20 = sadd.s32 1, %s7017_s15 }
  0x16   : > { %s188_s21 = ssub.s32 %s7021_s16, %s7213_s19  ;;  %p201_p5 = scmp.ne.s32.totalorder %s7017_s15, %s7013_s0 }
  0x17   : > { %p189_p6 = scmp.eq.s32.totalorder %s188_s21, 0  ;;  %p202_p7 = scmp.eq.s32.totalorder %s7209_s17, 1 }
  0x18   : > { %p207_p8 = scmp.ne.s32.totalorder %s7013_s0, %s7009_s14  ;;  %p208_p9 = scmp.eq.s32.totalorder %s5731_s18, 1 }
  0x19   : > { %s7224_s22 = scalar_select %p189_p6, %s7017_s15, %s191_s20  }
  0x1a   : > { %p7226_p10 = por %p202_p7, %p201_p5  ;;  %p7230_p11 = por %p208_p9, %p207_p8 }
  0x1b   : > { %p5734_p12 = scmp.ge.s32.totalorder %s7021_s16, 1  ;;  %p278_p13 = scmp.lt.s32.totalorder %s7021_s16, 3 }
  0x1d   : > { %p279_p0 = pnand %p5734_p12, %p278_p13 }
  0x1e   : > { %s323_s25 = sld [smem:[#allocation10 + %s7209_s17]] (!%p279_p0)  ;;  %v338_v0 = vld [vmem:[%s8649_s3] sm:$0xff] (!%p279_p0)  ;;  %v339_v1 = vld [vmem:[%s8649_s3 + $0x8] sm:$0xff] (!%p279_p0)  ;;  %v7048_v2 = vmov (!%p279_p0), 0.0|0.0   ;;  %vm7049_vm0 = vmmov (!%p279_p0), 0   ;;  %v7050_v4 = vmov (!%p279_p0), 0.0  }
  0x1f   : > { %282 = sbr.rel (%p279_p0) target bundleno = 14037 (0x36d5), region = 48  ;;  %6478 = vmatprep.subr.bf16.mxu0 (!%p279_p0), %v7048_v2  ;;  %v6479_v3 = vpack.c.bf16 (!%p279_p0), %v339_v1, %v338_v0  ;;  %6077 = vmatprep.mubr.msk.f32.mxu0 (!%p279_p0), %vm7049_vm0, %v7050_v4  ;;  %p317_p1 = scmp.lt.s32.totalorder (!%p279_p0), %s7209_s17, 1  ;;  %vm343_vm1 = vcmask (!%p279_p0), 130048   ;;  %v340_v8 = vld [vmem:[%s8648_s2] sm:$0xff] (!%p279_p0)  ;;  %vm433_vm2 = vcmask (!%p279_p0), 261120   ;;  %v341_v12 = vld [vmem:[%s8648_s2 + $0x8] sm:$0xff] (!%p279_p0) }
  0x20   : > { %s7246_s30 = sand.u32 (!%p279_p0), 1, %s7013_s0   ;;  %v342_v16 = vld [vmem:[%s8648_s2 + $0x10] sm:$0xff] (!%p279_p0)  ;;  %v6663_v42 = vld [vmem:[%s8651_s5] sm:$0xff] (!%p279_p0)   ;;  %v6664_v43 = vld [vmem:[%s8651_s5 + $0x8] sm:$0xff] (!%p279_p0)   ;;  %vm592_vm3 = vcmask (!%p279_p0), 257024   ;;  %s8658_s13 = smov (!%p279_p0), 96  }
  0x21   : > { %s6481_s10 = smul.u32 (!%p279_p0), 24, %s7246_s30  ;;  %6480 = vmatpush3.bf16.msra.mxu0 (!%p279_p0), %v6479_v3  ;;  %v7294_v41 = vld [vmem:[%s8649_s3 + $0x12] sm:$0x1] (!%p279_p0)  ;;  %6086 = vmatprep.subr.bf16.mxu1 (!%p279_p0), %v6663_v42  ;;  %v5745_v55 = vld [vmem:[%s8649_s3 + $0x10] ss:$0 sm:$0xff] (!%p279_p0)  ;;  %s8656_s18 = smov (!%p279_p0), 64  }
  0x22   : > { %6087 = vmatpush3.bf16.msra.mxu1 (!%p279_p0), %v6663_v42  ;;  %v5746_v59 = vld [vmem:[%s8649_s3 + $0x11] ss:$0 sm:$0xff] (!%p279_p0) }
  0x23   : > { %6088 = vmatprep.subr.bf16.mxu1 (!%p279_p0), %v6664_v43 }
  0x24   : > { %p324_p2 = scmp.lt.s32.totalorder (!%p279_p0), %s323_s25, 24  ;;  %p5736_p3 = scmp.gt.s32.totalorder (!%p279_p0), %s323_s25, 1 }
  0x26   : > { %s318_s11 = scalar_select %p317_p1, %s7209_s17, 1  ;;  %6089 = vmatpush3.bf16.msra.mxu1 %v6664_v43 }
  0x27   : > { %s8671_s25 = smov (!%p324_p2, %s323_s25), 24 }
  0x28   : > { %s6482_s12 = smul.u32 24, %s318_s11  ;;  %s8673_s25 = smov (!%p5736_p3, %s8671_s25), 1 }
  0x29   : > { %s328_s21 = sadd.s32 7, %s8673_s25  ;;  %p5755_p5 = scmp.le.s32.totalorder %s8673_s25, 0 }
  0x2a   : > { %s321_s20 = scalar_lea.vmem %s8647_s1, %s6482_s12  ;;  %p329_p4 = scmp.lt.s32.totalorder %s328_s21, 0  ;;  %vm624_vm4 = vcmask (!%p5755_p5), 7168   ;;  %vm633_vm5 = vcmask (!%p5755_p5), 64512  }
  0x2b   : > { %v335_v5 = vld [vmem:[%s321_s20] sm:$0xff]  ;;  %v336_v6 = vld [vmem:[%s321_s20 + $0x8] sm:$0xff]  ;;  %s330_s26 = ssub.s32 0, %s328_s21  ;;  %v337_v7 = vld [vmem:[%s321_s20 + $0x10] sm:$0xff]  ;;  %s7271_s20 = scalar_lea.vmem [#allocation11], %s6481_s10 }
  0x2c   : > { %6078 = vmatmul.mubr.msk.f32.vlgmr.msra.gmra.mrb[0].mxu0 %vm343_vm1, %v335_v5  ;;  %s5741_s27 = smin.u32 %s330_s26, %s328_s21  ;;  %v5747_v5 = vld [vmem:[%s8652_s6] ss:$0 sm:$0xff]  ;;  %s7330_s21 = scalar_lea.vmem [#allocation13], %s6481_s10 }
  0x2d   : > { %6080 = vmatprep.mubr.msk.f32.mxu0 %vm7049_vm0, %v7050_v4  ;;  %s332_s28 = sshrl.u32 %s5741_s27, 3 }
  0x2e   : > { %s333_s29 = ssub.s32 0, %s332_s28 }
  0x2f   : > { %s8675_s29 = smov (!%p329_p4, %s333_s29), %s332_s28 }
  0x30   : > { %6081 = vmatmul.mubr.msk.f32.gmra.mrb[2].mxu0 %vm343_vm1, %v336_v6  ;;  %p5756_p6 = scmp.le.s32.totalorder (!%p5755_p5), %s8675_s29, 0 }
  0x31   : > { %6083 = vmatprep.mubr.msk.f32.mxu0 %vm7049_vm0, %v7050_v4 }
  0x34   : > { %6084 = vmatmul.mubr.msk.f32.gmra.mrb[4].mxu0 %vm343_vm1, %v337_v7 }
  0xff   : > { %v419_v9 = vpop.f32.mrb[0].mxu0 }
 0x100   : > { %v420_v10 = vadd.f32 %v419_v9, %v340_v8  ;;  %v6079_v11 = vpop.f32.mrb[1].mxu0 }
 0x102   : > { %434 = vst.msk [vmem:[%s7271_s20] sm:$0xff] %vm433_vm2, %v420_v10  ;;  %437 = vst.msk [vmem:[#allocation2] sm:$0xff] %vm433_vm2, %v420_v10 }
 0x103   : > { %v424_v13 = vpop.f32.mrb[2].mxu0 }
 0x104   : > { %v425_v14 = vadd.f32 %v424_v13, %v341_v12  ;;  %v6082_v15 = vpop.f32.mrb[3].mxu0 }
 0x106   : > { %435 = vst.msk [vmem:[%s7271_s20 + $0x8] sm:$0xff] %vm433_vm2, %v425_v14  ;;  %438 = vst.msk [vmem:[#allocation2 + $0x8] sm:$0xff] %vm433_vm2, %v425_v14 }
 0x107   : > { %v429_v17 = vpop.f32.mrb[4].mxu0 }
 0x108   : > { %v430_v18 = vadd.f32 %v429_v17, %v342_v16  ;;  %v6085_v19 = vpop.f32.mrb[5].mxu0 }
 0x109   : > { %v441_v20 = vld [vmem:[#allocation2] sm:$0xff] }
 0x10a   : > { %436 = vst.msk [vmem:[%s7271_s20 + $0x10] sm:$0xff] %vm433_vm2, %v430_v18  ;;  %439 = vst.msk [vmem:[#allocation2 + $0x10] sm:$0xff] %vm433_vm2, %v430_v18  ;;  %v446_v21 = vsel %vm433_vm2, %v441_v20, 0.0 }
 0x10b   : > { %447 = vadd.xlane.f32.xlu0 %v446_v21 }
 0x10d   : > { %v442_v22 = vld [vmem:[#allocation2 + $0x8] sm:$0xff] }
 0x10e   : > { %v449_v23 = vsel %vm433_vm2, %v442_v22, 0.0 }
 0x10f   : > { %450 = vadd.xlane.f32.xlu0 %v449_v23  ;;  %v7053_v23 = vmov (!%p5755_p5), -inf  }
 0x110   : > { %625 = vst.msk [vmem:[#allocation6] sm:$0xff] (!%p5755_p5), %vm624_vm4, %v7053_v23  ;;  %626 = vst.msk [vmem:[#allocation6 + $0x8] sm:$0xff] (!%p5755_p5), %vm624_vm4, %v7053_v23 }
 0x111   : > { %v443_v24 = vld [vmem:[#allocation2 + $0x10] sm:$0xff]  ;;  %627 = vst.msk [vmem:[#allocation6 + $0x10] sm:$0xff] (!%p5755_p5), %vm624_vm4, %v7053_v23  ;;  %628 = vst.msk [vmem:[#allocation6 + $0x18] sm:$0xff] (!%p5755_p5), %vm624_vm4, %v7053_v23 }
 0x112   : > { %v452_v25 = vsel %vm433_vm2, %v443_v24, 0.0 }
 0x113   : > { %453 = vadd.xlane.f32.xlu1 %v452_v25 }
 0x198   : > { %v448_v26 = vpop.xlane.xlu0 %447 }
 0x199   : > { %v456_v27 = vmul.f32 0.03125, %v448_v26 }
 0x19b   : > { %v459_v28 = vsub.f32 %v441_v20, %v456_v27 }
 0x19c   : > { %v451_v29 = vpop.xlane.xlu0 %450 }
 0x19d   : > { %v457_v30 = vmul.f32 0.03125, %v451_v29  ;;  %v462_v31 = vmul.f32 %v459_v28, %v459_v28 }
 0x19f   : > { %v460_v32 = vsub.f32 %v442_v22, %v457_v30  ;;  %v465_v33 = vsel %vm433_vm2, %v462_v31, 0.0 }
 0x1a0   : > { %466 = vadd.xlane.f32.xlu1 %v465_v33  ;;  %v454_v34 = vpop.xlane.xlu1 %453 }
 0x1a1   : > { %v458_v35 = vmul.f32 0.03125, %v454_v34  ;;  %v463_v36 = vmul.f32 %v460_v32, %v460_v32 }
 0x1a3   : > { %v461_v37 = vsub.f32 %v443_v24, %v458_v35  ;;  %v468_v38 = vsel %vm433_vm2, %v463_v36, 0.0  ;;  %v7054_v24 = vmov (!%p5755_p5), 0.0  }
 0x1a4   : > { %469 = vadd.xlane.f32.xlu0 %v468_v38  ;;  %629 = vst.msk [vmem:[#allocation7] sm:$0xff] (!%p5755_p5), %vm624_vm4, %v7054_v24  ;;  %630 = vst.msk [vmem:[#allocation7 + $0x8] sm:$0xff] (!%p5755_p5), %vm624_vm4, %v7054_v24 }
 0x1a5   : > { %v464_v39 = vmul.f32 %v461_v37, %v461_v37  ;;  %631 = vst.msk [vmem:[#allocation7 + $0x10] sm:$0xff] (!%p5755_p5), %vm624_vm4, %v7054_v24  ;;  %632 = vst.msk [vmem:[#allocation7 + $0x18] sm:$0xff] (!%p5755_p5), %vm624_vm4, %v7054_v24 }
 0x1a6   : > { %634 = vst.msk [vmem:[#allocation8] sm:$0xff] (!%p5755_p5), %vm633_vm5, %v7054_v24  ;;  %635 = vst.msk [vmem:[#allocation8 + $0x8] sm:$0xff] (!%p5755_p5), %vm633_vm5, %v7054_v24 }
 0x1a7   : > { %v471_v40 = vsel %vm433_vm2, %v464_v39, 0.0  ;;  %636 = vst.msk [vmem:[#allocation8 + $0x10] sm:$0xff] (!%p5755_p5), %vm633_vm5, %v7054_v24  ;;  %637 = vst.msk [vmem:[#allocation8 + $0x18] sm:$0xff] (!%p5755_p5), %vm633_vm5, %v7054_v24 }
 0x1a8   : > { %472 = vadd.xlane.f32.xlu1 %v471_v40 }
 0x22d   : > { %v467_v44 = vpop.xlane.xlu1 %466 }
 0x22e   : > { %v474_v45 = vmul.f32 0.03125, %v467_v44 }
 0x230   : > { %v477_v46 = vadd.f32 1e-06, %v474_v45 }
 0x231   : > { %v470_v47 = vpop.xlane.xlu0 %469 }
 0x232   : > { %6665 = vrsqrt.f32 %v477_v46  ;;  %v475_v48 = vmul.f32 0.03125, %v470_v47 }
 0x234   : > { %v478_v49 = vadd.f32 1e-06, %v475_v48 }
 0x235   : > { %v473_v50 = vpop.xlane.xlu1 %472 }
 0x236   : > { %6667 = vrsqrt.f32 %v478_v49  ;;  %v476_v51 = vmul.f32 0.03125, %v473_v50 }
 0x238   : > { %v479_v52 = vadd.f32 1e-06, %v476_v51 }
 0x23a   : > { %6669 = vrsqrt.f32 %v479_v52 }
 0x23c   : > { %v6666_v53 = vpop.eup %6665 }
 0x23d   : > { %v483_v54 = vmul.f32 %v6666_v53, %v459_v28 }
 0x23f   : > { %v490_v58 = vmul.f32 %v5745_v55, %v483_v54 }
 0x240   : > { %v6668_v56 = vpop.eup %6667 }
 0x241   : > { %v484_v57 = vmul.f32 %v6668_v56, %v460_v32  ;;  %v497_v62 = vadd.f32 %v5746_v59, %v490_v58 }
 0x243   : > { %v491_v60 = vmul.f32 %v5745_v55, %v484_v57 }
 0x244   : > { %v6670_v61 = vpop.eup %6669 }
 0x245   : > { %v498_v63 = vadd.f32 %v5746_v59, %v491_v60  ;;  %v485_v0 = vmul.f32 %v6670_v61, %v461_v37 }
 0x247   : > { %v500_v1 = vpack.c.bf16 %v498_v63, %v497_v62  ;;  %v492_v2 = vmul.f32 %v5745_v55, %v485_v0 }
 0x249   : > { %6090 = vmatprep.mubr.msk.bf16.mxu1 %vm433_vm2, %v500_v1  ;;  %v499_v3 = vadd.f32 %v5746_v59, %v492_v2 }
 0x24b   : > { %v501_v4 = vpack.c.bf16 %v499_v3, %v499_v3 }
 0x24d   : > { %6091 = vmatmul.mubr.msk.bf16.vlgmr.msra.gmra.mrb[0].mxu1 %vm433_vm2, %v501_v4 }
 0x320   : > { %v6092_v6 = vpop.f32.mrb[0].mxu1 }
 0x321   : > { %v574_v7 = vadd.f32 %v6092_v6, %v5747_v5  ;;  %v565_v8 = vpop.f32.mrb[1].mxu1 }
 0x322   : > { %v566_v9 = vadd.f32 %v5747_v5, %v565_v8  ;;  %v6093_v10 = vpop.f32.mrb[2].mxu1 }
 0x323   : > { %v5922_v11 = vpack.c.bf16 %v574_v7, %v574_v7  ;;  %v568_v12 = vpop.f32.mrb[3].mxu1 }
 0x324   : > { %v5920_v13 = vpack.c.bf16 %v566_v9, %v566_v9  ;;  %v569_v14 = vadd.f32 %v5747_v5, %v568_v12 }
 0x325   : > { %595 = vst.msk [vmem:[#allocation3 + $0x8] sm:$0xf] %vm592_vm3, %v5922_v11  ;;  %600 = vrot.lane.b32.xlu1 %v5922_v11, %s8658_s13 }
 0x326   : > { %593 = vst.msk [vmem:[#allocation3] sm:$0xf] %vm592_vm3, %v5920_v13  ;;  %v5921_v15 = vpack.c.bf16 %v569_v14, %v569_v14  ;;  %596 = vrot.lane.b32.xlu0 %v5920_v13, %s8658_s13 }
 0x328   : > { %594 = vst.msk [vmem:[#allocation3 + $0x4] sm:$0xf] %vm592_vm3, %v5921_v15 }
 0x329   : > { %608 = vrot.lane.b32.xlu1 %v5920_v13, %s8656_s18 }
 0x32a   : > { %610 = vrot.lane.b32.xlu0 %v5921_v15, %s8656_s18 }
 0x32d   : > { %598 = vrot.lane.b32.xlu1 %v5921_v15, %s8658_s13  ;;  %v7335_v22 = vld [vmem:[#allocation3] sm:$0xf] (!%p5755_p5) }
 0x331   : > { %612 = vrot.lane.b32.xlu1 %v5922_v11, %s8656_s18 }
 0x397   : > { %v601_v16 = vpop.permute.xlu1 %600 }
 0x398   : > { %607 = vst.msk [vmem:[#allocation4 + $0x8] sm:$0xf] %vm592_vm3, %v601_v16  ;;  %v597_v17 = vpop.permute.xlu0 %596 }
 0x399   : > { %605 = vst.msk [vmem:[#allocation4] sm:$0xf] %vm592_vm3, %v597_v17 }
 0x39b   : > { %v609_v18 = vpop.permute.xlu1 %608 }
 0x39c   : > { %617 = vst.msk [vmem:[#allocation5] sm:$0xf] %vm592_vm3, %v609_v18  ;;  %v611_v19 = vpop.permute.xlu0 %610 }
 0x39d   : > { %618 = vst.msk [vmem:[#allocation5 + $0x4] sm:$0xf] %vm592_vm3, %v611_v19 }
 0x39e   : > { %623 = sbr.rel (%p5755_p5) target bundleno = 2689 (0xa81), region = 52 }
 0x39f   : > { %v599_v20 = vpop.permute.xlu1 %598 }
 0x3a0   : > { %606 = vst.msk [vmem:[#allocation4 + $0x4] sm:$0xf] %vm592_vm3, %v599_v20 }
 0x3a3   : > { %v613_v21 = vpop.permute.xlu1 %612 }
 0x3a4   : > { %619 = vst.msk [vmem:[#allocation5 + $0x8] sm:$0xf] %vm592_vm3, %v613_v21 }
 0x3a5   : > { %5673 = sbr.rel (%p5756_p6) target bundleno = 2207 (0x89f), region = 267  ;;  %s7358_s10 = smov (!%p5756_p6), 0  }
 0x3ac LB: >> { %v7055_v25 = vmov 0.0   ;;  %vm7056_vm6 = vmmov 0   ;;  %s5757_s26 = sshll.u32 %s7025_s10, 3  ;;  %v654_v28 = vlaneseq  ;;  %v658_v32 = vstv %s8673_s25  ;;  %s7058_s12 = smov 120   ;;  %v7395_v44 = vld [vmem:[#allocation6] sm:$0xff]  ;;  %v845_v23 = vld [vmem:[#allocation6 + $0x8] sm:$0xff]  ;;  %s7025_s10 = sphi %s7358_s10, %s642_s10  }
 0x3ad   : >> { %6094 = vmatprep.subr.bf16.mxu0 %v7055_v25  ;;  %6096 = vmatprep.mubr.msk.bf16.mxu0 %vm7056_vm6, %v7055_v25  ;;  %s7370_s27 = sshra.s32 %s5757_s26, 3  ;;  %v656_v30 = vstv %s5757_s26  ;;  %v7057_v40 = vmov 0   ;;  %v5762_v43 = vcombine.low %v7335_v22, %v7335_v22  ;;  %s7059_s26 = smov 112   ;;  %vm741_vm8 = vcmask 1043456  }
 0x3ae   : >> { %6100 = vmatprep.subr.bf16.mxu1 %v7055_v25  ;;  %6102 = vmatprep.mubr.msk.bf16.mxu1 %vm7056_vm6, %v7055_v25  ;;  %s5758_s28 = sshll.u32 %s7370_s27, 2  ;;  %v655_v29 = vand.u32 127, %v654_v28  ;;  %s642_s10 = sadd.s32 1, %s7025_s10  }
 0x3af   : >> { %s649_s11 = scalar_lea.vmem [#allocation4], %s5758_s28  ;;  %6671 = vset.pattern.permute.xlu0 %v7057_v40  ;;  %6672 = vset.pattern.permute.xlu1 %v7057_v40  ;;  %s652_s18 = scalar_lea.vmem [#allocation5], %s5758_s28 }
 0x3b0   : >> { %v650_v26 = vld [vmem:[%s649_s11] sm:$0xf]  ;;  %v657_v31 = vadd.s32 %v656_v30, %v655_v29  ;;  %s7060_s11 = smov 104   ;;  %v983_v30 = vld [vmem:[#allocation6 + $0x10] sm:$0xff]  ;;  %p641_p7 = scmp.ge.s32.totalorder %s642_s10, %s8675_s29 }
 0x3b1   : >> { %v665_v27 = vsel %vm633_vm5, %v650_v26, 0  ;;  %v5763_v42 = vcombine.low %v650_v26, %v650_v26  ;;  %v7407_v48 = vld [vmem:[%s652_s18] sm:$0xf] }
 0x3b2   : >> { %6095 = vmatpush3.bf16.xpose.msra.mxu0 %v665_v27  ;;  %vm659_vm7 = vcmp.ge.s32.totalorder %v657_v31, %v658_v32  ;;  %v743_v49 = vsel %vm741_vm8, %v7407_v48, 0 }
 0x3b3   : >> { %6112 = vmatprep.subr.bf16.mxu0 %v7055_v25  ;;  %v7383_v33 = vsel %vm659_vm7, -1e+09, %v7055_v25  ;;  %796 = vrot.lane.b32.xlu1 %v5763_v42, %s7058_s12 }
 0x3b4   : >> { %6101 = vmatpush3.bf16.msra.mxu1 %v743_v49 }
 0x3b5   : >> { %6106 = vmatprep.subr.bf16.mxu1 %v7055_v25 }
 0x3b7   : >> { %791 = vrot.lane.b32.xlu1 %v5762_v43, %s7058_s12 }
 0x3b9   : >> { %6097 = vmatmul.mubr.msk.bf16.vlgmr.msra.gmra.mrb[0].mxu0 %vm633_vm5, %v7335_v22 }
 0x3ba   : >> { %6114 = vmatprep.mubr.msk.bf16.mxu0 %vm7056_vm6, %v7055_v25 }
 0x3bb   : >> { %934 = vrot.lane.b32.xlu1 %v5763_v42, %s7059_s26 }
 0x3bf   : >> { %932 = vrot.lane.b32.xlu1 %v5762_v43, %s7059_s26 }
 0x3c3   : >> { %1069 = vrot.lane.b32.xlu1 %v5763_v42, %s7060_s11 }
 0x3c7   : >> { %1067 = vrot.lane.b32.xlu1 %v5762_v43, %s7060_s11 }
 0x425   : >> { %v797_v53 = vpop.permute.xlu1 %796 }
 0x426   : >> { %v802_v56 = vsel %vm633_vm5, %v797_v53, 0 }
 0x429   : >> { %v792_v54 = vpop.permute.xlu1 %791 }
 0x42d   : >> { %v935_v58 = vpop.permute.xlu1 %934 }
 0x42e   : >> { %v940_v60 = vsel %vm633_vm5, %v935_v58, 0 }
 0x431   : >> { %v933_v59 = vpop.permute.xlu1 %932 }
 0x435   : >> { %v1070_v61 = vpop.permute.xlu1 %1069 }
 0x436   : >> { %v1075_v62 = vsel %vm633_vm5, %v1070_v61, 0 }
 0x439   : >> { %v1068_v63 = vpop.permute.xlu1 %1067 }
 0x48c   : >> { %v701_v34 = vpop.f32.mrb[0].mxu0 }
 0x48d   : >> { %v702_v35 = vadd.f32 %v701_v34, %v7383_v33  ;;  %v6098_v36 = vpop.f32.mrb[1].mxu0 }
 0x48e   : >> { %v704_v37 = vpop.f32.mrb[2].mxu0  ;;  %v1118_v36 = vld [vmem:[#allocation6 + $0x18] sm:$0xff] }
 0x48f   : >> { %v6099_v38 = vpop.f32.mrb[3].mxu0  ;;  %v708_v39 = vsel %vm633_vm5, %v702_v35, -inf }
 0x490   : >> { %709 = vmax.xlane.f32.xlu0 %v708_v39  ;;  %v5765_v39 = vcombine.low %v7407_v48, %v7407_v48 }
 0x51d   : >> { %v710_v45 = vpop.xlane.xlu0 %709 }
 0x51e   : >> { %v7398_v46 = vmax.f32 %v7395_v44, %v710_v45 }
 0x520   : >> { %v712_v47 = vsub.f32 %v7395_v44, %v7398_v46  ;;  %787 = vst.msk [vmem:[#allocation6] sm:$0xff] %vm624_vm4, %v7398_v46  ;;  %717 = vperm.xlu0 %6671, %v7398_v46  }
 0x522   : >> { %v713_v26 = vmul.f32 1.442695, %v712_v47 }
 0x59f   : >> { %v718_v50 = vpop.permute.xlu0 %717 }
 0x5a0   : >> { %v720_v51 = vsub.f32 %v702_v35, %v718_v50 }
 0x5a2   : >> { %v721_v52 = vmul.f32 1.442695, %v720_v51  ;;  %v730_v51 = vld [vmem:[#allocation8] sm:$0xff] }
 0x5a4   : >> { %6675 = vpow2.f32 %v721_v52 }
 0x5a5   : >> { %6677 = vpow2.f32 %v713_v26 }
 0x5ae   : >> { %v7412_v55 = vpop.eup %6675 }
 0x5af   : >> { %v737_v57 = vpack.c.bf16 %v7412_v55, %v7412_v55  ;;  %v7441_v35 = vpop.eup %6677  ;;  %v725_v43 = vsel %vm633_vm5, %v7412_v55, 0.0 }
 0x5b1   : >> { %6103 = vmatmul.mubr.msk.bf16.vlgmr.msra.gmra.mrb[0].mxu1 %vm633_vm5, %v737_v57 }
 0x5b2   : >> { %6107 = vmatpush3.bf16.xpose.msra.mxu1 %v802_v56  ;;  %6108 = vmatprep.mubr.msk.bf16.mxu1 %vm7056_vm6, %v7055_v25 }
 0x5b3   : >> { %6118 = vmatprep.subr.bf16.mxu1 %v7055_v25 }
 0x5b9   : >> { %6109 = vmatmul.mubr.msk.bf16.vlgmr.msra.gmra.mrb[4].mxu1 %vm633_vm5, %v792_v54 }
 0x5ba   : >> { %6119 = vmatpush3.bf16.xpose.msra.mxu1 %v940_v60  ;;  %6120 = vmatprep.mubr.msk.bf16.mxu1 %vm7056_vm6, %v7055_v25 }
 0x5bb   : >> { %6130 = vmatprep.subr.bf16.mxu1 %v7055_v25 }
 0x5c1   : >> { %6121 = vmatmul.mubr.msk.bf16.vlgmr.msra.gmra.mrb[8].mxu1 %vm633_vm5, %v933_v59 }
 0x5c2   : >> { %6131 = vmatpush3.bf16.xpose.msra.mxu1 %v1075_v62  ;;  %6132 = vmatprep.mubr.msk.bf16.mxu1 %vm7056_vm6, %v7055_v25 }
 0x5c9   : >> { %6133 = vmatmul.mubr.msk.bf16.vlgmr.msra.gmra.mrb[12].mxu1 %vm633_vm5, %v1068_v63 }
 0x684   : >> { %v7431_v0 = vpop.f32.mrb[0].mxu1 }
 0x685   : >> { %v6104_v1 = vpop.f32.mrb[1].mxu1 }
 0x686   : >> { %v782_v2 = vpop.f32.mrb[2].mxu1 }
 0x687   : >> { %v6105_v3 = vpop.f32.mrb[3].mxu1 }
 0x68c   : >> { %v838_v4 = vpop.f32.mrb[4].mxu1 }
 0x68d   : >> { %v839_v5 = vadd.f32 %v838_v4, %v7383_v33  ;;  %v6110_v6 = vpop.f32.mrb[5].mxu1 }
 0x68e   : >> { %v841_v7 = vpop.f32.mrb[6].mxu1 }
 0x68f   : >> { %v6111_v8 = vpop.f32.mrb[7].mxu1  ;;  %v846_v9 = vsel %vm633_vm5, %v839_v5, -inf }
 0x690   : >> { %847 = vmax.xlane.f32.xlu1 %v846_v9 }
 0x694   : >> { %v976_v10 = vpop.f32.mrb[8].mxu1 }
 0x695   : >> { %v977_v11 = vadd.f32 %v976_v10, %v7383_v33  ;;  %v6122_v12 = vpop.f32.mrb[9].mxu1 }
 0x696   : >> { %v979_v13 = vpop.f32.mrb[10].mxu1  ;;  %v723_v12 = vld [vmem:[#allocation7] sm:$0xff] }
 0x697   : >> { %v6123_v14 = vpop.f32.mrb[11].mxu1  ;;  %v984_v15 = vsel %vm633_vm5, %v977_v11, -inf  ;;  %v724_v13 = vmul.f32 %v7441_v35, %v723_v12 }
 0x698   : >> { %985 = vmax.xlane.f32.xlu0 %v984_v15 }
 0x69c   : >> { %v1111_v16 = vpop.f32.mrb[12].mxu1 }
 0x69d   : >> { %v1112_v17 = vadd.f32 %v1111_v16, %v7383_v33  ;;  %v6134_v18 = vpop.f32.mrb[13].mxu1 }
 0x69e   : >> { %v1114_v19 = vpop.f32.mrb[14].mxu1 }
 0x69f   : >> { %v6135_v20 = vpop.f32.mrb[15].mxu1  ;;  %v1119_v21 = vsel %vm633_vm5, %v1112_v17, -inf }
 0x6a0   : >> { %1120 = vmax.xlane.f32.xlu1 %v1119_v21 }
 0x71d   : >> { %v848_v27 = vpop.xlane.xlu1 %847 }
 0x71e   : >> { %v849_v28 = vmax.f32 %v845_v23, %v848_v27 }
 0x720   : >> { %v850_v29 = vsub.f32 %v845_v23, %v849_v28  ;;  %931 = vst.msk [vmem:[#allocation6 + $0x8] sm:$0xff] %vm624_vm4, %v849_v28  ;;  %855 = vperm.xlu1 %6672, %v849_v28   ;;  %v1135_v28 = vld [vmem:[#allocation7 + $0x18] sm:$0xff] }
 0x722   : >> { %v851_v44 = vmul.f32 1.442695, %v850_v29 }
 0x725   : >> { %v986_v31 = vpop.xlane.xlu0 %985 }
 0x726   : >> { %v987_v32 = vmax.f32 %v983_v30, %v986_v31 }
 0x728   : >> { %v988_v34 = vsub.f32 %v983_v30, %v987_v32  ;;  %1066 = vst.msk [vmem:[#allocation6 + $0x10] sm:$0xff] %vm624_vm4, %v987_v32  ;;  %993 = vperm.xlu0 %6671, %v987_v32   ;;  %v870_v32 = vld [vmem:[#allocation8 + $0x8] sm:$0xff] }
 0x72a   : >> { %v989_v33 = vmul.f32 1.442695, %v988_v34 }
 0x72c   : >> { %6679 = vpow2.f32 %v989_v33  ;;  %733 = vperm.xlu0 %6671, %v7441_v35  }
 0x72d   : >> { %v1121_v37 = vpop.xlane.xlu1 %1120  ;;  %6681 = vpow2.f32 %v851_v44 }
 0x72e   : >> { %v1122_v38 = vmax.f32 %v1118_v36, %v1121_v37 }
 0x730   : >> { %v1123_v40 = vsub.f32 %v1118_v36, %v1122_v38  ;;  %1201 = vst.msk [vmem:[#allocation6 + $0x18] sm:$0xff] %vm624_vm4, %v1122_v38  ;;  %1128 = vperm.xlu1 %6672, %v1122_v38  }
 0x732   : >> { %v1124_v8 = vmul.f32 1.442695, %v1123_v40 }
 0x734   : >> { %881 = vrot.lane.b32.xlu1 %v5765_v39, %s7058_s12 }
 0x736   : >> { %v7448_v42 = vpop.eup %6679 }
 0x737   : >> { %1011 = vperm.xlu0 %6671, %v7448_v42   ;;  %v6682_v45 = vpop.eup %6681 }
 0x738   : >> { %1016 = vrot.lane.b32.xlu1 %v5765_v39, %s7059_s26 }
 0x73c   : >> { %1151 = vrot.lane.b32.xlu1 %v5765_v39, %s7060_s11  ;;  %v1008_v39 = vld [vmem:[#allocation8 + $0x10] sm:$0xff] }
 0x760   : >> { %726 = vadd.xlane.f32.xlu1 %v725_v43 }
 0x771   : >> { %873 = vperm.xlu1 %6672, %v6682_v45  }
 0x79f   : >> { %v856_v46 = vpop.permute.xlu1 %855 }
 0x7a0   : >> { %v858_v47 = vsub.f32 %v839_v5, %v856_v46 }
 0x7a2   : >> { %v859_v48 = vmul.f32 1.442695, %v858_v47  ;;  %v1143_v47 = vld [vmem:[#allocation8 + $0x18] sm:$0xff] }
 0x7a4   : >> { %6683 = vpow2.f32 %v859_v48 }
 0x7a7   : >> { %v994_v49 = vpop.permute.xlu0 %993 }
 0x7a8   : >> { %v996_v50 = vsub.f32 %v977_v11, %v994_v49 }
 0x7aa   : >> { %v997_v52 = vmul.f32 1.442695, %v996_v50 }
 0x7ab   : >> { %v734_v53 = vpop.permute.xlu0 %733 }
 0x7ac   : >> { %6685 = vpow2.f32 %v997_v52  ;;  %v736_v54 = vmul.f32 %v734_v53, %v730_v51 }
 0x7ae   : >> { %v6684_v56 = vpop.eup %6683  ;;  %v785_v57 = vadd.f32 %v7431_v0, %v736_v54 }
 0x7af   : >> { %v1129_v55 = vpop.permute.xlu1 %1128  ;;  %v864_v58 = vsel %vm633_vm5, %v6684_v56, 0.0  ;;  %v877_v1 = vpack.c.bf16 %v6684_v56, %v6684_v56 }
 0x7b0   : >> { %786 = vst.msk [vmem:[#allocation8] sm:$0xff] %vm633_vm5, %v785_v57  ;;  %v1131_v59 = vsub.f32 %v1112_v17, %v1129_v55  ;;  %865 = vadd.xlane.f32.xlu0 %v864_v58  ;;  %v862_v17 = vld [vmem:[#allocation7 + $0x8] sm:$0xff] }
 0x7b1   : >> { %v863_v18 = vmul.f32 %v6682_v45, %v862_v17 }
 0x7b2   : >> { %v1132_v60 = vmul.f32 1.442695, %v1131_v59 }
 0x7b3   : >> { %v882_v61 = vpop.permute.xlu1 %881 }
 0x7b4   : >> { %6687 = vpow2.f32 %v1132_v60  ;;  %v887_v62 = vsel %vm741_vm8, %v882_v61, 0 }
 0x7b5   : >> { %6113 = vmatpush3.bf16.msra.mxu0 %v887_v62  ;;  %6689 = vpow2.f32 %v1124_v8 }
 0x7b6   : >> { %v6686_v63 = vpop.eup %6685  ;;  %6124 = vmatprep.subr.bf16.mxu0 %v7055_v25  ;;  %v1012_v16 = vpop.permute.xlu0 %1011 }
 0x7b7   : >> { %v1002_v2 = vsel %vm633_vm5, %v6686_v63, 0.0  ;;  %v1017_v0 = vpop.permute.xlu1 %1016  ;;  %v1015_v6 = vpack.c.bf16 %v6686_v63, %v6686_v63  ;;  %v1014_v40 = vmul.f32 %v1012_v16, %v1008_v39 }
 0x7b8   : >> { %6115 = vmatmul.mubr.msk.bf16.vlgmr.msra.gmra.mrb[4].mxu0 %vm633_vm5, %v877_v1  ;;  %1003 = vadd.xlane.f32.xlu0 %v1002_v2  ;;  %v1022_v3 = vsel %vm741_vm8, %v1017_v0, 0 }
 0x7b9   : >> { %6125 = vmatpush3.bf16.msra.mxu0 %v1022_v3  ;;  %6126 = vmatprep.mubr.msk.bf16.mxu0 %vm7056_vm6, %v7055_v25 }
 0x7ba   : >> { %6136 = vmatprep.subr.bf16.mxu0 %v7055_v25 }
 0x7bb   : >> { %v1152_v4 = vpop.permute.xlu1 %1151 }
 0x7bc   : >> { %v1157_v7 = vsel %vm741_vm8, %v1152_v4, 0 }
 0x7be   : >> { %v6688_v5 = vpop.eup %6687 }
 0x7bf   : >> { %v1137_v9 = vsel %vm633_vm5, %v6688_v5, 0.0  ;;  %v1150_v10 = vpack.c.bf16 %v6688_v5, %v6688_v5  ;;  %v6690_v11 = vpop.eup %6689 }
 0x7c0   : >> { %6127 = vmatmul.mubr.msk.bf16.vlgmr.msra.gmra.mrb[8].mxu0 %vm633_vm5, %v1015_v6  ;;  %1138 = vadd.xlane.f32.xlu1 %v1137_v9  ;;  %v1136_v29 = vmul.f32 %v6690_v11, %v1135_v28 }
 0x7c1   : >> { %6137 = vmatpush3.bf16.msra.mxu0 %v1157_v7  ;;  %6138 = vmatprep.mubr.msk.bf16.mxu0 %vm7056_vm6, %v7055_v25  ;;  %v1000_v25 = vld [vmem:[#allocation7 + $0x10] sm:$0xff] }
 0x7c2   : >> { %v1001_v21 = vmul.f32 %v7448_v42, %v1000_v25 }
 0x7c8   : >> { %6139 = vmatmul.mubr.msk.bf16.vlgmr.msra.gmra.mrb[12].mxu0 %vm633_vm5, %v1150_v10 }
 0x7ce   : >> { %1146 = vperm.xlu0 %6671, %v6690_v11  }
 0x7ed   : >> { %v727_v14 = vpop.xlane.xlu1 %726 }
 0x7ee   : >> { %v728_v15 = vadd.f32 %v727_v14, %v724_v13 }
 0x7f0   : >> { %729 = vst.msk [vmem:[#allocation7] sm:$0xff] %vm624_vm4, %v728_v15 }
 0x7f1   : >> { %v874_v27 = vpop.permute.xlu1 %873 }
 0x7f2   : >> { %v876_v34 = vmul.f32 %v874_v27, %v870_v32 }
 0x83d   : >> { %v866_v19 = vpop.xlane.xlu0 %865 }
 0x83e   : >> { %v867_v20 = vadd.f32 %v866_v19, %v863_v18 }
 0x840   : >> { %868 = vst.msk [vmem:[#allocation7 + $0x8] sm:$0xff] %vm624_vm4, %v867_v20 }
 0x845   : >> { %v1004_v23 = vpop.xlane.xlu0 %1003 }
 0x846   : >> { %v1005_v26 = vadd.f32 %v1004_v23, %v1001_v21 }
 0x848   : >> { %1006 = vst.msk [vmem:[#allocation7 + $0x10] sm:$0xff] %vm624_vm4, %v1005_v26 }
 0x84d   : >> { %v1139_v30 = vpop.xlane.xlu1 %1138  ;;  %v1147_v48 = vpop.permute.xlu0 %1146 }
 0x84e   : >> { %v1140_v31 = vadd.f32 %v1139_v30, %v1136_v29  ;;  %v1149_v49 = vmul.f32 %v1147_v48, %v1143_v47 }
 0x850   : >> { %1141 = vst.msk [vmem:[#allocation7 + $0x18] sm:$0xff] %vm624_vm4, %v1140_v31 }
 0x88b   : >> { %v923_v33 = vpop.f32.mrb[4].mxu0 }
 0x88c   : >> { %v929_v35 = vadd.f32 %v923_v33, %v876_v34  ;;  %v6116_v36 = vpop.f32.mrb[5].mxu0 }
 0x88d   : >> { %v926_v37 = vpop.f32.mrb[6].mxu0 }
 0x88e   : >> { %930 = vst.msk [vmem:[#allocation8 + $0x8] sm:$0xff] %vm633_vm5, %v929_v35  ;;  %v6117_v38 = vpop.f32.mrb[7].mxu0 }
 0x893   : >> { %v1058_v42 = vpop.f32.mrb[8].mxu0 }
 0x894   : >> { %v1064_v43 = vadd.f32 %v1058_v42, %v1014_v40  ;;  %v6128_v44 = vpop.f32.mrb[9].mxu0 }
 0x895   : >> { %v1061_v45 = vpop.f32.mrb[10].mxu0 }
 0x896   : >> { %1065 = vst.msk [vmem:[#allocation8 + $0x10] sm:$0xff] %vm633_vm5, %v1064_v43  ;;  %v6129_v46 = vpop.f32.mrb[11].mxu0 }
 0x898   : > { %644 = sbr.rel (!%p641_p7) target bundleno = 940 (0x3ac), region = 273 }
 0x89b   : >> { %v1193_v50 = vpop.f32.mrb[12].mxu0 }
 0x89c   : >> { %v1199_v51 = vadd.f32 %v1193_v50, %v1149_v49  ;;  %v6140_v52 = vpop.f32.mrb[13].mxu0 }
 0x89d   : >> { %v1196_v53 = vpop.f32.mrb[14].mxu0 }
 0x89e   : >> { %1200 = vst.msk [vmem:[#allocation8 + $0x18] sm:$0xff] %vm633_vm5, %v1199_v51  ;;  %v6141_v54 = vpop.f32.mrb[15].mxu0 }
 0x89f PF: > { %v1215_v56 = vld [vmem:[#allocation7 + $0x8] sm:$0xff]  ;;  %v1239_v57 = vld [vmem:[#allocation7 + $0x18] sm:$0xff]  ;;  %v1227_v55 = vld [vmem:[#allocation7 + $0x10] sm:$0xff]  ;;  %6142 = vmatprep.subr.bf16.mxu0 %v7054_v24  ;;  %v7061_v58 = vmov 0   ;;  %vm7062_vm9 = vmmov 0   ;;  %s7063_s12 = smov 8   ;;  %v1325_v21 = vlaneseq }
 0x8a0   : > { %6691 = vset.pattern.permute.xlu0 %v7061_v58  ;;  %6692 = vset.pattern.permute.xlu1 %v7061_v58  ;;  %6695 = vrcp.f32 %v1215_v56  ;;  %v1203_v59 = vld [vmem:[#allocation7] sm:$0xff]  ;;  %v6694_v1 = vld [vmem:[%s8653_s7 + $0x8] sm:$0xff]   ;;  %s7064_s26 = smov 16   ;;  %s7065_s11 = smov 24   ;;  %vm1262_vm10 = vcmask 195584  }
 0x8a1   : > { %6697 = vrcp.f32 %v1239_v57  ;;  %v6693_v22 = vld [vmem:[%s8653_s7] sm:$0xff]   ;;  %6146 = vmatprep.mubr.msk.bf16.mxu0 %vm7062_vm9, %v7054_v24  ;;  %v1225_v7 = vld [vmem:[#allocation8 + $0x10] sm:$0xff]  ;;  %v1326_v23 = vshrl.u32 %v1325_v21, 7 }
 0x8a2   : > { %6699 = vrcp.f32 %v1227_v55  ;;  %6143 = vmatpush3.bf16.msra.mxu0 %v6693_v22  ;;  %v1213_v2 = vld [vmem:[#allocation8 + $0x8] sm:$0xff] }
 0x8a3   : > { %6701 = vrcp.f32 %v1203_v59  ;;  %6144 = vmatprep.subr.bf16.mxu0 %v7054_v24  ;;  %v1202_v24 = vld [vmem:[#allocation8] sm:$0xff]  ;;  %v1327_v26 = vsub.s32 0, %v1326_v23 }
 0x8a4   : > { %v1323_v27 = vld [vmem:[#allocation2] sm:$0xff] }
 0x8a5   : > { %v1237_v0 = vld [vmem:[#allocation8 + $0x18] sm:$0xff]  ;;  %v1328_v28 = vrot.slane %v7294_v41, %v1327_v26 }
 0x8a6   : > { %6145 = vmatpush3.bf16.msra.mxu0 %v6694_v1 }
 0x8aa   : > { %v6696_v60 = vpop.eup %6695 }
 0x8ab   : > { %v6698_v61 = vpop.eup %6697  ;;  %1219 = vperm.xlu0 %6691, %v6696_v60  }
 0x8ac   : > { %v6700_v62 = vpop.eup %6699  ;;  %1243 = vperm.xlu1 %6692, %v6698_v61  }
 0x8ad   : > { %v6702_v63 = vpop.eup %6701 }
 0x8af   : > { %1231 = vperm.xlu0 %6691, %v6700_v62  }
 0x8b0   : > { %1207 = vperm.xlu1 %6692, %v6702_v63  }
 0x92a   : > { %v1220_v3 = vpop.permute.xlu0 %1219 }
 0x92b   : > { %v1222_v4 = vmul.f32 %v1220_v3, %v1213_v2  ;;  %v1244_v5 = vpop.permute.xlu1 %1243 }
 0x92c   : > { %v1246_v6 = vmul.f32 %v1244_v5, %v1237_v0 }
 0x92d   : > { %v1223_v8 = vpack.c.bf16 %v1222_v4, %v1222_v4 }
 0x92e   : > { %v1232_v9 = vpop.permute.xlu0 %1231  ;;  %v1247_v10 = vpack.c.bf16 %v1246_v6, %v1246_v6 }
 0x92f   : > { %v1234_v11 = vmul.f32 %v1232_v9, %v1225_v7  ;;  %1249 = vrot.lane.b32.xlu0 %v1223_v8, %s7063_s12  ;;  %v1208_v13 = vpop.permute.xlu1 %1207 }
 0x930   : > { %v1210_v14 = vmul.f32 %v1208_v13, %v1202_v24 }
 0x931   : > { %v1235_v12 = vpack.c.bf16 %v1234_v11, %v1234_v11 }
 0x932   : > { %v1211_v16 = vpack.c.bf16 %v1210_v14, %v1210_v14 }
 0x933   : > { %1252 = vrot.lane.b32.xlu1 %v1235_v12, %s7064_s26  ;;  %1255 = vrot.lane.b32.xlu0 %v1247_v10, %s7065_s11 }
 0x9a1   : > { %v1250_v15 = vpop.permute.xlu0 %1249 }
 0x9a2   : > { %v1259_v17 = vsel %vm633_vm5, %v1211_v16, %v1250_v15 }
 0x9a5   : > { %v1253_v18 = vpop.permute.xlu1 %1252  ;;  %v1256_v19 = vpop.permute.xlu0 %1255 }
 0x9a6   : > { %v1261_v20 = vsel %vm343_vm1, %v1259_v17, %v1253_v18 }
 0x9a7   : > { %v1264_v25 = vsel %vm1262_vm10, %v1261_v20, %v1256_v19 }
 0x9a8   : > { %6147 = vmatmul.mubr.msk.bf16.vlgmr.msra.gmra.mrb[0].mxu0 %vm433_vm2, %v1264_v25 }
 0xa7b   : > { %v1317_v29 = vpop.f32.mrb[0].mxu0 }
 0xa7c   : > { %v1324_v30 = vadd.f32 %v1323_v27, %v1317_v29  ;;  %v6148_v31 = vpop.f32.mrb[1].mxu0 }
 0xa7d   : > { %v1320_v32 = vpop.f32.mrb[2].mxu0 }
 0xa7e   : > { %v1329_v34 = vadd.f32 %v1328_v28, %v1324_v30  ;;  %v6149_v33 = vpop.f32.mrb[3].mxu0 }
 0xa80   : > { %1330 = vst.msk [vmem:[#allocation2] sm:$0xff] %vm433_vm2, %v1329_v34 }
 0xa81 PF: > { %p5774_p8 = scmp.le.s32.totalorder %s8673_s25, 8 }
 0xa82   : > { %vm1335_vm11 = vcmask (!%p5774_p8), 7168   ;;  %v7502_v35 = vld [vmem:[#allocation3 + $0x4] sm:$0xf] (!%p5774_p8)  ;;  %vm1344_vm12 = vcmask (!%p5774_p8), 64512   ;;  %v7066_v36 = vmov (!%p5774_p8), -inf   ;;  %v7067_v37 = vmov (!%p5774_p8), 0.0  }
 0xa83   : > { %1334 = sbr.rel (%p5774_p8) target bundleno = 4454 (0x1166), region = 63  ;;  %1336 = vst.msk [vmem:[#allocation6] sm:$0xff] (!%p5774_p8), %vm1335_vm11, %v7066_v36  ;;  %1337 = vst.msk [vmem:[#allocation6 + $0x8] sm:$0xff] (!%p5774_p8), %vm1335_vm11, %v7066_v36  ;;  %p5775_p9 = scmp.le.s32.totalorder (!%p5774_p8), %s8675_s29, 0 }
 0xa84   : > { %1338 = vst.msk [vmem:[#allocation6 + $0x10] sm:$0xff] (!%p5774_p8), %vm1335_vm11, %v7066_v36  ;;  %1339 = vst.msk [vmem:[#allocation6 + $0x18] sm:$0xff] (!%p5774_p8), %vm1335_vm11, %v7066_v36 }
 0xa85   : > { %1340 = vst.msk [vmem:[#allocation7] sm:$0xff] (!%p5774_p8), %vm1335_vm11, %v7067_v37  ;;  %1341 = vst.msk [vmem:[#allocation7 + $0x8] sm:$0xff] (!%p5774_p8), %vm1335_vm11, %v7067_v37 }
 0xa86   : > { %1342 = vst.msk [vmem:[#allocation7 + $0x10] sm:$0xff] (!%p5774_p8), %vm1335_vm11, %v7067_v37  ;;  %1343 = vst.msk [vmem:[#allocation7 + $0x18] sm:$0xff] (!%p5774_p8), %vm1335_vm11, %v7067_v37 }
 0xa87   : > { %1345 = vst.msk [vmem:[#allocation8] sm:$0xff] (!%p5774_p8), %vm1344_vm12, %v7067_v37  ;;  %1346 = vst.msk [vmem:[#allocation8 + $0x8] sm:$0xff] (!%p5774_p8), %vm1344_vm12, %v7067_v37 }
 0xa88   : > { %1347 = vst.msk [vmem:[#allocation8 + $0x10] sm:$0xff] (!%p5774_p8), %vm1344_vm12, %v7067_v37  ;;  %1348 = vst.msk [vmem:[#allocation8 + $0x18] sm:$0xff] (!%p5774_p8), %vm1344_vm12, %v7067_v37 }
 0xa8a   : > { %5678 = sbr.rel (%p5775_p9) target bundleno = 3972 (0xf84), region = 278  ;;  %s7525_s18 = smov (!%p5775_p9), 0  }
 0xa91 LB: >> { %v7068_v38 = vmov 0.0   ;;  %vm7069_vm13 = vmmov 0   ;;  %s5776_s10 = sshll.u32 %s7029_s18, 3  ;;  %v1365_v42 = vlaneseq  ;;  %v1369_v46 = vstv %s8673_s25  ;;  %s7071_s26 = smov 120   ;;  %v7562_v55 = vld [vmem:[#allocation6] sm:$0xff]  ;;  %v1556_v36 = vld [vmem:[#allocation6 + $0x8] sm:$0xff]  ;;  %s7029_s18 = sphi %s7525_s18, %s1353_s18  }
 0xa92   : >> { %6150 = vmatprep.subr.bf16.mxu0 %v7068_v38  ;;  %6152 = vmatprep.mubr.msk.bf16.mxu0 %vm7069_vm13, %v7068_v38  ;;  %s7537_s27 = sshra.s32 %s5776_s10, 3  ;;  %v1367_v44 = vstv %s5776_s10  ;;  %v7070_v54 = vmov 0   ;;  %v5781_v57 = vcombine.low %v7502_v35, %v7502_v35  ;;  %s7072_s11 = smov 112   ;;  %vm1452_vm15 = vcmask 1043456  }
 0xa93   : >> { %6156 = vmatprep.subr.bf16.mxu1 %v7068_v38  ;;  %6158 = vmatprep.mubr.msk.bf16.mxu1 %vm7069_vm13, %v7068_v38  ;;  %s5777_s28 = sshll.u32 %s7537_s27, 2  ;;  %v1366_v43 = vand.u32 127, %v1365_v42  ;;  %s7073_s10 = smov 104  }
 0xa94   : >> { %s1360_s12 = scalar_lea.vmem [#allocation4], %s5777_s28  ;;  %6703 = vset.pattern.permute.xlu0 %v7070_v54  ;;  %6704 = vset.pattern.permute.xlu1 %v7070_v54  ;;  %s1353_s18 = sadd.s32 1, %s7029_s18  }
 0xa95   : >> { %v1361_v39 = vld [vmem:[%s1360_s12] sm:$0xf]  ;;  %v1368_v45 = vadd.s32 %v1367_v44, %v1366_v43  ;;  %s1363_s12 = scalar_lea.vmem [#allocation5], %s5777_s28  ;;  %v1694_v44 = vld [vmem:[#allocation6 + $0x10] sm:$0xff]  ;;  %p1352_p12 = scmp.ge.s32.totalorder %s1353_s18, %s8675_s29 }
 0xa96   : >> { %v1376_v40 = vsel %vm1344_vm12, %v1361_v39, 0  ;;  %v5782_v56 = vcombine.low %v1361_v39, %v1361_v39  ;;  %v7574_v61 = vld [vmem:[%s1363_s12] sm:$0xf] }
 0xa97   : >> { %6151 = vmatpush3.bf16.xpose.msra.mxu0 %v1376_v40  ;;  %vm1370_vm14 = vcmp.ge.s32.totalorder %v1368_v45, %v1369_v46  ;;  %v1454_v62 = vsel %vm1452_vm15, %v7574_v61, 0 }
 0xa98   : >> { %6168 = vmatprep.subr.bf16.mxu0 %v7068_v38  ;;  %v7550_v47 = vsel %vm1370_vm14, -1e+09, %v7068_v38  ;;  %1507 = vrot.lane.b32.xlu1 %v5782_v56, %s7071_s26 }
 0xa99   : >> { %6157 = vmatpush3.bf16.msra.mxu1 %v1454_v62 }
 0xa9a   : >> { %6162 = vmatprep.subr.bf16.mxu1 %v7068_v38 }
 0xa9c   : >> { %1502 = vrot.lane.b32.xlu1 %v5781_v57, %s7071_s26 }
 0xa9e   : >> { %6153 = vmatmul.mubr.msk.bf16.vlgmr.msra.gmra.mrb[0].mxu0 %vm1344_vm12, %v7502_v35 }
 0xa9f   : >> { %6170 = vmatprep.mubr.msk.bf16.mxu0 %vm7069_vm13, %v7068_v38 }
 0xaa0   : >> { %1645 = vrot.lane.b32.xlu1 %v5782_v56, %s7072_s11 }
 0xaa4   : >> { %1643 = vrot.lane.b32.xlu1 %v5781_v57, %s7072_s11 }
 0xaa8   : >> { %1780 = vrot.lane.b32.xlu1 %v5782_v56, %s7073_s10 }
 0xaac   : >> { %1778 = vrot.lane.b32.xlu1 %v5781_v57, %s7073_s10 }
 0xb0a   : >> { %v1508_v2 = vpop.permute.xlu1 %1507 }
 0xb0b   : >> { %v1513_v4 = vsel %vm1344_vm12, %v1508_v2, 0 }
 0xb0e   : >> { %v1503_v0 = vpop.permute.xlu1 %1502 }
 0xb12   : >> { %v1646_v6 = vpop.permute.xlu1 %1645 }
 0xb13   : >> { %v1651_v8 = vsel %vm1344_vm12, %v1646_v6, 0 }
 0xb16   : >> { %v1644_v7 = vpop.permute.xlu1 %1643 }
 0xb1a   : >> { %v1781_v9 = vpop.permute.xlu1 %1780 }
 0xb1b   : >> { %v1786_v10 = vsel %vm1344_vm12, %v1781_v9, 0 }
 0xb1e   : >> { %v1779_v11 = vpop.permute.xlu1 %1778 }
 0xb71   : >> { %v1412_v48 = vpop.f32.mrb[0].mxu0 }
 0xb72   : >> { %v1413_v49 = vadd.f32 %v1412_v48, %v7550_v47  ;;  %v6154_v50 = vpop.f32.mrb[1].mxu0 }
 0xb73   : >> { %v1415_v51 = vpop.f32.mrb[2].mxu0  ;;  %v1829_v50 = vld [vmem:[#allocation6 + $0x18] sm:$0xff] }
 0xb74   : >> { %v6155_v52 = vpop.f32.mrb[3].mxu0  ;;  %v1419_v53 = vsel %vm1344_vm12, %v1413_v49, -inf }
 0xb75   : >> { %1420 = vmax.xlane.f32.xlu0 %v1419_v53  ;;  %v5784_v53 = vcombine.low %v7574_v61, %v7574_v61 }
 0xc02   : >> { %v1421_v58 = vpop.xlane.xlu0 %1420 }
 0xc03   : >> { %v7565_v59 = vmax.f32 %v7562_v55, %v1421_v58 }
 0xc05   : >> { %v1423_v60 = vsub.f32 %v7562_v55, %v7565_v59  ;;  %1498 = vst.msk [vmem:[#allocation6] sm:$0xff] %vm1335_vm11, %v7565_v59  ;;  %1428 = vperm.xlu0 %6703, %v7565_v59  }
 0xc07   : >> { %v1424_v39 = vmul.f32 1.442695, %v1423_v60 }
 0xc84   : >> { %v1429_v63 = vpop.permute.xlu0 %1428 }
 0xc85   : >> { %v1431_v22 = vsub.f32 %v1413_v49, %v1429_v63 }
 0xc87   : >> { %v1432_v1 = vmul.f32 1.442695, %v1431_v22  ;;  %v1441_v22 = vld [vmem:[#allocation8] sm:$0xff] }
 0xc89   : >> { %6707 = vpow2.f32 %v1432_v1 }
 0xc8a   : >> { %6709 = vpow2.f32 %v1424_v39 }
 0xc93   : >> { %v7579_v3 = vpop.eup %6707 }
 0xc94   : >> { %v1448_v5 = vpack.c.bf16 %v7579_v3, %v7579_v3  ;;  %v7608_v49 = vpop.eup %6709  ;;  %v1436_v57 = vsel %vm1344_vm12, %v7579_v3, 0.0 }
 0xc96   : >> { %6159 = vmatmul.mubr.msk.bf16.vlgmr.msra.gmra.mrb[0].mxu1 %vm1344_vm12, %v1448_v5 }
 0xc97   : >> { %6163 = vmatpush3.bf16.xpose.msra.mxu1 %v1513_v4  ;;  %6164 = vmatprep.mubr.msk.bf16.mxu1 %vm7069_vm13, %v7068_v38 }
 0xc98   : >> { %6174 = vmatprep.subr.bf16.mxu1 %v7068_v38 }
 0xc9e   : >> { %6165 = vmatmul.mubr.msk.bf16.vlgmr.msra.gmra.mrb[4].mxu1 %vm1344_vm12, %v1503_v0 }
 0xc9f   : >> { %6175 = vmatpush3.bf16.xpose.msra.mxu1 %v1651_v8  ;;  %6176 = vmatprep.mubr.msk.bf16.mxu1 %vm7069_vm13, %v7068_v38 }
 0xca0   : >> { %6186 = vmatprep.subr.bf16.mxu1 %v7068_v38 }
 0xca6   : >> { %6177 = vmatmul.mubr.msk.bf16.vlgmr.msra.gmra.mrb[8].mxu1 %vm1344_vm12, %v1644_v7 }
 0xca7   : >> { %6187 = vmatpush3.bf16.xpose.msra.mxu1 %v1786_v10  ;;  %6188 = vmatprep.mubr.msk.bf16.mxu1 %vm7069_vm13, %v7068_v38 }
 0xcae   : >> { %6189 = vmatmul.mubr.msk.bf16.vlgmr.msra.gmra.mrb[12].mxu1 %vm1344_vm12, %v1779_v11 }
 0xd69   : >> { %v7598_v12 = vpop.f32.mrb[0].mxu1 }
 0xd6a   : >> { %v6160_v13 = vpop.f32.mrb[1].mxu1 }
 0xd6b   : >> { %v1493_v24 = vpop.f32.mrb[2].mxu1 }
 0xd6c   : >> { %v6161_v14 = vpop.f32.mrb[3].mxu1 }
 0xd71   : >> { %v1549_v15 = vpop.f32.mrb[4].mxu1 }
 0xd72   : >> { %v1550_v16 = vadd.f32 %v1549_v15, %v7550_v47  ;;  %v6166_v17 = vpop.f32.mrb[5].mxu1 }
 0xd73   : >> { %v1552_v18 = vpop.f32.mrb[6].mxu1 }
 0xd74   : >> { %v6167_v19 = vpop.f32.mrb[7].mxu1  ;;  %v1557_v20 = vsel %vm1344_vm12, %v1550_v16, -inf }
 0xd75   : >> { %1558 = vmax.xlane.f32.xlu1 %v1557_v20 }
 0xd79   : >> { %v1687_v25 = vpop.f32.mrb[8].mxu1 }
 0xd7a   : >> { %v1688_v21 = vadd.f32 %v1687_v25, %v7550_v47  ;;  %v6178_v23 = vpop.f32.mrb[9].mxu1 }
 0xd7b   : >> { %v1690_v26 = vpop.f32.mrb[10].mxu1  ;;  %v1434_v23 = vld [vmem:[#allocation7] sm:$0xff] }
 0xd7c   : >> { %v6179_v27 = vpop.f32.mrb[11].mxu1  ;;  %v1695_v28 = vsel %vm1344_vm12, %v1688_v21, -inf  ;;  %v1435_v26 = vmul.f32 %v7608_v49, %v1434_v23 }
 0xd7d   : >> { %1696 = vmax.xlane.f32.xlu0 %v1695_v28 }
 0xd81   : >> { %v1822_v29 = vpop.f32.mrb[12].mxu1 }
 0xd82   : >> { %v1823_v30 = vadd.f32 %v1822_v29, %v7550_v47  ;;  %v6190_v31 = vpop.f32.mrb[13].mxu1 }
 0xd83   : >> { %v1825_v32 = vpop.f32.mrb[14].mxu1 }
 0xd84   : >> { %v6191_v34 = vpop.f32.mrb[15].mxu1  ;;  %v1830_v33 = vsel %vm1344_vm12, %v1823_v30, -inf }
 0xd85   : >> { %1831 = vmax.xlane.f32.xlu1 %v1830_v33 }
 0xe02   : >> { %v1559_v40 = vpop.xlane.xlu1 %1558 }
 0xe03   : >> { %v1560_v42 = vmax.f32 %v1556_v36, %v1559_v40 }
 0xe05   : >> { %v1561_v43 = vsub.f32 %v1556_v36, %v1560_v42  ;;  %1642 = vst.msk [vmem:[#allocation6 + $0x8] sm:$0xff] %vm1335_vm11, %v1560_v42  ;;  %1566 = vperm.xlu1 %6704, %v1560_v42   ;;  %v1846_v42 = vld [vmem:[#allocation7 + $0x18] sm:$0xff] }
 0xe07   : >> { %v1562_v55 = vmul.f32 1.442695, %v1561_v43 }
 0xe0a   : >> { %v1697_v45 = vpop.xlane.xlu0 %1696 }
 0xe0b   : >> { %v1698_v46 = vmax.f32 %v1694_v44, %v1697_v45 }
 0xe0d   : >> { %v1699_v48 = vsub.f32 %v1694_v44, %v1698_v46  ;;  %1777 = vst.msk [vmem:[#allocation6 + $0x10] sm:$0xff] %vm1335_vm11, %v1698_v46  ;;  %1704 = vperm.xlu0 %6703, %v1698_v46   ;;  %v1581_v46 = vld [vmem:[#allocation8 + $0x8] sm:$0xff] }
 0xe0f   : >> { %v1700_v47 = vmul.f32 1.442695, %v1699_v48 }
 0xe11   : >> { %6711 = vpow2.f32 %v1700_v47  ;;  %1444 = vperm.xlu0 %6703, %v7608_v49  }
 0xe12   : >> { %v1832_v51 = vpop.xlane.xlu1 %1831  ;;  %6713 = vpow2.f32 %v1562_v55 }
 0xe13   : >> { %v1833_v52 = vmax.f32 %v1829_v50, %v1832_v51 }
 0xe15   : >> { %v1834_v54 = vsub.f32 %v1829_v50, %v1833_v52  ;;  %1912 = vst.msk [vmem:[#allocation6 + $0x18] sm:$0xff] %vm1335_vm11, %v1833_v52  ;;  %1839 = vperm.xlu1 %6704, %v1833_v52  }
 0xe17   : >> { %v1835_v19 = vmul.f32 1.442695, %v1834_v54 }
 0xe19   : >> { %1592 = vrot.lane.b32.xlu1 %v5784_v53, %s7071_s26 }
 0xe1b   : >> { %v7615_v56 = vpop.eup %6711 }
 0xe1c   : >> { %1722 = vperm.xlu0 %6703, %v7615_v56   ;;  %v6714_v58 = vpop.eup %6713 }
 0xe1d   : >> { %1727 = vrot.lane.b32.xlu1 %v5784_v53, %s7072_s11 }
 0xe21   : >> { %1862 = vrot.lane.b32.xlu1 %v5784_v53, %s7073_s10  ;;  %v1719_v53 = vld [vmem:[#allocation8 + $0x10] sm:$0xff] }
 0xe45   : >> { %1437 = vadd.xlane.f32.xlu1 %v1436_v57 }
 0xe56   : >> { %1584 = vperm.xlu1 %6704, %v6714_v58  }
 0xe84   : >> { %v1567_v59 = vpop.permute.xlu1 %1566 }
 0xe85   : >> { %v1569_v60 = vsub.f32 %v1550_v16, %v1567_v59 }
 0xe87   : >> { %v1570_v61 = vmul.f32 1.442695, %v1569_v60  ;;  %v1854_v60 = vld [vmem:[#allocation8 + $0x18] sm:$0xff] }
 0xe89   : >> { %6715 = vpow2.f32 %v1570_v61 }
 0xe8c   : >> { %v1705_v62 = vpop.permute.xlu0 %1704 }
 0xe8d   : >> { %v1707_v63 = vsub.f32 %v1688_v21, %v1705_v62 }
 0xe8f   : >> { %v1708_v1 = vmul.f32 1.442695, %v1707_v63 }
 0xe90   : >> { %v1445_v2 = vpop.permute.xlu0 %1444 }
 0xe91   : >> { %6717 = vpow2.f32 %v1708_v1  ;;  %v1447_v0 = vmul.f32 %v1445_v2, %v1441_v22 }
 0xe93   : >> { %v6716_v4 = vpop.eup %6715  ;;  %v1496_v5 = vadd.f32 %v7598_v12, %v1447_v0 }
 0xe94   : >> { %v1840_v3 = vpop.permute.xlu1 %1839  ;;  %v1575_v6 = vsel %vm1344_vm12, %v6716_v4, 0.0  ;;  %v1588_v13 = vpack.c.bf16 %v6716_v4, %v6716_v4 }
 0xe95   : >> { %1497 = vst.msk [vmem:[#allocation8] sm:$0xff] %vm1344_vm12, %v1496_v5  ;;  %v1842_v7 = vsub.f32 %v1823_v30, %v1840_v3  ;;  %1576 = vadd.xlane.f32.xlu0 %v1575_v6  ;;  %v1573_v30 = vld [vmem:[#allocation7 + $0x8] sm:$0xff] }
 0xe96   : >> { %v1574_v31 = vmul.f32 %v6714_v58, %v1573_v30 }
 0xe97   : >> { %v1843_v8 = vmul.f32 1.442695, %v1842_v7 }
 0xe98   : >> { %v1593_v9 = vpop.permute.xlu1 %1592 }
 0xe99   : >> { %6719 = vpow2.f32 %v1843_v8  ;;  %v1598_v10 = vsel %vm1452_vm15, %v1593_v9, 0 }
 0xe9a   : >> { %6169 = vmatpush3.bf16.msra.mxu0 %v1598_v10  ;;  %6721 = vpow2.f32 %v1835_v19 }
 0xe9b   : >> { %v6718_v11 = vpop.eup %6717  ;;  %6180 = vmatprep.subr.bf16.mxu0 %v7068_v38  ;;  %v1723_v29 = vpop.permute.xlu0 %1722 }
 0xe9c   : >> { %v1713_v24 = vsel %vm1344_vm12, %v6718_v11, 0.0  ;;  %v1728_v12 = vpop.permute.xlu1 %1727  ;;  %v1726_v17 = vpack.c.bf16 %v6718_v11, %v6718_v11  ;;  %v1725_v54 = vmul.f32 %v1723_v29, %v1719_v53 }
 0xe9d   : >> { %6171 = vmatmul.mubr.msk.bf16.vlgmr.msra.gmra.mrb[4].mxu0 %vm1344_vm12, %v1588_v13  ;;  %1714 = vadd.xlane.f32.xlu0 %v1713_v24  ;;  %v1733_v14 = vsel %vm1452_vm15, %v1728_v12, 0 }
 0xe9e   : >> { %6181 = vmatpush3.bf16.msra.mxu0 %v1733_v14  ;;  %6182 = vmatprep.mubr.msk.bf16.mxu0 %vm7069_vm13, %v7068_v38 }
 0xe9f   : >> { %6192 = vmatprep.subr.bf16.mxu0 %v7068_v38 }
 0xea0   : >> { %v1863_v15 = vpop.permute.xlu1 %1862 }
 0xea1   : >> { %v1868_v18 = vsel %vm1452_vm15, %v1863_v15, 0 }
 0xea3   : >> { %v6720_v16 = vpop.eup %6719 }
 0xea4   : >> { %v1848_v20 = vsel %vm1344_vm12, %v6720_v16, 0.0  ;;  %v1861_v25 = vpack.c.bf16 %v6720_v16, %v6720_v16  ;;  %v6722_v21 = vpop.eup %6721 }
 0xea5   : >> { %6183 = vmatmul.mubr.msk.bf16.vlgmr.msra.gmra.mrb[8].mxu0 %vm1344_vm12, %v1726_v17  ;;  %1849 = vadd.xlane.f32.xlu1 %v1848_v20  ;;  %v1847_v43 = vmul.f32 %v6722_v21, %v1846_v42 }
 0xea6   : >> { %6193 = vmatpush3.bf16.msra.mxu0 %v1868_v18  ;;  %6194 = vmatprep.mubr.msk.bf16.mxu0 %vm7069_vm13, %v7068_v38  ;;  %v1711_v38 = vld [vmem:[#allocation7 + $0x10] sm:$0xff] }
 0xea7   : >> { %v1712_v33 = vmul.f32 %v7615_v56, %v1711_v38 }
 0xead   : >> { %6195 = vmatmul.mubr.msk.bf16.vlgmr.msra.gmra.mrb[12].mxu0 %vm1344_vm12, %v1861_v25 }
 0xeb3   : >> { %1857 = vperm.xlu0 %6703, %v6722_v21  }
 0xed2   : >> { %v1438_v27 = vpop.xlane.xlu1 %1437 }
 0xed3   : >> { %v1439_v28 = vadd.f32 %v1438_v27, %v1435_v26 }
 0xed5   : >> { %1440 = vst.msk [vmem:[#allocation7] sm:$0xff] %vm1335_vm11, %v1439_v28 }
 0xed6   : >> { %v1585_v40 = vpop.permute.xlu1 %1584 }
 0xed7   : >> { %v1587_v48 = vmul.f32 %v1585_v40, %v1581_v46 }
 0xf22   : >> { %v1577_v32 = vpop.xlane.xlu0 %1576 }
 0xf23   : >> { %v1578_v34 = vadd.f32 %v1577_v32, %v1574_v31 }
 0xf25   : >> { %1579 = vst.msk [vmem:[#allocation7 + $0x8] sm:$0xff] %vm1335_vm11, %v1578_v34 }
 0xf2a   : >> { %v1715_v36 = vpop.xlane.xlu0 %1714 }
 0xf2b   : >> { %v1716_v39 = vadd.f32 %v1715_v36, %v1712_v33 }
 0xf2d   : >> { %1717 = vst.msk [vmem:[#allocation7 + $0x10] sm:$0xff] %vm1335_vm11, %v1716_v39 }
 0xf32   : >> { %v1850_v44 = vpop.xlane.xlu1 %1849  ;;  %v1858_v61 = vpop.permute.xlu0 %1857 }
 0xf33   : >> { %v1851_v45 = vadd.f32 %v1850_v44, %v1847_v43  ;;  %v1860_v62 = vmul.f32 %v1858_v61, %v1854_v60 }
 0xf35   : >> { %1852 = vst.msk [vmem:[#allocation7 + $0x18] sm:$0xff] %vm1335_vm11, %v1851_v45 }
 0xf70   : >> { %v1634_v47 = vpop.f32.mrb[4].mxu0 }
 0xf71   : >> { %v1640_v49 = vadd.f32 %v1634_v47, %v1587_v48  ;;  %v6172_v50 = vpop.f32.mrb[5].mxu0 }
 0xf72   : >> { %v1637_v51 = vpop.f32.mrb[6].mxu0 }
 0xf73   : >> { %1641 = vst.msk [vmem:[#allocation8 + $0x8] sm:$0xff] %vm1344_vm12, %v1640_v49  ;;  %v6173_v52 = vpop.f32.mrb[7].mxu0 }
 0xf78   : >> { %v1769_v56 = vpop.f32.mrb[8].mxu0 }
 0xf79   : >> { %v1775_v57 = vadd.f32 %v1769_v56, %v1725_v54  ;;  %v6184_v55 = vpop.f32.mrb[9].mxu0 }
 0xf7a   : >> { %v1772_v58 = vpop.f32.mrb[10].mxu0 }
 0xf7b   : >> { %1776 = vst.msk [vmem:[#allocation8 + $0x10] sm:$0xff] %vm1344_vm12, %v1775_v57  ;;  %v6185_v59 = vpop.f32.mrb[11].mxu0 }
 0xf7d   : > { %1355 = sbr.rel (!%p1352_p12) target bundleno = 2705 (0xa91), region = 284 }
 0xf80   : >> { %v1904_v63 = vpop.f32.mrb[12].mxu0 }
 0xf81   : >> { %v1910_v22 = vadd.f32 %v1904_v63, %v1860_v62  ;;  %v6196_v1 = vpop.f32.mrb[13].mxu0 }
 0xf82   : >> { %v1907_v2 = vpop.f32.mrb[14].mxu0 }
 0xf83   : >> { %1911 = vst.msk [vmem:[#allocation8 + $0x18] sm:$0xff] %vm1344_vm12, %v1910_v22  ;;  %v6197_v0 = vpop.f32.mrb[15].mxu0 }
 0xf84 PF: > { %v1926_v4 = vld [vmem:[#allocation7 + $0x8] sm:$0xff]  ;;  %v1950_v5 = vld [vmem:[#allocation7 + $0x18] sm:$0xff]  ;;  %v1938_v3 = vld [vmem:[#allocation7 + $0x10] sm:$0xff]  ;;  %6198 = vmatprep.subr.bf16.mxu0 %v7067_v37  ;;  %v7074_v6 = vmov 0   ;;  %vm7075_vm0 = vmmov 0   ;;  %s7076_s11 = smov 8   ;;  %v2036_v33 = vlaneseq }
 0xf85   : > { %6723 = vset.pattern.permute.xlu0 %v7074_v6  ;;  %6724 = vset.pattern.permute.xlu1 %v7074_v6  ;;  %6727 = vrcp.f32 %v1926_v4  ;;  %v1914_v7 = vld [vmem:[#allocation7] sm:$0xff]  ;;  %v6726_v13 = vld [vmem:[%s8653_s7 + $0x8] sm:$0xff]   ;;  %s7077_s10 = smov 16   ;;  %s7078_s12 = smov 24   ;;  %vm1973_vm4 = vcmask 195584  }
 0xf86   : > { %6729 = vrcp.f32 %v1950_v5  ;;  %v6725_v35 = vld [vmem:[%s8653_s7] sm:$0xff]   ;;  %6202 = vmatprep.mubr.msk.bf16.mxu0 %vm7075_vm0, %v7067_v37  ;;  %v1936_v18 = vld [vmem:[#allocation8 + $0x10] sm:$0xff]  ;;  %v2037_v36 = vshrl.u32 %v2036_v33, 7 }
 0xf87   : > { %6731 = vrcp.f32 %v1938_v3  ;;  %6199 = vmatpush3.bf16.msra.mxu0 %v6725_v35  ;;  %v1924_v24 = vld [vmem:[#allocation8 + $0x8] sm:$0xff] }
 0xf88   : > { %6733 = vrcp.f32 %v1914_v7  ;;  %6200 = vmatprep.subr.bf16.mxu0 %v7067_v37  ;;  %v1913_v37 = vld [vmem:[#allocation8] sm:$0xff]  ;;  %v2038_v39 = vsub.s32 0, %v2037_v36  ;;  %v2034_v40 = vld [vmem:[#allocation2 + $0x8] sm:$0xff] }
 0xf8a   : > { %v1948_v12 = vld [vmem:[#allocation8 + $0x18] sm:$0xff]  ;;  %v2039_v42 = vrot.slane %v7294_v41, %v2038_v39 }
 0xf8b   : > { %6201 = vmatpush3.bf16.msra.mxu0 %v6726_v13 }
 0xf8f   : > { %v6728_v8 = vpop.eup %6727 }
 0xf90   : > { %v6730_v9 = vpop.eup %6729  ;;  %1930 = vperm.xlu0 %6723, %v6728_v8  }
 0xf91   : > { %v6732_v10 = vpop.eup %6731  ;;  %1954 = vperm.xlu1 %6724, %v6730_v9  }
 0xf92   : > { %v6734_v11 = vpop.eup %6733 }
 0xf94   : > { %1942 = vperm.xlu0 %6723, %v6732_v10  }
 0xf95   : > { %1918 = vperm.xlu1 %6724, %v6734_v11  }
0x100f   : > { %v1931_v14 = vpop.permute.xlu0 %1930 }
0x1010   : > { %v1933_v15 = vmul.f32 %v1931_v14, %v1924_v24  ;;  %v1955_v16 = vpop.permute.xlu1 %1954 }
0x1011   : > { %v1957_v17 = vmul.f32 %v1955_v16, %v1948_v12 }
0x1012   : > { %v1934_v19 = vpack.c.bf16 %v1933_v15, %v1933_v15 }
0x1013   : > { %v1943_v20 = vpop.permute.xlu0 %1942  ;;  %v1958_v25 = vpack.c.bf16 %v1957_v17, %v1957_v17 }
0x1014   : > { %v1945_v21 = vmul.f32 %v1943_v20, %v1936_v18  ;;  %1960 = vrot.lane.b32.xlu0 %v1934_v19, %s7076_s11  ;;  %v1919_v26 = vpop.permute.xlu1 %1918 }
0x1015   : > { %v1921_v27 = vmul.f32 %v1919_v26, %v1913_v37 }
0x1016   : > { %v1946_v23 = vpack.c.bf16 %v1945_v21, %v1945_v21 }
0x1017   : > { %v1922_v29 = vpack.c.bf16 %v1921_v27, %v1921_v27 }
0x1018   : > { %1963 = vrot.lane.b32.xlu1 %v1946_v23, %s7077_s10  ;;  %1966 = vrot.lane.b32.xlu0 %v1958_v25, %s7078_s12 }
0x1086   : > { %v1961_v28 = vpop.permute.xlu0 %1960 }
0x1087   : > { %v1970_v30 = vsel %vm1344_vm12, %v1922_v29, %v1961_v28 }
0x108a   : > { %v1964_v31 = vpop.permute.xlu1 %1963  ;;  %v1967_v32 = vpop.permute.xlu0 %1966 }
0x108b   : > { %v1972_v34 = vsel %vm343_vm1, %v1970_v30, %v1964_v31 }
0x108c   : > { %v1975_v38 = vsel %vm1973_vm4, %v1972_v34, %v1967_v32 }
0x108d   : > { %6203 = vmatmul.mubr.msk.bf16.vlgmr.msra.gmra.mrb[0].mxu0 %vm433_vm2, %v1975_v38 }
0x1160   : > { %v2028_v43 = vpop.f32.mrb[0].mxu0 }
0x1161   : > { %v2035_v44 = vadd.f32 %v2034_v40, %v2028_v43  ;;  %v6204_v45 = vpop.f32.mrb[1].mxu0 }
0x1162   : > { %v2031_v46 = vpop.f32.mrb[2].mxu0 }
0x1163   : > { %v2040_v48 = vadd.f32 %v2039_v42, %v2035_v44  ;;  %v6205_v47 = vpop.f32.mrb[3].mxu0 }
0x1165   : > { %2041 = vst.msk [vmem:[#allocation2 + $0x8] sm:$0xff] %vm433_vm2, %v2040_v48 }
0x1166 PF: > { %p5793_p13 = scmp.le.s32.totalorder %s8673_s25, 16 }
0x1167   : > { %vm2046_vm5 = vcmask (!%p5793_p13), 7168   ;;  %v7669_v49 = vld [vmem:[#allocation3 + $0x8] sm:$0xf] (!%p5793_p13)  ;;  %vm2055_vm6 = vcmask (!%p5793_p13), 64512   ;;  %v7079_v50 = vmov (!%p5793_p13), -inf   ;;  %v7080_v51 = vmov (!%p5793_p13), 0.0  }
0x1168   : > { %2045 = sbr.rel (%p5793_p13) target bundleno = 6219 (0x184b), region = 74  ;;  %2047 = vst.msk [vmem:[#allocation6] sm:$0xff] (!%p5793_p13), %vm2046_vm5, %v7079_v50  ;;  %2048 = vst.msk [vmem:[#allocation6 + $0x8] sm:$0xff] (!%p5793_p13), %vm2046_vm5, %v7079_v50  ;;  %p5794_p0 = scmp.le.s32.totalorder (!%p5793_p13), %s8675_s29, 0 }
0x1169   : > { %2049 = vst.msk [vmem:[#allocation6 + $0x10] sm:$0xff] (!%p5793_p13), %vm2046_vm5, %v7079_v50  ;;  %2050 = vst.msk [vmem:[#allocation6 + $0x18] sm:$0xff] (!%p5793_p13), %vm2046_vm5, %v7079_v50 }
0x116a   : > { %2051 = vst.msk [vmem:[#allocation7] sm:$0xff] (!%p5793_p13), %vm2046_vm5, %v7080_v51  ;;  %2052 = vst.msk [vmem:[#allocation7 + $0x8] sm:$0xff] (!%p5793_p13), %vm2046_vm5, %v7080_v51 }
0x116b   : > { %2053 = vst.msk [vmem:[#allocation7 + $0x10] sm:$0xff] (!%p5793_p13), %vm2046_vm5, %v7080_v51  ;;  %2054 = vst.msk [vmem:[#allocation7 + $0x18] sm:$0xff] (!%p5793_p13), %vm2046_vm5, %v7080_v51 }
0x116c   : > { %2056 = vst.msk [vmem:[#allocation8] sm:$0xff] (!%p5793_p13), %vm2055_vm6, %v7080_v51  ;;  %2057 = vst.msk [vmem:[#allocation8 + $0x8] sm:$0xff] (!%p5793_p13), %vm2055_vm6, %v7080_v51 }
0x116d   : > { %2058 = vst.msk [vmem:[#allocation8 + $0x10] sm:$0xff] (!%p5793_p13), %vm2055_vm6, %v7080_v51  ;;  %2059 = vst.msk [vmem:[#allocation8 + $0x18] sm:$0xff] (!%p5793_p13), %vm2055_vm6, %v7080_v51 }
0x116f   : > { %5683 = sbr.rel (%p5794_p0) target bundleno = 5737 (0x1669), region = 289  ;;  %s7692_s18 = smov (!%p5794_p0), 0  }
0x1176 LB: >> { %v7081_v52 = vmov 0.0   ;;  %vm7082_vm7 = vmmov 0   ;;  %s5795_s27 = sshll.u32 %s7033_s18, 3  ;;  %v2076_v56 = vlaneseq  ;;  %v2080_v59 = vstv %s8673_s25  ;;  %s7084_s10 = smov 120   ;;  %v7729_v3 = vld [vmem:[#allocation6] sm:$0xff]  ;;  %v2267_v50 = vld [vmem:[#allocation6 + $0x8] sm:$0xff]  ;;  %s7033_s18 = sphi %s7692_s18, %s2064_s18  }
0x1177   : >> { %6206 = vmatprep.subr.bf16.mxu0 %v7081_v52  ;;  %6208 = vmatprep.mubr.msk.bf16.mxu0 %vm7082_vm7, %v7081_v52  ;;  %s7704_s28 = sshra.s32 %s5795_s27, 3  ;;  %v2078_v55 = vstv %s5795_s27  ;;  %v7083_v0 = vmov 0   ;;  %v5800_v5 = vcombine.low %v7669_v49, %v7669_v49  ;;  %s7085_s12 = smov 112   ;;  %vm2163_vm9 = vcmask 1043456  }
0x1178   : >> { %6212 = vmatprep.subr.bf16.mxu1 %v7081_v52  ;;  %6214 = vmatprep.mubr.msk.bf16.mxu1 %vm7082_vm7, %v7081_v52  ;;  %s5796_s26 = sshll.u32 %s7704_s28, 2  ;;  %v2077_v57 = vand.u32 127, %v2076_v56  ;;  %s7086_s27 = smov 104  }
0x1179   : >> { %s2071_s11 = scalar_lea.vmem [#allocation4], %s5796_s26  ;;  %6735 = vset.pattern.permute.xlu0 %v7083_v0  ;;  %6736 = vset.pattern.permute.xlu1 %v7083_v0  ;;  %s2064_s18 = sadd.s32 1, %s7033_s18  }
0x117a   : >> { %v2072_v53 = vld [vmem:[%s2071_s11] sm:$0xf]  ;;  %v2079_v58 = vadd.s32 %v2078_v55, %v2077_v57  ;;  %s2074_s11 = scalar_lea.vmem [#allocation5], %s5796_s26  ;;  %v2405_v55 = vld [vmem:[#allocation6 + $0x10] sm:$0xff]  ;;  %p2063_p1 = scmp.ge.s32.totalorder %s2064_s18, %s8675_s29 }
0x117b   : >> { %v2087_v54 = vsel %vm2055_vm6, %v2072_v53, 0  ;;  %v5801_v4 = vcombine.low %v2072_v53, %v2072_v53  ;;  %v7741_v9 = vld [vmem:[%s2074_s11] sm:$0xf] }
0x117c   : >> { %6207 = vmatpush3.bf16.xpose.msra.mxu0 %v2087_v54  ;;  %vm2081_vm8 = vcmp.ge.s32.totalorder %v2079_v58, %v2080_v59  ;;  %v2165_v10 = vsel %vm2163_vm9, %v7741_v9, 0 }
0x117d   : >> { %6224 = vmatprep.subr.bf16.mxu0 %v7081_v52  ;;  %v7717_v60 = vsel %vm2081_vm8, -1e+09, %v7081_v52  ;;  %2218 = vrot.lane.b32.xlu1 %v5801_v4, %s7084_s10 }
0x117e   : >> { %6213 = vmatpush3.bf16.msra.mxu1 %v2165_v10 }
0x117f   : >> { %6218 = vmatprep.subr.bf16.mxu1 %v7081_v52 }
0x1181   : >> { %2213 = vrot.lane.b32.xlu1 %v5800_v5, %s7084_s10 }
0x1183   : >> { %6209 = vmatmul.mubr.msk.bf16.vlgmr.msra.gmra.mrb[0].mxu0 %vm2055_vm6, %v7669_v49 }
0x1184   : >> { %6226 = vmatprep.mubr.msk.bf16.mxu0 %vm7082_vm7, %v7081_v52 }
0x1185   : >> { %2356 = vrot.lane.b32.xlu1 %v5801_v4, %s7085_s12 }
0x1189   : >> { %2354 = vrot.lane.b32.xlu1 %v5800_v5, %s7085_s12 }
0x118d   : >> { %2491 = vrot.lane.b32.xlu1 %v5801_v4, %s7086_s27 }
0x1191   : >> { %2489 = vrot.lane.b32.xlu1 %v5800_v5, %s7086_s27 }
0x11ef   : >> { %v2219_v24 = vpop.permute.xlu1 %2218 }
0x11f0   : >> { %v2224_v15 = vsel %vm2055_vm6, %v2219_v24, 0 }
0x11f3   : >> { %v2214_v12 = vpop.permute.xlu1 %2213 }
0x11f7   : >> { %v2357_v17 = vpop.permute.xlu1 %2356 }
0x11f8   : >> { %v2362_v19 = vsel %vm2055_vm6, %v2357_v17, 0 }
0x11fb   : >> { %v2355_v18 = vpop.permute.xlu1 %2354 }
0x11ff   : >> { %v2492_v20 = vpop.permute.xlu1 %2491 }
0x1200   : >> { %v2497_v25 = vsel %vm2055_vm6, %v2492_v20, 0 }
0x1203   : >> { %v2490_v21 = vpop.permute.xlu1 %2489 }
0x1256   : >> { %v2123_v61 = vpop.f32.mrb[0].mxu0 }
0x1257   : >> { %v2124_v62 = vadd.f32 %v2123_v61, %v7717_v60  ;;  %v6210_v63 = vpop.f32.mrb[1].mxu0 }
0x1258   : >> { %v2126_v22 = vpop.f32.mrb[2].mxu0  ;;  %v2540_v63 = vld [vmem:[#allocation6 + $0x18] sm:$0xff] }
0x1259   : >> { %v6211_v1 = vpop.f32.mrb[3].mxu0  ;;  %v2130_v2 = vsel %vm2055_vm6, %v2124_v62, -inf }
0x125a   : >> { %2131 = vmax.xlane.f32.xlu0 %v2130_v2  ;;  %v5803_v2 = vcombine.low %v7741_v9, %v7741_v9 }
0x12e7   : >> { %v2132_v6 = vpop.xlane.xlu0 %2131 }
0x12e8   : >> { %v7732_v7 = vmax.f32 %v7729_v3, %v2132_v6 }
0x12ea   : >> { %v2134_v8 = vsub.f32 %v7729_v3, %v7732_v7  ;;  %2209 = vst.msk [vmem:[#allocation6] sm:$0xff] %vm2046_vm5, %v7732_v7  ;;  %2139 = vperm.xlu0 %6735, %v7732_v7  }
0x12ec   : >> { %v2135_v53 = vmul.f32 1.442695, %v2134_v8 }
0x1369   : >> { %v2140_v11 = vpop.permute.xlu0 %2139 }
0x136a   : >> { %v2142_v35 = vsub.f32 %v2124_v62, %v2140_v11 }
0x136c   : >> { %v2143_v13 = vmul.f32 1.442695, %v2142_v35  ;;  %v2152_v35 = vld [vmem:[#allocation8] sm:$0xff] }
0x136e   : >> { %6739 = vpow2.f32 %v2143_v13 }
0x136f   : >> { %6741 = vpow2.f32 %v2135_v53 }
0x1378   : >> { %v7746_v14 = vpop.eup %6739 }
0x1379   : >> { %v2159_v16 = vpack.c.bf16 %v7746_v14, %v7746_v14  ;;  %v7775_v62 = vpop.eup %6741  ;;  %v2147_v5 = vsel %vm2055_vm6, %v7746_v14, 0.0 }
0x137b   : >> { %6215 = vmatmul.mubr.msk.bf16.vlgmr.msra.gmra.mrb[0].mxu1 %vm2055_vm6, %v2159_v16 }
0x137c   : >> { %6219 = vmatpush3.bf16.xpose.msra.mxu1 %v2224_v15  ;;  %6220 = vmatprep.mubr.msk.bf16.mxu1 %vm7082_vm7, %v7081_v52 }
0x137d   : >> { %6230 = vmatprep.subr.bf16.mxu1 %v7081_v52 }
0x1383   : >> { %6221 = vmatmul.mubr.msk.bf16.vlgmr.msra.gmra.mrb[4].mxu1 %vm2055_vm6, %v2214_v12 }
0x1384   : >> { %6231 = vmatpush3.bf16.xpose.msra.mxu1 %v2362_v19  ;;  %6232 = vmatprep.mubr.msk.bf16.mxu1 %vm7082_vm7, %v7081_v52 }
0x1385   : >> { %6242 = vmatprep.subr.bf16.mxu1 %v7081_v52 }
0x138b   : >> { %6233 = vmatmul.mubr.msk.bf16.vlgmr.msra.gmra.mrb[8].mxu1 %vm2055_vm6, %v2355_v18 }
0x138c   : >> { %6243 = vmatpush3.bf16.xpose.msra.mxu1 %v2497_v25  ;;  %6244 = vmatprep.mubr.msk.bf16.mxu1 %vm7082_vm7, %v7081_v52 }
0x1393   : >> { %6245 = vmatmul.mubr.msk.bf16.vlgmr.msra.gmra.mrb[12].mxu1 %vm2055_vm6, %v2490_v21 }
0x144e   : >> { %v7765_v23 = vpop.f32.mrb[0].mxu1 }
0x144f   : >> { %v6216_v26 = vpop.f32.mrb[1].mxu1 }
0x1450   : >> { %v2204_v37 = vpop.f32.mrb[2].mxu1 }
0x1451   : >> { %v6217_v27 = vpop.f32.mrb[3].mxu1 }
0x1456   : >> { %v2260_v28 = vpop.f32.mrb[4].mxu1 }
0x1457   : >> { %v2261_v29 = vadd.f32 %v2260_v28, %v7717_v60  ;;  %v6222_v30 = vpop.f32.mrb[5].mxu1 }
0x1458   : >> { %v2263_v31 = vpop.f32.mrb[6].mxu1 }
0x1459   : >> { %v6223_v32 = vpop.f32.mrb[7].mxu1  ;;  %v2268_v34 = vsel %vm2055_vm6, %v2261_v29, -inf }
0x145a   : >> { %2269 = vmax.xlane.f32.xlu1 %v2268_v34 }
0x145e   : >> { %v2398_v38 = vpop.f32.mrb[8].mxu1 }
0x145f   : >> { %v2399_v33 = vadd.f32 %v2398_v38, %v7717_v60  ;;  %v6234_v36 = vpop.f32.mrb[9].mxu1 }
0x1460   : >> { %v2401_v39 = vpop.f32.mrb[10].mxu1  ;;  %v2145_v36 = vld [vmem:[#allocation7] sm:$0xff] }
0x1461   : >> { %v6235_v40 = vpop.f32.mrb[11].mxu1  ;;  %v2406_v42 = vsel %vm2055_vm6, %v2399_v33, -inf  ;;  %v2146_v39 = vmul.f32 %v7775_v62, %v2145_v36 }
0x1462   : >> { %2407 = vmax.xlane.f32.xlu0 %v2406_v42 }
0x1466   : >> { %v2533_v43 = vpop.f32.mrb[12].mxu1 }
0x1467   : >> { %v2534_v44 = vadd.f32 %v2533_v43, %v7717_v60  ;;  %v6246_v45 = vpop.f32.mrb[13].mxu1 }
0x1468   : >> { %v2536_v46 = vpop.f32.mrb[14].mxu1 }
0x1469   : >> { %v6247_v48 = vpop.f32.mrb[15].mxu1  ;;  %v2541_v47 = vsel %vm2055_vm6, %v2534_v44, -inf }
0x146a   : >> { %2542 = vmax.xlane.f32.xlu1 %v2541_v47 }
0x14e7   : >> { %v2270_v54 = vpop.xlane.xlu1 %2269 }
0x14e8   : >> { %v2271_v56 = vmax.f32 %v2267_v50, %v2270_v54 }
0x14ea   : >> { %v2272_v57 = vsub.f32 %v2267_v50, %v2271_v56  ;;  %2353 = vst.msk [vmem:[#allocation6 + $0x8] sm:$0xff] %vm2046_vm5, %v2271_v56  ;;  %2277 = vperm.xlu1 %6736, %v2271_v56   ;;  %v2557_v56 = vld [vmem:[#allocation7 + $0x18] sm:$0xff] }
0x14ec   : >> { %v2273_v3 = vmul.f32 1.442695, %v2272_v57 }
0x14ef   : >> { %v2408_v58 = vpop.xlane.xlu0 %2407 }
0x14f0   : >> { %v2409_v59 = vmax.f32 %v2405_v55, %v2408_v58 }
0x14f2   : >> { %v2410_v61 = vsub.f32 %v2405_v55, %v2409_v59  ;;  %2488 = vst.msk [vmem:[#allocation6 + $0x10] sm:$0xff] %vm2046_vm5, %v2409_v59  ;;  %2415 = vperm.xlu0 %6735, %v2409_v59   ;;  %v2292_v59 = vld [vmem:[#allocation8 + $0x8] sm:$0xff] }
0x14f4   : >> { %v2411_v60 = vmul.f32 1.442695, %v2410_v61 }
0x14f6   : >> { %6743 = vpow2.f32 %v2411_v60  ;;  %2155 = vperm.xlu0 %6735, %v7775_v62  }
0x14f7   : >> { %v2543_v22 = vpop.xlane.xlu1 %2542  ;;  %6745 = vpow2.f32 %v2273_v3 }
0x14f8   : >> { %v2544_v1 = vmax.f32 %v2540_v63, %v2543_v22 }
0x14fa   : >> { %v2545_v0 = vsub.f32 %v2540_v63, %v2544_v1  ;;  %2623 = vst.msk [vmem:[#allocation6 + $0x18] sm:$0xff] %vm2046_vm5, %v2544_v1  ;;  %2550 = vperm.xlu1 %6736, %v2544_v1  }
0x14fc   : >> { %v2546_v32 = vmul.f32 1.442695, %v2545_v0 }
0x14fe   : >> { %2303 = vrot.lane.b32.xlu1 %v5803_v2, %s7084_s10 }
0x1500   : >> { %v7782_v4 = vpop.eup %6743 }
0x1501   : >> { %2433 = vperm.xlu0 %6735, %v7782_v4   ;;  %v6746_v6 = vpop.eup %6745 }
0x1502   : >> { %2438 = vrot.lane.b32.xlu1 %v5803_v2, %s7085_s12 }
0x1506   : >> { %2573 = vrot.lane.b32.xlu1 %v5803_v2, %s7086_s27  ;;  %v2430_v2 = vld [vmem:[#allocation8 + $0x10] sm:$0xff] }
0x152a   : >> { %2148 = vadd.xlane.f32.xlu1 %v2147_v5 }
0x153b   : >> { %2295 = vperm.xlu1 %6736, %v6746_v6  }
0x1569   : >> { %v2278_v7 = vpop.permute.xlu1 %2277 }
0x156a   : >> { %v2280_v8 = vsub.f32 %v2261_v29, %v2278_v7 }
0x156c   : >> { %v2281_v9 = vmul.f32 1.442695, %v2280_v8  ;;  %v2565_v8 = vld [vmem:[#allocation8 + $0x18] sm:$0xff] }
0x156e   : >> { %6747 = vpow2.f32 %v2281_v9 }
0x1571   : >> { %v2416_v10 = vpop.permute.xlu0 %2415 }
0x1572   : >> { %v2418_v11 = vsub.f32 %v2399_v33, %v2416_v10 }
0x1574   : >> { %v2419_v13 = vmul.f32 1.442695, %v2418_v11 }
0x1575   : >> { %v2156_v24 = vpop.permute.xlu0 %2155 }
0x1576   : >> { %6749 = vpow2.f32 %v2419_v13  ;;  %v2158_v12 = vmul.f32 %v2156_v24, %v2152_v35 }
0x1578   : >> { %v6748_v15 = vpop.eup %6747  ;;  %v2207_v16 = vadd.f32 %v7765_v23, %v2158_v12 }
0x1579   : >> { %v2551_v14 = vpop.permute.xlu1 %2550  ;;  %v2286_v17 = vsel %vm2055_vm6, %v6748_v15, 0.0  ;;  %v2299_v26 = vpack.c.bf16 %v6748_v15, %v6748_v15 }
0x157a   : >> { %2208 = vst.msk [vmem:[#allocation8] sm:$0xff] %vm2055_vm6, %v2207_v16  ;;  %v2553_v18 = vsub.f32 %v2534_v44, %v2551_v14  ;;  %2287 = vadd.xlane.f32.xlu0 %v2286_v17  ;;  %v2284_v44 = vld [vmem:[#allocation7 + $0x8] sm:$0xff] }
0x157b   : >> { %v2285_v45 = vmul.f32 %v6746_v6, %v2284_v44 }
0x157c   : >> { %v2554_v19 = vmul.f32 1.442695, %v2553_v18 }
0x157d   : >> { %v2304_v20 = vpop.permute.xlu1 %2303 }
0x157e   : >> { %6751 = vpow2.f32 %v2554_v19  ;;  %v2309_v25 = vsel %vm2163_vm9, %v2304_v20, 0 }
0x157f   : >> { %6225 = vmatpush3.bf16.msra.mxu0 %v2309_v25  ;;  %6753 = vpow2.f32 %v2546_v32 }
0x1580   : >> { %v6750_v21 = vpop.eup %6749  ;;  %6236 = vmatprep.subr.bf16.mxu0 %v7081_v52  ;;  %v2434_v43 = vpop.permute.xlu0 %2433 }
0x1581   : >> { %v2424_v37 = vsel %vm2055_vm6, %v6750_v21, 0.0  ;;  %v2439_v23 = vpop.permute.xlu1 %2438  ;;  %v2437_v30 = vpack.c.bf16 %v6750_v21, %v6750_v21  ;;  %v2436_v0 = vmul.f32 %v2434_v43, %v2430_v2 }
0x1582   : >> { %6227 = vmatmul.mubr.msk.bf16.vlgmr.msra.gmra.mrb[4].mxu0 %vm2055_vm6, %v2299_v26  ;;  %2425 = vadd.xlane.f32.xlu0 %v2424_v37  ;;  %v2444_v27 = vsel %vm2163_vm9, %v2439_v23, 0 }
0x1583   : >> { %6237 = vmatpush3.bf16.msra.mxu0 %v2444_v27  ;;  %6238 = vmatprep.mubr.msk.bf16.mxu0 %vm7082_vm7, %v7081_v52 }
0x1584   : >> { %6248 = vmatprep.subr.bf16.mxu0 %v7081_v52 }
0x1585   : >> { %v2574_v28 = vpop.permute.xlu1 %2573 }
0x1586   : >> { %v2579_v31 = vsel %vm2163_vm9, %v2574_v28, 0 }
0x1588   : >> { %v6752_v29 = vpop.eup %6751 }
0x1589   : >> { %v2559_v34 = vsel %vm2055_vm6, %v6752_v29, 0.0  ;;  %v2572_v38 = vpack.c.bf16 %v6752_v29, %v6752_v29  ;;  %v6754_v33 = vpop.eup %6753 }
0x158a   : >> { %6239 = vmatmul.mubr.msk.bf16.vlgmr.msra.gmra.mrb[8].mxu0 %vm2055_vm6, %v2437_v30  ;;  %2560 = vadd.xlane.f32.xlu1 %v2559_v34  ;;  %v2558_v57 = vmul.f32 %v6754_v33, %v2557_v56 }
0x158b   : >> { %6249 = vmatpush3.bf16.msra.mxu0 %v2579_v31  ;;  %6250 = vmatprep.mubr.msk.bf16.mxu0 %vm7082_vm7, %v7081_v52  ;;  %v2422_v52 = vld [vmem:[#allocation7 + $0x10] sm:$0xff] }
0x158c   : >> { %v2423_v47 = vmul.f32 %v7782_v4, %v2422_v52 }
0x1592   : >> { %6251 = vmatmul.mubr.msk.bf16.vlgmr.msra.gmra.mrb[12].mxu0 %vm2055_vm6, %v2572_v38 }
0x1598   : >> { %2568 = vperm.xlu0 %6735, %v6754_v33  }
0x15b7   : >> { %v2149_v40 = vpop.xlane.xlu1 %2148 }
0x15b8   : >> { %v2150_v42 = vadd.f32 %v2149_v40, %v2146_v39 }
0x15ba   : >> { %2151 = vst.msk [vmem:[#allocation7] sm:$0xff] %vm2046_vm5, %v2150_v42 }
0x15bb   : >> { %v2296_v54 = vpop.permute.xlu1 %2295 }
0x15bc   : >> { %v2298_v61 = vmul.f32 %v2296_v54, %v2292_v59 }
0x1607   : >> { %v2288_v46 = vpop.xlane.xlu0 %2287 }
0x1608   : >> { %v2289_v48 = vadd.f32 %v2288_v46, %v2285_v45 }
0x160a   : >> { %2290 = vst.msk [vmem:[#allocation7 + $0x8] sm:$0xff] %vm2046_vm5, %v2289_v48 }
0x160f   : >> { %v2426_v50 = vpop.xlane.xlu0 %2425 }
0x1610   : >> { %v2427_v53 = vadd.f32 %v2426_v50, %v2423_v47 }
0x1612   : >> { %2428 = vst.msk [vmem:[#allocation7 + $0x10] sm:$0xff] %vm2046_vm5, %v2427_v53 }
0x1617   : >> { %v2561_v55 = vpop.xlane.xlu1 %2560  ;;  %v2569_v9 = vpop.permute.xlu0 %2568 }
0x1618   : >> { %v2562_v58 = vadd.f32 %v2561_v55, %v2558_v57  ;;  %v2571_v10 = vmul.f32 %v2569_v9, %v2565_v8 }
0x161a   : >> { %2563 = vst.msk [vmem:[#allocation7 + $0x18] sm:$0xff] %vm2046_vm5, %v2562_v58 }
0x1655   : >> { %v2345_v60 = vpop.f32.mrb[4].mxu0 }
0x1656   : >> { %v2351_v62 = vadd.f32 %v2345_v60, %v2298_v61  ;;  %v6228_v63 = vpop.f32.mrb[5].mxu0 }
0x1657   : >> { %v2348_v22 = vpop.f32.mrb[6].mxu0 }
0x1658   : >> { %2352 = vst.msk [vmem:[#allocation8 + $0x8] sm:$0xff] %vm2055_vm6, %v2351_v62  ;;  %v6229_v1 = vpop.f32.mrb[7].mxu0 }
0x165d   : >> { %v2480_v4 = vpop.f32.mrb[8].mxu0 }
0x165e   : >> { %v2486_v5 = vadd.f32 %v2480_v4, %v2436_v0  ;;  %v6240_v3 = vpop.f32.mrb[9].mxu0 }
0x165f   : >> { %v2483_v6 = vpop.f32.mrb[10].mxu0 }
0x1660   : >> { %2487 = vst.msk [vmem:[#allocation8 + $0x10] sm:$0xff] %vm2055_vm6, %v2486_v5  ;;  %v6241_v7 = vpop.f32.mrb[11].mxu0 }
0x1662   : > { %2066 = sbr.rel (!%p2063_p1) target bundleno = 4470 (0x1176), region = 295 }
0x1665   : >> { %v2615_v11 = vpop.f32.mrb[12].mxu0 }
0x1666   : >> { %v2621_v35 = vadd.f32 %v2615_v11, %v2571_v10  ;;  %v6252_v13 = vpop.f32.mrb[13].mxu0 }
0x1667   : >> { %v2618_v24 = vpop.f32.mrb[14].mxu0 }
0x1668   : >> { %2622 = vst.msk [vmem:[#allocation8 + $0x18] sm:$0xff] %vm2055_vm6, %v2621_v35  ;;  %v6253_v12 = vpop.f32.mrb[15].mxu0 }
0x1669 PF: > { %v2637_v15 = vld [vmem:[#allocation7 + $0x8] sm:$0xff]  ;;  %v2661_v16 = vld [vmem:[#allocation7 + $0x18] sm:$0xff]  ;;  %v2649_v14 = vld [vmem:[#allocation7 + $0x10] sm:$0xff]  ;;  %6254 = vmatprep.subr.bf16.mxu0 %v7080_v51  ;;  %v7087_v17 = vmov 0   ;;  %vm7088_vm10 = vmmov 0   ;;  %s7089_s12 = smov 8   ;;  %v2747_v47 = vlaneseq }
0x166a   : > { %6755 = vset.pattern.permute.xlu0 %v7087_v17  ;;  %6756 = vset.pattern.permute.xlu1 %v7087_v17  ;;  %6759 = vrcp.f32 %v2637_v15  ;;  %v2625_v18 = vld [vmem:[#allocation7] sm:$0xff]  ;;  %v6758_v26 = vld [vmem:[%s8653_s7 + $0x8] sm:$0xff]   ;;  %s7090_s27 = smov 16   ;;  %s7091_s11 = smov 24   ;;  %vm2684_vm11 = vcmask 195584   ;;  %v2745_v54 = vld [vmem:[#allocation2 + $0x10] sm:$0xff] }
0x166b   : > { %6761 = vrcp.f32 %v2661_v16  ;;  %v6757_v49 = vld [vmem:[%s8653_s7] sm:$0xff]   ;;  %6258 = vmatprep.mubr.msk.bf16.mxu0 %vm7088_vm10, %v7080_v51  ;;  %v2647_v31 = vld [vmem:[#allocation8 + $0x10] sm:$0xff]  ;;  %v2748_v50 = vshrl.u32 %v2747_v47, 7 }
0x166c   : > { %6763 = vrcp.f32 %v2649_v14  ;;  %6255 = vmatpush3.bf16.msra.mxu0 %v6757_v49  ;;  %v2635_v37 = vld [vmem:[#allocation8 + $0x8] sm:$0xff] }
0x166d   : > { %6765 = vrcp.f32 %v2625_v18  ;;  %6256 = vmatprep.subr.bf16.mxu0 %v7080_v51  ;;  %v2624_v51 = vld [vmem:[#allocation8] sm:$0xff]  ;;  %v2749_v53 = vsub.s32 0, %v2748_v50 }
0x166f   : > { %v2659_v23 = vld [vmem:[#allocation8 + $0x18] sm:$0xff]  ;;  %v2750_v56 = vrot.slane %v7294_v41, %v2749_v53 }
0x1670   : > { %6257 = vmatpush3.bf16.msra.mxu0 %v6758_v26 }
0x1674   : > { %v6760_v19 = vpop.eup %6759 }
0x1675   : > { %v6762_v20 = vpop.eup %6761  ;;  %2641 = vperm.xlu0 %6755, %v6760_v19  }
0x1676   : > { %v6764_v25 = vpop.eup %6763  ;;  %2665 = vperm.xlu1 %6756, %v6762_v20  }
0x1677   : > { %v6766_v21 = vpop.eup %6765 }
0x1679   : > { %2653 = vperm.xlu0 %6755, %v6764_v25  }
0x167a   : > { %2629 = vperm.xlu1 %6756, %v6766_v21  }
0x16f4   : > { %v2642_v27 = vpop.permute.xlu0 %2641 }
0x16f5   : > { %v2644_v28 = vmul.f32 %v2642_v27, %v2635_v37  ;;  %v2666_v29 = vpop.permute.xlu1 %2665 }
0x16f6   : > { %v2668_v30 = vmul.f32 %v2666_v29, %v2659_v23 }
0x16f7   : > { %v2645_v32 = vpack.c.bf16 %v2644_v28, %v2644_v28 }
0x16f8   : > { %v2654_v34 = vpop.permute.xlu0 %2653  ;;  %v2669_v38 = vpack.c.bf16 %v2668_v30, %v2668_v30 }
0x16f9   : > { %v2656_v33 = vmul.f32 %v2654_v34, %v2647_v31  ;;  %2671 = vrot.lane.b32.xlu0 %v2645_v32, %s7089_s12  ;;  %v2630_v39 = vpop.permute.xlu1 %2629 }
0x16fa   : > { %v2632_v40 = vmul.f32 %v2630_v39, %v2624_v51 }
0x16fb   : > { %v2657_v36 = vpack.c.bf16 %v2656_v33, %v2656_v33 }
0x16fc   : > { %v2633_v43 = vpack.c.bf16 %v2632_v40, %v2632_v40 }
0x16fd   : > { %2674 = vrot.lane.b32.xlu1 %v2657_v36, %s7090_s27  ;;  %2677 = vrot.lane.b32.xlu0 %v2669_v38, %s7091_s11 }
0x176b   : > { %v2672_v42 = vpop.permute.xlu0 %2671 }
0x176c   : > { %v2681_v44 = vsel %vm2055_vm6, %v2633_v43, %v2672_v42 }
0x176f   : > { %v2675_v45 = vpop.permute.xlu1 %2674  ;;  %v2678_v46 = vpop.permute.xlu0 %2677 }
0x1770   : > { %v2683_v48 = vsel %vm343_vm1, %v2681_v44, %v2675_v45 }
0x1771   : > { %v2686_v52 = vsel %vm2684_vm11, %v2683_v48, %v2678_v46 }
0x1772   : > { %6259 = vmatmul.mubr.msk.bf16.vlgmr.msra.gmra.mrb[0].mxu0 %vm433_vm2, %v2686_v52 }
0x1845   : > { %v2739_v57 = vpop.f32.mrb[0].mxu0 }
0x1846   : > { %v2746_v55 = vadd.f32 %v2745_v54, %v2739_v57  ;;  %v6260_v58 = vpop.f32.mrb[1].mxu0 }
0x1847   : > { %v2742_v59 = vpop.f32.mrb[2].mxu0 }
0x1848   : > { %v2751_v61 = vadd.f32 %v2750_v56, %v2746_v55  ;;  %v6261_v60 = vpop.f32.mrb[3].mxu0 }
0x184a   : > { %2752 = vst.msk [vmem:[#allocation2 + $0x10] sm:$0xff] %vm433_vm2, %v2751_v61 }
0x184b PF: > { %v7833_v62 = vld [vmem:[#allocation2] sm:$0xff]  ;;  %v7837_v22 = vld [vmem:[#allocation2 + $0x8] sm:$0xff]  ;;  %v2813_v17 = vld [vmem:[%s8650_s4 + $0x10] sm:$0xff]  ;;  %vm2895_vm12 = vcmask 523264   ;;  %s8663_s12 = smov 96   ;;  %s8664_s27 = smov 64  }
0x184c   : > { %v2758_v1 = vsel %vm433_vm2, %v7833_v62, 0.0  ;;  %v2761_v2 = vsel %vm433_vm2, %v7837_v22, 0.0  ;;  %v2811_v16 = vld [vmem:[%s8650_s4] sm:$0xff]  ;;  %v2812_v14 = vld [vmem:[%s8650_s4 + $0x8] sm:$0xff]  ;;  %v2814_v19 = vld [vmem:[%s8650_s4 + $0x18] sm:$0xff]  ;;  %vm3147_vm13 = vcmask (!%p5755_p5), 7168  }
0x184d   : > { %2759 = vadd.xlane.f32.xlu0 %v2758_v1  ;;  %v2815_v18 = vpack.c.bf16 %v2812_v14, %v2811_v16  ;;  %v2816_v20 = vpack.c.bf16 %v2814_v19, %v2813_v17  ;;  %v2881_v25 = vld [vmem:[%s8649_s3 + $0x16] sm:$0xff]  ;;  %v2882_v21 = vld [vmem:[%s8649_s3 + $0x1e] sm:$0xff]  ;;  %v2883_v49 = vld [vmem:[%s8649_s3 + $0x26] sm:$0xff]  ;;  %vm3156_vm14 = vcmask (!%p5755_p5), 64512   ;;  %p5836_p2 = scmp.le.s32.totalorder (!%p5755_p5), %s8675_s29, 0 }
0x184e   : > { %v2889_v26 = vpack.c.bf16 %v2882_v21, %v2881_v25  ;;  %v2884_v37 = vld [vmem:[%s8649_s3 + $0x2e] sm:$0xff]  ;;  %v2885_v57 = vld [vmem:[%s8649_s3 + $0x36] sm:$0xff]  ;;  %v2886_v55 = vld [vmem:[%s8649_s3 + $0x3e] sm:$0xff] }
0x184f   : > { %6262 = vmatprep.subr.bf16.mxu0 %v2815_v18  ;;  %v2890_v23 = vpack.c.bf16 %v2884_v37, %v2883_v49  ;;  %v5812_v51 = vld [vmem:[%s8649_s3 + $0x13] ss:$0 sm:$0xff]  ;;  %v5813_v46 = vld [vmem:[%s8649_s3 + $0x14] ss:$0 sm:$0xff]  ;;  %v2891_v58 = vpack.c.bf16 %v2886_v55, %v2885_v57  ;;  %v2887_v59 = vld [vmem:[%s8649_s3 + $0x46] sm:$0xff] }
0x1850   : > { %6263 = vmatpush3.bf16.msra.mxu0 %v2815_v18  ;;  %6270 = vmatprep.subr.bf16.mxu1 %v2889_v26  ;;  %v2888_v61 = vld [vmem:[%s8649_s3 + $0x4e] sm:$0xff]  ;;  %v5814_v1 = vld [vmem:[%s8650_s4 + $0x20] ss:$0 sm:$0xff]  ;;  %v5820_v57 = vld [vmem:[%s8649_s3 + $0x56] ss:$0 sm:$0xff] }
0x1851   : > { %v7835_v63 = vld [vmem:[#allocation2 + $0x10] sm:$0xff]  ;;  %2762 = vadd.xlane.f32.xlu0 %v2761_v2  ;;  %6264 = vmatprep.subr.bf16.mxu0 %v2816_v20  ;;  %v2892_v60 = vpack.c.bf16 %v2888_v61, %v2887_v59 }
0x1852   : > { %v2764_v41 = vsel %vm433_vm2, %v7835_v63, 0.0  ;;  %6271 = vmatpush3.bf16.msra.mxu1 %v2889_v26 }
0x1853   : > { %2765 = vadd.xlane.f32.xlu1 %v2764_v41  ;;  %6272 = vmatprep.subr.bf16.mxu1 %v2890_v23 }
0x1854   : > { %6265 = vmatpush3.bf16.msra.mxu0 %v2816_v20 }
0x1856   : > { %6273 = vmatpush3.bf16.msra.mxu1 %v2890_v23 }
0x1857   : > { %6274 = vmatprep.subr.bf16.mxu1 %v2891_v58 }
0x185a   : > { %6275 = vmatpush3.bf16.msra.mxu1 %v2891_v58 }
0x185b   : > { %6276 = vmatprep.subr.bf16.mxu1 %v2892_v60 }
0x185e   : > { %6277 = vmatpush3.bf16.msra.mxu1 %v2892_v60 }
0x18da   : > { %v2760_v0 = vpop.xlane.xlu0 %2759 }
0x18db   : > { %v2767_v5 = vmul.f32 0.03125, %v2760_v0 }
0x18dd   : > { %v2770_v6 = vsub.f32 %v7833_v62, %v2767_v5 }
0x18de   : > { %v2763_v8 = vpop.xlane.xlu0 %2762 }
0x18df   : > { %v2768_v9 = vmul.f32 0.03125, %v2763_v8  ;;  %v2773_v10 = vmul.f32 %v2770_v6, %v2770_v6 }
0x18e0   : > { %v2766_v4 = vpop.xlane.xlu1 %2765 }
0x18e1   : > { %v2769_v3 = vmul.f32 0.03125, %v2766_v4  ;;  %v2771_v35 = vsub.f32 %v7837_v22, %v2768_v9  ;;  %v2776_v13 = vsel %vm433_vm2, %v2773_v10, 0.0 }
0x18e2   : > { %2777 = vadd.xlane.f32.xlu1 %v2776_v13  ;;  %v5819_v13 = vld [vmem:[%s8649_s3 + $0x15] ss:$0 sm:$0xff] }
0x18e3   : > { %v2772_v7 = vsub.f32 %v7835_v63, %v2769_v3  ;;  %v2774_v12 = vmul.f32 %v2771_v35, %v2771_v35 }
0x18e5   : > { %v2775_v11 = vmul.f32 %v2772_v7, %v2772_v7  ;;  %v2779_v15 = vsel %vm433_vm2, %v2774_v12, 0.0 }
0x18e6   : > { %2780 = vadd.xlane.f32.xlu0 %v2779_v15 }
0x18e7   : > { %v2782_v24 = vsel %vm433_vm2, %v2775_v11, 0.0 }
0x18e8   : > { %2783 = vadd.xlane.f32.xlu1 %v2782_v24 }
0x196f   : > { %v2778_v27 = vpop.xlane.xlu1 %2777 }
0x1970   : > { %v2785_v28 = vmul.f32 0.03125, %v2778_v27 }
0x1972   : > { %v2788_v29 = vadd.f32 1e-06, %v2785_v28 }
0x1973   : > { %v2781_v31 = vpop.xlane.xlu0 %2780 }
0x1974   : > { %6769 = vrsqrt.f32 %v2788_v29  ;;  %v2786_v34 = vmul.f32 0.03125, %v2781_v31 }
0x1975   : > { %v2784_v30 = vpop.xlane.xlu1 %2783 }
0x1976   : > { %v2787_v32 = vmul.f32 0.03125, %v2784_v30  ;;  %v2789_v33 = vadd.f32 1e-06, %v2786_v34 }
0x1978   : > { %v2790_v38 = vadd.f32 1e-06, %v2787_v32 }
0x197a   : > { %6771 = vrsqrt.f32 %v2790_v38 }
0x197b   : > { %6773 = vrsqrt.f32 %v2789_v33 }
0x197e   : > { %v6770_v36 = vpop.eup %6769 }
0x197f   : > { %v2794_v39 = vmul.f32 %v6770_v36, %v2770_v6 }
0x1981   : > { %v2801_v45 = vmul.f32 %v5812_v51, %v2794_v39 }
0x1983   : > { %v2808_v50 = vadd.f32 %v5813_v46, %v2801_v45 }
0x1984   : > { %v6772_v40 = vpop.eup %6771 }
0x1985   : > { %v6774_v42 = vpop.eup %6773  ;;  %v2796_v43 = vmul.f32 %v6772_v40, %v2772_v7  ;;  %v7918_v40 = vld [vmem:[%s8649_s3 + $0x58] sm:$0x1] }
0x1986   : > { %v2795_v44 = vmul.f32 %v6774_v42, %v2771_v35  ;;  %v6767_v42 = vld [vmem:[%s8651_s5 + $0x10] sm:$0xff]  }
0x1987   : > { %v2803_v48 = vmul.f32 %v5812_v51, %v2796_v43  ;;  %v6768_v43 = vld [vmem:[%s8651_s5 + $0x18] sm:$0xff]   ;;  %6282 = vmatprep.subr.bf16.mxu0 %v6767_v42 }
0x1988   : > { %v2802_v52 = vmul.f32 %v5812_v51, %v2795_v44 }
0x1989   : > { %v2810_v47 = vadd.f32 %v5813_v46, %v2803_v48 }
0x198a   : > { %v2809_v53 = vadd.f32 %v5813_v46, %v2802_v52 }
0x198b   : > { %v2819_v54 = vpack.c.bf16 %v2810_v47, %v2810_v47 }
0x198c   : > { %v2818_v56 = vpack.c.bf16 %v2809_v53, %v2808_v50 }
0x198e   : > { %6266 = vmatprep.mubr.msk.bf16.mxu0 %vm433_vm2, %v2818_v56 }
0x198f   : > { %6267 = vmatmul.mubr.msk.bf16.vlgmr.msra.gmra.mrb[0].mxu0 %vm433_vm2, %v2819_v54 }
0x1990   : > { %6283 = vmatpush3.bf16.msra.mxu0 %v6767_v42 }
0x1991   : > { %6284 = vmatprep.subr.bf16.mxu0 %v6768_v43 }
0x1994   : > { %6285 = vmatpush3.bf16.msra.mxu0 %v6768_v43 }
0x1a62   : > { %v6268_v41 = vpop.f32.mrb[0].mxu0 }
0x1a63   : > { %v2873_v2 = vadd.f32 %v6268_v41, %v5814_v1  ;;  %v2864_v0 = vpop.f32.mrb[1].mxu0 }
0x1a64   : > { %v2865_v4 = vadd.f32 %v5814_v1, %v2864_v0  ;;  %v6269_v5 = vpop.f32.mrb[2].mxu0 }
0x1a65   : > { %v2867_v3 = vpop.f32.mrb[3].mxu0  ;;  %v2880_v7 = vmax.f32 %v2873_v2, 0.0 }
0x1a66   : > { %v2868_v6 = vadd.f32 %v5814_v1, %v2867_v3  ;;  %v2878_v8 = vmax.f32 %v2865_v4, 0.0  ;;  %v5821_v1 = vld [vmem:[%s8649_s3 + $0x57] ss:$0 sm:$0xff] }
0x1a67   : > { %v2894_v11 = vpack.c.bf16 %v2880_v7, %v2880_v7 }
0x1a68   : > { %v2879_v9 = vmax.f32 %v2868_v6, 0.0 }
0x1a6a   : > { %v2893_v10 = vpack.c.bf16 %v2879_v9, %v2878_v8  ;;  %v5827_v8 = vld [vmem:[%s8652_s6 + $0x1] ss:$0 sm:$0xff] }
0x1a6c   : > { %6278 = vmatprep.mubr.msk.bf16.mxu1 %vm2895_vm12, %v2893_v10 }
0x1a6d   : > { %6279 = vmatmul.mubr.msk.bf16.vlgmr.msra.gmra.mrb[0].mxu1 %vm2895_vm12, %v2894_v11 }
0x1b40   : > { %v6280_v35 = vpop.f32.mrb[0].mxu1 }
0x1b41   : > { %v2952_v24 = vadd.f32 %v6280_v35, %v7835_v63  ;;  %v2936_v12 = vpop.f32.mrb[1].mxu1 }
0x1b42   : > { %v2950_v15 = vadd.f32 %v2936_v12, %v7833_v62  ;;  %v6281_v16 = vpop.f32.mrb[2].mxu1 }
0x1b43   : > { %v2960_v14 = vadd.f32 %v5819_v13, %v2952_v24  ;;  %v2939_v17 = vpop.f32.mrb[3].mxu1 }
0x1b44   : > { %v2958_v18 = vadd.f32 %v5819_v13, %v2950_v15  ;;  %v2951_v19 = vadd.f32 %v2939_v17, %v7837_v22 }
0x1b45   : > { %2963 = vst.msk [vmem:[#allocation2 + $0x10] sm:$0xff] %vm433_vm2, %v2960_v14 }
0x1b46   : > { %2961 = vst.msk [vmem:[#allocation2] sm:$0xff] %vm433_vm2, %v2958_v18  ;;  %v2959_v20 = vadd.f32 %v5819_v13, %v2951_v19 }
0x1b48   : > { %2962 = vst.msk [vmem:[#allocation2 + $0x8] sm:$0xff] %vm433_vm2, %v2959_v20 }
0x1b4c   : > { %v2967_v49 = vld [vmem:[#allocation2 + $0x10] sm:$0xff] }
0x1b4d   : > { %v2965_v25 = vld [vmem:[#allocation2] sm:$0xff]  ;;  %v2976_v26 = vsel %vm433_vm2, %v2967_v49, 0.0 }
0x1b4e   : > { %v2970_v21 = vsel %vm433_vm2, %v2965_v25, 0.0 }
0x1b4f   : > { %2971 = vadd.xlane.f32.xlu0 %v2970_v21  ;;  %v2966_v63 = vld [vmem:[#allocation2 + $0x8] sm:$0xff] }
0x1b50   : > { %v2973_v62 = vsel %vm433_vm2, %v2966_v63, 0.0 }
0x1b51   : > { %2974 = vadd.xlane.f32.xlu1 %v2973_v62  ;;  %v7093_v62 = vmov (!%p5755_p5), 0.0  }
0x1b52   : > { %3152 = vst.msk [vmem:[#allocation7] sm:$0xff] (!%p5755_p5), %vm3147_vm13, %v7093_v62  ;;  %3153 = vst.msk [vmem:[#allocation7 + $0x8] sm:$0xff] (!%p5755_p5), %vm3147_vm13, %v7093_v62 }
0x1b53   : > { %2977 = vadd.xlane.f32.xlu0 %v2976_v26  ;;  %3154 = vst.msk [vmem:[#allocation7 + $0x10] sm:$0xff] (!%p5755_p5), %vm3147_vm13, %v7093_v62  ;;  %3155 = vst.msk [vmem:[#allocation7 + $0x18] sm:$0xff] (!%p5755_p5), %vm3147_vm13, %v7093_v62 }
0x1b54   : > { %3157 = vst.msk [vmem:[#allocation8] sm:$0xff] (!%p5755_p5), %vm3156_vm14, %v7093_v62  ;;  %3158 = vst.msk [vmem:[#allocation8 + $0x8] sm:$0xff] (!%p5755_p5), %vm3156_vm14, %v7093_v62 }
0x1b55   : > { %3159 = vst.msk [vmem:[#allocation8 + $0x10] sm:$0xff] (!%p5755_p5), %vm3156_vm14, %v7093_v62  ;;  %3160 = vst.msk [vmem:[#allocation8 + $0x18] sm:$0xff] (!%p5755_p5), %vm3156_vm14, %v7093_v62 }
0x1bdc   : > { %v2972_v22 = vpop.xlane.xlu0 %2971 }
0x1bdd   : > { %v2979_v37 = vmul.f32 0.03125, %v2972_v22 }
0x1bde   : > { %v2975_v23 = vpop.xlane.xlu1 %2974 }
0x1bdf   : > { %v2982_v27 = vsub.f32 %v2965_v25, %v2979_v37  ;;  %v2980_v28 = vmul.f32 0.03125, %v2975_v23 }
0x1be0   : > { %v2978_v29 = vpop.xlane.xlu0 %2977 }
0x1be1   : > { %v2983_v30 = vsub.f32 %v2966_v63, %v2980_v28  ;;  %v2981_v31 = vmul.f32 0.03125, %v2978_v29  ;;  %v2985_v32 = vmul.f32 %v2982_v27, %v2982_v27 }
0x1be3   : > { %v2984_v34 = vsub.f32 %v2967_v49, %v2981_v31  ;;  %v2988_v38 = vsel %vm433_vm2, %v2985_v32, 0.0  ;;  %v2986_v33 = vmul.f32 %v2983_v30, %v2983_v30  ;;  %v7092_v49 = vmov (!%p5755_p5), -inf  }
0x1be4   : > { %2989 = vadd.xlane.f32.xlu1 %v2988_v38  ;;  %3148 = vst.msk [vmem:[#allocation6] sm:$0xff] (!%p5755_p5), %vm3147_vm13, %v7092_v49  ;;  %3149 = vst.msk [vmem:[#allocation6 + $0x8] sm:$0xff] (!%p5755_p5), %vm3147_vm13, %v7092_v49 }
0x1be5   : > { %v2991_v36 = vsel %vm433_vm2, %v2986_v33, 0.0  ;;  %v2987_v39 = vmul.f32 %v2984_v34, %v2984_v34  ;;  %3150 = vst.msk [vmem:[#allocation6 + $0x10] sm:$0xff] (!%p5755_p5), %vm3147_vm13, %v7092_v49  ;;  %3151 = vst.msk [vmem:[#allocation6 + $0x18] sm:$0xff] (!%p5755_p5), %vm3147_vm13, %v7092_v49 }
0x1be6   : > { %2992 = vadd.xlane.f32.xlu0 %v2991_v36 }
0x1be7   : > { %v2994_v51 = vsel %vm433_vm2, %v2987_v39, 0.0 }
0x1be8   : > { %2995 = vadd.xlane.f32.xlu1 %v2994_v51 }
0x1c71   : > { %v2990_v44 = vpop.xlane.xlu1 %2989 }
0x1c72   : > { %v2997_v45 = vmul.f32 0.03125, %v2990_v44 }
0x1c73   : > { %v2993_v46 = vpop.xlane.xlu0 %2992 }
0x1c74   : > { %v3000_v48 = vadd.f32 1e-06, %v2997_v45  ;;  %v2998_v52 = vmul.f32 0.03125, %v2993_v46 }
0x1c75   : > { %v2996_v47 = vpop.xlane.xlu1 %2995 }
0x1c76   : > { %6775 = vrsqrt.f32 %v3000_v48  ;;  %v3001_v50 = vadd.f32 1e-06, %v2998_v52  ;;  %v2999_v53 = vmul.f32 0.03125, %v2996_v47 }
0x1c78   : > { %6777 = vrsqrt.f32 %v3001_v50  ;;  %v3002_v54 = vadd.f32 1e-06, %v2999_v53 }
0x1c7a   : > { %6779 = vrsqrt.f32 %v3002_v54 }
0x1c80   : > { %v6776_v56 = vpop.eup %6775 }
0x1c81   : > { %v3006_v55 = vmul.f32 %v6776_v56, %v2982_v27 }
0x1c82   : > { %v6778_v58 = vpop.eup %6777 }
0x1c83   : > { %v3007_v59 = vmul.f32 %v6778_v58, %v2983_v30  ;;  %v3013_v61 = vmul.f32 %v5820_v57, %v3006_v55 }
0x1c84   : > { %v6780_v60 = vpop.eup %6779 }
0x1c85   : > { %v3014_v41 = vmul.f32 %v5820_v57, %v3007_v59  ;;  %v3008_v2 = vmul.f32 %v6780_v60, %v2984_v34  ;;  %v3020_v0 = vadd.f32 %v5821_v1, %v3013_v61 }
0x1c87   : > { %v3021_v4 = vadd.f32 %v5821_v1, %v3014_v41  ;;  %v3015_v5 = vmul.f32 %v5820_v57, %v3008_v2 }
0x1c89   : > { %v3023_v3 = vpack.c.bf16 %v3021_v4, %v3020_v0  ;;  %v3022_v6 = vadd.f32 %v5821_v1, %v3015_v5 }
0x1c8b   : > { %6286 = vmatprep.mubr.msk.bf16.mxu0 %vm433_vm2, %v3023_v3  ;;  %v3024_v7 = vpack.c.bf16 %v3022_v6, %v3022_v6 }
0x1c8d   : > { %6287 = vmatmul.mubr.msk.bf16.vlgmr.msra.gmra.mrb[4].mxu0 %vm433_vm2, %v3024_v7 }
0x1d60   : > { %v6288_v9 = vpop.f32.mrb[4].mxu0 }
0x1d61   : > { %v3099_v10 = vadd.f32 %v6288_v9, %v5827_v8  ;;  %v3090_v11 = vpop.f32.mrb[5].mxu0 }
0x1d62   : > { %v3091_v35 = vadd.f32 %v5827_v8, %v3090_v11  ;;  %v6289_v13 = vpop.f32.mrb[6].mxu0 }
0x1d63   : > { %v5925_v24 = vpack.c.bf16 %v3099_v10, %v3099_v10  ;;  %v3093_v12 = vpop.f32.mrb[7].mxu0 }
0x1d64   : > { %v5923_v15 = vpack.c.bf16 %v3091_v35, %v3091_v35  ;;  %v3094_v16 = vadd.f32 %v5827_v8, %v3093_v12 }
0x1d65   : > { %3119 = vst.msk [vmem:[#allocation3 + $0x8] sm:$0xf] %vm592_vm3, %v5925_v24  ;;  %3124 = vrot.lane.b32.xlu1 %v5925_v24, %s8663_s12 }
0x1d66   : > { %3117 = vst.msk [vmem:[#allocation3] sm:$0xf] %vm592_vm3, %v5923_v15  ;;  %v5924_v14 = vpack.c.bf16 %v3094_v16, %v3094_v16  ;;  %3120 = vrot.lane.b32.xlu0 %v5923_v15, %s8663_s12 }
0x1d68   : > { %3118 = vst.msk [vmem:[#allocation3 + $0x4] sm:$0xf] %vm592_vm3, %v5924_v14 }
0x1d69   : > { %3132 = vrot.lane.b32.xlu1 %v5923_v15, %s8664_s27 }
0x1d6a   : > { %3134 = vrot.lane.b32.xlu0 %v5924_v14, %s8664_s27 }
0x1d6d   : > { %3122 = vrot.lane.b32.xlu1 %v5924_v14, %s8663_s12  ;;  %v7954_v63 = vld [vmem:[#allocation3] sm:$0xf] (!%p5755_p5) }
0x1d71   : > { %3136 = vrot.lane.b32.xlu1 %v5925_v24, %s8664_s27 }
0x1dd7   : > { %v3125_v17 = vpop.permute.xlu1 %3124 }
0x1dd8   : > { %3131 = vst.msk [vmem:[#allocation4 + $0x8] sm:$0xf] %vm592_vm3, %v3125_v17  ;;  %v3121_v18 = vpop.permute.xlu0 %3120 }
0x1dd9   : > { %3129 = vst.msk [vmem:[#allocation4] sm:$0xf] %vm592_vm3, %v3121_v18 }
0x1ddb   : > { %v3133_v19 = vpop.permute.xlu1 %3132 }
0x1ddc   : > { %3141 = vst.msk [vmem:[#allocation5] sm:$0xf] %vm592_vm3, %v3133_v19  ;;  %v3135_v20 = vpop.permute.xlu0 %3134 }
0x1ddd   : > { %3142 = vst.msk [vmem:[#allocation5 + $0x4] sm:$0xf] %vm592_vm3, %v3135_v20 }
0x1dde   : > { %3146 = sbr.rel (%p5755_p5) target bundleno = 9409 (0x24c1), region = 85 }
0x1ddf   : > { %v3123_v25 = vpop.permute.xlu1 %3122 }
0x1de0   : > { %3130 = vst.msk [vmem:[#allocation4 + $0x4] sm:$0xf] %vm592_vm3, %v3123_v25 }
0x1de3   : > { %v3137_v21 = vpop.permute.xlu1 %3136 }
0x1de4   : > { %3143 = vst.msk [vmem:[#allocation5 + $0x8] sm:$0xf] %vm592_vm3, %v3137_v21 }
0x1de5   : > { %5688 = sbr.rel (%p5836_p2) target bundleno = 8927 (0x22df), region = 300  ;;  %s7977_s13 = smov (!%p5836_p2), 0  }
0x1dec LB: >> { %v7094_v26 = vmov 0.0   ;;  %vm7095_vm3 = vmmov 0   ;;  %s5837_s11 = sshll.u32 %s7037_s13, 3  ;;  %v3177_v23 = vlaneseq  ;;  %v3181_v30 = vstv %s8673_s25  ;;  %s7097_s10 = smov 120   ;;  %v8014_v44 = vld [vmem:[#allocation6] sm:$0xff]  ;;  %v3368_v49 = vld [vmem:[#allocation6 + $0x8] sm:$0xff]  ;;  %s7037_s13 = sphi %s7977_s13, %s3165_s13  }
0x1ded   : >> { %6290 = vmatprep.subr.bf16.mxu0 %v7094_v26  ;;  %6292 = vmatprep.mubr.msk.bf16.mxu0 %vm7095_vm3, %v7094_v26  ;;  %s7989_s18 = sshra.s32 %s5837_s11, 3  ;;  %v3179_v28 = vstv %s5837_s11  ;;  %v7096_v51 = vmov 0   ;;  %v5842_v43 = vcombine.low %v7954_v63, %v7954_v63  ;;  %s7098_s12 = smov 112   ;;  %vm3264_vm0 = vcmask 1043456  }
0x1dee   : >> { %6296 = vmatprep.subr.bf16.mxu1 %v7094_v26  ;;  %6298 = vmatprep.mubr.msk.bf16.mxu1 %vm7095_vm3, %v7094_v26  ;;  %s5838_s28 = sshll.u32 %s7989_s18, 2  ;;  %v3178_v27 = vand.u32 127, %v3177_v23  ;;  %s7099_s27 = smov 104  }
0x1def   : >> { %s3172_s26 = scalar_lea.vmem [#allocation4], %s5838_s28  ;;  %6781 = vset.pattern.permute.xlu0 %v7096_v51  ;;  %6782 = vset.pattern.permute.xlu1 %v7096_v51  ;;  %s3175_s11 = scalar_lea.vmem [#allocation5], %s5838_s28 }
0x1df0   : >> { %v3173_v22 = vld [vmem:[%s3172_s26] sm:$0xf]  ;;  %v3180_v29 = vadd.s32 %v3179_v28, %v3178_v27  ;;  %v3506_v28 = vld [vmem:[#allocation6 + $0x10] sm:$0xff]  ;;  %s3165_s13 = sadd.s32 1, %s7037_s13  }
0x1df1   : >> { %v3188_v37 = vsel %vm3156_vm14, %v3173_v22, 0  ;;  %v5843_v42 = vcombine.low %v3173_v22, %v3173_v22  ;;  %v8026_v52 = vld [vmem:[%s3175_s11] sm:$0xf]  ;;  %p3164_p3 = scmp.ge.s32.totalorder %s3165_s13, %s8675_s29 }
0x1df2   : >> { %6291 = vmatpush3.bf16.xpose.msra.mxu0 %v3188_v37  ;;  %vm3182_vm15 = vcmp.ge.s32.totalorder %v3180_v29, %v3181_v30  ;;  %v3266_v47 = vsel %vm3264_vm0, %v8026_v52, 0 }
0x1df3   : >> { %6308 = vmatprep.subr.bf16.mxu0 %v7094_v26  ;;  %v8002_v31 = vsel %vm3182_vm15, -1e+09, %v7094_v26  ;;  %3319 = vrot.lane.b32.xlu1 %v5843_v42, %s7097_s10 }
0x1df4   : >> { %6297 = vmatpush3.bf16.msra.mxu1 %v3266_v47 }
0x1df5   : >> { %6302 = vmatprep.subr.bf16.mxu1 %v7094_v26 }
0x1df7   : >> { %3314 = vrot.lane.b32.xlu1 %v5842_v43, %s7097_s10 }
0x1df9   : >> { %6293 = vmatmul.mubr.msk.bf16.vlgmr.msra.gmra.mrb[0].mxu0 %vm3156_vm14, %v7954_v63 }
0x1dfa   : >> { %6310 = vmatprep.mubr.msk.bf16.mxu0 %vm7095_vm3, %v7094_v26 }
0x1dfb   : >> { %3457 = vrot.lane.b32.xlu1 %v5843_v42, %s7098_s12 }
0x1dff   : >> { %3455 = vrot.lane.b32.xlu1 %v5842_v43, %s7098_s12 }
0x1e03   : >> { %3592 = vrot.lane.b32.xlu1 %v5843_v42, %s7099_s27 }
0x1e07   : >> { %3590 = vrot.lane.b32.xlu1 %v5842_v43, %s7099_s27 }
0x1e65   : >> { %v3320_v56 = vpop.permute.xlu1 %3319 }
0x1e66   : >> { %v3325_v58 = vsel %vm3156_vm14, %v3320_v56, 0 }
0x1e69   : >> { %v3315_v57 = vpop.permute.xlu1 %3314 }
0x1e6d   : >> { %v3458_v61 = vpop.permute.xlu1 %3457 }
0x1e6e   : >> { %v3463_v1 = vsel %vm3156_vm14, %v3458_v61, 0 }
0x1e71   : >> { %v3456_v60 = vpop.permute.xlu1 %3455 }
0x1e75   : >> { %v3593_v41 = vpop.permute.xlu1 %3592 }
0x1e76   : >> { %v3598_v2 = vsel %vm3156_vm14, %v3593_v41, 0 }
0x1e79   : >> { %v3591_v0 = vpop.permute.xlu1 %3590 }
0x1ecc   : >> { %v3224_v32 = vpop.f32.mrb[0].mxu0 }
0x1ecd   : >> { %v3225_v34 = vadd.f32 %v3224_v32, %v8002_v31  ;;  %v6294_v38 = vpop.f32.mrb[1].mxu0 }
0x1ece   : >> { %v3227_v33 = vpop.f32.mrb[2].mxu0  ;;  %v3641_v38 = vld [vmem:[#allocation6 + $0x18] sm:$0xff] }
0x1ecf   : >> { %v6295_v36 = vpop.f32.mrb[3].mxu0  ;;  %v3231_v39 = vsel %vm3156_vm14, %v3225_v34, -inf }
0x1ed0   : >> { %3232 = vmax.xlane.f32.xlu0 %v3231_v39  ;;  %v5845_v39 = vcombine.low %v8026_v52, %v8026_v52 }
0x1f5d   : >> { %v3233_v45 = vpop.xlane.xlu0 %3232 }
0x1f5e   : >> { %v8017_v46 = vmax.f32 %v8014_v44, %v3233_v45 }
0x1f60   : >> { %v3235_v48 = vsub.f32 %v8014_v44, %v8017_v46  ;;  %3310 = vst.msk [vmem:[#allocation6] sm:$0xff] %vm3147_vm13, %v8017_v46  ;;  %3240 = vperm.xlu0 %6781, %v8017_v46  }
0x1f62   : >> { %v3236_v22 = vmul.f32 1.442695, %v3235_v48 }
0x1fdf   : >> { %v3241_v50 = vpop.permute.xlu0 %3240 }
0x1fe0   : >> { %v3243_v53 = vsub.f32 %v3225_v34, %v3241_v50 }
0x1fe2   : >> { %v3244_v54 = vmul.f32 1.442695, %v3243_v53  ;;  %v3253_v53 = vld [vmem:[#allocation8] sm:$0xff] }
0x1fe4   : >> { %6785 = vpow2.f32 %v3244_v54 }
0x1fe5   : >> { %6787 = vpow2.f32 %v3236_v22 }
0x1fee   : >> { %v8031_v55 = vpop.eup %6785 }
0x1fef   : >> { %v3260_v59 = vpack.c.bf16 %v8031_v55, %v8031_v55  ;;  %v8060_v34 = vpop.eup %6787  ;;  %v3248_v43 = vsel %vm3156_vm14, %v8031_v55, 0.0 }
0x1ff1   : >> { %6299 = vmatmul.mubr.msk.bf16.vlgmr.msra.gmra.mrb[0].mxu1 %vm3156_vm14, %v3260_v59 }
0x1ff2   : >> { %6303 = vmatpush3.bf16.xpose.msra.mxu1 %v3325_v58  ;;  %6304 = vmatprep.mubr.msk.bf16.mxu1 %vm7095_vm3, %v7094_v26 }
0x1ff3   : >> { %6314 = vmatprep.subr.bf16.mxu1 %v7094_v26 }
0x1ff9   : >> { %6305 = vmatmul.mubr.msk.bf16.vlgmr.msra.gmra.mrb[4].mxu1 %vm3156_vm14, %v3315_v57 }
0x1ffa   : >> { %6315 = vmatpush3.bf16.xpose.msra.mxu1 %v3463_v1  ;;  %6316 = vmatprep.mubr.msk.bf16.mxu1 %vm7095_vm3, %v7094_v26 }
0x1ffb   : >> { %6326 = vmatprep.subr.bf16.mxu1 %v7094_v26 }
0x2001   : >> { %6317 = vmatmul.mubr.msk.bf16.vlgmr.msra.gmra.mrb[8].mxu1 %vm3156_vm14, %v3456_v60 }
0x2002   : >> { %6327 = vmatpush3.bf16.xpose.msra.mxu1 %v3598_v2  ;;  %6328 = vmatprep.mubr.msk.bf16.mxu1 %vm7095_vm3, %v7094_v26 }
0x2009   : >> { %6329 = vmatmul.mubr.msk.bf16.vlgmr.msra.gmra.mrb[12].mxu1 %vm3156_vm14, %v3591_v0 }
0x20c4   : >> { %v8050_v4 = vpop.f32.mrb[0].mxu1 }
0x20c5   : >> { %v6300_v5 = vpop.f32.mrb[1].mxu1 }
0x20c6   : >> { %v3305_v3 = vpop.f32.mrb[2].mxu1 }
0x20c7   : >> { %v6301_v6 = vpop.f32.mrb[3].mxu1 }
0x20cc   : >> { %v3361_v7 = vpop.f32.mrb[4].mxu1 }
0x20cd   : >> { %v3362_v8 = vadd.f32 %v3361_v7, %v8002_v31  ;;  %v6306_v9 = vpop.f32.mrb[5].mxu1 }
0x20ce   : >> { %v3364_v10 = vpop.f32.mrb[6].mxu1 }
0x20cf   : >> { %v6307_v11 = vpop.f32.mrb[7].mxu1  ;;  %v3369_v35 = vsel %vm3156_vm14, %v3362_v8, -inf }
0x20d0   : >> { %3370 = vmax.xlane.f32.xlu1 %v3369_v35 }
0x20d4   : >> { %v3499_v13 = vpop.f32.mrb[8].mxu1 }
0x20d5   : >> { %v3500_v24 = vadd.f32 %v3499_v13, %v8002_v31  ;;  %v6318_v12 = vpop.f32.mrb[9].mxu1 }
0x20d6   : >> { %v3502_v15 = vpop.f32.mrb[10].mxu1  ;;  %v3246_v12 = vld [vmem:[#allocation7] sm:$0xff] }
0x20d7   : >> { %v6319_v16 = vpop.f32.mrb[11].mxu1  ;;  %v3507_v14 = vsel %vm3156_vm14, %v3500_v24, -inf  ;;  %v3247_v15 = vmul.f32 %v8060_v34, %v3246_v12 }
0x20d8   : >> { %3508 = vmax.xlane.f32.xlu0 %v3507_v14 }
0x20dc   : >> { %v3634_v17 = vpop.f32.mrb[12].mxu1 }
0x20dd   : >> { %v3635_v18 = vadd.f32 %v3634_v17, %v8002_v31  ;;  %v6330_v19 = vpop.f32.mrb[13].mxu1 }
0x20de   : >> { %v3637_v20 = vpop.f32.mrb[14].mxu1 }
0x20df   : >> { %v6331_v25 = vpop.f32.mrb[15].mxu1  ;;  %v3642_v21 = vsel %vm3156_vm14, %v3635_v18, -inf }
0x20e0   : >> { %3643 = vmax.xlane.f32.xlu1 %v3642_v21 }
0x215d   : >> { %v3371_v37 = vpop.xlane.xlu1 %3370 }
0x215e   : >> { %v3372_v23 = vmax.f32 %v3368_v49, %v3371_v37 }
0x2160   : >> { %v3373_v27 = vsub.f32 %v3368_v49, %v3372_v23  ;;  %3454 = vst.msk [vmem:[#allocation6 + $0x8] sm:$0xff] %vm3147_vm13, %v3372_v23  ;;  %3378 = vperm.xlu1 %6782, %v3372_v23   ;;  %v3658_v23 = vld [vmem:[#allocation7 + $0x18] sm:$0xff] }
0x2162   : >> { %v3374_v44 = vmul.f32 1.442695, %v3373_v27 }
0x2165   : >> { %v3509_v29 = vpop.xlane.xlu0 %3508 }
0x2166   : >> { %v3510_v30 = vmax.f32 %v3506_v28, %v3509_v29 }
0x2168   : >> { %v3511_v32 = vsub.f32 %v3506_v28, %v3510_v30  ;;  %3589 = vst.msk [vmem:[#allocation6 + $0x10] sm:$0xff] %vm3147_vm13, %v3510_v30  ;;  %3516 = vperm.xlu0 %6781, %v3510_v30   ;;  %v3393_v30 = vld [vmem:[#allocation8 + $0x8] sm:$0xff] }
0x216a   : >> { %v3512_v31 = vmul.f32 1.442695, %v3511_v32 }
0x216c   : >> { %6789 = vpow2.f32 %v3512_v31  ;;  %3256 = vperm.xlu0 %6781, %v8060_v34  }
0x216d   : >> { %v3644_v33 = vpop.xlane.xlu1 %3643  ;;  %6791 = vpow2.f32 %v3374_v44 }
0x216e   : >> { %v3645_v36 = vmax.f32 %v3641_v38, %v3644_v33 }
0x2170   : >> { %v3646_v51 = vsub.f32 %v3641_v38, %v3645_v36  ;;  %3724 = vst.msk [vmem:[#allocation6 + $0x18] sm:$0xff] %vm3147_vm13, %v3645_v36  ;;  %3651 = vperm.xlu1 %6782, %v3645_v36  }
0x2172   : >> { %v3647_v11 = vmul.f32 1.442695, %v3646_v51 }
0x2174   : >> { %3404 = vrot.lane.b32.xlu1 %v5845_v39, %s7097_s10 }
0x2176   : >> { %v8067_v42 = vpop.eup %6789 }
0x2177   : >> { %3534 = vperm.xlu0 %6781, %v8067_v42   ;;  %v6792_v45 = vpop.eup %6791 }
0x2178   : >> { %3539 = vrot.lane.b32.xlu1 %v5845_v39, %s7098_s12 }
0x217c   : >> { %3674 = vrot.lane.b32.xlu1 %v5845_v39, %s7099_s27  ;;  %v3531_v39 = vld [vmem:[#allocation8 + $0x10] sm:$0xff] }
0x21a0   : >> { %3249 = vadd.xlane.f32.xlu1 %v3248_v43 }
0x21b1   : >> { %3396 = vperm.xlu1 %6782, %v6792_v45  }
0x21df   : >> { %v3379_v46 = vpop.permute.xlu1 %3378 }
0x21e0   : >> { %v3381_v48 = vsub.f32 %v3362_v8, %v3379_v46 }
0x21e2   : >> { %v3382_v52 = vmul.f32 1.442695, %v3381_v48  ;;  %v3666_v48 = vld [vmem:[#allocation8 + $0x18] sm:$0xff] }
0x21e4   : >> { %6793 = vpow2.f32 %v3382_v52 }
0x21e7   : >> { %v3517_v47 = vpop.permute.xlu0 %3516 }
0x21e8   : >> { %v3519_v50 = vsub.f32 %v3500_v24, %v3517_v47 }
0x21ea   : >> { %v3520_v54 = vmul.f32 1.442695, %v3519_v50 }
0x21eb   : >> { %v3257_v56 = vpop.permute.xlu0 %3256 }
0x21ec   : >> { %6795 = vpow2.f32 %v3520_v54  ;;  %v3259_v57 = vmul.f32 %v3257_v56, %v3253_v53 }
0x21ee   : >> { %v6794_v58 = vpop.eup %6793  ;;  %v3308_v59 = vadd.f32 %v8050_v4, %v3259_v57 }
0x21ef   : >> { %v3652_v55 = vpop.permute.xlu1 %3651  ;;  %v3387_v61 = vsel %vm3156_vm14, %v6794_v58, 0.0  ;;  %v3400_v5 = vpack.c.bf16 %v6794_v58, %v6794_v58 }
0x21f0   : >> { %3309 = vst.msk [vmem:[#allocation8] sm:$0xff] %vm3156_vm14, %v3308_v59  ;;  %v3654_v60 = vsub.f32 %v3635_v18, %v3652_v55  ;;  %3388 = vadd.xlane.f32.xlu0 %v3387_v61  ;;  %v3385_v18 = vld [vmem:[#allocation7 + $0x8] sm:$0xff] }
0x21f1   : >> { %v3386_v19 = vmul.f32 %v6792_v45, %v3385_v18 }
0x21f2   : >> { %v3655_v1 = vmul.f32 1.442695, %v3654_v60 }
0x21f3   : >> { %v3405_v41 = vpop.permute.xlu1 %3404 }
0x21f4   : >> { %6797 = vpow2.f32 %v3655_v1  ;;  %v3410_v2 = vsel %vm3264_vm0, %v3405_v41, 0 }
0x21f5   : >> { %6309 = vmatpush3.bf16.msra.mxu0 %v3410_v2  ;;  %6799 = vpow2.f32 %v3647_v11 }
0x21f6   : >> { %v6796_v0 = vpop.eup %6795  ;;  %6320 = vmatprep.subr.bf16.mxu0 %v7094_v26  ;;  %v3535_v17 = vpop.permute.xlu0 %3534 }
0x21f7   : >> { %v3525_v3 = vsel %vm3156_vm14, %v6796_v0, 0.0  ;;  %v3540_v4 = vpop.permute.xlu1 %3539  ;;  %v3538_v9 = vpack.c.bf16 %v6796_v0, %v6796_v0  ;;  %v3537_v51 = vmul.f32 %v3535_v17, %v3531_v39 }
0x21f8   : >> { %6311 = vmatmul.mubr.msk.bf16.vlgmr.msra.gmra.mrb[4].mxu0 %vm3156_vm14, %v3400_v5  ;;  %3526 = vadd.xlane.f32.xlu0 %v3525_v3  ;;  %v3545_v6 = vsel %vm3264_vm0, %v3540_v4, 0 }
0x21f9   : >> { %6321 = vmatpush3.bf16.msra.mxu0 %v3545_v6  ;;  %6322 = vmatprep.mubr.msk.bf16.mxu0 %vm7095_vm3, %v7094_v26 }
0x21fa   : >> { %6332 = vmatprep.subr.bf16.mxu0 %v7094_v26 }
0x21fb   : >> { %v3675_v7 = vpop.permute.xlu1 %3674 }
0x21fc   : >> { %v3680_v10 = vsel %vm3264_vm0, %v3675_v7, 0 }
0x21fe   : >> { %v6798_v8 = vpop.eup %6797 }
0x21ff   : >> { %v3660_v35 = vsel %vm3156_vm14, %v6798_v8, 0.0  ;;  %v3673_v13 = vpack.c.bf16 %v6798_v8, %v6798_v8  ;;  %v6800_v24 = vpop.eup %6799 }
0x2200   : >> { %6323 = vmatmul.mubr.msk.bf16.vlgmr.msra.gmra.mrb[8].mxu0 %vm3156_vm14, %v3538_v9  ;;  %3661 = vadd.xlane.f32.xlu1 %v3660_v35  ;;  %v3659_v27 = vmul.f32 %v6800_v24, %v3658_v23 }
0x2201   : >> { %6333 = vmatpush3.bf16.msra.mxu0 %v3680_v10  ;;  %6334 = vmatprep.mubr.msk.bf16.mxu0 %vm7095_vm3, %v7094_v26  ;;  %v3523_v26 = vld [vmem:[#allocation7 + $0x10] sm:$0xff] }
0x2202   : >> { %v3524_v21 = vmul.f32 %v8067_v42, %v3523_v26 }
0x2208   : >> { %6335 = vmatmul.mubr.msk.bf16.vlgmr.msra.gmra.mrb[12].mxu0 %vm3156_vm14, %v3673_v13 }
0x220e   : >> { %3669 = vperm.xlu0 %6781, %v6800_v24  }
0x222d   : >> { %v3250_v16 = vpop.xlane.xlu1 %3249 }
0x222e   : >> { %v3251_v14 = vadd.f32 %v3250_v16, %v3247_v15 }
0x2230   : >> { %3252 = vst.msk [vmem:[#allocation7] sm:$0xff] %vm3147_vm13, %v3251_v14 }
0x2231   : >> { %v3397_v37 = vpop.permute.xlu1 %3396 }
0x2232   : >> { %v3399_v32 = vmul.f32 %v3397_v37, %v3393_v30 }
0x227d   : >> { %v3389_v20 = vpop.xlane.xlu0 %3388 }
0x227e   : >> { %v3390_v25 = vadd.f32 %v3389_v20, %v3386_v19 }
0x2280   : >> { %3391 = vst.msk [vmem:[#allocation7 + $0x8] sm:$0xff] %vm3147_vm13, %v3390_v25 }
0x2285   : >> { %v3527_v49 = vpop.xlane.xlu0 %3526 }
0x2286   : >> { %v3528_v22 = vadd.f32 %v3527_v49, %v3524_v21 }
0x2288   : >> { %3529 = vst.msk [vmem:[#allocation7 + $0x10] sm:$0xff] %vm3147_vm13, %v3528_v22 }
0x228d   : >> { %v3662_v28 = vpop.xlane.xlu1 %3661  ;;  %v3670_v52 = vpop.permute.xlu0 %3669 }
0x228e   : >> { %v3663_v29 = vadd.f32 %v3662_v28, %v3659_v27  ;;  %v3672_v47 = vmul.f32 %v3670_v52, %v3666_v48 }
0x2290   : >> { %3664 = vst.msk [vmem:[#allocation7 + $0x18] sm:$0xff] %vm3147_vm13, %v3663_v29 }
0x22cb   : >> { %v3446_v31 = vpop.f32.mrb[4].mxu0 }
0x22cc   : >> { %v3452_v34 = vadd.f32 %v3446_v31, %v3399_v32  ;;  %v6312_v38 = vpop.f32.mrb[5].mxu0 }
0x22cd   : >> { %v3449_v33 = vpop.f32.mrb[6].mxu0 }
0x22ce   : >> { %3453 = vst.msk [vmem:[#allocation8 + $0x8] sm:$0xff] %vm3156_vm14, %v3452_v34  ;;  %v6313_v36 = vpop.f32.mrb[7].mxu0 }
0x22d3   : >> { %v3581_v42 = vpop.f32.mrb[8].mxu0 }
0x22d4   : >> { %v3587_v43 = vadd.f32 %v3581_v42, %v3537_v51  ;;  %v6324_v44 = vpop.f32.mrb[9].mxu0 }
0x22d5   : >> { %v3584_v45 = vpop.f32.mrb[10].mxu0 }
0x22d6   : >> { %3588 = vst.msk [vmem:[#allocation8 + $0x10] sm:$0xff] %vm3156_vm14, %v3587_v43  ;;  %v6325_v46 = vpop.f32.mrb[11].mxu0 }
0x22d8   : > { %3167 = sbr.rel (!%p3164_p3) target bundleno = 7660 (0x1dec), region = 306 }
0x22db   : >> { %v3716_v50 = vpop.f32.mrb[12].mxu0 }
0x22dc   : >> { %v3722_v53 = vadd.f32 %v3716_v50, %v3672_v47  ;;  %v6336_v54 = vpop.f32.mrb[13].mxu0 }
0x22dd   : >> { %v3719_v56 = vpop.f32.mrb[14].mxu0 }
0x22de   : >> { %3723 = vst.msk [vmem:[#allocation8 + $0x18] sm:$0xff] %vm3156_vm14, %v3722_v53  ;;  %v6337_v57 = vpop.f32.mrb[15].mxu0 }
0x22df PF: > { %v3738_v58 = vld [vmem:[#allocation7 + $0x8] sm:$0xff]  ;;  %v3762_v59 = vld [vmem:[#allocation7 + $0x18] sm:$0xff]  ;;  %v3750_v55 = vld [vmem:[#allocation7 + $0x10] sm:$0xff]  ;;  %6338 = vmatprep.subr.bf16.mxu0 %v7093_v62  ;;  %v7100_v61 = vmov 0   ;;  %vm7101_vm4 = vmmov 0   ;;  %s7102_s10 = smov 8   ;;  %v3849_v21 = vlaneseq }
0x22e0   : > { %6801 = vset.pattern.permute.xlu0 %v7100_v61  ;;  %6802 = vset.pattern.permute.xlu1 %v7100_v61  ;;  %6805 = vrcp.f32 %v3738_v58  ;;  %v3726_v60 = vld [vmem:[#allocation7] sm:$0xff]  ;;  %v6803_v63 = vld [vmem:[%s8653_s7 + $0x10] sm:$0xff]   ;;  %v3736_v3 = vld [vmem:[#allocation8 + $0x8] sm:$0xff]  ;;  %s7103_s12 = smov 16   ;;  %s7104_s27 = smov 24   ;;  %vm3785_vm5 = vcmask 195584  }
0x22e1   : > { %6807 = vrcp.f32 %v3762_v59  ;;  %6339 = vmatpush3.bf16.msra.mxu0 %v6803_v63  ;;  %v6804_v5 = vld [vmem:[%s8653_s7 + $0x18] sm:$0xff]   ;;  %6342 = vmatprep.mubr.msk.bf16.mxu0 %vm7101_vm4, %v7093_v62  ;;  %v3748_v10 = vld [vmem:[#allocation8 + $0x10] sm:$0xff]  ;;  %v3850_v49 = vshrl.u32 %v3849_v21, 7  ;;  %v3847_v37 = vld [vmem:[#allocation2] sm:$0xff] }
0x22e2   : > { %6809 = vrcp.f32 %v3750_v55  ;;  %6340 = vmatprep.subr.bf16.mxu0 %v7093_v62  ;;  %v3725_v62 = vld [vmem:[#allocation8] sm:$0xff] }
0x22e3   : > { %6811 = vrcp.f32 %v3726_v60  ;;  %v3851_v22 = vsub.s32 0, %v3850_v49 }
0x22e5   : > { %6341 = vmatpush3.bf16.msra.mxu0 %v6804_v5  ;;  %v3760_v4 = vld [vmem:[#allocation8 + $0x18] sm:$0xff]  ;;  %v3852_v23 = vrot.slane %v7918_v40, %v3851_v22 }
0x22ea   : > { %v6806_v1 = vpop.eup %6805 }
0x22eb   : > { %v6808_v41 = vpop.eup %6807  ;;  %3742 = vperm.xlu0 %6801, %v6806_v1  }
0x22ec   : > { %v6810_v2 = vpop.eup %6809  ;;  %3766 = vperm.xlu1 %6802, %v6808_v41  }
0x22ed   : > { %v6812_v0 = vpop.eup %6811 }
0x22ef   : > { %3754 = vperm.xlu0 %6801, %v6810_v2  }
0x22f0   : > { %3730 = vperm.xlu1 %6802, %v6812_v0  }
0x236a   : > { %v3743_v6 = vpop.permute.xlu0 %3742 }
0x236b   : > { %v3745_v7 = vmul.f32 %v3743_v6, %v3736_v3  ;;  %v3767_v8 = vpop.permute.xlu1 %3766 }
0x236c   : > { %v3769_v9 = vmul.f32 %v3767_v8, %v3760_v4 }
0x236d   : > { %v3746_v11 = vpack.c.bf16 %v3745_v7, %v3745_v7 }
0x236e   : > { %v3755_v35 = vpop.permute.xlu0 %3754  ;;  %v3770_v13 = vpack.c.bf16 %v3769_v9, %v3769_v9 }
0x236f   : > { %v3757_v24 = vmul.f32 %v3755_v35, %v3748_v10  ;;  %3772 = vrot.lane.b32.xlu0 %v3746_v11, %s7102_s10  ;;  %v3731_v15 = vpop.permute.xlu1 %3730 }
0x2370   : > { %v3733_v16 = vmul.f32 %v3731_v15, %v3725_v62 }
0x2371   : > { %v3758_v12 = vpack.c.bf16 %v3757_v24, %v3757_v24 }
0x2372   : > { %v3734_v17 = vpack.c.bf16 %v3733_v16, %v3733_v16 }
0x2373   : > { %3775 = vrot.lane.b32.xlu1 %v3758_v12, %s7103_s12  ;;  %3778 = vrot.lane.b32.xlu0 %v3770_v13, %s7104_s27 }
0x23e1   : > { %v3773_v14 = vpop.permute.xlu0 %3772 }
0x23e2   : > { %v3782_v18 = vsel %vm3156_vm14, %v3734_v17, %v3773_v14 }
0x23e5   : > { %v3776_v19 = vpop.permute.xlu1 %3775  ;;  %v3779_v20 = vpop.permute.xlu0 %3778 }
0x23e6   : > { %v3784_v25 = vsel %vm343_vm1, %v3782_v18, %v3776_v19 }
0x23e7   : > { %v3787_v26 = vsel %vm3785_vm5, %v3784_v25, %v3779_v20 }
0x23e8   : > { %6343 = vmatmul.mubr.msk.bf16.vlgmr.msra.gmra.mrb[0].mxu0 %vm433_vm2, %v3787_v26 }
0x24bb   : > { %v3841_v27 = vpop.f32.mrb[0].mxu0 }
0x24bc   : > { %v3848_v28 = vadd.f32 %v3847_v37, %v3841_v27  ;;  %v6344_v29 = vpop.f32.mrb[1].mxu0 }
0x24bd   : > { %v3844_v30 = vpop.f32.mrb[2].mxu0 }
0x24be   : > { %v3853_v32 = vadd.f32 %v3852_v23, %v3848_v28  ;;  %v6345_v31 = vpop.f32.mrb[3].mxu0 }
0x24c0   : > { %3854 = vst.msk [vmem:[#allocation2] sm:$0xff] %vm433_vm2, %v3853_v32 }
0x24c1 PF: > { %3857 = sbr.rel (%p5774_p8) target bundleno = 11172 (0x2ba4), region = 96  ;;  %vm3858_vm6 = vcmask (!%p5774_p8), 7168   ;;  %v8120_v34 = vld [vmem:[#allocation3 + $0x4] sm:$0xf] (!%p5774_p8)  ;;  %vm3867_vm7 = vcmask (!%p5774_p8), 64512   ;;  %v7105_v38 = vmov (!%p5774_p8), -inf  }
0x24c2   : > { %3859 = vst.msk [vmem:[#allocation6] sm:$0xff] (!%p5774_p8), %vm3858_vm6, %v7105_v38  ;;  %3860 = vst.msk [vmem:[#allocation6 + $0x8] sm:$0xff] (!%p5774_p8), %vm3858_vm6, %v7105_v38  ;;  %v7106_v33 = vmov (!%p5774_p8), 0.0   ;;  %p5859_p4 = scmp.le.s32.totalorder (!%p5774_p8), %s8675_s29, 0 }
0x24c3   : > { %3861 = vst.msk [vmem:[#allocation6 + $0x10] sm:$0xff] (!%p5774_p8), %vm3858_vm6, %v7105_v38  ;;  %3862 = vst.msk [vmem:[#allocation6 + $0x18] sm:$0xff] (!%p5774_p8), %vm3858_vm6, %v7105_v38 }
0x24c4   : > { %3863 = vst.msk [vmem:[#allocation7] sm:$0xff] (!%p5774_p8), %vm3858_vm6, %v7106_v33  ;;  %3864 = vst.msk [vmem:[#allocation7 + $0x8] sm:$0xff] (!%p5774_p8), %vm3858_vm6, %v7106_v33 }
0x24c5   : > { %3865 = vst.msk [vmem:[#allocation7 + $0x10] sm:$0xff] (!%p5774_p8), %vm3858_vm6, %v7106_v33  ;;  %3866 = vst.msk [vmem:[#allocation7 + $0x18] sm:$0xff] (!%p5774_p8), %vm3858_vm6, %v7106_v33 }
0x24c6   : > { %3868 = vst.msk [vmem:[#allocation8] sm:$0xff] (!%p5774_p8), %vm3867_vm7, %v7106_v33  ;;  %3869 = vst.msk [vmem:[#allocation8 + $0x8] sm:$0xff] (!%p5774_p8), %vm3867_vm7, %v7106_v33 }
0x24c7   : > { %3870 = vst.msk [vmem:[#allocation8 + $0x10] sm:$0xff] (!%p5774_p8), %vm3867_vm7, %v7106_v33  ;;  %3871 = vst.msk [vmem:[#allocation8 + $0x18] sm:$0xff] (!%p5774_p8), %vm3867_vm7, %v7106_v33 }
0x24c8   : > { %5693 = sbr.rel (%p5859_p4) target bundleno = 10690 (0x29c2), region = 311  ;;  %s8143_s11 = smov (!%p5859_p4), 0  }
0x24cf LB: >> { %v7107_v36 = vmov 0.0   ;;  %vm7108_vm8 = vmmov 0   ;;  %s5860_s13 = sshll.u32 %s7041_s11, 3  ;;  %v3888_v42 = vlaneseq  ;;  %v3892_v46 = vstv %s8673_s25  ;;  %s7110_s10 = smov 120   ;;  %v8180_v55 = vld [vmem:[#allocation6] sm:$0xff]  ;;  %v4079_v38 = vld [vmem:[#allocation6 + $0x8] sm:$0xff]  ;;  %s7041_s11 = sphi %s8143_s11, %s3876_s11  }
0x24d0   : >> { %6346 = vmatprep.subr.bf16.mxu0 %v7107_v36  ;;  %6348 = vmatprep.mubr.msk.bf16.mxu0 %vm7108_vm8, %v7107_v36  ;;  %s8155_s18 = sshra.s32 %s5860_s13, 3  ;;  %v3890_v44 = vstv %s5860_s13  ;;  %v7109_v57 = vmov 0   ;;  %v5865_v59 = vcombine.low %v8120_v34, %v8120_v34  ;;  %s7111_s12 = smov 112   ;;  %vm3975_vm10 = vcmask 1043456  }
0x24d1   : >> { %6352 = vmatprep.subr.bf16.mxu1 %v7107_v36  ;;  %6354 = vmatprep.mubr.msk.bf16.mxu1 %vm7108_vm8, %v7107_v36  ;;  %s5861_s28 = sshll.u32 %s8155_s18, 2  ;;  %v3889_v43 = vand.u32 127, %v3888_v42  ;;  %s7112_s27 = smov 104  }
0x24d2   : >> { %s3883_s26 = scalar_lea.vmem [#allocation4], %s5861_s28  ;;  %6813 = vset.pattern.permute.xlu0 %v7109_v57  ;;  %6814 = vset.pattern.permute.xlu1 %v7109_v57  ;;  %s3886_s13 = scalar_lea.vmem [#allocation5], %s5861_s28 }
0x24d3   : >> { %v3884_v39 = vld [vmem:[%s3883_s26] sm:$0xf]  ;;  %v3891_v45 = vadd.s32 %v3890_v44, %v3889_v43  ;;  %v4217_v44 = vld [vmem:[#allocation6 + $0x10] sm:$0xff]  ;;  %s3876_s11 = sadd.s32 1, %s7041_s11  }
0x24d4   : >> { %v3899_v51 = vsel %vm3867_vm7, %v3884_v39, 0  ;;  %v5866_v58 = vcombine.low %v3884_v39, %v3884_v39  ;;  %v8192_v41 = vld [vmem:[%s3886_s13] sm:$0xf]  ;;  %p3875_p5 = scmp.ge.s32.totalorder %s3876_s11, %s8675_s29 }
0x24d5   : >> { %6347 = vmatpush3.bf16.xpose.msra.mxu0 %v3899_v51  ;;  %vm3893_vm9 = vcmp.ge.s32.totalorder %v3891_v45, %v3892_v46  ;;  %v3977_v2 = vsel %vm3975_vm10, %v8192_v41, 0 }
0x24d6   : >> { %6364 = vmatprep.subr.bf16.mxu0 %v7107_v36  ;;  %v8168_v48 = vsel %vm3893_vm9, -1e+09, %v7107_v36  ;;  %4030 = vrot.lane.b32.xlu1 %v5866_v58, %s7110_s10 }
0x24d7   : >> { %6353 = vmatpush3.bf16.msra.mxu1 %v3977_v2 }
0x24d8   : >> { %6358 = vmatprep.subr.bf16.mxu1 %v7107_v36 }
0x24da   : >> { %4025 = vrot.lane.b32.xlu1 %v5865_v59, %s7110_s10 }
0x24dc   : >> { %6349 = vmatmul.mubr.msk.bf16.vlgmr.msra.gmra.mrb[0].mxu0 %vm3867_vm7, %v8120_v34 }
0x24dd   : >> { %6366 = vmatprep.mubr.msk.bf16.mxu0 %vm7108_vm8, %v7107_v36 }
0x24de   : >> { %4168 = vrot.lane.b32.xlu1 %v5866_v58, %s7111_s12 }
0x24e2   : >> { %4166 = vrot.lane.b32.xlu1 %v5865_v59, %s7111_s12 }
0x24e6   : >> { %4303 = vrot.lane.b32.xlu1 %v5866_v58, %s7112_s27 }
0x24ea   : >> { %4301 = vrot.lane.b32.xlu1 %v5865_v59, %s7112_s27 }
0x2548   : >> { %v4031_v3 = vpop.permute.xlu1 %4030 }
0x2549   : >> { %v4036_v7 = vsel %vm3867_vm7, %v4031_v3, 0 }
0x254c   : >> { %v4026_v4 = vpop.permute.xlu1 %4025 }
0x2550   : >> { %v4169_v9 = vpop.permute.xlu1 %4168 }
0x2551   : >> { %v4174_v11 = vsel %vm3867_vm7, %v4169_v9, 0 }
0x2554   : >> { %v4167_v10 = vpop.permute.xlu1 %4166 }
0x2558   : >> { %v4304_v35 = vpop.permute.xlu1 %4303 }
0x2559   : >> { %v4309_v13 = vsel %vm3867_vm7, %v4304_v35, 0 }
0x255c   : >> { %v4302_v24 = vpop.permute.xlu1 %4301 }
0x25af   : >> { %v3935_v52 = vpop.f32.mrb[0].mxu0 }
0x25b0   : >> { %v3936_v47 = vadd.f32 %v3935_v52, %v8168_v48  ;;  %v6350_v50 = vpop.f32.mrb[1].mxu0 }
0x25b1   : >> { %v3938_v53 = vpop.f32.mrb[2].mxu0  ;;  %v4352_v50 = vld [vmem:[#allocation6 + $0x18] sm:$0xff] }
0x25b2   : >> { %v6351_v54 = vpop.f32.mrb[3].mxu0  ;;  %v3942_v56 = vsel %vm3867_vm7, %v3936_v47, -inf }
0x25b3   : >> { %3943 = vmax.xlane.f32.xlu0 %v3942_v56  ;;  %v5868_v56 = vcombine.low %v8192_v41, %v8192_v41 }
0x2640   : >> { %v3944_v61 = vpop.xlane.xlu0 %3943 }
0x2641   : >> { %v8183_v60 = vmax.f32 %v8180_v55, %v3944_v61 }
0x2643   : >> { %v3946_v1 = vsub.f32 %v8180_v55, %v8183_v60  ;;  %4021 = vst.msk [vmem:[#allocation6] sm:$0xff] %vm3858_vm6, %v8183_v60  ;;  %3951 = vperm.xlu0 %6813, %v8183_v60  }
0x2645   : >> { %v3947_v39 = vmul.f32 1.442695, %v3946_v1 }
0x26c2   : >> { %v3952_v0 = vpop.permute.xlu0 %3951 }
0x26c3   : >> { %v3954_v63 = vsub.f32 %v3936_v47, %v3952_v0 }
0x26c5   : >> { %v3955_v5 = vmul.f32 1.442695, %v3954_v63  ;;  %v3964_v63 = vld [vmem:[#allocation8] sm:$0xff] }
0x26c7   : >> { %6817 = vpow2.f32 %v3955_v5 }
0x26c8   : >> { %6819 = vpow2.f32 %v3947_v39 }
0x26d1   : >> { %v8197_v6 = vpop.eup %6817 }
0x26d2   : >> { %v3971_v8 = vpack.c.bf16 %v8197_v6, %v8197_v6  ;;  %v8226_v47 = vpop.eup %6819  ;;  %v3959_v59 = vsel %vm3867_vm7, %v8197_v6, 0.0 }
0x26d4   : >> { %6355 = vmatmul.mubr.msk.bf16.vlgmr.msra.gmra.mrb[0].mxu1 %vm3867_vm7, %v3971_v8 }
0x26d5   : >> { %6359 = vmatpush3.bf16.xpose.msra.mxu1 %v4036_v7  ;;  %6360 = vmatprep.mubr.msk.bf16.mxu1 %vm7108_vm8, %v7107_v36 }
0x26d6   : >> { %6370 = vmatprep.subr.bf16.mxu1 %v7107_v36 }
0x26dc   : >> { %6361 = vmatmul.mubr.msk.bf16.vlgmr.msra.gmra.mrb[4].mxu1 %vm3867_vm7, %v4026_v4 }
0x26dd   : >> { %6371 = vmatpush3.bf16.xpose.msra.mxu1 %v4174_v11  ;;  %6372 = vmatprep.mubr.msk.bf16.mxu1 %vm7108_vm8, %v7107_v36 }
0x26de   : >> { %6382 = vmatprep.subr.bf16.mxu1 %v7107_v36 }
0x26e4   : >> { %6373 = vmatmul.mubr.msk.bf16.vlgmr.msra.gmra.mrb[8].mxu1 %vm3867_vm7, %v4167_v10 }
0x26e5   : >> { %6383 = vmatpush3.bf16.xpose.msra.mxu1 %v4309_v13  ;;  %6384 = vmatprep.mubr.msk.bf16.mxu1 %vm7108_vm8, %v7107_v36 }
0x26ec   : >> { %6385 = vmatmul.mubr.msk.bf16.vlgmr.msra.gmra.mrb[12].mxu1 %vm3867_vm7, %v4302_v24 }
0x27a7   : >> { %v8216_v12 = vpop.f32.mrb[0].mxu1 }
0x27a8   : >> { %v6356_v15 = vpop.f32.mrb[1].mxu1 }
0x27a9   : >> { %v4016_v62 = vpop.f32.mrb[2].mxu1 }
0x27aa   : >> { %v6357_v16 = vpop.f32.mrb[3].mxu1 }
0x27af   : >> { %v4072_v14 = vpop.f32.mrb[4].mxu1 }
0x27b0   : >> { %v4073_v17 = vadd.f32 %v4072_v14, %v8168_v48  ;;  %v6362_v18 = vpop.f32.mrb[5].mxu1 }
0x27b1   : >> { %v4075_v19 = vpop.f32.mrb[6].mxu1 }
0x27b2   : >> { %v6363_v20 = vpop.f32.mrb[7].mxu1  ;;  %v4080_v25 = vsel %vm3867_vm7, %v4073_v17, -inf }
0x27b3   : >> { %4081 = vmax.xlane.f32.xlu1 %v4080_v25 }
0x27b7   : >> { %v4210_v26 = vpop.f32.mrb[8].mxu1 }
0x27b8   : >> { %v4211_v21 = vadd.f32 %v4210_v26, %v8168_v48  ;;  %v6374_v49 = vpop.f32.mrb[9].mxu1 }
0x27b9   : >> { %v4213_v22 = vpop.f32.mrb[10].mxu1  ;;  %v3957_v49 = vld [vmem:[#allocation7] sm:$0xff] }
0x27ba   : >> { %v6375_v37 = vpop.f32.mrb[11].mxu1  ;;  %v4218_v23 = vsel %vm3867_vm7, %v4211_v21, -inf  ;;  %v3958_v22 = vmul.f32 %v8226_v47, %v3957_v49 }
0x27bb   : >> { %4219 = vmax.xlane.f32.xlu0 %v4218_v23 }
0x27bf   : >> { %v4345_v27 = vpop.f32.mrb[12].mxu1 }
0x27c0   : >> { %v4346_v28 = vadd.f32 %v4345_v27, %v8168_v48  ;;  %v6386_v29 = vpop.f32.mrb[13].mxu1 }
0x27c1   : >> { %v4348_v30 = vpop.f32.mrb[14].mxu1 }
0x27c2   : >> { %v6387_v32 = vpop.f32.mrb[15].mxu1  ;;  %v4353_v31 = vsel %vm3867_vm7, %v4346_v28, -inf }
0x27c3   : >> { %4354 = vmax.xlane.f32.xlu1 %v4353_v31 }
0x2840   : >> { %v4082_v51 = vpop.xlane.xlu1 %4081 }
0x2841   : >> { %v4083_v42 = vmax.f32 %v4079_v38, %v4082_v51 }
0x2843   : >> { %v4084_v43 = vsub.f32 %v4079_v38, %v4083_v42  ;;  %4165 = vst.msk [vmem:[#allocation6 + $0x8] sm:$0xff] %vm3858_vm6, %v4083_v42  ;;  %4089 = vperm.xlu1 %6814, %v4083_v42   ;;  %v4369_v42 = vld [vmem:[#allocation7 + $0x18] sm:$0xff] }
0x2845   : >> { %v4085_v55 = vmul.f32 1.442695, %v4084_v43 }
0x2848   : >> { %v4220_v45 = vpop.xlane.xlu0 %4219 }
0x2849   : >> { %v4221_v46 = vmax.f32 %v4217_v44, %v4220_v45 }
0x284b   : >> { %v4222_v52 = vsub.f32 %v4217_v44, %v4221_v46  ;;  %4300 = vst.msk [vmem:[#allocation6 + $0x10] sm:$0xff] %vm3858_vm6, %v4221_v46  ;;  %4227 = vperm.xlu0 %6813, %v4221_v46   ;;  %v4104_v46 = vld [vmem:[#allocation8 + $0x8] sm:$0xff] }
0x284d   : >> { %v4223_v48 = vmul.f32 1.442695, %v4222_v52 }
0x284f   : >> { %6821 = vpow2.f32 %v4223_v48  ;;  %3967 = vperm.xlu0 %6813, %v8226_v47  }
0x2850   : >> { %v4355_v53 = vpop.xlane.xlu1 %4354  ;;  %6823 = vpow2.f32 %v4085_v55 }
0x2851   : >> { %v4356_v54 = vmax.f32 %v4352_v50, %v4355_v53 }
0x2853   : >> { %v4357_v57 = vsub.f32 %v4352_v50, %v4356_v54  ;;  %4435 = vst.msk [vmem:[#allocation6 + $0x18] sm:$0xff] %vm3858_vm6, %v4356_v54  ;;  %4362 = vperm.xlu1 %6814, %v4356_v54  }
0x2855   : >> { %v4358_v20 = vmul.f32 1.442695, %v4357_v57 }
0x2857   : >> { %4115 = vrot.lane.b32.xlu1 %v5868_v56, %s7110_s10 }
0x2859   : >> { %v8233_v58 = vpop.eup %6821 }
0x285a   : >> { %4245 = vperm.xlu0 %6813, %v8233_v58   ;;  %v6824_v61 = vpop.eup %6823 }
0x285b   : >> { %4250 = vrot.lane.b32.xlu1 %v5868_v56, %s7111_s12 }
0x285f   : >> { %4385 = vrot.lane.b32.xlu1 %v5868_v56, %s7112_s27  ;;  %v4242_v56 = vld [vmem:[#allocation8 + $0x10] sm:$0xff] }
0x2883   : >> { %3960 = vadd.xlane.f32.xlu1 %v3959_v59 }
0x2894   : >> { %4107 = vperm.xlu1 %6814, %v6824_v61  }
0x28c2   : >> { %v4090_v60 = vpop.permute.xlu1 %4089 }
0x28c3   : >> { %v4092_v1 = vsub.f32 %v4073_v17, %v4090_v60 }
0x28c5   : >> { %v4093_v41 = vmul.f32 1.442695, %v4092_v1  ;;  %v4377_v1 = vld [vmem:[#allocation8 + $0x18] sm:$0xff] }
0x28c7   : >> { %6825 = vpow2.f32 %v4093_v41 }
0x28ca   : >> { %v4228_v2 = vpop.permute.xlu0 %4227 }
0x28cb   : >> { %v4230_v0 = vsub.f32 %v4211_v21, %v4228_v2 }
0x28cd   : >> { %v4231_v5 = vmul.f32 1.442695, %v4230_v0 }
0x28ce   : >> { %v3968_v3 = vpop.permute.xlu0 %3967 }
0x28cf   : >> { %6827 = vpow2.f32 %v4231_v5  ;;  %v3970_v4 = vmul.f32 %v3968_v3, %v3964_v63 }
0x28d1   : >> { %v6826_v7 = vpop.eup %6825  ;;  %v4019_v8 = vadd.f32 %v8216_v12, %v3970_v4 }
0x28d2   : >> { %v4363_v6 = vpop.permute.xlu1 %4362  ;;  %v4098_v9 = vsel %vm3867_vm7, %v6826_v7, 0.0  ;;  %v4111_v15 = vpack.c.bf16 %v6826_v7, %v6826_v7 }
0x28d3   : >> { %4020 = vst.msk [vmem:[#allocation8] sm:$0xff] %vm3867_vm7, %v4019_v8  ;;  %v4365_v10 = vsub.f32 %v4346_v28, %v4363_v6  ;;  %4099 = vadd.xlane.f32.xlu0 %v4098_v9  ;;  %v4096_v28 = vld [vmem:[#allocation7 + $0x8] sm:$0xff] }
0x28d4   : >> { %v4097_v29 = vmul.f32 %v6824_v61, %v4096_v28 }
0x28d5   : >> { %v4366_v11 = vmul.f32 1.442695, %v4365_v10 }
0x28d6   : >> { %v4116_v35 = vpop.permute.xlu1 %4115 }
0x28d7   : >> { %6829 = vpow2.f32 %v4366_v11  ;;  %v4121_v13 = vsel %vm3975_vm10, %v4116_v35, 0 }
0x28d8   : >> { %6365 = vmatpush3.bf16.msra.mxu0 %v4121_v13  ;;  %6831 = vpow2.f32 %v4358_v20 }
0x28d9   : >> { %v6828_v24 = vpop.eup %6827  ;;  %6376 = vmatprep.subr.bf16.mxu0 %v7107_v36  ;;  %v4246_v27 = vpop.permute.xlu0 %4245 }
0x28da   : >> { %v4236_v62 = vsel %vm3867_vm7, %v6828_v24, 0.0  ;;  %v4251_v12 = vpop.permute.xlu1 %4250  ;;  %v4249_v18 = vpack.c.bf16 %v6828_v24, %v6828_v24  ;;  %v4248_v57 = vmul.f32 %v4246_v27, %v4242_v56 }
0x28db   : >> { %6367 = vmatmul.mubr.msk.bf16.vlgmr.msra.gmra.mrb[4].mxu0 %vm3867_vm7, %v4111_v15  ;;  %4237 = vadd.xlane.f32.xlu0 %v4236_v62  ;;  %v4256_v16 = vsel %vm3975_vm10, %v4251_v12, 0 }
0x28dc   : >> { %6377 = vmatpush3.bf16.msra.mxu0 %v4256_v16  ;;  %6378 = vmatprep.mubr.msk.bf16.mxu0 %vm7108_vm8, %v7107_v36 }
0x28dd   : >> { %6388 = vmatprep.subr.bf16.mxu0 %v7107_v36 }
0x28de   : >> { %v4386_v14 = vpop.permute.xlu1 %4385 }
0x28df   : >> { %v4391_v19 = vsel %vm3975_vm10, %v4386_v14, 0 }
0x28e1   : >> { %v6830_v17 = vpop.eup %6829 }
0x28e2   : >> { %v4371_v25 = vsel %vm3867_vm7, %v6830_v17, 0.0  ;;  %v4384_v26 = vpack.c.bf16 %v6830_v17, %v6830_v17  ;;  %v6832_v21 = vpop.eup %6831 }
0x28e3   : >> { %6379 = vmatmul.mubr.msk.bf16.vlgmr.msra.gmra.mrb[8].mxu0 %vm3867_vm7, %v4249_v18  ;;  %4372 = vadd.xlane.f32.xlu1 %v4371_v25  ;;  %v4370_v43 = vmul.f32 %v6832_v21, %v4369_v42 }
0x28e4   : >> { %6389 = vmatpush3.bf16.msra.mxu0 %v4391_v19  ;;  %6390 = vmatprep.mubr.msk.bf16.mxu0 %vm7108_vm8, %v7107_v36  ;;  %v4234_v36 = vld [vmem:[#allocation7 + $0x10] sm:$0xff] }
0x28e5   : >> { %v4235_v31 = vmul.f32 %v8233_v58, %v4234_v36 }
0x28eb   : >> { %6391 = vmatmul.mubr.msk.bf16.vlgmr.msra.gmra.mrb[12].mxu0 %vm3867_vm7, %v4384_v26 }
0x28f1   : >> { %4380 = vperm.xlu0 %6813, %v6832_v21  }
0x2910   : >> { %v3961_v37 = vpop.xlane.xlu1 %3960 }
0x2911   : >> { %v3962_v23 = vadd.f32 %v3961_v37, %v3958_v22 }
0x2913   : >> { %3963 = vst.msk [vmem:[#allocation7] sm:$0xff] %vm3858_vm6, %v3962_v23 }
0x2914   : >> { %v4108_v51 = vpop.permute.xlu1 %4107 }
0x2915   : >> { %v4110_v52 = vmul.f32 %v4108_v51, %v4104_v46 }
0x2960   : >> { %v4100_v30 = vpop.xlane.xlu0 %4099 }
0x2961   : >> { %v4101_v32 = vadd.f32 %v4100_v30, %v4097_v29 }
0x2963   : >> { %4102 = vst.msk [vmem:[#allocation7 + $0x8] sm:$0xff] %vm3858_vm6, %v4101_v32 }
0x2968   : >> { %v4238_v38 = vpop.xlane.xlu0 %4237 }
0x2969   : >> { %v4239_v39 = vadd.f32 %v4238_v38, %v4235_v31 }
0x296b   : >> { %4240 = vst.msk [vmem:[#allocation7 + $0x10] sm:$0xff] %vm3858_vm6, %v4239_v39 }
0x2970   : >> { %v4373_v44 = vpop.xlane.xlu1 %4372  ;;  %v4381_v41 = vpop.permute.xlu0 %4380 }
0x2971   : >> { %v4374_v45 = vadd.f32 %v4373_v44, %v4370_v43  ;;  %v4383_v2 = vmul.f32 %v4381_v41, %v4377_v1 }
0x2973   : >> { %4375 = vst.msk [vmem:[#allocation7 + $0x18] sm:$0xff] %vm3858_vm6, %v4374_v45 }
0x29ae   : >> { %v4157_v48 = vpop.f32.mrb[4].mxu0 }
0x29af   : >> { %v4163_v47 = vadd.f32 %v4157_v48, %v4110_v52  ;;  %v6368_v50 = vpop.f32.mrb[5].mxu0 }
0x29b0   : >> { %v4160_v53 = vpop.f32.mrb[6].mxu0 }
0x29b1   : >> { %4164 = vst.msk [vmem:[#allocation8 + $0x8] sm:$0xff] %vm3867_vm7, %v4163_v47  ;;  %v6369_v54 = vpop.f32.mrb[7].mxu0 }
0x29b6   : >> { %v4292_v58 = vpop.f32.mrb[8].mxu0 }
0x29b7   : >> { %v4298_v59 = vadd.f32 %v4292_v58, %v4248_v57  ;;  %v6380_v55 = vpop.f32.mrb[9].mxu0 }
0x29b8   : >> { %v4295_v61 = vpop.f32.mrb[10].mxu0 }
0x29b9   : >> { %4299 = vst.msk [vmem:[#allocation8 + $0x10] sm:$0xff] %vm3867_vm7, %v4298_v59  ;;  %v6381_v60 = vpop.f32.mrb[11].mxu0 }
0x29bb   : > { %3878 = sbr.rel (!%p3875_p5) target bundleno = 9423 (0x24cf), region = 317 }
0x29be   : >> { %v4427_v0 = vpop.f32.mrb[12].mxu0 }
0x29bf   : >> { %v4433_v63 = vadd.f32 %v4427_v0, %v4383_v2  ;;  %v6392_v5 = vpop.f32.mrb[13].mxu0 }
0x29c0   : >> { %v4430_v3 = vpop.f32.mrb[14].mxu0 }
0x29c1   : >> { %4434 = vst.msk [vmem:[#allocation8 + $0x18] sm:$0xff] %vm3867_vm7, %v4433_v63  ;;  %v6393_v4 = vpop.f32.mrb[15].mxu0 }
0x29c2 PF: > { %v4449_v7 = vld [vmem:[#allocation7 + $0x8] sm:$0xff]  ;;  %v4473_v8 = vld [vmem:[#allocation7 + $0x18] sm:$0xff]  ;;  %v4461_v6 = vld [vmem:[#allocation7 + $0x10] sm:$0xff]  ;;  %6394 = vmatprep.subr.bf16.mxu0 %v7106_v33  ;;  %v7113_v9 = vmov 0   ;;  %vm7114_vm11 = vmmov 0   ;;  %s7115_s10 = smov 8   ;;  %v4560_v31 = vlaneseq }
0x29c3   : > { %6833 = vset.pattern.permute.xlu0 %v7113_v9  ;;  %6834 = vset.pattern.permute.xlu1 %v7113_v9  ;;  %6837 = vrcp.f32 %v4449_v7  ;;  %v4437_v10 = vld [vmem:[#allocation7] sm:$0xff]  ;;  %v6835_v34 = vld [vmem:[%s8653_s7 + $0x10] sm:$0xff]   ;;  %v4447_v62 = vld [vmem:[#allocation8 + $0x8] sm:$0xff]  ;;  %s7116_s12 = smov 16   ;;  %s7117_s27 = smov 24   ;;  %vm4496_vm13 = vcmask 195584  }
0x29c4   : > { %6839 = vrcp.f32 %v4473_v8  ;;  %6395 = vmatpush3.bf16.msra.mxu0 %v6835_v34  ;;  %v6836_v15 = vld [vmem:[%s8653_s7 + $0x18] sm:$0xff]   ;;  %6398 = vmatprep.mubr.msk.bf16.mxu0 %vm7114_vm11, %v7106_v33  ;;  %v4459_v19 = vld [vmem:[#allocation8 + $0x10] sm:$0xff]  ;;  %v4561_v38 = vshrl.u32 %v4560_v31, 7 }
0x29c5   : > { %6841 = vrcp.f32 %v4461_v6  ;;  %6396 = vmatprep.subr.bf16.mxu0 %v7106_v33  ;;  %v4436_v33 = vld [vmem:[#allocation8] sm:$0xff]  ;;  %v4558_v51 = vld [vmem:[#allocation2 + $0x8] sm:$0xff] }
0x29c6   : > { %6843 = vrcp.f32 %v4437_v10  ;;  %v4562_v39 = vsub.s32 0, %v4561_v38 }
0x29c8   : > { %6397 = vmatpush3.bf16.msra.mxu0 %v6836_v15  ;;  %v4471_v12 = vld [vmem:[#allocation8 + $0x18] sm:$0xff]  ;;  %v4563_v42 = vrot.slane %v7918_v40, %v4562_v39 }
0x29cd   : > { %v6838_v11 = vpop.eup %6837 }
0x29ce   : > { %v6840_v35 = vpop.eup %6839  ;;  %4453 = vperm.xlu0 %6833, %v6838_v11  }
0x29cf   : > { %v6842_v13 = vpop.eup %6841  ;;  %4477 = vperm.xlu1 %6834, %v6840_v35  }
0x29d0   : > { %v6844_v24 = vpop.eup %6843 }
0x29d2   : > { %4465 = vperm.xlu0 %6833, %v6842_v13  }
0x29d3   : > { %4441 = vperm.xlu1 %6834, %v6844_v24  }
0x2a4d   : > { %v4454_v16 = vpop.permute.xlu0 %4453 }
0x2a4e   : > { %v4456_v14 = vmul.f32 %v4454_v16, %v4447_v62  ;;  %v4478_v17 = vpop.permute.xlu1 %4477 }
0x2a4f   : > { %v4480_v18 = vmul.f32 %v4478_v17, %v4471_v12 }
0x2a50   : > { %v4457_v20 = vpack.c.bf16 %v4456_v14, %v4456_v14 }
0x2a51   : > { %v4466_v25 = vpop.permute.xlu0 %4465  ;;  %v4481_v26 = vpack.c.bf16 %v4480_v18, %v4480_v18 }
0x2a52   : > { %v4468_v21 = vmul.f32 %v4466_v25, %v4459_v19  ;;  %4483 = vrot.lane.b32.xlu0 %v4457_v20, %s7115_s10  ;;  %v4442_v22 = vpop.permute.xlu1 %4441 }
0x2a53   : > { %v4444_v37 = vmul.f32 %v4442_v22, %v4436_v33 }
0x2a54   : > { %v4469_v49 = vpack.c.bf16 %v4468_v21, %v4468_v21 }
0x2a55   : > { %v4445_v27 = vpack.c.bf16 %v4444_v37, %v4444_v37 }
0x2a56   : > { %4486 = vrot.lane.b32.xlu1 %v4469_v49, %s7116_s12  ;;  %4489 = vrot.lane.b32.xlu0 %v4481_v26, %s7117_s27 }
0x2ac4   : > { %v4484_v23 = vpop.permute.xlu0 %4483 }
0x2ac5   : > { %v4493_v28 = vsel %vm3867_vm7, %v4445_v27, %v4484_v23 }
0x2ac8   : > { %v4487_v29 = vpop.permute.xlu1 %4486  ;;  %v4490_v30 = vpop.permute.xlu0 %4489 }
0x2ac9   : > { %v4495_v32 = vsel %vm343_vm1, %v4493_v28, %v4487_v29 }
0x2aca   : > { %v4498_v36 = vsel %vm4496_vm13, %v4495_v32, %v4490_v30 }
0x2acb   : > { %6399 = vmatmul.mubr.msk.bf16.vlgmr.msra.gmra.mrb[0].mxu0 %vm433_vm2, %v4498_v36 }
0x2b9e   : > { %v4552_v43 = vpop.f32.mrb[0].mxu0 }
0x2b9f   : > { %v4559_v44 = vadd.f32 %v4558_v51, %v4552_v43  ;;  %v6400_v45 = vpop.f32.mrb[1].mxu0 }
0x2ba0   : > { %v4555_v46 = vpop.f32.mrb[2].mxu0 }
0x2ba1   : > { %v4564_v52 = vadd.f32 %v4563_v42, %v4559_v44  ;;  %v6401_v48 = vpop.f32.mrb[3].mxu0 }
0x2ba3   : > { %4565 = vst.msk [vmem:[#allocation2 + $0x8] sm:$0xff] %vm433_vm2, %v4564_v52 }
0x2ba4 PF: > { %4568 = sbr.rel (%p5793_p13) target bundleno = 12935 (0x3287), region = 107  ;;  %vm4569_vm14 = vcmask (!%p5793_p13), 7168   ;;  %v8286_v47 = vld [vmem:[#allocation3 + $0x8] sm:$0xf] (!%p5793_p13)  ;;  %vm4578_vm3 = vcmask (!%p5793_p13), 64512   ;;  %v7118_v50 = vmov (!%p5793_p13), -inf  }
0x2ba5   : > { %4570 = vst.msk [vmem:[#allocation6] sm:$0xff] (!%p5793_p13), %vm4569_vm14, %v7118_v50  ;;  %4571 = vst.msk [vmem:[#allocation6 + $0x8] sm:$0xff] (!%p5793_p13), %vm4569_vm14, %v7118_v50  ;;  %v7119_v53 = vmov (!%p5793_p13), 0.0   ;;  %p5882_p6 = scmp.le.s32.totalorder (!%p5793_p13), %s8675_s29, 0 }
0x2ba6   : > { %4572 = vst.msk [vmem:[#allocation6 + $0x10] sm:$0xff] (!%p5793_p13), %vm4569_vm14, %v7118_v50  ;;  %4573 = vst.msk [vmem:[#allocation6 + $0x18] sm:$0xff] (!%p5793_p13), %vm4569_vm14, %v7118_v50 }
0x2ba7   : > { %4574 = vst.msk [vmem:[#allocation7] sm:$0xff] (!%p5793_p13), %vm4569_vm14, %v7119_v53  ;;  %4575 = vst.msk [vmem:[#allocation7 + $0x8] sm:$0xff] (!%p5793_p13), %vm4569_vm14, %v7119_v53 }
0x2ba8   : > { %4576 = vst.msk [vmem:[#allocation7 + $0x10] sm:$0xff] (!%p5793_p13), %vm4569_vm14, %v7119_v53  ;;  %4577 = vst.msk [vmem:[#allocation7 + $0x18] sm:$0xff] (!%p5793_p13), %vm4569_vm14, %v7119_v53 }
0x2ba9   : > { %4579 = vst.msk [vmem:[#allocation8] sm:$0xff] (!%p5793_p13), %vm4578_vm3, %v7119_v53  ;;  %4580 = vst.msk [vmem:[#allocation8 + $0x8] sm:$0xff] (!%p5793_p13), %vm4578_vm3, %v7119_v53 }
0x2baa   : > { %4581 = vst.msk [vmem:[#allocation8 + $0x10] sm:$0xff] (!%p5793_p13), %vm4578_vm3, %v7119_v53  ;;  %4582 = vst.msk [vmem:[#allocation8 + $0x18] sm:$0xff] (!%p5793_p13), %vm4578_vm3, %v7119_v53 }
0x2bab   : > { %5698 = sbr.rel (%p5882_p6) target bundleno = 12453 (0x30a5), region = 322  ;;  %s8309_s13 = smov (!%p5882_p6), 0  }
0x2bb2 LB: >> { %v7120_v54 = vmov 0.0   ;;  %vm7121_vm15 = vmmov 0   ;;  %s5883_s11 = sshll.u32 %s7045_s13, 3  ;;  %v4599_v58 = vlaneseq  ;;  %v4603_v60 = vstv %s8673_s25  ;;  %s7123_s10 = smov 120   ;;  %v8346_v6 = vld [vmem:[#allocation6] sm:$0xff]  ;;  %v4790_v50 = vld [vmem:[#allocation6 + $0x8] sm:$0xff]  ;;  %s7045_s13 = sphi %s8309_s13, %s4587_s13  }
0x2bb3   : >> { %6402 = vmatprep.subr.bf16.mxu0 %v7120_v54  ;;  %6404 = vmatprep.mubr.msk.bf16.mxu0 %vm7121_vm15, %v7120_v54  ;;  %s8321_s18 = sshra.s32 %s5883_s11, 3  ;;  %v4601_v55 = vstv %s5883_s11  ;;  %v7122_v4 = vmov 0   ;;  %v5888_v8 = vcombine.low %v8286_v47, %v8286_v47  ;;  %s7124_s12 = smov 112   ;;  %vm4686_vm4 = vcmask 1043456  }
0x2bb4   : >> { %6408 = vmatprep.subr.bf16.mxu1 %v7120_v54  ;;  %6410 = vmatprep.mubr.msk.bf16.mxu1 %vm7121_vm15, %v7120_v54  ;;  %s5884_s28 = sshll.u32 %s8321_s18, 2  ;;  %v4600_v59 = vand.u32 127, %v4599_v58  ;;  %s7125_s27 = smov 104  }
0x2bb5   : >> { %s4594_s26 = scalar_lea.vmem [#allocation4], %s5884_s28  ;;  %6845 = vset.pattern.permute.xlu0 %v7122_v4  ;;  %6846 = vset.pattern.permute.xlu1 %v7122_v4  ;;  %s4597_s11 = scalar_lea.vmem [#allocation5], %s5884_s28 }
0x2bb6   : >> { %v4595_v56 = vld [vmem:[%s4594_s26] sm:$0xf]  ;;  %v4602_v61 = vadd.s32 %v4601_v55, %v4600_v59  ;;  %v4928_v55 = vld [vmem:[#allocation6 + $0x10] sm:$0xff]  ;;  %s4587_s13 = sadd.s32 1, %s7045_s13  }
0x2bb7   : >> { %v4610_v57 = vsel %vm4578_vm3, %v4595_v56, 0  ;;  %v5889_v7 = vcombine.low %v4595_v56, %v4595_v56  ;;  %v8358_v35 = vld [vmem:[%s4597_s11] sm:$0xf]  ;;  %p4586_p7 = scmp.ge.s32.totalorder %s4587_s13, %s8675_s29 }
0x2bb8   : >> { %6403 = vmatpush3.bf16.xpose.msra.mxu0 %v4610_v57  ;;  %vm4604_vm0 = vcmp.ge.s32.totalorder %v4602_v61, %v4603_v60  ;;  %v4688_v13 = vsel %vm4686_vm4, %v8358_v35, 0 }
0x2bb9   : >> { %6420 = vmatprep.subr.bf16.mxu0 %v7120_v54  ;;  %v8334_v1 = vsel %vm4604_vm0, -1e+09, %v7120_v54  ;;  %4741 = vrot.lane.b32.xlu1 %v5889_v7, %s7123_s10 }
0x2bba   : >> { %6409 = vmatpush3.bf16.msra.mxu1 %v4688_v13 }
0x2bbb   : >> { %6414 = vmatprep.subr.bf16.mxu1 %v7120_v54 }
0x2bbd   : >> { %4736 = vrot.lane.b32.xlu1 %v5888_v8, %s7123_s10 }
0x2bbf   : >> { %6405 = vmatmul.mubr.msk.bf16.vlgmr.msra.gmra.mrb[0].mxu0 %vm4578_vm3, %v8286_v47 }
0x2bc0   : >> { %6422 = vmatprep.mubr.msk.bf16.mxu0 %vm7121_vm15, %v7120_v54 }
0x2bc1   : >> { %4879 = vrot.lane.b32.xlu1 %v5889_v7, %s7124_s12 }
0x2bc5   : >> { %4877 = vrot.lane.b32.xlu1 %v5888_v8, %s7124_s12 }
0x2bc9   : >> { %5014 = vrot.lane.b32.xlu1 %v5889_v7, %s7125_s27 }
0x2bcd   : >> { %5012 = vrot.lane.b32.xlu1 %v5888_v8, %s7125_s27 }
0x2c2b   : >> { %v4742_v62 = vpop.permute.xlu1 %4741 }
0x2c2c   : >> { %v4747_v14 = vsel %vm4578_vm3, %v4742_v62, 0 }
0x2c2f   : >> { %v4737_v12 = vpop.permute.xlu1 %4736 }
0x2c33   : >> { %v4880_v18 = vpop.permute.xlu1 %4879 }
0x2c34   : >> { %v4885_v20 = vsel %vm4578_vm3, %v4880_v18, 0 }
0x2c37   : >> { %v4878_v19 = vpop.permute.xlu1 %4877 }
0x2c3b   : >> { %v5015_v25 = vpop.permute.xlu1 %5014 }
0x2c3c   : >> { %v5020_v26 = vsel %vm4578_vm3, %v5015_v25, 0 }
0x2c3f   : >> { %v5013_v21 = vpop.permute.xlu1 %5012 }
0x2c92   : >> { %v4646_v41 = vpop.f32.mrb[0].mxu0 }
0x2c93   : >> { %v4647_v2 = vadd.f32 %v4646_v41, %v8334_v1  ;;  %v6406_v0 = vpop.f32.mrb[1].mxu0 }
0x2c94   : >> { %v4649_v63 = vpop.f32.mrb[2].mxu0  ;;  %v5063_v0 = vld [vmem:[#allocation6 + $0x18] sm:$0xff] }
0x2c95   : >> { %v6407_v5 = vpop.f32.mrb[3].mxu0  ;;  %v4653_v3 = vsel %vm4578_vm3, %v4647_v2, -inf }
0x2c96   : >> { %4654 = vmax.xlane.f32.xlu0 %v4653_v3  ;;  %v5891_v3 = vcombine.low %v8358_v35, %v8358_v35 }
0x2d23   : >> { %v4655_v9 = vpop.xlane.xlu0 %4654 }
0x2d24   : >> { %v8349_v10 = vmax.f32 %v8346_v6, %v4655_v9 }
0x2d26   : >> { %v4657_v11 = vsub.f32 %v8346_v6, %v8349_v10  ;;  %4732 = vst.msk [vmem:[#allocation6] sm:$0xff] %vm4569_vm14, %v8349_v10  ;;  %4662 = vperm.xlu0 %6845, %v8349_v10  }
0x2d28   : >> { %v4658_v56 = vmul.f32 1.442695, %v4657_v11 }
0x2da5   : >> { %v4663_v24 = vpop.permute.xlu0 %4662 }
0x2da6   : >> { %v4665_v34 = vsub.f32 %v4647_v2, %v4663_v24 }
0x2da8   : >> { %v4666_v15 = vmul.f32 1.442695, %v4665_v34  ;;  %v4675_v34 = vld [vmem:[#allocation8] sm:$0xff] }
0x2daa   : >> { %6849 = vpow2.f32 %v4666_v15 }
0x2dab   : >> { %6851 = vpow2.f32 %v4658_v56 }
0x2db4   : >> { %v8363_v16 = vpop.eup %6849 }
0x2db5   : >> { %v4682_v17 = vpack.c.bf16 %v8363_v16, %v8363_v16  ;;  %v8392_v2 = vpop.eup %6851  ;;  %v4670_v8 = vsel %vm4578_vm3, %v8363_v16, 0.0 }
0x2db7   : >> { %6411 = vmatmul.mubr.msk.bf16.vlgmr.msra.gmra.mrb[0].mxu1 %vm4578_vm3, %v4682_v17 }
0x2db8   : >> { %6415 = vmatpush3.bf16.xpose.msra.mxu1 %v4747_v14  ;;  %6416 = vmatprep.mubr.msk.bf16.mxu1 %vm7121_vm15, %v7120_v54 }
0x2db9   : >> { %6426 = vmatprep.subr.bf16.mxu1 %v7120_v54 }
0x2dbf   : >> { %6417 = vmatmul.mubr.msk.bf16.vlgmr.msra.gmra.mrb[4].mxu1 %vm4578_vm3, %v4737_v12 }
0x2dc0   : >> { %6427 = vmatpush3.bf16.xpose.msra.mxu1 %v4885_v20  ;;  %6428 = vmatprep.mubr.msk.bf16.mxu1 %vm7121_vm15, %v7120_v54 }
0x2dc1   : >> { %6438 = vmatprep.subr.bf16.mxu1 %v7120_v54 }
0x2dc7   : >> { %6429 = vmatmul.mubr.msk.bf16.vlgmr.msra.gmra.mrb[8].mxu1 %vm4578_vm3, %v4878_v19 }
0x2dc8   : >> { %6439 = vmatpush3.bf16.xpose.msra.mxu1 %v5020_v26  ;;  %6440 = vmatprep.mubr.msk.bf16.mxu1 %vm7121_vm15, %v7120_v54 }
0x2dcf   : >> { %6441 = vmatmul.mubr.msk.bf16.vlgmr.msra.gmra.mrb[12].mxu1 %vm4578_vm3, %v5013_v21 }
0x2e8a   : >> { %v8382_v49 = vpop.f32.mrb[0].mxu1 }
0x2e8b   : >> { %v6412_v22 = vpop.f32.mrb[1].mxu1 }
0x2e8c   : >> { %v4727_v33 = vpop.f32.mrb[2].mxu1 }
0x2e8d   : >> { %v6413_v37 = vpop.f32.mrb[3].mxu1 }
0x2e92   : >> { %v4783_v23 = vpop.f32.mrb[4].mxu1 }
0x2e93   : >> { %v4784_v27 = vadd.f32 %v4783_v23, %v8334_v1  ;;  %v6418_v28 = vpop.f32.mrb[5].mxu1 }
0x2e94   : >> { %v4786_v29 = vpop.f32.mrb[6].mxu1 }
0x2e95   : >> { %v6419_v30 = vpop.f32.mrb[7].mxu1  ;;  %v4791_v32 = vsel %vm4578_vm3, %v4784_v27, -inf }
0x2e96   : >> { %4792 = vmax.xlane.f32.xlu1 %v4791_v32 }
0x2e9a   : >> { %v4921_v36 = vpop.f32.mrb[8].mxu1 }
0x2e9b   : >> { %v4922_v31 = vadd.f32 %v4921_v36, %v8334_v1  ;;  %v6430_v38 = vpop.f32.mrb[9].mxu1 }
0x2e9c   : >> { %v4924_v39 = vpop.f32.mrb[10].mxu1  ;;  %v4668_v38 = vld [vmem:[#allocation7] sm:$0xff] }
0x2e9d   : >> { %v6431_v51 = vpop.f32.mrb[11].mxu1  ;;  %v4929_v42 = vsel %vm4578_vm3, %v4922_v31, -inf  ;;  %v4669_v39 = vmul.f32 %v8392_v2, %v4668_v38 }
0x2e9e   : >> { %4930 = vmax.xlane.f32.xlu0 %v4929_v42 }
0x2ea2   : >> { %v5056_v43 = vpop.f32.mrb[12].mxu1 }
0x2ea3   : >> { %v5057_v44 = vadd.f32 %v5056_v43, %v8334_v1  ;;  %v6442_v45 = vpop.f32.mrb[13].mxu1 }
0x2ea4   : >> { %v5059_v46 = vpop.f32.mrb[14].mxu1 }
0x2ea5   : >> { %v6443_v52 = vpop.f32.mrb[15].mxu1  ;;  %v5064_v48 = vsel %vm4578_vm3, %v5057_v44, -inf }
0x2ea6   : >> { %5065 = vmax.xlane.f32.xlu1 %v5064_v48 }
0x2f23   : >> { %v4793_v57 = vpop.xlane.xlu1 %4792 }
0x2f24   : >> { %v4794_v58 = vmax.f32 %v4790_v50, %v4793_v57 }
0x2f26   : >> { %v4795_v59 = vsub.f32 %v4790_v50, %v4794_v58  ;;  %4876 = vst.msk [vmem:[#allocation6 + $0x8] sm:$0xff] %vm4569_vm14, %v4794_v58  ;;  %4800 = vperm.xlu1 %6846, %v4794_v58   ;;  %v5080_v58 = vld [vmem:[#allocation7 + $0x18] sm:$0xff] }
0x2f28   : >> { %v4796_v6 = vmul.f32 1.442695, %v4795_v59 }
0x2f2b   : >> { %v4931_v61 = vpop.xlane.xlu0 %4930 }
0x2f2c   : >> { %v4932_v60 = vmax.f32 %v4928_v55, %v4931_v61 }
0x2f2e   : >> { %v4933_v41 = vsub.f32 %v4928_v55, %v4932_v60  ;;  %5011 = vst.msk [vmem:[#allocation6 + $0x10] sm:$0xff] %vm4569_vm14, %v4932_v60  ;;  %4938 = vperm.xlu0 %6845, %v4932_v60   ;;  %v4815_v60 = vld [vmem:[#allocation8 + $0x8] sm:$0xff] }
0x2f30   : >> { %v4934_v1 = vmul.f32 1.442695, %v4933_v41 }
0x2f32   : >> { %6853 = vpow2.f32 %v4934_v1  ;;  %4678 = vperm.xlu0 %6845, %v8392_v2  }
0x2f33   : >> { %v5066_v63 = vpop.xlane.xlu1 %5065  ;;  %6855 = vpow2.f32 %v4796_v6 }
0x2f34   : >> { %v5067_v5 = vmax.f32 %v5063_v0, %v5066_v63 }
0x2f36   : >> { %v5068_v4 = vsub.f32 %v5063_v0, %v5067_v5  ;;  %5146 = vst.msk [vmem:[#allocation6 + $0x18] sm:$0xff] %vm4569_vm14, %v5067_v5  ;;  %5073 = vperm.xlu1 %6846, %v5067_v5  }
0x2f38   : >> { %v5069_v30 = vmul.f32 1.442695, %v5068_v4 }
0x2f3a   : >> { %4826 = vrot.lane.b32.xlu1 %v5891_v3, %s7123_s10 }
0x2f3c   : >> { %v8399_v7 = vpop.eup %6853 }
0x2f3d   : >> { %4956 = vperm.xlu0 %6845, %v8399_v7   ;;  %v6856_v9 = vpop.eup %6855 }
0x2f3e   : >> { %4961 = vrot.lane.b32.xlu1 %v5891_v3, %s7124_s12 }
0x2f42   : >> { %5096 = vrot.lane.b32.xlu1 %v5891_v3, %s7125_s27  ;;  %v4953_v3 = vld [vmem:[#allocation8 + $0x10] sm:$0xff] }
0x2f66   : >> { %4671 = vadd.xlane.f32.xlu1 %v4670_v8 }
0x2f77   : >> { %4818 = vperm.xlu1 %6846, %v6856_v9  }
0x2fa5   : >> { %v4801_v10 = vpop.permute.xlu1 %4800 }
0x2fa6   : >> { %v4803_v11 = vsub.f32 %v4784_v27, %v4801_v10 }
0x2fa8   : >> { %v4804_v35 = vmul.f32 1.442695, %v4803_v11  ;;  %v5088_v11 = vld [vmem:[#allocation8 + $0x18] sm:$0xff] }
0x2faa   : >> { %6857 = vpow2.f32 %v4804_v35 }
0x2fad   : >> { %v4939_v13 = vpop.permute.xlu0 %4938 }
0x2fae   : >> { %v4941_v24 = vsub.f32 %v4922_v31, %v4939_v13 }
0x2fb0   : >> { %v4942_v15 = vmul.f32 1.442695, %v4941_v24 }
0x2fb1   : >> { %v4679_v62 = vpop.permute.xlu0 %4678 }
0x2fb2   : >> { %6859 = vpow2.f32 %v4942_v15  ;;  %v4681_v12 = vmul.f32 %v4679_v62, %v4675_v34 }
0x2fb4   : >> { %v6858_v14 = vpop.eup %6857  ;;  %v4730_v17 = vadd.f32 %v8382_v49, %v4681_v12 }
0x2fb5   : >> { %v5074_v16 = vpop.permute.xlu1 %5073  ;;  %v4809_v18 = vsel %vm4578_vm3, %v6858_v14, 0.0  ;;  %v4822_v22 = vpack.c.bf16 %v6858_v14, %v6858_v14 }
0x2fb6   : >> { %4731 = vst.msk [vmem:[#allocation8] sm:$0xff] %vm4578_vm3, %v4730_v17  ;;  %v5076_v19 = vsub.f32 %v5057_v44, %v5074_v16  ;;  %4810 = vadd.xlane.f32.xlu0 %v4809_v18  ;;  %v4807_v44 = vld [vmem:[#allocation7 + $0x8] sm:$0xff] }
0x2fb7   : >> { %v4808_v45 = vmul.f32 %v6856_v9, %v4807_v44 }
0x2fb8   : >> { %v5077_v20 = vmul.f32 1.442695, %v5076_v19 }
0x2fb9   : >> { %v4827_v25 = vpop.permute.xlu1 %4826 }
0x2fba   : >> { %6861 = vpow2.f32 %v5077_v20  ;;  %v4832_v26 = vsel %vm4686_vm4, %v4827_v25, 0 }
0x2fbb   : >> { %6421 = vmatpush3.bf16.msra.mxu0 %v4832_v26  ;;  %6863 = vpow2.f32 %v5069_v30 }
0x2fbc   : >> { %v6860_v21 = vpop.eup %6859  ;;  %6432 = vmatprep.subr.bf16.mxu0 %v7120_v54  ;;  %v4957_v43 = vpop.permute.xlu0 %4956 }
0x2fbd   : >> { %v4947_v33 = vsel %vm4578_vm3, %v6860_v21, 0.0  ;;  %v4962_v49 = vpop.permute.xlu1 %4961  ;;  %v4960_v28 = vpack.c.bf16 %v6860_v21, %v6860_v21  ;;  %v4959_v4 = vmul.f32 %v4957_v43, %v4953_v3 }
0x2fbe   : >> { %6423 = vmatmul.mubr.msk.bf16.vlgmr.msra.gmra.mrb[4].mxu0 %vm4578_vm3, %v4822_v22  ;;  %4948 = vadd.xlane.f32.xlu0 %v4947_v33  ;;  %v4967_v37 = vsel %vm4686_vm4, %v4962_v49, 0 }
0x2fbf   : >> { %6433 = vmatpush3.bf16.msra.mxu0 %v4967_v37  ;;  %6434 = vmatprep.mubr.msk.bf16.mxu0 %vm7121_vm15, %v7120_v54 }
0x2fc0   : >> { %6444 = vmatprep.subr.bf16.mxu0 %v7120_v54 }
0x2fc1   : >> { %v5097_v23 = vpop.permute.xlu1 %5096 }
0x2fc2   : >> { %v5102_v29 = vsel %vm4686_vm4, %v5097_v23, 0 }
0x2fc4   : >> { %v6862_v27 = vpop.eup %6861 }
0x2fc5   : >> { %v5082_v32 = vsel %vm4578_vm3, %v6862_v27, 0.0  ;;  %v5095_v36 = vpack.c.bf16 %v6862_v27, %v6862_v27  ;;  %v6864_v31 = vpop.eup %6863 }
0x2fc6   : >> { %6435 = vmatmul.mubr.msk.bf16.vlgmr.msra.gmra.mrb[8].mxu0 %vm4578_vm3, %v4960_v28  ;;  %5083 = vadd.xlane.f32.xlu1 %v5082_v32  ;;  %v5081_v59 = vmul.f32 %v6864_v31, %v5080_v58 }
0x2fc7   : >> { %6445 = vmatpush3.bf16.msra.mxu0 %v5102_v29  ;;  %6446 = vmatprep.mubr.msk.bf16.mxu0 %vm7121_vm15, %v7120_v54  ;;  %v4945_v54 = vld [vmem:[#allocation7 + $0x10] sm:$0xff] }
0x2fc8   : >> { %v4946_v48 = vmul.f32 %v8399_v7, %v4945_v54 }
0x2fce   : >> { %6447 = vmatmul.mubr.msk.bf16.vlgmr.msra.gmra.mrb[12].mxu0 %vm4578_vm3, %v5095_v36 }
0x2fd4   : >> { %5091 = vperm.xlu0 %6845, %v6864_v31  }
0x2ff3   : >> { %v4672_v51 = vpop.xlane.xlu1 %4671 }
0x2ff4   : >> { %v4673_v42 = vadd.f32 %v4672_v51, %v4669_v39 }
0x2ff6   : >> { %4674 = vst.msk [vmem:[#allocation7] sm:$0xff] %vm4569_vm14, %v4673_v42 }
0x2ff7   : >> { %v4819_v57 = vpop.permute.xlu1 %4818 }
0x2ff8   : >> { %v4821_v41 = vmul.f32 %v4819_v57, %v4815_v60 }
0x3043   : >> { %v4811_v46 = vpop.xlane.xlu0 %4810 }
0x3044   : >> { %v4812_v52 = vadd.f32 %v4811_v46, %v4808_v45 }
0x3046   : >> { %4813 = vst.msk [vmem:[#allocation7 + $0x8] sm:$0xff] %vm4569_vm14, %v4812_v52 }
0x304b   : >> { %v4949_v50 = vpop.xlane.xlu0 %4948 }
0x304c   : >> { %v4950_v56 = vadd.f32 %v4949_v50, %v4946_v48 }
0x304e   : >> { %4951 = vst.msk [vmem:[#allocation7 + $0x10] sm:$0xff] %vm4569_vm14, %v4950_v56 }
0x3053   : >> { %v5084_v55 = vpop.xlane.xlu1 %5083  ;;  %v5092_v35 = vpop.permute.xlu0 %5091 }
0x3054   : >> { %v5085_v61 = vadd.f32 %v5084_v55, %v5081_v59  ;;  %v5094_v13 = vmul.f32 %v5092_v35, %v5088_v11 }
0x3056   : >> { %5086 = vst.msk [vmem:[#allocation7 + $0x18] sm:$0xff] %vm4569_vm14, %v5085_v61 }
0x3091   : >> { %v4868_v1 = vpop.f32.mrb[4].mxu0 }
0x3092   : >> { %v4874_v2 = vadd.f32 %v4868_v1, %v4821_v41  ;;  %v6424_v0 = vpop.f32.mrb[5].mxu0 }
0x3093   : >> { %v4871_v63 = vpop.f32.mrb[6].mxu0 }
0x3094   : >> { %4875 = vst.msk [vmem:[#allocation8 + $0x8] sm:$0xff] %vm4578_vm3, %v4874_v2  ;;  %v6425_v5 = vpop.f32.mrb[7].mxu0 }
0x3099   : >> { %v5003_v7 = vpop.f32.mrb[8].mxu0 }
0x309a   : >> { %v5009_v8 = vadd.f32 %v5003_v7, %v4959_v4  ;;  %v6436_v6 = vpop.f32.mrb[9].mxu0 }
0x309b   : >> { %v5006_v9 = vpop.f32.mrb[10].mxu0 }
0x309c   : >> { %5010 = vst.msk [vmem:[#allocation8 + $0x10] sm:$0xff] %vm4578_vm3, %v5009_v8  ;;  %v6437_v10 = vpop.f32.mrb[11].mxu0 }
0x309e   : > { %4589 = sbr.rel (!%p4586_p7) target bundleno = 11186 (0x2bb2), region = 328 }
0x30a1   : >> { %v5138_v24 = vpop.f32.mrb[12].mxu0 }
0x30a2   : >> { %v5144_v34 = vadd.f32 %v5138_v24, %v5094_v13  ;;  %v6448_v15 = vpop.f32.mrb[13].mxu0 }
0x30a3   : >> { %v5141_v62 = vpop.f32.mrb[14].mxu0 }
0x30a4   : >> { %5145 = vst.msk [vmem:[#allocation8 + $0x18] sm:$0xff] %vm4578_vm3, %v5144_v34  ;;  %v6449_v12 = vpop.f32.mrb[15].mxu0 }
0x30a5 PF: > { %v5160_v14 = vld [vmem:[#allocation7 + $0x8] sm:$0xff]  ;;  %v5184_v17 = vld [vmem:[#allocation7 + $0x18] sm:$0xff]  ;;  %v5172_v16 = vld [vmem:[#allocation7 + $0x10] sm:$0xff]  ;;  %6450 = vmatprep.subr.bf16.mxu0 %v7119_v53  ;;  %v7126_v18 = vmov 0   ;;  %vm7127_vm5 = vmmov 0   ;;  %s7128_s28 = smov 8   ;;  %v5271_v48 = vlaneseq }
0x30a6   : > { %6865 = vset.pattern.permute.xlu0 %v7126_v18  ;;  %6866 = vset.pattern.permute.xlu1 %v7126_v18  ;;  %6869 = vrcp.f32 %v5160_v14  ;;  %v5148_v19 = vld [vmem:[#allocation7] sm:$0xff]  ;;  %v6867_v47 = vld [vmem:[%s8653_s7 + $0x10] sm:$0xff]   ;;  %v5158_v33 = vld [vmem:[#allocation8 + $0x8] sm:$0xff]  ;;  %s7129_s26 = smov 16   ;;  %s7130_s10 = smov 24   ;;  %vm5207_vm6 = vcmask 195584  }
0x30a7   : > { %6871 = vrcp.f32 %v5184_v17  ;;  %6451 = vmatpush3.bf16.msra.mxu0 %v6867_v47  ;;  %v6868_v22 = vld [vmem:[%s8653_s7 + $0x18] sm:$0xff]   ;;  %6454 = vmatprep.mubr.msk.bf16.mxu0 %vm7127_vm5, %v7119_v53  ;;  %v5170_v29 = vld [vmem:[#allocation8 + $0x10] sm:$0xff]  ;;  %v5272_v50 = vshrl.u32 %v5271_v48, 7 }
0x30a8   : > { %6873 = vrcp.f32 %v5172_v16  ;;  %6452 = vmatprep.subr.bf16.mxu0 %v7119_v53  ;;  %v5147_v53 = vld [vmem:[#allocation8] sm:$0xff]  ;;  %v5269_v57 = vld [vmem:[#allocation2 + $0x10] sm:$0xff] }
0x30a9   : > { %6875 = vrcp.f32 %v5148_v19  ;;  %v5273_v56 = vsub.s32 0, %v5272_v50 }
0x30ab   : > { %6453 = vmatpush3.bf16.msra.mxu0 %v6868_v22  ;;  %v5182_v49 = vld [vmem:[#allocation8 + $0x18] sm:$0xff]  ;;  %v5274_v58 = vrot.slane %v7918_v40, %v5273_v56 }
0x30b0   : > { %v6870_v20 = vpop.eup %6869 }
0x30b1   : > { %v6872_v25 = vpop.eup %6871  ;;  %5164 = vperm.xlu0 %6865, %v6870_v20  }
0x30b2   : > { %v6874_v26 = vpop.eup %6873  ;;  %5188 = vperm.xlu1 %6866, %v6872_v25  }
0x30b3   : > { %v6876_v21 = vpop.eup %6875 }
0x30b5   : > { %5176 = vperm.xlu0 %6865, %v6874_v26  }
0x30b6   : > { %5152 = vperm.xlu1 %6866, %v6876_v21  }
0x3130   : > { %v5165_v37 = vpop.permute.xlu0 %5164 }
0x3131   : > { %v5167_v23 = vmul.f32 %v5165_v37, %v5158_v33  ;;  %v5189_v27 = vpop.permute.xlu1 %5188 }
0x3132   : > { %v5191_v28 = vmul.f32 %v5189_v27, %v5182_v49 }
0x3133   : > { %v5168_v30 = vpack.c.bf16 %v5167_v23, %v5167_v23 }
0x3134   : > { %v5177_v32 = vpop.permute.xlu0 %5176  ;;  %v5192_v36 = vpack.c.bf16 %v5191_v28, %v5191_v28 }
0x3135   : > { %v5179_v31 = vmul.f32 %v5177_v32, %v5170_v29  ;;  %5194 = vrot.lane.b32.xlu0 %v5168_v30, %s7128_s28  ;;  %v5153_v39 = vpop.permute.xlu1 %5152 }
0x3136   : > { %v5155_v51 = vmul.f32 %v5153_v39, %v5147_v53 }
0x3137   : > { %v5180_v38 = vpack.c.bf16 %v5179_v31, %v5179_v31 }
0x3138   : > { %v5156_v43 = vpack.c.bf16 %v5155_v51, %v5155_v51 }
0x3139   : > { %5197 = vrot.lane.b32.xlu1 %v5180_v38, %s7129_s26  ;;  %5200 = vrot.lane.b32.xlu0 %v5192_v36, %s7130_s10 }
0x31a7   : > { %v5195_v42 = vpop.permute.xlu0 %5194 }
0x31a8   : > { %v5204_v44 = vsel %vm4578_vm3, %v5156_v43, %v5195_v42 }
0x31ab   : > { %v5198_v45 = vpop.permute.xlu1 %5197  ;;  %v5201_v46 = vpop.permute.xlu0 %5200 }
0x31ac   : > { %v5206_v52 = vsel %vm343_vm1, %v5204_v44, %v5198_v45 }
0x31ad   : > { %v5209_v54 = vsel %vm5207_vm6, %v5206_v52, %v5201_v46 }
0x31ae   : > { %6455 = vmatmul.mubr.msk.bf16.vlgmr.msra.gmra.mrb[0].mxu0 %vm433_vm2, %v5209_v54 }
0x3281   : > { %v5263_v59 = vpop.f32.mrb[0].mxu0 }
0x3282   : > { %v5270_v55 = vadd.f32 %v5269_v57, %v5263_v59  ;;  %v6456_v61 = vpop.f32.mrb[1].mxu0 }
0x3283   : > { %v5266_v60 = vpop.f32.mrb[2].mxu0 }
0x3284   : > { %v5275_v41 = vadd.f32 %v5274_v58, %v5270_v55  ;;  %v6457_v1 = vpop.f32.mrb[3].mxu0 }
0x3286   : > { %5276 = vst.msk [vmem:[#allocation2 + $0x10] sm:$0xff] %vm433_vm2, %v5275_v41 }
0x3287 PF: > { %v8450_v2 = vld [vmem:[#allocation2] sm:$0xff]  ;;  %v8454_v63 = vld [vmem:[#allocation2 + $0x8] sm:$0xff]  ;;  %v5337_v18 = vld [vmem:[%s8650_s4 + $0x31] sm:$0xff]  ;;  %s8660_s11 = smul.u32 384, %s7209_s17  ;;  %s5567_s25 = sshll.u32 %s7271_s20, 4  ;;  %s8549_s25 = int_to_ptr.vmem [resolvable:$true] %s5567_s25 }
0x3288   : > { %v5282_v5 = vsel %vm433_vm2, %v8450_v2, 0.0  ;;  %v5285_v3 = vsel %vm433_vm2, %v8454_v63, 0.0  ;;  %v5335_v17 = vld [vmem:[%s8650_s4 + $0x21] sm:$0xff]  ;;  %v5336_v16 = vld [vmem:[%s8650_s4 + $0x29] sm:$0xff]  ;;  %v5338_v20 = vld [vmem:[%s8650_s4 + $0x39] sm:$0xff]  ;;  %s5549_s28 = scalar_lea.sflag [#allocation12], %s7246_s30 }
0x3289   : > { %5283 = vadd.xlane.f32.xlu0 %v5282_v5  ;;  %v5339_v19 = vpack.c.bf16 %v5336_v16, %v5335_v17  ;;  %v5340_v25 = vpack.c.bf16 %v5338_v20, %v5337_v18  ;;  %v5405_v26 = vld [vmem:[%s8649_s3 + $0x5c] sm:$0xff]  ;;  %v5406_v21 = vld [vmem:[%s8649_s3 + $0x64] sm:$0xff]  ;;  %v5407_v47 = vld [vmem:[%s8649_s3 + $0x6c] sm:$0xff]  ;;  %s8547_s18 = scalar_lea.hbm %s8654_s8, %s8660_s11  ;;  %s6901_s26 = scalar_lea.vmem %s8549_s25, 384 }
0x328a   : > { %v5413_v22 = vpack.c.bf16 %v5406_v21, %v5405_v26  ;;  %v5408_v33 = vld [vmem:[%s8649_s3 + $0x74] sm:$0xff]  ;;  %v5409_v59 = vld [vmem:[%s8649_s3 + $0x7c] sm:$0xff]  ;;  %v5410_v55 = vld [vmem:[%s8649_s3 + $0x84] sm:$0xff]  ;;  %p6902_p8 = scmp.ne.s32.totalorder %s8549_s25, %s6901_s26  ;;  %s7131_s10 = smov [#allocation11]  }
0x328b   : > { %6458 = vmatprep.subr.bf16.mxu0 %v5339_v19  ;;  %v5414_v49 = vpack.c.bf16 %v5408_v33, %v5407_v47  ;;  %v5904_v53 = vld [vmem:[%s8649_s3 + $0x59] ss:$0 sm:$0xff]  ;;  %v5905_v46 = vld [vmem:[%s8649_s3 + $0x5a] ss:$0 sm:$0xff]  ;;  %v5415_v61 = vpack.c.bf16 %v5410_v55, %v5409_v59  ;;  %v5411_v60 = vld [vmem:[%s8649_s3 + $0x8c] sm:$0xff]  ;;  %s6905_s12 = sshll.u32 %s7131_s10, 4  ;;  %s6906_s12 = int_to_ptr.vmem [resolvable:$false] %s6905_s12 }
0x328c   : > { %6459 = vmatpush3.bf16.msra.mxu0 %v5339_v19  ;;  %6466 = vmatprep.subr.bf16.mxu1 %v5413_v22  ;;  %v5412_v41 = vld [vmem:[%s8649_s3 + $0x94] sm:$0xff]  ;;  %v5906_v5 = vld [vmem:[%s8650_s4 + $0x41] ss:$0 sm:$0xff]  ;;  %p6903_p9 = pnand %p6902_p8, %p7226_p10  ;;  %s6907_s20 = scalar_lea.vmem %s6906_s12, 768 }
0x328d   : > { %v8452_v0 = vld [vmem:[#allocation2 + $0x10] sm:$0xff]  ;;  %5286 = vadd.xlane.f32.xlu0 %v5285_v3  ;;  %6460 = vmatprep.subr.bf16.mxu0 %v5340_v25  ;;  %v5416_v1 = vpack.c.bf16 %v5412_v41, %v5411_v60  ;;  %p6908_p13 = scmp.lt.s32.totalorder %s8549_s25, %s6906_s12  ;;  %p6909_p0 = scmp.lt.s32.totalorder %s6907_s20, %s6901_s26 }
0x328e   : > { %v5288_v40 = vsel %vm433_vm2, %v8452_v0, 0.0  ;;  %6467 = vmatpush3.bf16.msra.mxu1 %v5413_v22  ;;  %p6904_p12 = pneg %p6903_p9 }
0x328f   : > { %5289 = vadd.xlane.f32.xlu1 %v5288_v40  ;;  %6468 = vmatprep.subr.bf16.mxu1 %v5414_v49  ;;  %p6910_p1 = por %p6909_p0, %p6908_p13 }
0x3290   : > { %6461 = vmatpush3.bf16.msra.mxu0 %v5340_v25 }
0x3291   : > { %p6911_p2 = pnand %p6910_p1, %p6904_p12 }
0x3292   : > { %6469 = vmatpush3.bf16.msra.mxu1 %v5414_v49 }
0x3293   : > { %6470 = vmatprep.subr.bf16.mxu1 %v5415_v61 }
0x3296   : > { %6471 = vmatpush3.bf16.msra.mxu1 %v5415_v61 }
0x3297   : > { %6472 = vmatprep.subr.bf16.mxu1 %v5416_v1 }
0x329a   : > { %6473 = vmatpush3.bf16.msra.mxu1 %v5416_v1 }
0x3316   : > { %v5284_v4 = vpop.xlane.xlu0 %5283 }
0x3317   : > { %v5291_v8 = vmul.f32 0.03125, %v5284_v4 }
0x3319   : > { %v5294_v9 = vsub.f32 %v8450_v2, %v5291_v8 }
0x331a   : > { %v5287_v11 = vpop.xlane.xlu0 %5286 }
0x331b   : > { %v5292_v35 = vmul.f32 0.03125, %v5287_v11  ;;  %v5297_v13 = vmul.f32 %v5294_v9, %v5294_v9 }
0x331c   : > { %v5290_v7 = vpop.xlane.xlu1 %5289 }
0x331d   : > { %v5293_v6 = vmul.f32 0.03125, %v5290_v7  ;;  %v5295_v34 = vsub.f32 %v8454_v63, %v5292_v35  ;;  %v5300_v15 = vsel %vm433_vm2, %v5297_v13, 0.0 }
0x331e   : > { %5301 = vadd.xlane.f32.xlu1 %v5300_v15  ;;  %v5911_v15 = vld [vmem:[%s8649_s3 + $0x5b] ss:$0 sm:$0xff] }
0x331f   : > { %v5296_v10 = vsub.f32 %v8452_v0, %v5293_v6  ;;  %v5298_v12 = vmul.f32 %v5295_v34, %v5295_v34 }
0x3321   : > { %v5299_v24 = vmul.f32 %v5296_v10, %v5296_v10  ;;  %v5303_v14 = vsel %vm433_vm2, %v5298_v12, 0.0 }
0x3322   : > { %5304 = vadd.xlane.f32.xlu0 %v5303_v14 }
0x3323   : > { %v5306_v62 = vsel %vm433_vm2, %v5299_v24, 0.0 }
0x3324   : > { %5307 = vadd.xlane.f32.xlu1 %v5306_v62 }
0x33ab   : > { %v5302_v37 = vpop.xlane.xlu1 %5301 }
0x33ac   : > { %v5309_v23 = vmul.f32 0.03125, %v5302_v37 }
0x33ae   : > { %v5312_v27 = vadd.f32 1e-06, %v5309_v23 }
0x33af   : > { %v5305_v29 = vpop.xlane.xlu0 %5304 }
0x33b0   : > { %6877 = vrsqrt.f32 %v5312_v27  ;;  %v5310_v32 = vmul.f32 0.03125, %v5305_v29 }
0x33b1   : > { %v5308_v28 = vpop.xlane.xlu1 %5307 }
0x33b2   : > { %v5311_v30 = vmul.f32 0.03125, %v5308_v28  ;;  %v5313_v31 = vadd.f32 1e-06, %v5310_v32 }
0x33b4   : > { %v5314_v36 = vadd.f32 1e-06, %v5311_v30 }
0x33b6   : > { %6879 = vrsqrt.f32 %v5314_v36 }
0x33b7   : > { %6881 = vrsqrt.f32 %v5313_v31 }
0x33ba   : > { %v6878_v38 = vpop.eup %6877 }
0x33bb   : > { %v5318_v39 = vmul.f32 %v6878_v38, %v5294_v9 }
0x33bd   : > { %v5325_v45 = vmul.f32 %v5904_v53, %v5318_v39 }
0x33bf   : > { %v5332_v50 = vadd.f32 %v5905_v46, %v5325_v45 }
0x33c0   : > { %v6880_v51 = vpop.eup %6879 }
0x33c1   : > { %v6882_v42 = vpop.eup %6881  ;;  %v5320_v43 = vmul.f32 %v6880_v51, %v5296_v10 }
0x33c2   : > { %v5319_v44 = vmul.f32 %v6882_v42, %v5295_v34 }
0x33c3   : > { %v5327_v52 = vmul.f32 %v5904_v53, %v5320_v43 }
0x33c4   : > { %v5326_v54 = vmul.f32 %v5904_v53, %v5319_v44 }
0x33c5   : > { %v5334_v48 = vadd.f32 %v5905_v46, %v5327_v52 }
0x33c6   : > { %v5333_v56 = vadd.f32 %v5905_v46, %v5326_v54 }
0x33c7   : > { %v5343_v57 = vpack.c.bf16 %v5334_v48, %v5334_v48 }
0x33c8   : > { %v5342_v58 = vpack.c.bf16 %v5333_v56, %v5332_v50 }
0x33ca   : > { %6462 = vmatprep.mubr.msk.bf16.mxu0 %vm433_vm2, %v5342_v58 }
0x33cb   : > { %6463 = vmatmul.mubr.msk.bf16.vlgmr.msra.gmra.mrb[0].mxu0 %vm433_vm2, %v5343_v57 }
0x349e   : > { %v6464_v40 = vpop.f32.mrb[0].mxu0 }
0x349f   : > { %v5397_v3 = vadd.f32 %v6464_v40, %v5906_v5  ;;  %v5388_v4 = vpop.f32.mrb[1].mxu0 }
0x34a0   : > { %v5389_v7 = vadd.f32 %v5906_v5, %v5388_v4  ;;  %v6465_v8 = vpop.f32.mrb[2].mxu0 }
0x34a1   : > { %v5391_v6 = vpop.f32.mrb[3].mxu0  ;;  %v5404_v10 = vmax.f32 %v5397_v3, 0.0 }
0x34a2   : > { %v5392_v9 = vadd.f32 %v5906_v5, %v5391_v6  ;;  %v5402_v11 = vmax.f32 %v5389_v7, 0.0 }
0x34a3   : > { %v5418_v24 = vpack.c.bf16 %v5404_v10, %v5404_v10 }
0x34a4   : > { %v5403_v35 = vmax.f32 %v5392_v9, 0.0 }
0x34a6   : > { %v5417_v13 = vpack.c.bf16 %v5403_v35, %v5402_v11 }
0x34a8   : > { %6474 = vmatprep.mubr.msk.bf16.mxu1 %vm2895_vm12, %v5417_v13 }
0x34a9   : > { %6475 = vmatmul.mubr.msk.bf16.vlgmr.msra.gmra.mrb[0].mxu1 %vm2895_vm12, %v5418_v24 }
0x357c   : > { %v6476_v34 = vpop.f32.mrb[0].mxu1 }
0x357d   : > { %v5475_v62 = vadd.f32 %v6476_v34, %v8452_v0  ;;  %v5459_v12 = vpop.f32.mrb[1].mxu1 }
0x357e   : > { %v5473_v14 = vadd.f32 %v5459_v12, %v8450_v2  ;;  %v6477_v17 = vpop.f32.mrb[2].mxu1 }
0x357f   : > { %v5483_v16 = vadd.f32 %v5911_v15, %v5475_v62  ;;  %v5462_v18 = vpop.f32.mrb[3].mxu1 }
0x3580   : > { %v5481_v19 = vadd.f32 %v5911_v15, %v5473_v14  ;;  %v5474_v20 = vadd.f32 %v5462_v18, %v8454_v63 }
0x3581   : > { %5486 = vst.msk [vmem:[#allocation2 + $0x10] sm:$0xff] %vm433_vm2, %v5483_v16 }
0x3582   : > { %5484 = vst.msk [vmem:[#allocation2] sm:$0xff] %vm433_vm2, %v5481_v19  ;;  %v5482_v25 = vadd.f32 %v5911_v15, %v5474_v20 }
0x3584   : > { %5485 = vst.msk [vmem:[#allocation2 + $0x8] sm:$0xff] %vm433_vm2, %v5482_v25 }
0x3588   : > { %v5489_v47 = vld [vmem:[#allocation2 + $0x10] sm:$0xff] }
0x3589   : > { %v5487_v26 = vld [vmem:[#allocation2] sm:$0xff]  ;;  %v5498_v22 = vsel %vm433_vm2, %v5489_v47, 0.0 }
0x358a   : > { %v5492_v21 = vsel %vm433_vm2, %v5487_v26, 0.0 }
0x358b   : > { %5493 = vadd.xlane.f32.xlu0 %v5492_v21  ;;  %v5488_v0 = vld [vmem:[#allocation2 + $0x8] sm:$0xff] }
0x358c   : > { %v5495_v2 = vsel %vm433_vm2, %v5488_v0, 0.0 }
0x358d   : > { %5496 = vadd.xlane.f32.xlu1 %v5495_v2 }
0x358f   : > { %5499 = vadd.xlane.f32.xlu0 %v5498_v22 }
0x3618   : > { %v5494_v63 = vpop.xlane.xlu0 %5493 }
0x3619   : > { %v5501_v33 = vmul.f32 0.03125, %v5494_v63 }
0x361a   : > { %v5497_v49 = vpop.xlane.xlu1 %5496 }
0x361b   : > { %v5504_v37 = vsub.f32 %v5487_v26, %v5501_v33  ;;  %v5502_v23 = vmul.f32 0.03125, %v5497_v49 }
0x361c   : > { %v5500_v27 = vpop.xlane.xlu0 %5499 }
0x361d   : > { %v8529_v28 = vsub.f32 %v5488_v0, %v5502_v23  ;;  %v5503_v29 = vmul.f32 0.03125, %v5500_v27  ;;  %v5507_v30 = vmul.f32 %v5504_v37, %v5504_v37 }
0x361f   : > { %v8531_v32 = vsub.f32 %v5489_v47, %v5503_v29  ;;  %v5510_v36 = vsel %vm433_vm2, %v5507_v30, 0.0  ;;  %v5508_v31 = vmul.f32 %v8529_v28, %v8529_v28 }
0x3620   : > { %5511 = vadd.xlane.f32.xlu1 %v5510_v36 }
0x3621   : > { %v5513_v38 = vsel %vm433_vm2, %v5508_v31, 0.0  ;;  %v5509_v39 = vmul.f32 %v8531_v32, %v8531_v32 }
0x3622   : > { %5514 = vadd.xlane.f32.xlu0 %v5513_v38 }
0x3623   : > { %v5516_v53 = vsel %vm433_vm2, %v5509_v39, 0.0 }
0x3624   : > { %5517 = vadd.xlane.f32.xlu1 %v5516_v53 }
0x3625   : > { %6914 = shalt.err (!%p6911_p2)
}
0x3626   : > { %s6915_s27 = scalar_lea.hbm %s8547_s18, 384  ;;  %s6919_s10 = scalar_lea.hbm %s8654_s8, 768 }
0x3627   : > { %p6916_p3 = scmp.ne.s32.totalorder %s8547_s18, %s6915_s27  ;;  %p6920_p6 = scmp.lt.u32.totalorder %s8547_s18, %s8654_s8 }
0x3628   : > { %p6921_p7 = scmp.lt.u32.totalorder %s6919_s10, %s6915_s27  ;;  %p6923_p9 = scmp.lt.u32.totalorder %s6915_s27, %s8547_s18 }
0x3629   : > { %p6917_p4 = pnand %p6916_p3, %p7226_p10 }
0x362a   : > { %p6922_p8 = por %p6921_p7, %p6920_p6 }
0x362b   : > { %p6918_p5 = pneg %p6917_p4 }
0x362c   : > { %p6924_p12 = por %p6923_p9, %p6922_p8 }
0x362e   : > { %p6925_p13 = pnand %p6924_p12, %p6918_p5 }
0x3630   : > { %6928 = shalt.err (!%p6925_p13)
}
0x3631   : > { %s7132_s26 = smov 128   ;;  %s7133_s20 = smov 8   ;;  %v5912_v56 = vld [vmem:[%s8649_s3 + $0x9c] ss:$0 sm:$0xff]  ;;  %v5913_v59 = vld [vmem:[%s8649_s3 + $0x9d] ss:$0 sm:$0xff] }
0x3632   : > { %6485 = dma.vmem_to_hbm [thread:$0]  (%p7226_p10), %s8549_s25, 384, %s8547_s18, %s5549_s28, %s7132_s26, %s7132_s26, %s7133_s20  }
0x3633   : > { %s5583_s28 = sshll.u32 %s7330_s21, 4  ;;  %s8665_s29 = smul.u32 384, %s7209_s17  ;;  %s8598_s28 = int_to_ptr.vmem [resolvable:$true] %s5583_s28 }
0x3634   : > { %s5554_s11 = scalar_lea.sflag [#allocation14], %s7246_s30  ;;  %s6929_s27 = scalar_lea.vmem %s8598_s28, 384 }
0x3635   : > { %s8594_s12 = scalar_lea.hbm %s8655_s9, %s8665_s29  ;;  %p6930_p0 = scmp.ne.s32.totalorder %s8598_s28, %s6929_s27 }
0x3636   : > { %s7134_s17 = smov [#allocation13]  }
0x3637   : > { %p6931_p1 = pnand %p6930_p0, %p7226_p10  ;;  %s6933_s25 = sshll.u32 %s7134_s17, 4  ;;  %s6934_s25 = int_to_ptr.vmem [resolvable:$false] %s6933_s25 }
0x3638   : > { %s6935_s18 = scalar_lea.vmem %s6934_s25, 768  ;;  %p6936_p3 = scmp.lt.s32.totalorder %s8598_s28, %s6934_s25 }
0x3639   : > { %p6932_p2 = pneg %p6931_p1  ;;  %p6937_p4 = scmp.lt.s32.totalorder %s6935_s18, %s6929_s27 }
0x363b   : > { %p6938_p5 = por %p6937_p4, %p6936_p3 }
0x363d   : > { %p6939_p6 = pnand %p6938_p5, %p6932_p2 }
0x36ad   : > { %v5512_v51 = vpop.xlane.xlu1 %5511 }
0x36ae   : > { %v5519_v42 = vmul.f32 0.03125, %v5512_v51 }
0x36af   : > { %v5515_v43 = vpop.xlane.xlu0 %5514 }
0x36b0   : > { %v5522_v44 = vadd.f32 1e-06, %v5519_v42  ;;  %v5520_v45 = vmul.f32 0.03125, %v5515_v43 }
0x36b1   : > { %v5518_v46 = vpop.xlane.xlu1 %5517 }
0x36b2   : > { %6883 = vrsqrt.f32 %v5522_v44  ;;  %v5523_v52 = vadd.f32 1e-06, %v5520_v45  ;;  %v5521_v54 = vmul.f32 0.03125, %v5518_v46 }
0x36b4   : > { %6885 = vrsqrt.f32 %v5523_v52  ;;  %v5524_v48 = vadd.f32 1e-06, %v5521_v54 }
0x36b6   : > { %6887 = vrsqrt.f32 %v5524_v48 }
0x36bc   : > { %v6884_v50 = vpop.eup %6883 }
0x36bd   : > { %v5528_v57 = vmul.f32 %v6884_v50, %v5504_v37 }
0x36be   : > { %v6886_v58 = vpop.eup %6885 }
0x36bf   : > { %v5535_v55 = vmul.f32 %v5912_v56, %v5528_v57  ;;  %v5529_v61 = vmul.f32 %v6886_v58, %v8529_v28 }
0x36c0   : > { %v6888_v60 = vpop.eup %6887 }
0x36c1   : > { %v5536_v41 = vmul.f32 %v5912_v56, %v5529_v61  ;;  %v5530_v1 = vmul.f32 %v6888_v60, %v8531_v32  ;;  %v5542_v5 = vadd.f32 %v5913_v59, %v5535_v55 }
0x36c3   : > { %v5543_v40 = vadd.f32 %v5913_v59, %v5536_v41  ;;  %v5537_v3 = vmul.f32 %v5912_v56, %v5530_v1  ;;  %5545 = vst.msk [vmem:[%s7330_s21] sm:$0xff] %vm433_vm2, %v5542_v5 }
0x36c5   : > { %5546 = vst.msk [vmem:[%s7330_s21 + $0x8] sm:$0xff] %vm433_vm2, %v5543_v40  ;;  %v5544_v4 = vadd.f32 %v5913_v59, %v5537_v3 }
0x36c7   : > { %5547 = vst.msk [vmem:[%s7330_s21 + $0x10] sm:$0xff] %vm433_vm2, %v5544_v4 }
0x36c8   : > { %6942 = shalt.err (!%p6939_p6)
}
0x36c9   : > { %s6943_s21 = scalar_lea.hbm %s8594_s12, 384  ;;  %s6947_s10 = scalar_lea.hbm %s8655_s9, 768 }
0x36ca   : > { %p6944_p7 = scmp.ne.s32.totalorder %s8594_s12, %s6943_s21  ;;  %p6948_p12 = scmp.lt.u32.totalorder %s8594_s12, %s8655_s9 }
0x36cb   : > { %p6949_p13 = scmp.lt.u32.totalorder %s6947_s10, %s6943_s21  ;;  %p6951_p1 = scmp.lt.u32.totalorder %s6943_s21, %s8594_s12 }
0x36cc   : > { %p6945_p8 = pnand %p6944_p7, %p7226_p10 }
0x36cd   : > { %p6950_p0 = por %p6949_p13, %p6948_p12 }
0x36ce   : > { %p6946_p9 = pneg %p6945_p8 }
0x36cf   : > { %p6952_p2 = por %p6951_p1, %p6950_p0 }
0x36d1   : > { %p6953_p3 = pnand %p6952_p2, %p6946_p9 }
0x36d3   : > { %6956 = shalt.err (!%p6953_p3)
}
0x36d4   : > { %6486 = dma.vmem_to_hbm [thread:$0]  (%p7226_p10), %s8598_s28, 384, %s8594_s12, %s5554_s11, %s7132_s26, %s7132_s26, %s7133_s20  }
0x36d5 PF: > { %p6496_p4 = scmp.ge.s32.totalorder %s7021_s16, 2  ;;  %s5598_s27 = sand.u32 1, %s7009_s14  }
0x36d6   : > { %s5599_s18 = scalar_lea.sflag [#allocation12], %s5598_s27 }
0x36d7   : > { %p6490_p5 = pnand %p6496_p4, %p7230_p11 }
0x36d9   : > { %7000 = dma.done.wait (!%p6490_p5), %s5599_s18, 384  }
0x36da   : > { %7002 = vsyncadd (!%p6490_p5), %s5599_s18, 4294966912  ;;  %s5608_s23 = scalar_lea.sflag [#allocation14], %s5598_s27 }
0x36db   : > { %7004 = dma.done.wait (!%p6490_p5), %s5608_s23, 384  }
0x36dc   : > { %7006 = vsyncadd (!%p6490_p5), %s5608_s23, 4294966912  ;;  %p29_p10 = scmp.ge.s32.totalorder %s7213_s19, 4   ;;  %s8666_s14 = smov %s7013_s0 }
0x36dd   : > { %s8667_s0 = smov %s7017_s15  ;;  %s8668_s15 = smov %s7224_s22 }
0x36de   : > { %s8669_s16 = smov %s7213_s19  ;;  %31 = sbr.rel (!%p29_p10) target bundleno = 20 (0x14), region = 339 }
0x36e5   :  { %5613 = vsyncpa [#allocation12], 1 }
0x36e6   :  { %5615 = vsyncpa [#allocation12 + $0x1], 1 }
0x36e7   :  { %5616 = vsyncpa [#allocation14], 1 }
0x36e8   :  { %5618 = vsyncpa [#allocation14 + $0x1], 1 }

</bundles_post_ra>
